<compile_context>
chip_gen: v5e
topology: v5e:2x2
jax: 0.10.0
libtpu: 0.0.40
codegen_flags: <defaults>
</compile_context>

<pallas_src>
import functools
import math

import jax
import jax.numpy as jnp
from jax.experimental import pallas as pl
from jax.experimental.pallas import tpu as pltpu

NEG_INF = float(jnp.finfo(jnp.float32).min)
MASK_BIG = 1e30

# Kernel-side (fused) weight names, in argument order.
KW_NAMES = (
    "norm1_g", "norm1_b", "norm2_g", "norm2_b", "norm3_g", "norm3_b",
    "sa_wqkv", "sa_bqkv", "sa_wo", "sa_bo",
    "ca_wq", "ca_bq", "ca_wkv", "ca_bkv", "ca_wo", "ca_bo",
    "ff_w1", "ff_b1", "ff_w2", "ff_b2",
)


# --------------------------------------------------------------------------
# Pallas kernel (one grid step == `block_b` batch elements, both streams)
# --------------------------------------------------------------------------
def _decoder_block_kernel(
        ys2_ref, yy_ref, id_ref, xs_ref, xy_ref,
        n1g_ref, n1b_ref, n2g_ref, n2b_ref, n3g_ref, n3b_ref,
        sa_wqkv_ref, sa_bqkv_ref, sa_wo_ref, sa_bo_ref,
        ca_wq_ref, ca_bq_ref, ca_wkv_ref, ca_bkv_ref, ca_wo_ref, ca_bo_ref,
        ff_w1_ref, ff_b1_ref, ff_w2_ref, ff_b2_ref,
        out_ref, *, n_heads, eps):
    _, Bt, L, D = ys2_ref.shape
    T = xs_ref.shape[1]
    H = n_heads
    dk = D // H
    scale = 1.0 / math.sqrt(dk)
    ns = Bt * L                      # rows per stream
    n_rows = 2 * ns                  # rows of the stacked fwd+bwd matrix
    bf16 = jnp.bfloat16
    f32 = jnp.float32

    def mm(x, w):                    # bf16 MXU matmul, f32 accumulation
        return jnp.dot(x.astype(bf16), w, preferred_element_type=f32)

    def layer_norm(x, g, b):
        mu = jnp.mean(x, axis=-1, keepdims=True)
        var = jnp.mean(jnp.square(x - mu), axis=-1, keepdims=True)
        return (x - mu) * jax.lax.rsqrt(var + eps) * g + b

    def softmax(e):
        # NOTE: rows with >=1 unmasked key match the reference; fully masked
        # rows fall back to the unmasked distribution (additive-mask form).
        e = e - jnp.max(e, axis=-1, keepdims=True)
        p = jnp.exp(e)
        return p * pl.reciprocal(jnp.sum(p, axis=-1, keepdims=True), approx=True)

    def heads_fold(x2d):             # (M, D) f32 -> (H, M, dk) bf16
        return x2d.astype(bf16).reshape(-1, H, dk).transpose(1, 0, 2)

    def heads_unfold(xh):            # (H, M, dk) f32 -> (M, D) f32
        return xh.transpose(1, 0, 2).reshape(-1, D)

    def swap_streams(xh):            # (H, 2*ns, dk), rows (s,b,l) -> stream 1-s
        return jnp.concatenate([xh[:, ns:], xh[:, :ns]], axis=1)

    # ---- additive masks, computed once per grid step, reused by every head -
    yy_add = (yy_ref[...].astype(f32) - 1.0) * MASK_BIG        # (Bt, L, L)
    id_add = (id_ref[...].astype(f32) - 1.0) * MASK_BIG        # (Bt, L, L)
    xy_add = (xy_ref[...].astype(f32) - 1.0) * MASK_BIG        # (Bt, L, T)

    x0 = ys2_ref[...].reshape(n_rows, D)                       # rows (s, b, l)

    # ---- synchronous bidirectional self-attention (shared weights) --------
    xn = layer_norm(x0, n1g_ref[...], n1b_ref[...])
    qkv = mm(xn, sa_wqkv_ref[...]) + sa_bqkv_ref[...]          # (n_rows, 3D)

    qf = heads_fold(qkv[:, :D])                                # (H, n_rows, dk)
    kf = heads_fold(qkv[:, D:2 * D])
    vf = heads_fold(qkv[:, 2 * D:])
    kf_op = swap_streams(kf)                                   # opposite stream
    vf_op = swap_streams(vf)

    def batched(xh):                 # (H, n_rows, dk) -> (H*2*Bt, L, dk)
        return xh.reshape(2 * H * Bt, L, dk)

    q_b, k_b, v_b = batched(qf), batched(kf), batched(vf)
    k_ob, v_ob = batched(kf_op), batched(vf_op)

    e_h = jnp.einsum('nqd,nkd->nqk', q_b, k_b,
                     preferred_element_type=f32) * scale       # history (same)
    e_f = jnp.einsum('nqd,nkd->nqk', q_b, k_ob,
                     preferred_element_type=f32) * scale       # future (other)
    e_h = e_h.reshape(2 * H, Bt, L, L) + yy_add[None]
    e_f = e_f.reshape(2 * H, Bt, L, L) + id_add[None]
    aw_h = softmax(e_h).reshape(2 * H * Bt, L, L).astype(bf16)
    aw_f = softmax(e_f).reshape(2 * H * Bt, L, L).astype(bf16)
    ctx = (jnp.einsum('nqk,nkd->nqd', aw_h, v_b, preferred_element_type=f32)
           + jnp.einsum('nqk,nkd->nqd', aw_f, v_ob, preferred_element_type=f32))
    ctx2 = heads_unfold(ctx.reshape(H, n_rows, dk))            # (n_rows, D)
    x1 = mm(ctx2, sa_wo_ref[...]) + sa_bo_ref[...] + x0        # dropout == id

    # ---- source (encoder) attention, shared for both streams --------------
    xn = layer_norm(x1, n2g_ref[...], n2b_ref[...])
    q2f = heads_fold(mm(xn, ca_wq_ref[...]) + ca_bq_ref[...])  # (H, n_rows, dk)
    kv_x = mm(xs_ref[...].reshape(Bt * T, D), ca_wkv_ref[...]) + ca_bkv_ref[...]
    kx = heads_fold(kv_x[:, :D]).reshape(H * Bt, T, dk)
    vx = heads_fold(kv_x[:, D:]).reshape(H * Bt, T, dk)

    ctx_parts = []
    for s in range(2):               # 2-iteration stream loop (keys are shared)
        q_s = q2f[:, s * ns:(s + 1) * ns].reshape(H * Bt, L, dk)
        e = jnp.einsum('nqd,nkd->nqk', q_s, kx,
                       preferred_element_type=f32) * scale
        e = e.reshape(H, Bt, L, T) + xy_add[None]
        aw = softmax(e).reshape(H * Bt, L, T).astype(bf16)
        c = jnp.einsum('nqk,nkd->nqd', aw, vx, preferred_element_type=f32)
        ctx_parts.append(c.reshape(H, ns, dk))
    ctx2 = heads_unfold(jnp.concatenate(ctx_parts, axis=1))    # (n_rows, D)
    x2 = mm(ctx2, ca_wo_ref[...]) + ca_bo_ref[...] + x1

    # ---- position-wise feed-forward (relu) ---------------------------------
    xn = layer_norm(x2, n3g_ref[...], n3b_ref[...])
    h1 = jnp.maximum(mm(xn, ff_w1_ref[...]) + ff_b1_ref[...], 0.0).astype(bf16)
    x3 = mm(h1, ff_w2_ref[...]) + ff_b2_ref[...] + x2

    out_ref[...] = x3.reshape(2, Bt, L, D).astype(out_ref.dtype)


# --------------------------------------------------------------------------
# wrapper
# --------------------------------------------------------------------------
def sync_bidir_transformer_decoder_block(ys, ys_bwd, yy_mask, identity_mask,
                                         xs, xy_mask, kparams, *,
                                         n_heads, eps=1e-12, block_b=1):
    """Eval-mode forward pass; returns (out, out_bwd), each [B, L, d_model].

    block_b tuning: pick the largest value that fits VMEM; prefer
    2*block_b*L a multiple of 256 on v6e/v7x (128 on v5e).  Single-TC chips
    (v5e/v6e) are fastest with grid length 1; on v7x keep an even grid >= 2.
    """
    B, L, D = ys.shape
    T = xs.shape[1]
    assert D % n_heads == 0
    assert B % block_b == 0
    weights = [kparams[name] for name in KW_NAMES]

    # Host-side prep: stack the two streams (removes in-kernel stream
    # concatenates/slices) and shrink the masks to bf16 (halves mask DMA).
    ys2 = jnp.stack([ys, ys_bwd], axis=0)                      # [2, B, L, D]
    yy_m = (yy_mask != 0).astype(jnp.bfloat16)
    id_m = (identity_mask != 0).astype(jnp.bfloat16)
    xy_m = (xy_mask != 0).astype(jnp.bfloat16)

    stream_spec = pl.BlockSpec((2, block_b, L, D), lambda b: (0, b, 0, 0))

    def batch_spec(arr):
        n = arr.ndim - 1
        return pl.BlockSpec((block_b,) + arr.shape[1:],
                            lambda b, _n=n: (b,) + (0,) * _n)

    def weight_spec(arr):
        n = arr.ndim
        # Constant index_map (fetched once); single-buffered to halve the
        # weight VMEM footprint (matters at realistic d_model/d_ff on v7x).
        return pl.BlockSpec(arr.shape, lambda b, _n=n: (0,) * _n,
                            pipeline_mode=pl.Buffered(1))

    in_specs = ([stream_spec, batch_spec(yy_m), batch_spec(id_m),
                 batch_spec(xs), batch_spec(xy_m)]
                + [weight_spec(w) for w in weights])

    # ---- advisory cost estimate & explicit VMEM budget ---------------------
    d_ff = kparams["ff_w1"].shape[1]
    nbytes = lambda a: a.size * a.dtype.itemsize
    per_b_proj = (2 * (2 * L) * D * (3 * D)          # fused QKV
                  + 3 * 2 * (2 * L) * D * D          # sa_out, ca_q, ca_out
                  + 2 * T * D * (2 * D)              # fused src K/V
                  + 2 * 2 * (2 * L) * D * d_ff)      # FFN
    per_b_attn = 16 * L * L * D + 8 * L * T * D
    flops = int(B * (per_b_proj + per_b_attn))
    transcendentals = int(B * n_heads * (4 * L * L + 2 * L * T))
    bytes_accessed = int(sum(nbytes(a) for a in (ys2, yy_m, id_m, xs, xy_m))
                         + nbytes(ys2)                          # output
                         + sum(nbytes(w) for w in weights))     # fetched once

    weight_bytes = sum(nbytes(w) for w in weights)
    n_rows = 2 * block_b * L
    io_block = (2 * n_rows * D * ys.dtype.itemsize              # ys2 in + out
                + block_b * T * D * xs.dtype.itemsize
                + 2 * block_b * (2 * L * L + L * T))            # bf16 masks
    inter = 4 * (n_rows * (3 * D + 4 * D) + n_rows * d_ff // 2
                 + 4 * n_heads * block_b * L * (2 * L + T))
    vmem_limit = int(min(64 * 1024 * 1024,                      # v7x physical
                         max(32 * 1024 * 1024,
                             weight_bytes + 2 * io_block + 2 * inter)))

    kernel = functools.partial(_decoder_block_kernel, n_heads=n_heads, eps=eps)
    out2 = pl.pallas_call(
        kernel,
        grid=(B // block_b,),
        in_specs=in_specs,
        out_specs=stream_spec,
        out_shape=jax.ShapeDtypeStruct(ys2.shape, ys.dtype),
        compiler_params=pltpu.CompilerParams(
            dimension_semantics=("parallel",),
            vmem_limit_bytes=vmem_limit),
        cost_estimate=pl.CostEstimate(flops=flops,
                                      transcendentals=transcendentals,
                                      bytes_accessed=bytes_accessed),
    )(ys2, yy_m, id_m, xs, xy_m, *weights)
    return out2[0], out2[1]


# --------------------------------------------------------------------------
# parameter init (shapes follow the PyTorch module) + host-side fusion
# --------------------------------------------------------------------------
def init_params(key, d_model, d_ff):
    def lin(k, fan_in, fan_out):
        s = 1.0 / math.sqrt(fan_in)
        kw, kb = jax.random.split(k)
        w = jax.random.uniform(kw, (fan_in, fan_out), jnp.float32, -s, s)
        b = jax.random.uniform(kb, (1, fan_out), jnp.float32, -s, s)
        return w, b

    p = {}
    for name in ("norm1", "norm2", "norm3"):
        p[f"{name}_g"] = jnp.ones((1, d_model), jnp.float32)
        p[f"{name}_b"] = jnp.zeros((1, d_model), jnp.float32)

    keys = jax.random.split(key, 10)
    idx = 0
    for prefix in ("sa", "ca"):       # self_attn (sync bidir MHA), src_attn
        for suffix in ("q", "k", "v", "o"):
            w, b = lin(keys[idx], d_model, d_model)
            p[f"{prefix}_w{suffix}"] = w
            p[f"{prefix}_b{suffix}"] = b
            idx += 1
    p["ff_w1"], p["ff_b1"] = lin(keys[idx], d_model, d_ff); idx += 1
    p["ff_w2"], p["ff_b2"] = lin(keys[idx], d_ff, d_model); idx += 1
    return p


def fuse_params(p):
    """Fuse QKV / KV weights and cast matmul weights to bf16 (halves DMA)."""
    bf16 = jnp.bfloat16
    kp = {n: p[n] for n in ("norm1_g", "norm1_b", "norm2_g", "norm2_b",
                            "norm3_g", "norm3_b")}
    kp["sa_wqkv"] = jnp.concatenate(
        [p["sa_wq"], p["sa_wk"], p["sa_wv"]], axis=1).astype(bf16)
    kp["sa_bqkv"] = jnp.concatenate([p["sa_bq"], p["sa_bk"], p["sa_bv"]], axis=1)
    kp["sa_wo"] = p["sa_wo"].astype(bf16); kp["sa_bo"] = p["sa_bo"]
    kp["ca_wq"] = p["ca_wq"].astype(bf16); kp["ca_bq"] = p["ca_bq"]
    kp["ca_wkv"] = jnp.concatenate([p["ca_wk"], p["ca_wv"]], axis=1).astype(bf16)
    kp["ca_bkv"] = jnp.concatenate([p["ca_bk"], p["ca_bv"]], axis=1)
    kp["ca_wo"] = p["ca_wo"].astype(bf16); kp["ca_bo"] = p["ca_bo"]
    kp["ff_w1"] = p["ff_w1"].astype(bf16); kp["ff_b1"] = p["ff_b1"]
    kp["ff_w2"] = p["ff_w2"].astype(bf16); kp["ff_b2"] = p["ff_b2"]
    return kp


# --------------------------------------------------------------------------
# plain-JAX reference (independent per-head-loop formulation of the module;
# same bf16-at-matmul-boundary precision so the comparison is tight)
# --------------------------------------------------------------------------
def _reference_one(ys, ysb, yy_mask, id_mask, xs, xy_mask, kp, *, n_heads, eps):
    D = ys.shape[-1]
    dk = D // n_heads
    scale = 1.0 / math.sqrt(dk)
    bf16 = jnp.bfloat16

    def ln(x, g, b):
        mu = jnp.mean(x, axis=-1, keepdims=True)
        var = jnp.mean(jnp.square(x - mu), axis=-1, keepdims=True)
        return (x - mu) * jax.lax.rsqrt(var + eps) * g + b

    def lin(x, wm, bm):
        return jnp.dot(x.astype(bf16), wm.astype(bf16),
                       preferred_element_type=jnp.float32) + bm

    def softmax(e):
        e = e - jnp.max(e, axis=-1, keepdims=True)
        p = jnp.exp(e)
        return p / jnp.sum(p, axis=-1, keepdims=True)

    wq, wk, wv = kp["sa_wqkv"][:, :D], kp["sa_wqkv"][:, D:2 * D], kp["sa_wqkv"][:, 2 * D:]
    bq, bk, bv = kp["sa_bqkv"][:, :D], kp["sa_bqkv"][:, D:2 * D], kp["sa_bqkv"][:, 2 * D:]

    ys_n = ln(ys, kp["norm1_g"], kp["norm1_b"])
    ysb_n = ln(ysb, kp["norm1_g"], kp["norm1_b"])
    q_f, k_f, v_f = lin(ys_n, wq, bq), lin(ys_n, wk, bk), lin(ys_n, wv, bv)
    q_b, k_b, v_b = lin(ysb_n, wq, bq), lin(ysb_n, wk, bk), lin(ysb_n, wv, bv)

    def sync_heads(q, k_self, v_self, k_cross, v_cross):
        outs = []
        for h in range(n_heads):
            sl = slice(h * dk, (h + 1) * dk)
            e_h = jnp.dot(q[:, sl].astype(bf16), k_self[:, sl].astype(bf16).T,
                          preferred_element_type=jnp.float32) * scale
            e_h = jnp.where(yy_mask == 0, NEG_INF, e_h)
            e_f = jnp.dot(q[:, sl].astype(bf16), k_cross[:, sl].astype(bf16).T,
                          preferred_element_type=jnp.float32) * scale
            e_f = jnp.where(id_mask == 0, NEG_INF, e_f)
            aw_h, aw_f = softmax(e_h), softmax(e_f)
            outs.append(jnp.dot(aw_h.astype(bf16), v_self[:, sl].astype(bf16),
                                preferred_element_type=jnp.float32)
                        + jnp.dot(aw_f.astype(bf16), v_cross[:, sl].astype(bf16),
                                  preferred_element_type=jnp.float32))
        return jnp.concatenate(outs, axis=-1)

    cv_f = lin(sync_heads(q_f, k_f, v_f, k_b, v_b), kp["sa_wo"], kp["sa_bo"])
    cv_b = lin(sync_heads(q_b, k_b, v_b, k_f, v_f), kp["sa_wo"], kp["sa_bo"])
    out = cv_f + ys
    outb = cv_b + ysb

    wkx, wvx = kp["ca_wkv"][:, :D], kp["ca_wkv"][:, D:]
    bkx, bvx = kp["ca_bkv"][:, :D], kp["ca_bkv"][:, D:]
    k_x, v_x = lin(xs, wkx, bkx), lin(xs, wvx, bvx)

    def src_attend(xq):
        q = lin(xq, kp["ca_wq"], kp["ca_bq"])
        outs = []
        for h in range(n_heads):
            sl = slice(h * dk, (h + 1) * dk)
            e = jnp.dot(q[:, sl].astype(bf16), k_x[:, sl].astype(bf16).T,
                        preferred_element_type=jnp.float32) * scale
            e = jnp.where(xy_mask == 0, NEG_INF, e)
            aw = softmax(e)
            outs.append(jnp.dot(aw.astype(bf16), v_x[:, sl].astype(bf16),
                                preferred_element_type=jnp.float32))
        return lin(jnp.concatenate(outs, axis=-1), kp["ca_wo"], kp["ca_bo"])

    out = src_attend(ln(out, kp["norm2_g"], kp["norm2_b"])) + out
    outb = src_attend(ln(outb, kp["norm2_g"], kp["norm2_b"])) + outb

    def ffn(x):
        h = jnp.maximum(lin(x, kp["ff_w1"], kp["ff_b1"]), 0.0)
        return lin(h, kp["ff_w2"], kp["ff_b2"])

    out = ffn(ln(out, kp["norm3_g"], kp["norm3_b"])) + out
    outb = ffn(ln(outb, kp["norm3_g"], kp["norm3_b"])) + outb
    return out, outb


if __name__ == "__main__":
    # D = 128 keeps every feature/last dim lane-dense (multiple of 128).
    B, L, T, D, D_FF, H = 4, 8, 16, 128, 256, 4
    EPS = 1e-12
    BLOCK_B = 2          # 2 batch elements per grid step; grid = 2 ("parallel")

    key = jax.random.PRNGKey(0)
    k1, k2, k3, kparam = jax.random.split(key, 4)
    ys = jax.random.normal(k1, (B, L, D), jnp.float32)
    ys_bwd = jax.random.normal(k2, (B, L, D), jnp.float32)
    xs = jax.random.normal(k3, (B, T, D), jnp.float32)

    # causal mask for history attention, off-diagonal mask for future attention
    yy_mask = jnp.tile(jnp.tril(jnp.ones((L, L), jnp.float32))[None], (B, 1, 1))
    identity_mask = jnp.tile(
        (jnp.ones((L, L), jnp.float32) - jnp.eye(L, dtype=jnp.float32))[None],
        (B, 1, 1))
    xy_mask = jnp.ones((B, L, T), jnp.float32)

    params = init_params(kparam, D, D_FF)
    kparams = fuse_params(params)

    out, out_bwd = sync_bidir_transformer_decoder_block(
        ys, ys_bwd, yy_mask, identity_mask, xs, xy_mask, kparams,
        n_heads=H, eps=EPS, block_b=BLOCK_B)
    jax.block_until_ready((out, out_bwd))

    # independent plain-JAX reference (per-head loop, unfused application)
    ref_fn = jax.vmap(functools.partial(_reference_one, n_heads=H, eps=EPS),
                      in_axes=(0, 0, 0, 0, 0, 0, None))
    ref_out, ref_out_bwd = ref_fn(ys, ys_bwd, yy_mask, identity_mask, xs,
                                  xy_mask, kparams)
    assert out.shape == (B, L, D) and out_bwd.shape == (B, L, D)
    err_f = float(jnp.max(jnp.abs(out - ref_out)))
    err_b = float(jnp.max(jnp.abs(out_bwd - ref_out_bwd)))
    assert jnp.allclose(out, ref_out, atol=1e-2, rtol=1e-2), err_f
    assert jnp.allclose(out_bwd, ref_out_bwd, atol=1e-2, rtol=1e-2), err_b

    print("KERNEL_OK")
</pallas_src>

<mosaic_0001>
module attributes {stable_mosaic.version = 11 : i64} {
  func.func @_decoder_block_kernel(%arg0: i32, %arg1: memref<2x2x8x128xf32, #tpu.memory_space<vmem>>, %arg2: memref<2x8x8xbf16, #tpu.memory_space<vmem>>, %arg3: memref<2x8x8xbf16, #tpu.memory_space<vmem>>, %arg4: memref<2x16x128xf32, #tpu.memory_space<vmem>>, %arg5: memref<2x8x16xbf16, #tpu.memory_space<vmem>>, %arg6: memref<1x128xf32, #tpu.memory_space<vmem>>, %arg7: memref<1x128xf32, #tpu.memory_space<vmem>>, %arg8: memref<1x128xf32, #tpu.memory_space<vmem>>, %arg9: memref<1x128xf32, #tpu.memory_space<vmem>>, %arg10: memref<1x128xf32, #tpu.memory_space<vmem>>, %arg11: memref<1x128xf32, #tpu.memory_space<vmem>>, %arg12: memref<128x384xbf16, #tpu.memory_space<vmem>>, %arg13: memref<1x384xf32, #tpu.memory_space<vmem>>, %arg14: memref<128x128xbf16, #tpu.memory_space<vmem>>, %arg15: memref<1x128xf32, #tpu.memory_space<vmem>>, %arg16: memref<128x128xbf16, #tpu.memory_space<vmem>>, %arg17: memref<1x128xf32, #tpu.memory_space<vmem>>, %arg18: memref<128x256xbf16, #tpu.memory_space<vmem>>, %arg19: memref<1x256xf32, #tpu.memory_space<vmem>>, %arg20: memref<128x128xbf16, #tpu.memory_space<vmem>>, %arg21: memref<1x128xf32, #tpu.memory_space<vmem>>, %arg22: memref<128x256xbf16, #tpu.memory_space<vmem>>, %arg23: memref<1x256xf32, #tpu.memory_space<vmem>>, %arg24: memref<256x128xbf16, #tpu.memory_space<vmem>>, %arg25: memref<1x128xf32, #tpu.memory_space<vmem>>, %arg26: memref<2x2x8x128xf32, #tpu.memory_space<vmem>>) attributes {dimension_semantics = [#tpu.dimension_semantics<parallel>], iteration_bounds = array<i64: 2>, scalar_prefetch = 0 : i64, scratch_operands = 0 : i64, tpu.core_type = #tpu.core_type<tc>, window_params = [{transform_indices = @transform_0, window_bounds = array<i64: 2, 2, 8, 128>}, {transform_indices = @transform_1, window_bounds = array<i64: 2, 8, 8>}, {transform_indices = @transform_2, window_bounds = array<i64: 2, 8, 8>}, {transform_indices = @transform_3, window_bounds = array<i64: 2, 16, 128>}, {transform_indices = @transform_4, window_bounds = array<i64: 2, 8, 16>}, {pipeline_mode = #tpu.pipeline_mode<synchronous>, transform_indices = @transform_5, window_bounds = array<i64: 1, 128>}, {pipeline_mode = #tpu.pipeline_mode<synchronous>, transform_indices = @transform_6, window_bounds = array<i64: 1, 128>}, {pipeline_mode = #tpu.pipeline_mode<synchronous>, transform_indices = @transform_7, window_bounds = array<i64: 1, 128>}, {pipeline_mode = #tpu.pipeline_mode<synchronous>, transform_indices = @transform_8, window_bounds = array<i64: 1, 128>}, {pipeline_mode = #tpu.pipeline_mode<synchronous>, transform_indices = @transform_9, window_bounds = array<i64: 1, 128>}, {pipeline_mode = #tpu.pipeline_mode<synchronous>, transform_indices = @transform_10, window_bounds = array<i64: 1, 128>}, {pipeline_mode = #tpu.pipeline_mode<synchronous>, transform_indices = @transform_11, window_bounds = array<i64: 128, 384>}, {pipeline_mode = #tpu.pipeline_mode<synchronous>, transform_indices = @transform_12, window_bounds = array<i64: 1, 384>}, {pipeline_mode = #tpu.pipeline_mode<synchronous>, transform_indices = @transform_13, window_bounds = array<i64: 128, 128>}, {pipeline_mode = #tpu.pipeline_mode<synchronous>, transform_indices = @transform_14, window_bounds = array<i64: 1, 128>}, {pipeline_mode = #tpu.pipeline_mode<synchronous>, transform_indices = @transform_15, window_bounds = array<i64: 128, 128>}, {pipeline_mode = #tpu.pipeline_mode<synchronous>, transform_indices = @transform_16, window_bounds = array<i64: 1, 128>}, {pipeline_mode = #tpu.pipeline_mode<synchronous>, transform_indices = @transform_17, window_bounds = array<i64: 128, 256>}, {pipeline_mode = #tpu.pipeline_mode<synchronous>, transform_indices = @transform_18, window_bounds = array<i64: 1, 256>}, {pipeline_mode = #tpu.pipeline_mode<synchronous>, transform_indices = @transform_19, window_bounds = array<i64: 128, 128>}, {pipeline_mode = #tpu.pipeline_mode<synchronous>, transform_indices = @transform_20, window_bounds = array<i64: 1, 128>}, {pipeline_mode = #tpu.pipeline_mode<synchronous>, transform_indices = @transform_21, window_bounds = array<i64: 128, 256>}, {pipeline_mode = #tpu.pipeline_mode<synchronous>, transform_indices = @transform_22, window_bounds = array<i64: 1, 256>}, {pipeline_mode = #tpu.pipeline_mode<synchronous>, transform_indices = @transform_23, window_bounds = array<i64: 256, 128>}, {pipeline_mode = #tpu.pipeline_mode<synchronous>, transform_indices = @transform_24, window_bounds = array<i64: 1, 128>}, {transform_indices = @transform_25, window_bounds = array<i64: 2, 2, 8, 128>}]} {
    %c0 = arith.constant 0 : index
    %c0_0 = arith.constant 0 : index
    %c0_1 = arith.constant 0 : index
    %0 = vector.load %arg2[%c0, %c0_0, %c0_1] : memref<2x8x8xbf16, #tpu.memory_space<vmem>>, vector<2x8x8xbf16>
    %1 = arith.extf %0 : vector<2x8x8xbf16> to vector<2x8x8xf32>
    %cst = arith.constant 1.000000e+00 : f32
    %2 = vector.broadcast %cst : f32 to vector<2x8x8xf32>
    %3 = arith.subf %1, %2 : vector<2x8x8xf32>
    %cst_2 = arith.constant 1.000000e+30 : f32
    %4 = vector.broadcast %cst_2 : f32 to vector<2x8x8xf32>
    %5 = arith.mulf %3, %4 : vector<2x8x8xf32>
    %c0_3 = arith.constant 0 : index
    %c0_4 = arith.constant 0 : index
    %c0_5 = arith.constant 0 : index
    %6 = vector.load %arg3[%c0_3, %c0_4, %c0_5] : memref<2x8x8xbf16, #tpu.memory_space<vmem>>, vector<2x8x8xbf16>
    %7 = arith.extf %6 : vector<2x8x8xbf16> to vector<2x8x8xf32>
    %cst_6 = arith.constant 1.000000e+00 : f32
    %8 = vector.broadcast %cst_6 : f32 to vector<2x8x8xf32>
    %9 = arith.subf %7, %8 : vector<2x8x8xf32>
    %cst_7 = arith.constant 1.000000e+30 : f32
    %10 = vector.broadcast %cst_7 : f32 to vector<2x8x8xf32>
    %11 = arith.mulf %9, %10 : vector<2x8x8xf32>
    %c0_8 = arith.constant 0 : index
    %c0_9 = arith.constant 0 : index
    %c0_10 = arith.constant 0 : index
    %12 = vector.load %arg5[%c0_8, %c0_9, %c0_10] : memref<2x8x16xbf16, #tpu.memory_space<vmem>>, vector<2x8x16xbf16>
    %13 = arith.extf %12 : vector<2x8x16xbf16> to vector<2x8x16xf32>
    %cst_11 = arith.constant 1.000000e+00 : f32
    %14 = vector.broadcast %cst_11 : f32 to vector<2x8x16xf32>
    %15 = arith.subf %13, %14 : vector<2x8x16xf32>
    %cst_12 = arith.constant 1.000000e+30 : f32
    %16 = vector.broadcast %cst_12 : f32 to vector<2x8x16xf32>
    %17 = arith.mulf %15, %16 : vector<2x8x16xf32>
    %c0_13 = arith.constant 0 : index
    %c0_14 = arith.constant 0 : index
    %c0_15 = arith.constant 0 : index
    %c0_16 = arith.constant 0 : index
    %18 = vector.load %arg1[%c0_13, %c0_14, %c0_15, %c0_16] : memref<2x2x8x128xf32, #tpu.memory_space<vmem>>, vector<2x2x8x128xf32>
    %19 = vector.shape_cast %18 : vector<2x2x8x128xf32> to vector<32x128xf32>
    %c0_17 = arith.constant 0 : index
    %c0_18 = arith.constant 0 : index
    %20 = vector.load %arg6[%c0_17, %c0_18] : memref<1x128xf32, #tpu.memory_space<vmem>>, vector<1x128xf32>
    %c0_19 = arith.constant 0 : index
    %c0_20 = arith.constant 0 : index
    %21 = vector.load %arg7[%c0_19, %c0_20] : memref<1x128xf32, #tpu.memory_space<vmem>>, vector<1x128xf32>
    %cst_21 = arith.constant dense<0.000000e+00> : vector<32xf32>
    %22 = vector.multi_reduction <add>, %19, %cst_21 [1] : vector<32x128xf32> to vector<32xf32>
    %23 = vector.shape_cast %22 : vector<32xf32> to vector<32x1xf32>
    %cst_22 = arith.constant 1.280000e+02 : f32
    %24 = vector.broadcast %cst_22 : f32 to vector<32x1xf32>
    %25 = arith.divf %23, %24 : vector<32x1xf32>
    %26 = vector.broadcast %25 : vector<32x1xf32> to vector<32x128xf32>
    %27 = arith.subf %19, %26 : vector<32x128xf32>
    %28 = arith.mulf %27, %27 : vector<32x128xf32>
    %cst_23 = arith.constant dense<0.000000e+00> : vector<32xf32>
    %29 = vector.multi_reduction <add>, %28, %cst_23 [1] : vector<32x128xf32> to vector<32xf32>
    %30 = vector.shape_cast %29 : vector<32xf32> to vector<32x1xf32>
    %cst_24 = arith.constant 1.280000e+02 : f32
    %31 = vector.broadcast %cst_24 : f32 to vector<32x1xf32>
    %32 = arith.divf %30, %31 : vector<32x1xf32>
    %33 = vector.broadcast %25 : vector<32x1xf32> to vector<32x128xf32>
    %34 = arith.subf %19, %33 : vector<32x128xf32>
    %cst_25 = arith.constant 9.99999996E-13 : f32
    %35 = vector.broadcast %cst_25 : f32 to vector<32x1xf32>
    %36 = arith.addf %32, %35 : vector<32x1xf32>
    %37 = math.rsqrt %36 : vector<32x1xf32>
    %38 = vector.broadcast %37 : vector<32x1xf32> to vector<32x128xf32>
    %39 = arith.mulf %34, %38 : vector<32x128xf32>
    %40 = vector.broadcast %20 : vector<1x128xf32> to vector<32x128xf32>
    %41 = arith.mulf %39, %40 : vector<32x128xf32>
    %42 = vector.broadcast %21 : vector<1x128xf32> to vector<32x128xf32>
    %43 = arith.addf %41, %42 : vector<32x128xf32>
    %c0_26 = arith.constant 0 : index
    %c0_27 = arith.constant 0 : index
    %44 = vector.load %arg12[%c0_26, %c0_27] : memref<128x384xbf16, #tpu.memory_space<vmem>>, vector<128x384xbf16>
    %45 = arith.truncf %43 : vector<32x128xf32> to vector<32x128xbf16>
    %cst_28 = arith.constant dense<0.000000e+00> : vector<32x384xf32>
    %46 = tpu.matmul %45, %44, %cst_28 {dimension_numbers = #tpu.dot_dimension_numbers<[1], [0], [0], [1], [0, 0, 1, 1], [], []>} : vector<32x128xbf16>, vector<128x384xbf16>, vector<32x384xf32> -> vector<32x384xf32>
    %c0_29 = arith.constant 0 : index
    %c0_30 = arith.constant 0 : index
    %47 = vector.load %arg13[%c0_29, %c0_30] : memref<1x384xf32, #tpu.memory_space<vmem>>, vector<1x384xf32>
    %48 = vector.broadcast %47 : vector<1x384xf32> to vector<32x384xf32>
    %49 = arith.addf %46, %48 : vector<32x384xf32>
    %50 = vector.extract_strided_slice %49 {offsets = [0, 0], sizes = [32, 128], strides = [1, 1]} : vector<32x384xf32> to vector<32x128xf32>
    %51 = arith.truncf %50 : vector<32x128xf32> to vector<32x128xbf16>
    %52 = vector.shape_cast %51 : vector<32x128xbf16> to vector<32x4x32xbf16>
    %53 = tpu.transpose %52, [1, 0, 2] : vector<32x4x32xbf16> -> vector<4x32x32xbf16>
    %54 = vector.extract_strided_slice %49 {offsets = [0, 128], sizes = [32, 128], strides = [1, 1]} : vector<32x384xf32> to vector<32x128xf32>
    %55 = arith.truncf %54 : vector<32x128xf32> to vector<32x128xbf16>
    %56 = vector.shape_cast %55 : vector<32x128xbf16> to vector<32x4x32xbf16>
    %57 = tpu.transpose %56, [1, 0, 2] : vector<32x4x32xbf16> -> vector<4x32x32xbf16>
    %58 = vector.extract_strided_slice %49 {offsets = [0, 256], sizes = [32, 128], strides = [1, 1]} : vector<32x384xf32> to vector<32x128xf32>
    %59 = arith.truncf %58 : vector<32x128xf32> to vector<32x128xbf16>
    %60 = vector.shape_cast %59 : vector<32x128xbf16> to vector<32x4x32xbf16>
    %61 = tpu.transpose %60, [1, 0, 2] : vector<32x4x32xbf16> -> vector<4x32x32xbf16>
    %62 = vector.extract_strided_slice %57 {offsets = [0, 16, 0], sizes = [4, 16, 32], strides = [1, 1, 1]} : vector<4x32x32xbf16> to vector<4x16x32xbf16>
    %63 = vector.extract_strided_slice %57 {offsets = [0, 0, 0], sizes = [4, 16, 32], strides = [1, 1, 1]} : vector<4x32x32xbf16> to vector<4x16x32xbf16>
    %64 = tpu.concatenate %62, %63 in 1 : vector<4x16x32xbf16>, vector<4x16x32xbf16> -> vector<4x32x32xbf16>
    %65 = vector.extract_strided_slice %61 {offsets = [0, 16, 0], sizes = [4, 16, 32], strides = [1, 1, 1]} : vector<4x32x32xbf16> to vector<4x16x32xbf16>
    %66 = vector.extract_strided_slice %61 {offsets = [0, 0, 0], sizes = [4, 16, 32], strides = [1, 1, 1]} : vector<4x32x32xbf16> to vector<4x16x32xbf16>
    %67 = tpu.concatenate %65, %66 in 1 : vector<4x16x32xbf16>, vector<4x16x32xbf16> -> vector<4x32x32xbf16>
    %68 = vector.shape_cast %53 : vector<4x32x32xbf16> to vector<16x8x32xbf16>
    %69 = vector.shape_cast %57 : vector<4x32x32xbf16> to vector<16x8x32xbf16>
    %70 = vector.shape_cast %61 : vector<4x32x32xbf16> to vector<16x8x32xbf16>
    %71 = vector.shape_cast %64 : vector<4x32x32xbf16> to vector<16x8x32xbf16>
    %72 = vector.shape_cast %67 : vector<4x32x32xbf16> to vector<16x8x32xbf16>
    "tpu.trace_start"() <{level = 10 : i32, message = "nqd,nkd->nqk"}> : () -> ()
    %cst_31 = arith.constant dense<0.000000e+00> : vector<16x8x8xf32>
    %73 = tpu.matmul %68, %69, %cst_31 {dimension_numbers = #tpu.dot_dimension_numbers<[2], [2], [1], [1], [0, 0, 0, 1, 1, 1], [0], [0]>} : vector<16x8x32xbf16>, vector<16x8x32xbf16>, vector<16x8x8xf32> -> vector<16x8x8xf32>
    "tpu.trace_stop"() : () -> ()
    %cst_32 = arith.constant 0.176776692 : f32
    %74 = vector.broadcast %cst_32 : f32 to vector<16x8x8xf32>
    %75 = arith.mulf %73, %74 : vector<16x8x8xf32>
    "tpu.trace_start"() <{level = 10 : i32, message = "nqd,nkd->nqk"}> : () -> ()
    %cst_33 = arith.constant dense<0.000000e+00> : vector<16x8x8xf32>
    %76 = tpu.matmul %68, %71, %cst_33 {dimension_numbers = #tpu.dot_dimension_numbers<[2], [2], [1], [1], [0, 0, 0, 1, 1, 1], [0], [0]>} : vector<16x8x32xbf16>, vector<16x8x32xbf16>, vector<16x8x8xf32> -> vector<16x8x8xf32>
    "tpu.trace_stop"() : () -> ()
    %cst_34 = arith.constant 0.176776692 : f32
    %77 = vector.broadcast %cst_34 : f32 to vector<16x8x8xf32>
    %78 = arith.mulf %76, %77 : vector<16x8x8xf32>
    %79 = vector.shape_cast %75 : vector<16x8x8xf32> to vector<8x2x8x8xf32>
    %80 = vector.shape_cast %5 : vector<2x8x8xf32> to vector<1x2x8x8xf32>
    %81 = vector.broadcast %80 : vector<1x2x8x8xf32> to vector<8x2x8x8xf32>
    %82 = arith.addf %79, %81 : vector<8x2x8x8xf32>
    %83 = vector.shape_cast %78 : vector<16x8x8xf32> to vector<8x2x8x8xf32>
    %84 = vector.shape_cast %11 : vector<2x8x8xf32> to vector<1x2x8x8xf32>
    %85 = vector.broadcast %84 : vector<1x2x8x8xf32> to vector<8x2x8x8xf32>
    %86 = arith.addf %83, %85 : vector<8x2x8x8xf32>
    %cst_35 = arith.constant dense<0xFF800000> : vector<8x2x8xf32>
    %87 = vector.multi_reduction <maximumf>, %82, %cst_35 [3] : vector<8x2x8x8xf32> to vector<8x2x8xf32>
    %88 = vector.shape_cast %87 : vector<8x2x8xf32> to vector<8x2x8x1xf32>
    %89 = vector.broadcast %88 : vector<8x2x8x1xf32> to vector<8x2x8x8xf32>
    %90 = arith.subf %82, %89 : vector<8x2x8x8xf32>
    %91 = math.exp %90 : vector<8x2x8x8xf32>
    %cst_36 = arith.constant dense<0.000000e+00> : vector<8x2x8xf32>
    %92 = vector.multi_reduction <add>, %91, %cst_36 [3] : vector<8x2x8x8xf32> to vector<8x2x8xf32>
    %93 = vector.shape_cast %92 : vector<8x2x8xf32> to vector<8x2x8x1xf32>
    %94 = tpu.reciprocal %93 {approx = true} : vector<8x2x8x1xf32> -> vector<8x2x8x1xf32>
    %95 = vector.broadcast %94 : vector<8x2x8x1xf32> to vector<8x2x8x8xf32>
    %96 = arith.mulf %91, %95 : vector<8x2x8x8xf32>
    %97 = vector.shape_cast %96 : vector<8x2x8x8xf32> to vector<16x8x8xf32>
    %98 = arith.truncf %97 : vector<16x8x8xf32> to vector<16x8x8xbf16>
    %cst_37 = arith.constant dense<0xFF800000> : vector<8x2x8xf32>
    %99 = vector.multi_reduction <maximumf>, %86, %cst_37 [3] : vector<8x2x8x8xf32> to vector<8x2x8xf32>
    %100 = vector.shape_cast %99 : vector<8x2x8xf32> to vector<8x2x8x1xf32>
    %101 = vector.broadcast %100 : vector<8x2x8x1xf32> to vector<8x2x8x8xf32>
    %102 = arith.subf %86, %101 : vector<8x2x8x8xf32>
    %103 = math.exp %102 : vector<8x2x8x8xf32>
    %cst_38 = arith.constant dense<0.000000e+00> : vector<8x2x8xf32>
    %104 = vector.multi_reduction <add>, %103, %cst_38 [3] : vector<8x2x8x8xf32> to vector<8x2x8xf32>
    %105 = vector.shape_cast %104 : vector<8x2x8xf32> to vector<8x2x8x1xf32>
    %106 = tpu.reciprocal %105 {approx = true} : vector<8x2x8x1xf32> -> vector<8x2x8x1xf32>
    %107 = vector.broadcast %106 : vector<8x2x8x1xf32> to vector<8x2x8x8xf32>
    %108 = arith.mulf %103, %107 : vector<8x2x8x8xf32>
    %109 = vector.shape_cast %108 : vector<8x2x8x8xf32> to vector<16x8x8xf32>
    %110 = arith.truncf %109 : vector<16x8x8xf32> to vector<16x8x8xbf16>
    "tpu.trace_start"() <{level = 10 : i32, message = "nqk,nkd->nqd"}> : () -> ()
    %cst_39 = arith.constant dense<0.000000e+00> : vector<16x8x32xf32>
    %111 = tpu.matmul %98, %70, %cst_39 {dimension_numbers = #tpu.dot_dimension_numbers<[2], [1], [1], [2], [0, 0, 0, 1, 1, 2], [0], [0]>} : vector<16x8x8xbf16>, vector<16x8x32xbf16>, vector<16x8x32xf32> -> vector<16x8x32xf32>
    %cst_40 = arith.constant dense<0.000000e+00> : vector<16x8x32xf32>
    %112 = tpu.matmul %110, %72, %cst_40 {dimension_numbers = #tpu.dot_dimension_numbers<[2], [1], [1], [2], [0, 0, 0, 1, 1, 2], [0], [0]>} : vector<16x8x8xbf16>, vector<16x8x32xbf16>, vector<16x8x32xf32> -> vector<16x8x32xf32>
    "tpu.trace_stop"() : () -> ()
    %113 = arith.addf %111, %112 : vector<16x8x32xf32>
    %114 = vector.shape_cast %113 : vector<16x8x32xf32> to vector<4x32x32xf32>
    %115 = tpu.transpose %114, [1, 0, 2] : vector<4x32x32xf32> -> vector<32x4x32xf32>
    %116 = vector.shape_cast %115 : vector<32x4x32xf32> to vector<32x128xf32>
    %c0_41 = arith.constant 0 : index
    %c0_42 = arith.constant 0 : index
    %117 = vector.load %arg14[%c0_41, %c0_42] : memref<128x128xbf16, #tpu.memory_space<vmem>>, vector<128x128xbf16>
    %118 = arith.truncf %116 : vector<32x128xf32> to vector<32x128xbf16>
    %cst_43 = arith.constant dense<0.000000e+00> : vector<32x128xf32>
    %119 = tpu.matmul %118, %117, %cst_43 {dimension_numbers = #tpu.dot_dimension_numbers<[1], [0], [0], [1], [0, 0, 1, 1], [], []>} : vector<32x128xbf16>, vector<128x128xbf16>, vector<32x128xf32> -> vector<32x128xf32>
    %c0_44 = arith.constant 0 : index
    %c0_45 = arith.constant 0 : index
    %120 = vector.load %arg15[%c0_44, %c0_45] : memref<1x128xf32, #tpu.memory_space<vmem>>, vector<1x128xf32>
    %121 = vector.broadcast %120 : vector<1x128xf32> to vector<32x128xf32>
    %122 = arith.addf %119, %121 : vector<32x128xf32>
    %123 = arith.addf %122, %19 : vector<32x128xf32>
    %c0_46 = arith.constant 0 : index
    %c0_47 = arith.constant 0 : index
    %124 = vector.load %arg8[%c0_46, %c0_47] : memref<1x128xf32, #tpu.memory_space<vmem>>, vector<1x128xf32>
    %c0_48 = arith.constant 0 : index
    %c0_49 = arith.constant 0 : index
    %125 = vector.load %arg9[%c0_48, %c0_49] : memref<1x128xf32, #tpu.memory_space<vmem>>, vector<1x128xf32>
    %cst_50 = arith.constant dense<0.000000e+00> : vector<32xf32>
    %126 = vector.multi_reduction <add>, %123, %cst_50 [1] : vector<32x128xf32> to vector<32xf32>
    %127 = vector.shape_cast %126 : vector<32xf32> to vector<32x1xf32>
    %cst_51 = arith.constant 1.280000e+02 : f32
    %128 = vector.broadcast %cst_51 : f32 to vector<32x1xf32>
    %129 = arith.divf %127, %128 : vector<32x1xf32>
    %130 = vector.broadcast %129 : vector<32x1xf32> to vector<32x128xf32>
    %131 = arith.subf %123, %130 : vector<32x128xf32>
    %132 = arith.mulf %131, %131 : vector<32x128xf32>
    %cst_52 = arith.constant dense<0.000000e+00> : vector<32xf32>
    %133 = vector.multi_reduction <add>, %132, %cst_52 [1] : vector<32x128xf32> to vector<32xf32>
    %134 = vector.shape_cast %133 : vector<32xf32> to vector<32x1xf32>
    %cst_53 = arith.constant 1.280000e+02 : f32
    %135 = vector.broadcast %cst_53 : f32 to vector<32x1xf32>
    %136 = arith.divf %134, %135 : vector<32x1xf32>
    %137 = vector.broadcast %129 : vector<32x1xf32> to vector<32x128xf32>
    %138 = arith.subf %123, %137 : vector<32x128xf32>
    %cst_54 = arith.constant 9.99999996E-13 : f32
    %139 = vector.broadcast %cst_54 : f32 to vector<32x1xf32>
    %140 = arith.addf %136, %139 : vector<32x1xf32>
    %141 = math.rsqrt %140 : vector<32x1xf32>
    %142 = vector.broadcast %141 : vector<32x1xf32> to vector<32x128xf32>
    %143 = arith.mulf %138, %142 : vector<32x128xf32>
    %144 = vector.broadcast %124 : vector<1x128xf32> to vector<32x128xf32>
    %145 = arith.mulf %143, %144 : vector<32x128xf32>
    %146 = vector.broadcast %125 : vector<1x128xf32> to vector<32x128xf32>
    %147 = arith.addf %145, %146 : vector<32x128xf32>
    %c0_55 = arith.constant 0 : index
    %c0_56 = arith.constant 0 : index
    %148 = vector.load %arg16[%c0_55, %c0_56] : memref<128x128xbf16, #tpu.memory_space<vmem>>, vector<128x128xbf16>
    %149 = arith.truncf %147 : vector<32x128xf32> to vector<32x128xbf16>
    %cst_57 = arith.constant dense<0.000000e+00> : vector<32x128xf32>
    %150 = tpu.matmul %149, %148, %cst_57 {dimension_numbers = #tpu.dot_dimension_numbers<[1], [0], [0], [1], [0, 0, 1, 1], [], []>} : vector<32x128xbf16>, vector<128x128xbf16>, vector<32x128xf32> -> vector<32x128xf32>
    %c0_58 = arith.constant 0 : index
    %c0_59 = arith.constant 0 : index
    %151 = vector.load %arg17[%c0_58, %c0_59] : memref<1x128xf32, #tpu.memory_space<vmem>>, vector<1x128xf32>
    %152 = vector.broadcast %151 : vector<1x128xf32> to vector<32x128xf32>
    %153 = arith.addf %150, %152 : vector<32x128xf32>
    %154 = arith.truncf %153 : vector<32x128xf32> to vector<32x128xbf16>
    %155 = vector.shape_cast %154 : vector<32x128xbf16> to vector<32x4x32xbf16>
    %156 = tpu.transpose %155, [1, 0, 2] : vector<32x4x32xbf16> -> vector<4x32x32xbf16>
    %c0_60 = arith.constant 0 : index
    %c0_61 = arith.constant 0 : index
    %c0_62 = arith.constant 0 : index
    %157 = vector.load %arg4[%c0_60, %c0_61, %c0_62] : memref<2x16x128xf32, #tpu.memory_space<vmem>>, vector<2x16x128xf32>
    %158 = vector.shape_cast %157 : vector<2x16x128xf32> to vector<32x128xf32>
    %c0_63 = arith.constant 0 : index
    %c0_64 = arith.constant 0 : index
    %159 = vector.load %arg18[%c0_63, %c0_64] : memref<128x256xbf16, #tpu.memory_space<vmem>>, vector<128x256xbf16>
    %160 = arith.truncf %158 : vector<32x128xf32> to vector<32x128xbf16>
    %cst_65 = arith.constant dense<0.000000e+00> : vector<32x256xf32>
    %161 = tpu.matmul %160, %159, %cst_65 {dimension_numbers = #tpu.dot_dimension_numbers<[1], [0], [0], [1], [0, 0, 1, 1], [], []>} : vector<32x128xbf16>, vector<128x256xbf16>, vector<32x256xf32> -> vector<32x256xf32>
    %c0_66 = arith.constant 0 : index
    %c0_67 = arith.constant 0 : index
    %162 = vector.load %arg19[%c0_66, %c0_67] : memref<1x256xf32, #tpu.memory_space<vmem>>, vector<1x256xf32>
    %163 = vector.broadcast %162 : vector<1x256xf32> to vector<32x256xf32>
    %164 = arith.addf %161, %163 : vector<32x256xf32>
    %165 = vector.extract_strided_slice %164 {offsets = [0, 0], sizes = [32, 128], strides = [1, 1]} : vector<32x256xf32> to vector<32x128xf32>
    %166 = arith.truncf %165 : vector<32x128xf32> to vector<32x128xbf16>
    %167 = vector.shape_cast %166 : vector<32x128xbf16> to vector<32x4x32xbf16>
    %168 = tpu.transpose %167, [1, 0, 2] : vector<32x4x32xbf16> -> vector<4x32x32xbf16>
    %169 = vector.shape_cast %168 : vector<4x32x32xbf16> to vector<8x16x32xbf16>
    %170 = vector.extract_strided_slice %164 {offsets = [0, 128], sizes = [32, 128], strides = [1, 1]} : vector<32x256xf32> to vector<32x128xf32>
    %171 = arith.truncf %170 : vector<32x128xf32> to vector<32x128xbf16>
    %172 = vector.shape_cast %171 : vector<32x128xbf16> to vector<32x4x32xbf16>
    %173 = tpu.transpose %172, [1, 0, 2] : vector<32x4x32xbf16> -> vector<4x32x32xbf16>
    %174 = vector.shape_cast %173 : vector<4x32x32xbf16> to vector<8x16x32xbf16>
    %175 = vector.extract_strided_slice %156 {offsets = [0, 0, 0], sizes = [4, 16, 32], strides = [1, 1, 1]} : vector<4x32x32xbf16> to vector<4x16x32xbf16>
    %176 = vector.shape_cast %175 : vector<4x16x32xbf16> to vector<8x8x32xbf16>
    "tpu.trace_start"() <{level = 10 : i32, message = "nqd,nkd->nqk"}> : () -> ()
    %cst_68 = arith.constant dense<0.000000e+00> : vector<8x8x16xf32>
    %177 = tpu.matmul %176, %169, %cst_68 {dimension_numbers = #tpu.dot_dimension_numbers<[2], [2], [1], [1], [0, 0, 0, 1, 1, 1], [0], [0]>} : vector<8x8x32xbf16>, vector<8x16x32xbf16>, vector<8x8x16xf32> -> vector<8x8x16xf32>
    "tpu.trace_stop"() : () -> ()
    %cst_69 = arith.constant 0.176776692 : f32
    %178 = vector.broadcast %cst_69 : f32 to vector<8x8x16xf32>
    %179 = arith.mulf %177, %178 : vector<8x8x16xf32>
    %180 = vector.shape_cast %179 : vector<8x8x16xf32> to vector<4x2x8x16xf32>
    %181 = vector.shape_cast %17 : vector<2x8x16xf32> to vector<1x2x8x16xf32>
    %182 = vector.broadcast %181 : vector<1x2x8x16xf32> to vector<4x2x8x16xf32>
    %183 = arith.addf %180, %182 : vector<4x2x8x16xf32>
    %cst_70 = arith.constant dense<0xFF800000> : vector<4x2x8xf32>
    %184 = vector.multi_reduction <maximumf>, %183, %cst_70 [3] : vector<4x2x8x16xf32> to vector<4x2x8xf32>
    %185 = vector.shape_cast %184 : vector<4x2x8xf32> to vector<4x2x8x1xf32>
    %186 = vector.broadcast %185 : vector<4x2x8x1xf32> to vector<4x2x8x16xf32>
    %187 = arith.subf %183, %186 : vector<4x2x8x16xf32>
    %188 = math.exp %187 : vector<4x2x8x16xf32>
    %cst_71 = arith.constant dense<0.000000e+00> : vector<4x2x8xf32>
    %189 = vector.multi_reduction <add>, %188, %cst_71 [3] : vector<4x2x8x16xf32> to vector<4x2x8xf32>
    %190 = vector.shape_cast %189 : vector<4x2x8xf32> to vector<4x2x8x1xf32>
    %191 = tpu.reciprocal %190 {approx = true} : vector<4x2x8x1xf32> -> vector<4x2x8x1xf32>
    %192 = vector.broadcast %191 : vector<4x2x8x1xf32> to vector<4x2x8x16xf32>
    %193 = arith.mulf %188, %192 : vector<4x2x8x16xf32>
    %194 = vector.shape_cast %193 : vector<4x2x8x16xf32> to vector<8x8x16xf32>
    %195 = arith.truncf %194 : vector<8x8x16xf32> to vector<8x8x16xbf16>
    "tpu.trace_start"() <{level = 10 : i32, message = "nqk,nkd->nqd"}> : () -> ()
    %cst_72 = arith.constant dense<0.000000e+00> : vector<8x8x32xf32>
    %196 = tpu.matmul %195, %174, %cst_72 {dimension_numbers = #tpu.dot_dimension_numbers<[2], [1], [1], [2], [0, 0, 0, 1, 1, 2], [0], [0]>} : vector<8x8x16xbf16>, vector<8x16x32xbf16>, vector<8x8x32xf32> -> vector<8x8x32xf32>
    "tpu.trace_stop"() : () -> ()
    %197 = vector.shape_cast %196 : vector<8x8x32xf32> to vector<4x16x32xf32>
    %198 = vector.extract_strided_slice %156 {offsets = [0, 16, 0], sizes = [4, 16, 32], strides = [1, 1, 1]} : vector<4x32x32xbf16> to vector<4x16x32xbf16>
    %199 = vector.shape_cast %198 : vector<4x16x32xbf16> to vector<8x8x32xbf16>
    "tpu.trace_start"() <{level = 10 : i32, message = "nqd,nkd->nqk"}> : () -> ()
    %cst_73 = arith.constant dense<0.000000e+00> : vector<8x8x16xf32>
    %200 = tpu.matmul %199, %169, %cst_73 {dimension_numbers = #tpu.dot_dimension_numbers<[2], [2], [1], [1], [0, 0, 0, 1, 1, 1], [0], [0]>} : vector<8x8x32xbf16>, vector<8x16x32xbf16>, vector<8x8x16xf32> -> vector<8x8x16xf32>
    "tpu.trace_stop"() : () -> ()
    %cst_74 = arith.constant 0.176776692 : f32
    %201 = vector.broadcast %cst_74 : f32 to vector<8x8x16xf32>
    %202 = arith.mulf %200, %201 : vector<8x8x16xf32>
    %203 = vector.shape_cast %202 : vector<8x8x16xf32> to vector<4x2x8x16xf32>
    %204 = vector.shape_cast %17 : vector<2x8x16xf32> to vector<1x2x8x16xf32>
    %205 = vector.broadcast %204 : vector<1x2x8x16xf32> to vector<4x2x8x16xf32>
    %206 = arith.addf %203, %205 : vector<4x2x8x16xf32>
    %cst_75 = arith.constant dense<0xFF800000> : vector<4x2x8xf32>
    %207 = vector.multi_reduction <maximumf>, %206, %cst_75 [3] : vector<4x2x8x16xf32> to vector<4x2x8xf32>
    %208 = vector.shape_cast %207 : vector<4x2x8xf32> to vector<4x2x8x1xf32>
    %209 = vector.broadcast %208 : vector<4x2x8x1xf32> to vector<4x2x8x16xf32>
    %210 = arith.subf %206, %209 : vector<4x2x8x16xf32>
    %211 = math.exp %210 : vector<4x2x8x16xf32>
    %cst_76 = arith.constant dense<0.000000e+00> : vector<4x2x8xf32>
    %212 = vector.multi_reduction <add>, %211, %cst_76 [3] : vector<4x2x8x16xf32> to vector<4x2x8xf32>
    %213 = vector.shape_cast %212 : vector<4x2x8xf32> to vector<4x2x8x1xf32>
    %214 = tpu.reciprocal %213 {approx = true} : vector<4x2x8x1xf32> -> vector<4x2x8x1xf32>
    %215 = vector.broadcast %214 : vector<4x2x8x1xf32> to vector<4x2x8x16xf32>
    %216 = arith.mulf %211, %215 : vector<4x2x8x16xf32>
    %217 = vector.shape_cast %216 : vector<4x2x8x16xf32> to vector<8x8x16xf32>
    %218 = arith.truncf %217 : vector<8x8x16xf32> to vector<8x8x16xbf16>
    "tpu.trace_start"() <{level = 10 : i32, message = "nqk,nkd->nqd"}> : () -> ()
    %cst_77 = arith.constant dense<0.000000e+00> : vector<8x8x32xf32>
    %219 = tpu.matmul %218, %174, %cst_77 {dimension_numbers = #tpu.dot_dimension_numbers<[2], [1], [1], [2], [0, 0, 0, 1, 1, 2], [0], [0]>} : vector<8x8x16xbf16>, vector<8x16x32xbf16>, vector<8x8x32xf32> -> vector<8x8x32xf32>
    "tpu.trace_stop"() : () -> ()
    %220 = vector.shape_cast %219 : vector<8x8x32xf32> to vector<4x16x32xf32>
    %221 = tpu.concatenate %197, %220 in 1 : vector<4x16x32xf32>, vector<4x16x32xf32> -> vector<4x32x32xf32>
    %222 = tpu.transpose %221, [1, 0, 2] : vector<4x32x32xf32> -> vector<32x4x32xf32>
    %223 = vector.shape_cast %222 : vector<32x4x32xf32> to vector<32x128xf32>
    %c0_78 = arith.constant 0 : index
    %c0_79 = arith.constant 0 : index
    %224 = vector.load %arg20[%c0_78, %c0_79] : memref<128x128xbf16, #tpu.memory_space<vmem>>, vector<128x128xbf16>
    %225 = arith.truncf %223 : vector<32x128xf32> to vector<32x128xbf16>
    %cst_80 = arith.constant dense<0.000000e+00> : vector<32x128xf32>
    %226 = tpu.matmul %225, %224, %cst_80 {dimension_numbers = #tpu.dot_dimension_numbers<[1], [0], [0], [1], [0, 0, 1, 1], [], []>} : vector<32x128xbf16>, vector<128x128xbf16>, vector<32x128xf32> -> vector<32x128xf32>
    %c0_81 = arith.constant 0 : index
    %c0_82 = arith.constant 0 : index
    %227 = vector.load %arg21[%c0_81, %c0_82] : memref<1x128xf32, #tpu.memory_space<vmem>>, vector<1x128xf32>
    %228 = vector.broadcast %227 : vector<1x128xf32> to vector<32x128xf32>
    %229 = arith.addf %226, %228 : vector<32x128xf32>
    %230 = arith.addf %229, %123 : vector<32x128xf32>
    %c0_83 = arith.constant 0 : index
    %c0_84 = arith.constant 0 : index
    %231 = vector.load %arg10[%c0_83, %c0_84] : memref<1x128xf32, #tpu.memory_space<vmem>>, vector<1x128xf32>
    %c0_85 = arith.constant 0 : index
    %c0_86 = arith.constant 0 : index
    %232 = vector.load %arg11[%c0_85, %c0_86] : memref<1x128xf32, #tpu.memory_space<vmem>>, vector<1x128xf32>
    %cst_87 = arith.constant dense<0.000000e+00> : vector<32xf32>
    %233 = vector.multi_reduction <add>, %230, %cst_87 [1] : vector<32x128xf32> to vector<32xf32>
    %234 = vector.shape_cast %233 : vector<32xf32> to vector<32x1xf32>
    %cst_88 = arith.constant 1.280000e+02 : f32
    %235 = vector.broadcast %cst_88 : f32 to vector<32x1xf32>
    %236 = arith.divf %234, %235 : vector<32x1xf32>
    %237 = vector.broadcast %236 : vector<32x1xf32> to vector<32x128xf32>
    %238 = arith.subf %230, %237 : vector<32x128xf32>
    %239 = arith.mulf %238, %238 : vector<32x128xf32>
    %cst_89 = arith.constant dense<0.000000e+00> : vector<32xf32>
    %240 = vector.multi_reduction <add>, %239, %cst_89 [1] : vector<32x128xf32> to vector<32xf32>
    %241 = vector.shape_cast %240 : vector<32xf32> to vector<32x1xf32>
    %cst_90 = arith.constant 1.280000e+02 : f32
    %242 = vector.broadcast %cst_90 : f32 to vector<32x1xf32>
    %243 = arith.divf %241, %242 : vector<32x1xf32>
    %244 = vector.broadcast %236 : vector<32x1xf32> to vector<32x128xf32>
    %245 = arith.subf %230, %244 : vector<32x128xf32>
    %cst_91 = arith.constant 9.99999996E-13 : f32
    %246 = vector.broadcast %cst_91 : f32 to vector<32x1xf32>
    %247 = arith.addf %243, %246 : vector<32x1xf32>
    %248 = math.rsqrt %247 : vector<32x1xf32>
    %249 = vector.broadcast %248 : vector<32x1xf32> to vector<32x128xf32>
    %250 = arith.mulf %245, %249 : vector<32x128xf32>
    %251 = vector.broadcast %231 : vector<1x128xf32> to vector<32x128xf32>
    %252 = arith.mulf %250, %251 : vector<32x128xf32>
    %253 = vector.broadcast %232 : vector<1x128xf32> to vector<32x128xf32>
    %254 = arith.addf %252, %253 : vector<32x128xf32>
    %c0_92 = arith.constant 0 : index
    %c0_93 = arith.constant 0 : index
    %255 = vector.load %arg22[%c0_92, %c0_93] : memref<128x256xbf16, #tpu.memory_space<vmem>>, vector<128x256xbf16>
    %256 = arith.truncf %254 : vector<32x128xf32> to vector<32x128xbf16>
    %cst_94 = arith.constant dense<0.000000e+00> : vector<32x256xf32>
    %257 = tpu.matmul %256, %255, %cst_94 {dimension_numbers = #tpu.dot_dimension_numbers<[1], [0], [0], [1], [0, 0, 1, 1], [], []>} : vector<32x128xbf16>, vector<128x256xbf16>, vector<32x256xf32> -> vector<32x256xf32>
    %c0_95 = arith.constant 0 : index
    %c0_96 = arith.constant 0 : index
    %258 = vector.load %arg23[%c0_95, %c0_96] : memref<1x256xf32, #tpu.memory_space<vmem>>, vector<1x256xf32>
    %259 = vector.broadcast %258 : vector<1x256xf32> to vector<32x256xf32>
    %260 = arith.addf %257, %259 : vector<32x256xf32>
    %cst_97 = arith.constant 0.000000e+00 : f32
    %261 = vector.broadcast %cst_97 : f32 to vector<32x256xf32>
    %262 = arith.maximumf %260, %261 : vector<32x256xf32>
    %263 = arith.truncf %262 : vector<32x256xf32> to vector<32x256xbf16>
    %c0_98 = arith.constant 0 : index
    %c0_99 = arith.constant 0 : index
    %264 = vector.load %arg24[%c0_98, %c0_99] : memref<256x128xbf16, #tpu.memory_space<vmem>>, vector<256x128xbf16>
    %cst_100 = arith.constant dense<0.000000e+00> : vector<32x128xf32>
    %265 = tpu.matmul %263, %264, %cst_100 {dimension_numbers = #tpu.dot_dimension_numbers<[1], [0], [0], [1], [0, 0, 1, 1], [], []>} : vector<32x256xbf16>, vector<256x128xbf16>, vector<32x128xf32> -> vector<32x128xf32>
    %c0_101 = arith.constant 0 : index
    %c0_102 = arith.constant 0 : index
    %266 = vector.load %arg25[%c0_101, %c0_102] : memref<1x128xf32, #tpu.memory_space<vmem>>, vector<1x128xf32>
    %267 = vector.broadcast %266 : vector<1x128xf32> to vector<32x128xf32>
    %268 = arith.addf %265, %267 : vector<32x128xf32>
    %269 = arith.addf %268, %230 : vector<32x128xf32>
    %270 = vector.shape_cast %269 : vector<32x128xf32> to vector<2x2x8x128xf32>
    %c0_103 = arith.constant 0 : index
    %c0_104 = arith.constant 0 : index
    %c0_105 = arith.constant 0 : index
    %c0_106 = arith.constant 0 : index
    %271 = vector.load %arg26[%c0_103, %c0_104, %c0_105, %c0_106] : memref<2x2x8x128xf32, #tpu.memory_space<vmem>>, vector<2x2x8x128xf32>
    tpu.vector_store %arg26[%c0_103, %c0_104, %c0_105, %c0_106], %270 {strides = array<i32>} : memref<2x2x8x128xf32, #tpu.memory_space<vmem>>, vector<2x2x8x128xf32>,
    return
  }
  func.func @transform_0(%arg0: i32) -> (i32, i32, i32, i32) {
    %c0_i32 = arith.constant 0 : i32
    %c0_i32_0 = arith.constant 0 : i32
    %c0_i32_1 = arith.constant 0 : i32
    %c0_i32_2 = arith.constant 0 : i32
    return %c0_i32, %arg0, %c0_i32_0, %c0_i32_1 : i32, i32, i32, i32
  }
  func.func @transform_1(%arg0: i32) -> (i32, i32, i32) {
    %c0_i32 = arith.constant 0 : i32
    %c0_i32_0 = arith.constant 0 : i32
    %c0_i32_1 = arith.constant 0 : i32
    return %arg0, %c0_i32, %c0_i32_0 : i32, i32, i32
  }
  func.func @transform_2(%arg0: i32) -> (i32, i32, i32) {
    %c0_i32 = arith.constant 0 : i32
    %c0_i32_0 = arith.constant 0 : i32
    %c0_i32_1 = arith.constant 0 : i32
    return %arg0, %c0_i32, %c0_i32_0 : i32, i32, i32
  }
  func.func @transform_3(%arg0: i32) -> (i32, i32, i32) {
    %c0_i32 = arith.constant 0 : i32
    %c0_i32_0 = arith.constant 0 : i32
    %c0_i32_1 = arith.constant 0 : i32
    return %arg0, %c0_i32, %c0_i32_0 : i32, i32, i32
  }
  func.func @transform_4(%arg0: i32) -> (i32, i32, i32) {
    %c0_i32 = arith.constant 0 : i32
    %c0_i32_0 = arith.constant 0 : i32
    %c0_i32_1 = arith.constant 0 : i32
    return %arg0, %c0_i32, %c0_i32_0 : i32, i32, i32
  }
  func.func @transform_5(%arg0: i32) -> (i32, i32) {
    %c0_i32 = arith.constant 0 : i32
    %c0_i32_0 = arith.constant 0 : i32
    %c0_i32_1 = arith.constant 0 : i32
    return %c0_i32, %c0_i32_0 : i32, i32
  }
  func.func @transform_6(%arg0: i32) -> (i32, i32) {
    %c0_i32 = arith.constant 0 : i32
    %c0_i32_0 = arith.constant 0 : i32
    %c0_i32_1 = arith.constant 0 : i32
    return %c0_i32, %c0_i32_0 : i32, i32
  }
  func.func @transform_7(%arg0: i32) -> (i32, i32) {
    %c0_i32 = arith.constant 0 : i32
    %c0_i32_0 = arith.constant 0 : i32
    %c0_i32_1 = arith.constant 0 : i32
    return %c0_i32, %c0_i32_0 : i32, i32
  }
  func.func @transform_8(%arg0: i32) -> (i32, i32) {
    %c0_i32 = arith.constant 0 : i32
    %c0_i32_0 = arith.constant 0 : i32
    %c0_i32_1 = arith.constant 0 : i32
    return %c0_i32, %c0_i32_0 : i32, i32
  }
  func.func @transform_9(%arg0: i32) -> (i32, i32) {
    %c0_i32 = arith.constant 0 : i32
    %c0_i32_0 = arith.constant 0 : i32
    %c0_i32_1 = arith.constant 0 : i32
    return %c0_i32, %c0_i32_0 : i32, i32
  }
  func.func @transform_10(%arg0: i32) -> (i32, i32) {
    %c0_i32 = arith.constant 0 : i32
    %c0_i32_0 = arith.constant 0 : i32
    %c0_i32_1 = arith.constant 0 : i32
    return %c0_i32, %c0_i32_0 : i32, i32
  }
  func.func @transform_11(%arg0: i32) -> (i32, i32) {
    %c0_i32 = arith.constant 0 : i32
    %c0_i32_0 = arith.constant 0 : i32
    %c0_i32_1 = arith.constant 0 : i32
    return %c0_i32, %c0_i32_0 : i32, i32
  }
  func.func @transform_12(%arg0: i32) -> (i32, i32) {
    %c0_i32 = arith.constant 0 : i32
    %c0_i32_0 = arith.constant 0 : i32
    %c0_i32_1 = arith.constant 0 : i32
    return %c0_i32, %c0_i32_0 : i32, i32
  }
  func.func @transform_13(%arg0: i32) -> (i32, i32) {
    %c0_i32 = arith.constant 0 : i32
    %c0_i32_0 = arith.constant 0 : i32
    %c0_i32_1 = arith.constant 0 : i32
    return %c0_i32, %c0_i32_0 : i32, i32
  }
  func.func @transform_14(%arg0: i32) -> (i32, i32) {
    %c0_i32 = arith.constant 0 : i32
    %c0_i32_0 = arith.constant 0 : i32
    %c0_i32_1 = arith.constant 0 : i32
    return %c0_i32, %c0_i32_0 : i32, i32
  }
  func.func @transform_15(%arg0: i32) -> (i32, i32) {
    %c0_i32 = arith.constant 0 : i32
    %c0_i32_0 = arith.constant 0 : i32
    %c0_i32_1 = arith.constant 0 : i32
    return %c0_i32, %c0_i32_0 : i32, i32
  }
  func.func @transform_16(%arg0: i32) -> (i32, i32) {
    %c0_i32 = arith.constant 0 : i32
    %c0_i32_0 = arith.constant 0 : i32
    %c0_i32_1 = arith.constant 0 : i32
    return %c0_i32, %c0_i32_0 : i32, i32
  }
  func.func @transform_17(%arg0: i32) -> (i32, i32) {
    %c0_i32 = arith.constant 0 : i32
    %c0_i32_0 = arith.constant 0 : i32
    %c0_i32_1 = arith.constant 0 : i32
    return %c0_i32, %c0_i32_0 : i32, i32
  }
  func.func @transform_18(%arg0: i32) -> (i32, i32) {
    %c0_i32 = arith.constant 0 : i32
    %c0_i32_0 = arith.constant 0 : i32
    %c0_i32_1 = arith.constant 0 : i32
    return %c0_i32, %c0_i32_0 : i32, i32
  }
  func.func @transform_19(%arg0: i32) -> (i32, i32) {
    %c0_i32 = arith.constant 0 : i32
    %c0_i32_0 = arith.constant 0 : i32
    %c0_i32_1 = arith.constant 0 : i32
    return %c0_i32, %c0_i32_0 : i32, i32
  }
  func.func @transform_20(%arg0: i32) -> (i32, i32) {
    %c0_i32 = arith.constant 0 : i32
    %c0_i32_0 = arith.constant 0 : i32
    %c0_i32_1 = arith.constant 0 : i32
    return %c0_i32, %c0_i32_0 : i32, i32
  }
  func.func @transform_21(%arg0: i32) -> (i32, i32) {
    %c0_i32 = arith.constant 0 : i32
    %c0_i32_0 = arith.constant 0 : i32
    %c0_i32_1 = arith.constant 0 : i32
    return %c0_i32, %c0_i32_0 : i32, i32
  }
  func.func @transform_22(%arg0: i32) -> (i32, i32) {
    %c0_i32 = arith.constant 0 : i32
    %c0_i32_0 = arith.constant 0 : i32
    %c0_i32_1 = arith.constant 0 : i32
    return %c0_i32, %c0_i32_0 : i32, i32
  }
  func.func @transform_23(%arg0: i32) -> (i32, i32) {
    %c0_i32 = arith.constant 0 : i32
    %c0_i32_0 = arith.constant 0 : i32
    %c0_i32_1 = arith.constant 0 : i32
    return %c0_i32, %c0_i32_0 : i32, i32
  }
  func.func @transform_24(%arg0: i32) -> (i32, i32) {
    %c0_i32 = arith.constant 0 : i32
    %c0_i32_0 = arith.constant 0 : i32
    %c0_i32_1 = arith.constant 0 : i32
    return %c0_i32, %c0_i32_0 : i32, i32
  }
  func.func @transform_25(%arg0: i32) -> (i32, i32, i32, i32) {
    %c0_i32 = arith.constant 0 : i32
    %c0_i32_0 = arith.constant 0 : i32
    %c0_i32_1 = arith.constant 0 : i32
    %c0_i32_2 = arith.constant 0 : i32
    return %c0_i32, %arg0, %c0_i32_0, %c0_i32_1 : i32, i32, i32, i32
  }
}

</mosaic_0001>

<bundles_post_ra>
// kernel: tpu_custom_call.1
= control target key start
LH: loop header
LB: loop body
LE: loop exit
PB: predicated region body
PF: predicated region fallthrough
CT: control target
= control target key end

     0   :  { %s14579_s0 = inlined_call_operand.hbm [shape: f32[2,4,8,128], index: 0, kind: input, shape index: {}]   ;;  %s14580_s1 = inlined_call_operand.hbm [shape: bf16[4,8,8], index: 1, kind: input, shape index: {}]   ;;  %s14581_s2 = inlined_call_operand.hbm [shape: bf16[4,8,8], index: 2, kind: input, shape index: {}]   ;;  %s14582_s3 = inlined_call_operand.hbm [shape: f32[4,16,128], index: 3, kind: input, shape index: {}]   ;;  %s14583_s4 = inlined_call_operand.hbm [shape: bf16[4,8,16], index: 4, kind: input, shape index: {}]   ;;  %s14584_s5 = inlined_call_operand.hbm [shape: f32[1,128], index: 5, kind: input, shape index: {}]   ;;  %s14585_s6 = inlined_call_operand.hbm [shape: f32[1,128], index: 6, kind: input, shape index: {}]   ;;  %s14586_s7 = inlined_call_operand.hbm [shape: f32[1,128], index: 7, kind: input, shape index: {}]   ;;  %s14587_s8 = inlined_call_operand.hbm [shape: f32[1,128], index: 8, kind: input, shape index: {}]   ;;  %s14588_s9 = inlined_call_operand.vmem [shape: f32[1,128], index: 9, kind: input, shape index: {}]   ;;  %s14589_s10 = inlined_call_operand.vmem [shape: f32[1,128], index: 10, kind: input, shape index: {}]   ;;  %s14590_s11 = inlined_call_operand.hbm [shape: bf16[128,384], index: 11, kind: input, shape index: {}]   ;;  %s14591_s12 = inlined_call_operand.vmem [shape: f32[1,384], index: 12, kind: input, shape index: {}]   ;;  %s14592_s13 = inlined_call_operand.hbm [shape: bf16[128,128], index: 13, kind: input, shape index: {}]   ;;  %s14593_s14 = inlined_call_operand.vmem [shape: f32[1,128], index: 14, kind: input, shape index: {}]   ;;  %s14594_s15 = inlined_call_operand.hbm [shape: bf16[128,128], index: 15, kind: input, shape index: {}]   ;;  %s14595_s16 = inlined_call_operand.vmem [shape: f32[1,128], index: 16, kind: input, shape index: {}]   ;;  %s14596_s17 = inlined_call_operand.hbm [shape: bf16[128,256], index: 17, kind: input, shape index: {}]   ;;  %s14597_s18 = inlined_call_operand.vmem [shape: f32[1,256], index: 18, kind: input, shape index: {}]   ;;  %s14598_s19 = inlined_call_operand.hbm [shape: bf16[128,128], index: 19, kind: input, shape index: {}]   ;;  %s14599_s20 = inlined_call_operand.vmem [shape: f32[1,128], index: 20, kind: input, shape index: {}]   ;;  %s14600_s21 = inlined_call_operand.hbm [shape: bf16[128,256], index: 21, kind: input, shape index: {}]   ;;  %s14601_s22 = inlined_call_operand.vmem [shape: f32[1,256], index: 22, kind: input, shape index: {}]   ;;  %s14602_s23 = inlined_call_operand.hbm [shape: bf16[256,128], index: 23, kind: input, shape index: {}]   ;;  %s14603_s24 = inlined_call_operand.vmem [shape: f32[1,128], index: 24, kind: input, shape index: {}]   ;;  %s14604_s25 = inlined_call_operand.hbm [shape: f32[2,4,8,128], index: 25, kind: output, shape index: {}]  }
   0x1   :  { %14631 = sst [smem:[#allocation58_spill]] %s14579_s0 }
   0x2   :  { %14632 = sst [smem:[#allocation59_spill]] %s14580_s1 }
   0x3   :  { %14633 = sst [smem:[#allocation60_spill]] %s14581_s2 }
   0x4   :  { %14634 = sst [smem:[#allocation61_spill]] %s14582_s3 }
   0x5   :  { %14635 = sst [smem:[#allocation62_spill]] %s14583_s4 }
   0x6   :  { %14636 = sst [smem:[#allocation63_spill]] %s14584_s5 }
   0x7   :  { %14637 = sst [smem:[#allocation64_spill]] %s14585_s6 }
   0x8   :  { %14638 = sst [smem:[#allocation65_spill]] %s14586_s7 }
   0x9   :  { %14639 = sst [smem:[#allocation66_spill]] %s14587_s8 }
   0xa   :  { %14640 = sst [smem:[#allocation67_spill]] %s14588_s9 }
   0xb   :  { %14641 = sst [smem:[#allocation68_spill]] %s14589_s10 }
   0xc   :  { %14642 = sst [smem:[#allocation69_spill]] %s14590_s11 }
   0xd   :  { %14643 = sst [smem:[#allocation70_spill]] %s14592_s13 }
   0xe   :  { %14644 = sst [smem:[#allocation71_spill]] %s14594_s15 }
   0xf   :  { %14645 = sst [smem:[#allocation72_spill]] %s14595_s16 }
  0x10   :  { %14646 = sst [smem:[#allocation73_spill]] %s14596_s17 }
  0x11   :  { %14647 = sst [smem:[#allocation74_spill]] %s14598_s19 }
  0x12   :  { %14648 = sst [smem:[#allocation75_spill]] %s14599_s20 }
  0x13   :  { %14649 = sst [smem:[#allocation76_spill]] %s14600_s21 }
  0x14   :  { %14650 = sst [smem:[#allocation77_spill]] %s14601_s22 }
  0x15   :  { %14651 = sst [smem:[#allocation78_spill]] %s14602_s23 }
  0x16   :  { %14652 = sst [smem:[#allocation79_spill]] %s14603_s24 }
  0x17   :  { %14653 = sst [smem:[#allocation80_spill]] %s14604_s25 }
  0x18   :  { %30 = vsyncpa [#allocation3], 0 }
  0x19   :  { %32 = vsyncpa [#allocation3 + $0x1], 0 }
  0x1a   :  { %33 = vsyncpa [#allocation6], 0 }
  0x1b   :  { %35 = vsyncpa [#allocation6 + $0x1], 0 }
  0x1c   :  { %36 = vsyncpa [#allocation9], 0 }
  0x1d   :  { %38 = vsyncpa [#allocation9 + $0x1], 0 }
  0x1e   :  { %39 = vsyncpa [#allocation12], 0 }
  0x1f   :  { %40 = vsyncpa [#allocation15], 0 }
  0x20   :  { %41 = vsyncpa [#allocation18], 0 }
  0x21   :  { %42 = vsyncpa [#allocation21], 0 }
  0x22   :  { %43 = vsyncpa [#allocation24], 0 }
  0x23   :  { %44 = vsyncpa [#allocation27], 0 }
  0x24   :  { %45 = vsyncpa [#allocation4], 0 }
  0x25   :  { %47 = vsyncpa [#allocation4 + $0x1], 0  ;;  %s11029_s29 = smov 0   ;;  %s11031_s2 = smov 0  }
  0x26   :  { %s11033_s6 = smov 0   ;;  %s11035_s30 = smov 0  }
  0x27 LB: > { %14654 = sst [smem:[#allocation44_spill]] %s10845_s29  ;;  %s11050_s7 = sadd.s32 4294967295, %s10857_s30   ;;  %s10857_s30 = sphi %s11035_s30, %s14721_s30   ;;  %s10853_s6 = sphi %s11033_s6, %s14725_s6   ;;  %s10849_s2 = sphi %s11031_s2, %s14724_s2   ;;  %s10845_s29 = sphi %s11029_s29, %s14723_s29  }
  0x28   : > { %s9192_s3 = sadd.s32 4294967294, %s10857_s30   ;;  %s11054_s26 = sadd.s32 1, %s10857_s30  }
  0x29   : > { %14655 = sst [smem:[#allocation45_spill]] %s11054_s26  ;;  %s60_s1 = sadd.s32 1, %s10853_s6 }
  0x2a   : > { %s57_s8 = ssub.s32 %s10857_s30, %s11054_s26  ;;  %p67_p0 = scmp.ne.s32.totalorder %s10853_s6, %s10849_s2 }
  0x2b   : > { %p58_p1 = scmp.eq.s32.totalorder %s57_s8, 0  ;;  %p68_p2 = scmp.eq.s32.totalorder %s10857_s30, 0 }
  0x2c   : > { %p73_p3 = scmp.ne.s32.totalorder %s10849_s2, %s10845_s29  ;;  %p74_p4 = scmp.eq.s32.totalorder %s11050_s7, 0 }
  0x2d   : > { %s11066_s27 = scalar_select %p58_p1, %s10853_s6, %s60_s1  }
  0x2e   : > { %p11068_p5 = por %p68_p2, %p67_p0  ;;  %p11074_p6 = por %p74_p4, %p73_p3 }
  0x2f   : > { %14656 = sst [smem:[#allocation46_spill]] %s11066_s27  ;;  %p621_p7 = scmp.eq.s32.totalorder %s11050_s7, 1 }
  0x30   : > { %p627_p8 = scmp.eq.s32.totalorder %s9192_s3, 1  ;;  %p9193_p9 = scmp.ge.s32.totalorder %s10857_s30, 1 }
  0x31   : > { %p634_p10 = scmp.lt.s32.totalorder %s10857_s30, 3  ;;  %p11081_p11 = por %p621_p7, %p67_p0 }
  0x32   : > { %p11085_p12 = por %p627_p8, %p73_p3  ;;  %s14664_s27 = sld [smem:[#allocation63_spill]] }
  0x33   : > { %s14659_s9 = scalar_select %p11081_p11, 1, 0 }
  0x34   : > { %s14661_s5 = scalar_select %p11085_p12, 1, 0 }
  0x35   : > { %14660 = sst [smem:[#allocation47_spill]] %s14659_s9  ;;  %p11089_p13 = pnand %p9193_p9, %p634_p10 }
  0x36   : > { %14662 = sst [smem:[#allocation48_spill]] %s14661_s5  ;;  %s10859_s3 = smov [#allocation11]  }
  0x37   : > { %p9917_p1 = pneg %p11089_p13  ;;  %s648_s29 = sshll.u32 %s10859_s3, 4  ;;  %s649_s29 = int_to_ptr.vmem [resolvable:$true] %s648_s29 }
  0x38   : > { %s646_s26 = sshll.u32 %s14664_s27, 4  ;;  %s14665_s24 = sld [smem:[#allocation65_spill]]  ;;  %s647_s26 = int_to_ptr.hbm [resolvable:$true] %s646_s26 }
  0x39   : > { %p11103_p0 = pnand %p9917_p1, %p74_p4  ;;  %s10860_s27 = smov [#allocation14]  }
  0x3a   : > { %s672_s1 = sshll.u32 %s10860_s27, 4  ;;  %s14667_s11 = sld [smem:[#allocation69_spill]]  ;;  %s673_s1 = int_to_ptr.vmem [resolvable:$true] %s672_s1 }
  0x3b   : > { %9920 = dma.hbm_to_vmem [thread:$0]  (!%p11103_p0), %s647_s26, 16, %s649_s29, [#allocation12]  }
  0x3c   : > { %s10862_s10 = smov 192   ;;  %s10863_s20 = smov 12  }
  0x3d   : > { %s14668_s15 = sld [smem:[#allocation71_spill]]  ;;  %s10864_s26 = smov [#allocation20]  }
  0x3e   : > { %s670_s22 = sshll.u32 %s14665_s24, 4  ;;  %s10861_s24 = smov [#allocation17]   ;;  %s671_s22 = int_to_ptr.hbm [resolvable:$true] %s670_s22 }
  0x3f   : > { %9926 = dma.hbm_to_vmem [thread:$0]  (!%p11103_p0), %s671_s22, 16, %s673_s1, [#allocation15]  }
  0x40   : > { %s699_s25 = sshll.u32 %s14667_s11, 4  ;;  %s701_s9 = sshll.u32 %s10861_s24, 4  ;;  %s700_s25 = int_to_ptr.hbm [resolvable:$true] %s699_s25  ;;  %s702_s9 = int_to_ptr.vmem [resolvable:$true] %s701_s9 }
  0x41   : > { %9932 = dma.hbm_to_vmem [thread:$0]  (!%p11103_p0), %s700_s25, 3072, %s702_s9, [#allocation18], %s10862_s10, %s10862_s10, %s10863_s20  }
  0x42   : > { %s735_s8 = sshll.u32 %s10864_s26, 4  ;;  %s14669_s19 = sld [smem:[#allocation74_spill]]  ;;  %s736_s8 = int_to_ptr.vmem [resolvable:$true] %s735_s8 }
  0x43   : > { %s733_s29 = sshll.u32 %s14668_s15, 4  ;;  %s10865_s24 = smov 64   ;;  %s734_s29 = int_to_ptr.hbm [resolvable:$true] %s733_s29 }
  0x44   : > { %s10866_s11 = smov 4   ;;  %s10867_s10 = smov [#allocation23]  }
  0x45   : > { %9938 = dma.hbm_to_vmem [thread:$0]  (!%p11103_p0), %s734_s29, 1024, %s736_s8, [#allocation21], %s10865_s24, %s10865_s24, %s10866_s11  }
  0x46   : > { %s769_s16 = sshll.u32 %s10867_s10, 4  ;;  %s14670_s9 = sld [smem:[#allocation64_spill]]  ;;  %s770_s16 = int_to_ptr.vmem [resolvable:$true] %s769_s16 }
  0x47   : > { %s14671_s22 = sld [smem:[#allocation66_spill]]  ;;  %s10868_s29 = smov [#allocation13]  }
  0x48   : > { %s767_s1 = sshll.u32 %s14669_s19, 4  ;;  %s660_s8 = sshll.u32 %s10868_s29, 4  ;;  %s768_s1 = int_to_ptr.hbm [resolvable:$true] %s767_s1  ;;  %s661_s8 = int_to_ptr.vmem [resolvable:$true] %s660_s8 }
  0x49   : > { %9944 = dma.hbm_to_vmem [thread:$0]  (!%p11103_p0), %s768_s1, 1024, %s770_s16, [#allocation24], %s10865_s24, %s10865_s24, %s10866_s11  }
  0x4a   : > { %s10869_s10 = smov [#allocation16]   ;;  %s14672_s13 = sld [smem:[#allocation70_spill]] }
  0x4b   : > { %s684_s20 = sshll.u32 %s10869_s10, 4  ;;  %s14673_s17 = sld [smem:[#allocation73_spill]]  ;;  %s685_s20 = int_to_ptr.vmem [resolvable:$true] %s684_s20 }
  0x4c   : > { %s658_s27 = sshll.u32 %s14670_s9, 4  ;;  %s10870_s3 = smov [#allocation19]   ;;  %s659_s27 = int_to_ptr.hbm [resolvable:$true] %s658_s27 }
  0x4d   : > { %s682_s15 = sshll.u32 %s14671_s22, 4  ;;  %s718_s22 = sshll.u32 %s10870_s3, 4  ;;  %s683_s15 = int_to_ptr.hbm [resolvable:$true] %s682_s15  ;;  %s719_s22 = int_to_ptr.vmem [resolvable:$true] %s718_s22 }
  0x4e   : > { %9923 = dma.hbm_to_vmem [thread:$0]  (!%p11103_p0), %s659_s27, 16, %s661_s8, [#allocation12]  }
  0x4f   : > { %9929 = dma.hbm_to_vmem [thread:$0]  (!%p11103_p0), %s683_s15, 16, %s685_s20, [#allocation15]  }
  0x50   : > { %s716_s19 = sshll.u32 %s14672_s13, 4  ;;  %s10871_s27 = smov [#allocation22]   ;;  %s717_s19 = int_to_ptr.hbm [resolvable:$true] %s716_s19 }
  0x51   : > { %s750_s26 = sshll.u32 %s14673_s17, 4  ;;  %s752_s29 = sshll.u32 %s10871_s27, 4  ;;  %s751_s26 = int_to_ptr.hbm [resolvable:$true] %s750_s26  ;;  %s753_s29 = int_to_ptr.vmem [resolvable:$true] %s752_s29 }
  0x52   : > { %9935 = dma.hbm_to_vmem [thread:$0]  (!%p11103_p0), %s717_s19, 1024, %s719_s22, [#allocation18], %s10865_s24, %s10865_s24, %s10866_s11  }
  0x53   : > { %s10872_s8 = smov 128   ;;  %s10873_s15 = smov 8  }
  0x54   : > { %9941 = dma.hbm_to_vmem [thread:$0]  (!%p11103_p0), %s751_s26, 2048, %s753_s29, [#allocation21], %s10872_s8, %s10872_s8, %s10873_s15  }
  0x55   : > { %s14674_s21 = sld [smem:[#allocation76_spill]]  ;;  %s10874_s9 = smov [#allocation25]  }
  0x56   : > { %s786_s1 = sshll.u32 %s10874_s9, 4  ;;  %s14675_s23 = sld [smem:[#allocation78_spill]]  ;;  %s787_s1 = int_to_ptr.vmem [resolvable:$true] %s786_s1 }
  0x57   : > { %s10875_s22 = smov [#allocation26]   ;;  %p9205_p2 = scmp.ge.s32.totalorder %s10857_s30, 2 }
  0x58   : > { %s803_s27 = sshll.u32 %s10875_s22, 4  ;;  %s804_s27 = int_to_ptr.vmem [resolvable:$true] %s803_s27 }
  0x5a   : > { %816 = sbr.rel (%p9205_p2) target bundleno = 193 (0xc1), region = 96 }
  0x5b   : > { %s784_s25 = sshll.u32 %s14674_s21, 4  ;;  %s785_s25 = int_to_ptr.hbm [resolvable:$true] %s784_s25 }
  0x5c   : > { %s801_s19 = sshll.u32 %s14675_s23, 4  ;;  %s802_s19 = int_to_ptr.hbm [resolvable:$true] %s801_s19 }
  0x5d   : > { %9947 = dma.hbm_to_vmem [thread:$0]  (!%p11103_p0), %s785_s25, 2048, %s787_s1, [#allocation24], %s10872_s8, %s10872_s8, %s10873_s15  }
  0x5e   : > { %9950 = dma.hbm_to_vmem [thread:$0]  (!%p11103_p0), %s802_s19, 2048, %s804_s27, [#allocation27], %s10865_s24, %s10865_s24, %s10866_s11  }
  0x5f   : > { %s11172_s26 = sand.u32 1, %s10853_s6   ;;  %s9733_s5 = sshll.u32 %s10857_s30, 4 }
  0x60   : > { %s14616_s29 = sshll.u32 %s11172_s26, 5  ;;  %s14676_s11 = sld [smem:[#allocation58_spill]] }
  0x61   : > { %s9870_s10 = scalar_select %p11068_p5, [#allocation0], [#allocation33] }
  0x62   : > { %s824_s25 = scalar_lea.vmem [#allocation2], %s14616_s29  ;;  %s10876_s16 = smov 512  }
  0x63   : > { %s844_s9 = sshll.u32 %s824_s25, 4  ;;  %s834_s1 = sld [smem:[%s9870_s10]]   ;;  %s845_s9 = int_to_ptr.vmem [resolvable:$true] %s844_s9 }
  0x64   : > { %9871 = sst [smem:[#allocation30]] (%p11068_p5), %s10876_s16  ;;  %s10877_s3 = smov 256  }
  0x65   : > { %9872 = sst [smem:[#allocation30 + $0x1]] (%p11068_p5), %s10877_s3  ;;  %s10878_s19 = smov 2  }
  0x66   : > { %s829_s24 = scalar_lea.hbm %s14676_s11, %s9733_s5  ;;  %9873 = sst [smem:[#allocation30 + $0x2]] (%p11068_p5), %s10878_s19 }
  0x67   : > { %s842_s20 = sshll.u32 %s829_s24, 4  ;;  %s10879_s22 = smov 128   ;;  %s843_s20 = int_to_ptr.hbm [resolvable:$true] %s842_s20 }
  0x68   : > { %9874 = sst [smem:[#allocation30 + $0x3]] (%p11068_p5), %s10879_s22  ;;  %s10880_s8 = smov 8  }
  0x69   : > { %s9209_s27 = sshll.u32 %s834_s1, 26  ;;  %9875 = sst [smem:[#allocation30 + $0x4]] (%p11068_p5), %s10879_s22 }
  0x6a   : > { %s9210_s5 = sadd.s32 134217728, %s9209_s27  ;;  %9876 = sst [smem:[#allocation30 + $0x5]] (%p11068_p5), %s10880_s8 }
  0x6b   : > { %s821_s15 = scalar_lea.sflag [#allocation3], %s11172_s26  ;;  %s10881_s11 = smov [#allocation29]  }
  0x6c   : > { %9877 = dma.general (%p11068_p5), %s843_s20, 512, %s845_s9, %s821_s15, %s10881_s11, [#allocation30], %s9210_s5, 0  }
  0x6d   : > { %s14617_s24 = sand.u32 1, %s10857_s30   ;;  %s11200_s10 = sshll.u32 %s11172_s26, 3 }
  0x6e   : > { %s11203_s25 = sshll.u32 %s10857_s30, 3  ;;  %s871_s1 = scalar_lea.vmem [#allocation5], %s11200_s10 }
  0x6f   : > { %s879_s16 = sshll.u32 %s871_s1, 4  ;;  %s14677_s22 = sld [smem:[#allocation59_spill]]  ;;  %s880_s16 = int_to_ptr.vmem [resolvable:$true] %s879_s16 }
  0x70   : > { %s11212_s9 = scalar_lea.sflag [#allocation6], %s14617_s24 }
  0x75   : > { %s876_s27 = scalar_lea.hbm %s14677_s22, %s11203_s25  ;;  %s10681_s1 = scalar_lea.hbm %s14677_s22, 16 }
  0x76   : > { %s877_s20 = sshll.u32 %s876_s27, 4  ;;  %s878_s20 = int_to_ptr.hbm [resolvable:$true] %s877_s20 }
  0x77   : > { %s10675_s5 = sshra.s32 %s878_s20, 4  ;;  %s10676_s5 = int_to_ptr.hbm [resolvable:$true] %s10675_s5 }
  0x78   : > { %s10677_s8 = scalar_lea.hbm %s10676_s5, 8  ;;  %p10682_p9 = scmp.lt.s32.totalorder %s10676_s5, %s14677_s22 }
  0x79   : > { %p10678_p3 = scmp.ne.s32.totalorder %s10676_s5, %s10677_s8  ;;  %p10683_p10 = scmp.lt.s32.totalorder %s10681_s1, %s10677_s8 }
  0x7b   : > { %p10679_p7 = pnand %p10678_p3, %p11068_p5  ;;  %p10684_p1 = por %p10683_p10, %p10682_p9 }
  0x7d   : > { %p10680_p8 = pneg %p10679_p7 }
  0x7f   : > { %p10685_p0 = pnand %p10684_p1, %p10680_p8 }
  0x81   : > { %10688 = shalt.err (!%p10685_p0)
}
  0x82   : > { %s14619_s19 = smov 64   ;;  %s10883_s27 = smov 4  }
  0x83   : > { %9878 = dma.hbm_to_vmem [thread:$0]  (%p11068_p5), %s878_s20, 128, %s880_s16, %s11212_s9, %s14619_s19, %s14619_s19, %s10883_s27  }
  0x84   : > { %s9737_s15 = sshll.u32 %s10857_s30, 5  ;;  %s14678_s29 = sshll.u32 %s11172_s26, 5 }
  0x85   : > { %s915_s5 = scalar_lea.vmem [#allocation8], %s14678_s29  ;;  %s14679_s3 = sld [smem:[#allocation61_spill]] }
  0x86   : > { %s924_s8 = sshll.u32 %s915_s5, 4  ;;  %s14680_s17 = sand.u32 1, %s10857_s30   ;;  %s925_s8 = int_to_ptr.vmem [resolvable:$true] %s924_s8 }
  0x87   : > { %s11236_s21 = scalar_lea.sflag [#allocation9], %s14680_s17 }
  0x8b   : > { %s921_s24 = scalar_lea.hbm %s14679_s3, %s9737_s15  ;;  %s10709_s20 = scalar_lea.hbm %s14679_s3, 64 }
  0x8c   : > { %s922_s13 = sshll.u32 %s921_s24, 4  ;;  %s923_s13 = int_to_ptr.hbm [resolvable:$true] %s922_s13 }
  0x8d   : > { %s10703_s22 = sshra.s32 %s923_s13, 4  ;;  %s10704_s22 = int_to_ptr.hbm [resolvable:$true] %s10703_s22 }
  0x8e   : > { %s10705_s23 = scalar_lea.hbm %s10704_s22, 32  ;;  %p10710_p9 = scmp.lt.s32.totalorder %s10704_s22, %s14679_s3 }
  0x8f   : > { %p10706_p3 = scmp.ne.s32.totalorder %s10704_s22, %s10705_s23  ;;  %p10711_p10 = scmp.lt.s32.totalorder %s10709_s20, %s10705_s23 }
  0x91   : > { %p10707_p7 = pnand %p10706_p3, %p11068_p5  ;;  %p10712_p1 = por %p10711_p10, %p10710_p9 }
  0x93   : > { %p10708_p8 = pneg %p10707_p7 }
  0x95   : > { %p10713_p0 = pnand %p10712_p1, %p10708_p8 }
  0x97   : > { %10716 = shalt.err (!%p10713_p0)
}
  0x98   : > { %s10884_s17 = smov 128   ;;  %s10885_s24 = smov 8  }
  0x99   : > { %9880 = dma.hbm_to_vmem [thread:$0]  (%p11068_p5), %s923_s13, 512, %s925_s8, %s11236_s21, %s10884_s17, %s10884_s17, %s10885_s24  }
  0x9a   : > { %s14681_s1 = sld [smem:[#allocation60_spill]]  ;;  %s893_s29 = scalar_lea.vmem [#allocation7], %s11200_s10 }
  0x9b   : > { %s901_s22 = sshll.u32 %s893_s29, 4  ;;  %s902_s22 = int_to_ptr.vmem [resolvable:$true] %s901_s22 }
  0xa0   : > { %s898_s26 = scalar_lea.hbm %s14681_s1, %s11203_s25  ;;  %s10737_s13 = scalar_lea.hbm %s14681_s1, 16 }
  0xa1   : > { %s899_s16 = sshll.u32 %s898_s26, 4  ;;  %s900_s16 = int_to_ptr.hbm [resolvable:$true] %s899_s16 }
  0xa2   : > { %s10731_s23 = sshra.s32 %s900_s16, 4  ;;  %s10732_s23 = int_to_ptr.hbm [resolvable:$true] %s10731_s23 }
  0xa3   : > { %s10733_s20 = scalar_lea.hbm %s10732_s23, 8  ;;  %p10738_p9 = scmp.lt.s32.totalorder %s10732_s23, %s14681_s1 }
  0xa4   : > { %p10734_p3 = scmp.ne.s32.totalorder %s10732_s23, %s10733_s20  ;;  %p10739_p10 = scmp.lt.s32.totalorder %s10737_s13, %s10733_s20 }
  0xa6   : > { %p10735_p7 = pnand %p10734_p3, %p11068_p5  ;;  %p10740_p1 = por %p10739_p10, %p10738_p9 }
  0xa8   : > { %p10736_p8 = pneg %p10735_p7 }
  0xaa   : > { %p10741_p0 = pnand %p10740_p1, %p10736_p8 }
  0xac   : > { %10744 = shalt.err (!%p10741_p0)
}
  0xad   : > { %s14682_s24 = smov 64   ;;  %s14683_s11 = sld [smem:[#allocation62_spill]] }
  0xae   : > { %9879 = dma.hbm_to_vmem [thread:$0]  (%p11068_p5), %s900_s16, 128, %s902_s22, %s11212_s9, %s14682_s24, %s14682_s24, %s10883_s27  }
  0xaf   : > { %s938_s23 = scalar_lea.vmem [#allocation10], %s11200_s10 }
  0xb0   : > { %s946_s20 = sshll.u32 %s938_s23, 4  ;;  %s947_s20 = int_to_ptr.vmem [resolvable:$true] %s946_s20 }
  0xb3   : > { %s943_s26 = scalar_lea.hbm %s14683_s11, %s11203_s25  ;;  %s10765_s9 = scalar_lea.hbm %s14683_s11, 16 }
  0xb4   : > { %s944_s29 = sshll.u32 %s943_s26, 4  ;;  %s945_s29 = int_to_ptr.hbm [resolvable:$true] %s944_s29 }
  0xb5   : > { %s10759_s5 = sshra.s32 %s945_s29, 4  ;;  %s10760_s5 = int_to_ptr.hbm [resolvable:$true] %s10759_s5 }
  0xb6   : > { %s10761_s13 = scalar_lea.hbm %s10760_s5, 8  ;;  %p10766_p9 = scmp.lt.s32.totalorder %s10760_s5, %s14683_s11 }
  0xb7   : > { %p10762_p3 = scmp.ne.s32.totalorder %s10760_s5, %s10761_s13  ;;  %p10767_p10 = scmp.lt.s32.totalorder %s10765_s9, %s10761_s13 }
  0xb9   : > { %p10763_p7 = pnand %p10762_p3, %p11068_p5  ;;  %p10768_p1 = por %p10767_p10, %p10766_p9 }
  0xbb   : > { %p10764_p8 = pneg %p10763_p7 }
  0xbd   : > { %p10769_p0 = pnand %p10768_p1, %p10764_p8 }
  0xbf   : > { %10772 = shalt.err (!%p10769_p0)
}
  0xc0   : > { %9881 = dma.hbm_to_vmem [thread:$0]  (%p11068_p5), %s945_s29, 128, %s947_s20, %s11236_s21, %s14682_s24, %s14682_s24, %s10883_s27  }
  0xc1 PF: > { %958 = sbr.rel (%p11089_p13) target bundleno = 4402 (0x1132), region = 120 }
  0xc6   : > { %s11290_s10 = sand.u32 1, %s10849_s2  }
  0xc7   : > { %s11293_s25 = sshll.u32 %s11290_s10, 5  ;;  %s961_s19 = scalar_lea.sflag [#allocation3], %s11290_s10 }
  0xc8   : > { %s11297_s4 = scalar_lea.vmem [#allocation2], %s11293_s25 }
  0xc9   : > { %10804 = dma.done.wait (%p11074_p6), %s961_s19, 512  }
  0xca   : > { %10806 = vsyncadd (%p11074_p6), %s961_s19, 4294966784  ;;  %s970_s21 = sand.u32 1, %s11050_s7   ;;  %s11305_s0 = sshll.u32 %s11290_s10, 3 }
  0xcb   : > { %s971_s27 = scalar_lea.sflag [#allocation6], %s970_s21  ;;  %s974_s24 = scalar_lea.vmem [#allocation5], %s11305_s0 }
  0xcc   : > { %10808 = dma.done.wait (%p11074_p6), %s971_s27, 256  }
  0xcd   : > { %10810 = vsyncadd (%p11074_p6), %s971_s27, 4294967040  ;;  %s984_s15 = scalar_lea.vmem [#allocation7], %s11305_s0  ;;  %s991_s26 = scalar_lea.sflag [#allocation9], %s970_s21 }
  0xce   : > { %s11314_s29 = scalar_lea.vmem [#allocation8], %s11293_s25 }
  0xcf   : > { %10812 = dma.done.wait (%p11074_p6), %s991_s26, 640  }
  0xd0   : > { %10814 = vsyncadd (%p11074_p6), %s991_s26, 4294966656  ;;  %s1004_s23 = scalar_lea.vmem [#allocation10], %s11305_s0 }
  0xd1   : > { %10816 = dma.done.wait (%p74_p4), [#allocation12], 32  }
  0xd2   : > { %10818 = vsyncadd (%p74_p4), [#allocation12], 4294967264 }
  0xd3   : > { %10820 = dma.done.wait (%p74_p4), [#allocation15], 32  }
  0xd4   : > { %10822 = vsyncadd (%p74_p4), [#allocation15], 4294967264 }
  0xd5   : > { %10824 = dma.done.wait (%p74_p4), [#allocation18], 4096  }
  0xd6   : > { %10826 = vsyncadd (%p74_p4), [#allocation18], 4294963200 }
  0xd7   : > { %10828 = dma.done.wait (%p74_p4), [#allocation21], 3072  }
  0xd8   : > { %10830 = vsyncadd (%p74_p4), [#allocation21], 4294964224 }
  0xd9   : > { %10832 = dma.done.wait (%p74_p4), [#allocation24], 3072  }
  0xda   : > { %10834 = vsyncadd (%p74_p4), [#allocation24], 4294964224 }
  0xdb   : > { %10836 = dma.done.wait (%p74_p4), [#allocation27], 2048  }
  0xdc   : > { %10838 = vsyncadd (%p74_p4), [#allocation27], 4294965248  ;;  %v1180_v0 = vld [vmem:[%s11297_s4 + $0x10] sm:$0xff]  ;;  %v1178_v1 = vld [vmem:[%s11297_s4] sm:$0xff]  ;;  %v10886_v4 = vmov 128.0   ;;  %s10887_s5 = smov 32  }
  0xdd   : > { %1188 = vadd.xlane.f32.xlu2 %v1180_v0  ;;  %1184 = vadd.xlane.f32.xlu0 %v1178_v1  ;;  %v1179_v2 = vld [vmem:[%s11297_s4 + $0x8] sm:$0xff]  ;;  %v1181_v3 = vld [vmem:[%s11297_s4 + $0x18] sm:$0xff]  ;;  %10120 = vrcp.f32 %v10886_v4  ;;  %v9334_v27 = vld [vmem:[#allocation17 + $0xa8] sm:$0xf]  ;;  %s10888_s13 = smov 64   ;;  %s10889_s8 = smov 96  }
  0xde   : > { %v9761_v28 = vld [vmem:[#allocation17 + $0xb0] sm:$0xf0]  ;;  %v9760_v29 = vld [vmem:[#allocation17 + $0xac] sm:$0xf]  ;;  %v9336_v31 = vld [vmem:[#allocation17 + $0xb4] sm:$0xf0] }
  0xdf   : > { %v9335_v30 = vor.u32 %v9761_v28, %v9334_v27  ;;  %v9342_v32 = vld [vmem:[#allocation17 + $0xb0] sm:$0xf]  ;;  %v9762_v33 = vld [vmem:[#allocation17 + $0xb8] sm:$0xf0]  ;;  %v9339_v34 = vor.u32 %v9760_v29, %v9336_v31  ;;  %v9757_v38 = vld [vmem:[#allocation17 + $0x94] sm:$0xf] }
  0xe0   : > { %v9343_v35 = vor.u32 %v9762_v33, %v9342_v32  ;;  %v9322_v36 = vld [vmem:[#allocation17 + $0x90] sm:$0xf]  ;;  %v9758_v37 = vld [vmem:[#allocation17 + $0x98] sm:$0xf0]  ;;  %v9324_v40 = vld [vmem:[#allocation17 + $0x9c] sm:$0xf0] }
  0xe1   : > { %1455 = vmatpush.bf16.msra.mxu0 %v9335_v30  ;;  %1474 = vmatpush.bf16.msra.mxu1 %v9339_v34  ;;  %v9323_v39 = vor.u32 %v9758_v37, %v9322_v36  ;;  %v9330_v41 = vld [vmem:[#allocation17 + $0x98] sm:$0xf]  ;;  %v9759_v42 = vld [vmem:[#allocation17 + $0xa0] sm:$0xf0]  ;;  %v9327_v43 = vor.u32 %v9757_v38, %v9324_v40  ;;  %v9754_v47 = vld [vmem:[#allocation17 + $0x7c] sm:$0xf] }
  0xe2   : > { %1493 = vmatpush.bf16.msra.mxu2 %v9343_v35  ;;  %v9331_v44 = vor.u32 %v9759_v42, %v9330_v41  ;;  %v9310_v45 = vld [vmem:[#allocation17 + $0x78] sm:$0xf]  ;;  %v9755_v46 = vld [vmem:[#allocation17 + $0x80] sm:$0xf0]  ;;  %v9312_v49 = vld [vmem:[#allocation17 + $0x84] sm:$0xf0] }
  0xe3   : > { %v10121_v5 = vpop.eup %10120  ;;  %v9311_v48 = vor.u32 %v9755_v46, %v9310_v45  ;;  %v9318_v50 = vld [vmem:[#allocation17 + $0x80] sm:$0xf]  ;;  %v9756_v51 = vld [vmem:[#allocation17 + $0x88] sm:$0xf0]  ;;  %v9315_v52 = vor.u32 %v9754_v47, %v9312_v49  ;;  %v9751_v56 = vld [vmem:[#allocation17 + $0x64] sm:$0xf] }
  0xe4   : > { %v1193_v6 = vmul.f32 128.0, %v10121_v5  ;;  %vm1197_vm0 = vweird.f32 %v10121_v5  ;;  %v9319_v53 = vor.u32 %v9756_v51, %v9318_v50  ;;  %v9298_v54 = vld [vmem:[#allocation17 + $0x60] sm:$0xf]  ;;  %v9752_v55 = vld [vmem:[#allocation17 + $0x68] sm:$0xf0]  ;;  %vm1603_vm13 = vcmask 1047556  }
  0xe5   : > { %1186 = vadd.xlane.f32.xlu0 %v1179_v2  ;;  %1190 = vadd.xlane.f32.xlu2 %v1181_v3  ;;  %v9299_v57 = vor.u32 %v9752_v55, %v9298_v54  ;;  %v9300_v58 = vld [vmem:[#allocation17 + $0x6c] sm:$0xf0]  ;;  %v9306_v59 = vld [vmem:[#allocation17 + $0x68] sm:$0xf]  ;;  %v9753_v60 = vld [vmem:[#allocation17 + $0x70] sm:$0xf0] }
  0xe6   : > { %v1194_v7 = vsub.f32 1.0, %v1193_v6  ;;  %1456 = vmatpush.bf16.msra.mxu0 %v9323_v39  ;;  %1475 = vmatpush.bf16.msra.mxu1 %v9327_v43  ;;  %v9303_v61 = vor.u32 %v9751_v56, %v9300_v58  ;;  %v9307_v62 = vor.u32 %v9753_v60, %v9306_v59  ;;  %v9286_v63 = vld [vmem:[#allocation17 + $0x48] sm:$0xf]  ;;  %v9294_v4 = vld [vmem:[#allocation17 + $0x50] sm:$0xf]  ;;  %vm3041_vm14 = vcmask 261120  }
  0xe7   : > { %1494 = vmatpush.bf16.msra.mxu2 %v9331_v44  ;;  %v9270_v27 = vld [vmem:[#allocation17 + $0x20] sm:$0xf]  ;;  %v9744_v28 = vld [vmem:[#allocation17 + $0x28] sm:$0xf0]  ;;  %v9739_v36 = vld [vmem:[#allocation17 + $0x4] sm:$0xf] }
  0xe8   : > { %v1195_v8 = vmul.f32 %v10121_v5, %v1194_v7  ;;  %v9271_v32 = vor.u32 %v9744_v28, %v9270_v27  ;;  %v9250_v34 = vld [vmem:[#allocation17] sm:$0xf]  ;;  %v9740_v35 = vld [vmem:[#allocation17 + $0x8] sm:$0xf0]  ;;  %v9252_v40 = vld [vmem:[#allocation17 + $0xc] sm:$0xf0] }
  0xe9   : > { %v9251_v39 = vor.u32 %v9740_v35, %v9250_v34  ;;  %v9255_v41 = vor.u32 %v9739_v36, %v9252_v40  ;;  %v9258_v42 = vld [vmem:[#allocation17 + $0x8] sm:$0xf]  ;;  %v9741_v43 = vld [vmem:[#allocation17 + $0x10] sm:$0xf0]  ;;  %vm4054_vm15 = vcmask 1043456   ;;  %s14709_s21 = sld [smem:[#allocation72_spill]] }
  0xea   : > { %v1196_v9 = vadd.f32 %v10121_v5, %v1195_v8  ;;  %1457 = vmatpush.bf16.msra.mxu0 %v9311_v48  ;;  %1476 = vmatpush.bf16.msra.mxu1 %v9315_v52  ;;  %v9274_v8 = vld [vmem:[#allocation17 + $0x30] sm:$0xf]  ;;  %v9259_v44 = vor.u32 %v9741_v43, %v9258_v42  ;;  %v1319_v35 = vld [vmem:[%s14591_s12] sm:$0x7]  ;;  %s14712_s26 = sld [smem:[#allocation75_spill]] }
  0xeb   : > { %1495 = vmatpush.bf16.msra.mxu2 %v9319_v53  ;;  %v1322_v36 = vperm.slane %v1319_v35, 1  ;;  %v1321_v40 = vperm.slane %v1319_v35, 0  ;;  %s14713_s28 = sld [smem:[#allocation67_spill]] }
  0xec   : > { %v11349_v10 = vsel %vm1197_vm0, %v10121_v5, %v1196_v9  ;;  %v9750_v5 = vld [vmem:[#allocation17 + $0x58] sm:$0xf0]  ;;  %vm3666_vm0 = vcmask 64512   ;;  %s14715_s9 = sld [smem:[#allocation77_spill]] }
  0xed   : > { %14684 = vst [vmem:[#allocation49_spill] sm:$0xff] %v11349_v10  ;;  %v9295_v7 = vor.u32 %v9750_v5, %v9294_v4  ;;  %v9746_v9 = vld [vmem:[#allocation17 + $0x38] sm:$0xf0]  ;;  %v10110_v5 = vld [vmem:[#allocation11] ss:$0 sm:$0xff]  ;;  %s14716_s19 = sld [smem:[#allocation79_spill]] }
  0xee   : > { %1458 = vmatpush.bf16.msra.mxu0 %v9299_v57  ;;  %1477 = vmatpush.bf16.msra.mxu1 %v9303_v61 }
  0xef   : > { %1496 = vmatpush.bf16.msra.mxu2 %v9307_v62 }
  0xf3   : > { %1497 = vmatpush.bf16.msra.mxu2 %v9295_v7 }
 0x150   : > { %v1189_v11 = vpop.xlane.xlu2 %1188  ;;  %v1185_v12 = vpop.xlane.xlu0 %1184 }
 0x151   : > { %v1201_v13 = vmul.f32 %v11349_v10, %v1189_v11  ;;  %v1199_v14 = vmul.f32 %v11349_v10, %v1185_v12  ;;  %v9745_v11 = vld [vmem:[#allocation17 + $0x34] sm:$0xf]  ;;  %v9275_v12 = vor.u32 %v9746_v9, %v9274_v8 }
 0x153   : > { %v11353_v15 = vsub.f32 %v1180_v0, %v1201_v13  ;;  %v11355_v16 = vsub.f32 %v1178_v1, %v1199_v14  ;;  %v9749_v0 = vld [vmem:[#allocation17 + $0x50] sm:$0xf0]  ;;  %v9748_v1 = vld [vmem:[#allocation17 + $0x4c] sm:$0xf]  ;;  %v9276_v13 = vld [vmem:[#allocation17 + $0x3c] sm:$0xf0] }
 0x154   : > { %v9282_v14 = vld [vmem:[#allocation17 + $0x38] sm:$0xf] }
 0x155   : > { %v1209_v17 = vmul.f32 %v11353_v15, %v11353_v15  ;;  %v1207_v18 = vmul.f32 %v11355_v16, %v11355_v16 }
 0x157   : > { %1215 = vadd.xlane.f32.xlu0 %v1209_v17  ;;  %1211 = vadd.xlane.f32.xlu1 %v1207_v18  ;;  %v9747_v17 = vld [vmem:[#allocation17 + $0x40] sm:$0xf0]  ;;  %v9279_v18 = vor.u32 %v9745_v11, %v9276_v13 }
 0x158   : > { %v1187_v19 = vpop.xlane.xlu0 %1186  ;;  %v1191_v20 = vpop.xlane.xlu2 %1190 }
 0x159   : > { %v1200_v21 = vmul.f32 %v11349_v10, %v1187_v19  ;;  %v1202_v23 = vmul.f32 %v11349_v10, %v1191_v20  ;;  %v9283_v19 = vor.u32 %v9747_v17, %v9282_v14  ;;  %v9262_v20 = vld [vmem:[#allocation17 + $0x18] sm:$0xf] }
 0x15a   : > { %v10111_v14 = vld [vmem:[#allocation13] ss:$0 sm:$0xff] }
 0x15b   : > { %v11362_v22 = vsub.f32 %v1179_v2, %v1200_v21  ;;  %v11367_v25 = vsub.f32 %v1181_v3, %v1202_v23  ;;  %v9287_v2 = vor.u32 %v9749_v0, %v9286_v63  ;;  %v9288_v3 = vld [vmem:[#allocation17 + $0x54] sm:$0xf0]  ;;  %1498 = vmatpush.bf16.msra.mxu2 %v9283_v19  ;;  %v9743_v21 = vld [vmem:[#allocation17 + $0x20] sm:$0xf0]  ;;  %v9742_v23 = vld [vmem:[#allocation17 + $0x1c] sm:$0xf] }
 0x15c   : > { %v9291_v6 = vor.u32 %v9748_v1, %v9288_v3 }
 0x15d   : > { %v1208_v24 = vmul.f32 %v11362_v22, %v11362_v22  ;;  %v1210_v26 = vmul.f32 %v11367_v25, %v11367_v25  ;;  %1459 = vmatpush.bf16.msra.mxu0 %v9287_v2 }
 0x15e   : > { %1478 = vmatpush.bf16.msra.mxu1 %v9291_v6 }
 0x15f   : > { %1213 = vadd.xlane.f32.xlu1 %v1208_v24  ;;  %v9263_v24 = vor.u32 %v9743_v21, %v9262_v20  ;;  %1499 = vmatpush.bf16.msra.mxu2 %v9271_v32 }
 0x161   : > { %1460 = vmatpush.bf16.msra.mxu0 %v9275_v12 }
 0x162   : > { %1479 = vmatpush.bf16.msra.mxu1 %v9279_v18 }
 0x163   : > { %1500 = vmatpush.bf16.msra.mxu2 %v9259_v44 }
 0x165   : > { %1461 = vmatpush.bf16.msra.mxu0 %v9263_v24 }
 0x167   : > { %1217 = vadd.xlane.f32.xlu1 %v1210_v26  ;;  %v9264_v26 = vld [vmem:[#allocation17 + $0x24] sm:$0xf0] }
 0x168   : > { %v9267_v31 = vor.u32 %v9742_v23, %v9264_v26 }
 0x169   : > { %1462 = vmatpush.bf16.msra.mxu0 %v9251_v39 }
 0x16a   : > { %1480 = vmatpush.bf16.msra.mxu1 %v9267_v31 }
 0x16e   : > { %1481 = vmatpush.bf16.msra.mxu1 %v9255_v41 }
 0x1ca   : > { %v1212_v29 = vpop.xlane.xlu1 %1211  ;;  %v1216_v30 = vpop.xlane.xlu0 %1215 }
 0x1cb   : > { %v1219_v33 = vmul.f32 %v1212_v29, %v11349_v10  ;;  %v1221_v38 = vmul.f32 %v1216_v30, %v11349_v10 }
 0x1cd   : > { %v1223_v37 = vadd.f32 1e-12, %v1219_v33  ;;  %v1225_v45 = vadd.f32 1e-12, %v1221_v38 }
 0x1cf   : > { %10122 = vrsqrt.f32 %v1223_v37  ;;  %vm1233_vm2 = vweird.f32 %v1223_v37  ;;  %vm1253_vm9 = vweird.f32 %v1225_v45 }
 0x1d0   : > { %10124 = vrsqrt.f32 %v1225_v45 }
 0x1d2   : > { %v1214_v46 = vpop.xlane.xlu1 %1213 }
 0x1d3   : > { %v1220_v47 = vmul.f32 %v1214_v46, %v11349_v10 }
 0x1d5   : > { %v10123_v48 = vpop.eup %10122  ;;  %v1224_v49 = vadd.f32 1e-12, %v1220_v47 }
 0x1d6   : > { %v1228_v50 = vmul.f32 %v10123_v48, %v1223_v37  ;;  %v10125_v54 = vpop.eup %10124  ;;  %vm1234_vm1 = vweird.f32 %v10123_v48 }
 0x1d7   : > { %10126 = vrsqrt.f32 %v1224_v49  ;;  %v1248_v60 = vmul.f32 %v10125_v54, %v1225_v45  ;;  %vm1235_vm3 = vmor %vm1233_vm2, %vm1234_vm1  ;;  %vm1243_vm5 = vweird.f32 %v1224_v49  ;;  %vm1254_vm10 = vweird.f32 %v10125_v54 }
 0x1d8   : > { %v1229_v51 = vmul.f32 %v10123_v48, %v1228_v50  ;;  %vm1255_vm12 = vmor %vm1253_vm9, %vm1254_vm10  ;;  %vm5153_vm1 = vcmask 523264   ;;  %vm5158_vm2 = vcmask 785408  }
 0x1d9   : > { %v1249_v0 = vmul.f32 %v10125_v54, %v1248_v60 }
 0x1da   : > { %v1230_v52 = vmul.f32 0.5, %v1229_v51  ;;  %v1218_v53 = vpop.xlane.xlu1 %1217 }
 0x1db   : > { %v1222_v55 = vmul.f32 %v1218_v53, %v11349_v10  ;;  %v1250_v6 = vmul.f32 0.5, %v1249_v0 }
 0x1dc   : > { %v1231_v56 = vsub.f32 1.5, %v1230_v52 }
 0x1dd   : > { %v10127_v57 = vpop.eup %10126  ;;  %v1226_v58 = vadd.f32 1e-12, %v1222_v55  ;;  %v1251_v17 = vsub.f32 1.5, %v1250_v6 }
 0x1de   : > { %v1232_v59 = vmul.f32 %v10123_v48, %v1231_v56  ;;  %v1238_v61 = vmul.f32 %v10127_v57, %v1224_v49  ;;  %vm1244_vm4 = vweird.f32 %v10127_v57 }
 0x1df   : > { %10128 = vrsqrt.f32 %v1226_v58  ;;  %vm1245_vm6 = vmor %vm1243_vm5, %vm1244_vm4  ;;  %vm1263_vm7 = vweird.f32 %v1226_v58  ;;  %v1252_v23 = vmul.f32 %v10125_v54, %v1251_v17 }
 0x1e0   : > { %v1239_v62 = vmul.f32 %v10127_v57, %v1238_v61  ;;  %v1236_v63 = vsel %vm1235_vm3, %v10123_v48, %v1232_v59 }
 0x1e1   : > { %v1267_v4 = vmul.f32 %v1236_v63, %v11355_v16  ;;  %v11436_v63 = vperm.slane %v1319_v35, 2 }
 0x1e2   : > { %v1240_v1 = vmul.f32 0.5, %v1239_v62 }
 0x1e3   : > { %v1274_v13 = vmul.f32 %v10110_v5, %v1267_v4  ;;  %14686 = vst [vmem:[#allocation51_spill] sm:$0xff] %v11436_v63 }
 0x1e4   : > { %v1241_v2 = vsub.f32 1.5, %v1240_v1 }
 0x1e5   : > { %v10129_v3 = vpop.eup %10128  ;;  %v1281_v20 = vadd.f32 %v10111_v14, %v1274_v13 }
 0x1e6   : > { %v1242_v7 = vmul.f32 %v10127_v57, %v1241_v2  ;;  %v1258_v8 = vmul.f32 %v10129_v3, %v1226_v58  ;;  %vm1264_vm8 = vweird.f32 %v10129_v3 }
 0x1e7   : > { %vm1265_vm11 = vmor %vm1263_vm7, %vm1264_vm8 }
 0x1e8   : > { %v1246_v9 = vsel %vm1245_vm6, %v10127_v57, %v1242_v7  ;;  %v1259_v11 = vmul.f32 %v10129_v3, %v1258_v8 }
 0x1e9   : > { %v1268_v12 = vmul.f32 %v1246_v9, %v11362_v22  ;;  %v1256_v22 = vsel %vm1255_vm12, %v10125_v54, %v1252_v23  ;;  %v10890_v9 = vmov 1983009808  }
 0x1ea   : > { %v1260_v18 = vmul.f32 0.5, %v1259_v11  ;;  %v1269_v29 = vmul.f32 %v1256_v22, %v11353_v15  ;;  %v1594_v11 = vunpack.c.l.s4 %v10890_v9 }
 0x1eb   : > { %v1275_v19 = vmul.f32 %v10110_v5, %v1268_v12 }
 0x1ec   : > { %v1261_v16 = vsub.f32 1.5, %v1260_v18  ;;  %v1276_v31 = vmul.f32 %v10110_v5, %v1269_v29  ;;  %v11473_v12 = vunpack.c.0.s8 %v1594_v11 }
 0x1ed   : > { %v1282_v21 = vadd.f32 %v10111_v14, %v1275_v19  ;;  %v10891_v19 = vmov 1934713408  }
 0x1ee   : > { %v1262_v24 = vmul.f32 %v10129_v3, %v1261_v16  ;;  %v1283_v33 = vadd.f32 %v10111_v14, %v1276_v31  ;;  %v1608_v16 = vunpack.c.l.s4 %v10891_v19 }
 0x1ef   : > { %v1317_v26 = vpack.c.bf16 %v1282_v21, %v1281_v20 }
 0x1f0   : > { %v1266_v27 = vsel %vm1265_vm11, %v10129_v3, %v1262_v24  ;;  %v11478_v29 = vunpack.c.0.s8 %v1608_v16 }
 0x1f1   : > { %1463 = vmatmul.bf16.vlgmr.msra.gmra.mxu0 %v1317_v26  ;;  %1482 = vmatmul.bf16.vlgmr.msra.gmra.mxu1 %v1317_v26  ;;  %v1270_v28 = vmul.f32 %v1266_v27, %v11367_v25 }
 0x1f2   : > { %1501 = vmatmul.bf16.vlgmr.msra.gmra.mxu2 %v1317_v26 }
 0x1f3   : > { %v1277_v30 = vmul.f32 %v10110_v5, %v1270_v28 }
 0x1f5   : > { %v1284_v32 = vadd.f32 %v10111_v14, %v1277_v30 }
 0x1f7   : > { %v1318_v34 = vpack.c.bf16 %v1284_v32, %v1283_v33 }
 0x201   : > { %1468 = vmatmul.bf16.gmra.mxu0 %v1318_v34  ;;  %1487 = vmatmul.bf16.gmra.mxu1 %v1318_v34 }
 0x202   : > { %1506 = vmatmul.bf16.gmra.mxu2 %v1318_v34 }
 0x26e   : > { %v1483_v37 = vpop.f32.mrf.mxu1  ;;  %v1464_v39 = vpop.f32.mrf.mxu0 }
 0x26f   : > { %v1484_v38 = vadd.f32 %v1483_v37, %v1322_v36  ;;  %v1465_v15 = vadd.f32 %v1464_v39, %v1321_v40 }
 0x271   : > { %v11382_v25 = vpack.c.bf16 %v1484_v38, %v1484_v38  ;;  %v11390_v43 = vpack.c.bf16 %v1465_v15, %v1465_v15 }
 0x273   : > { %2025 = vrot.lane.b32.xlu1 %v11382_v25, %s10887_s5  ;;  %2017 = vrot.lane.b32.xlu0 %v11382_v25, %s10888_s13  ;;  %v2036_v23 = vshrl.u32 %v11382_v25, 16 }
 0x274   : > { %2009 = vrot.lane.b32.xlu2 %v11382_v25, %s10889_s8 }
 0x275   : > { %v1502_v53 = vpop.f32.mrf.mxu2 }
 0x276   : > { %v1485_v41 = vpop.f32.mrf.mxu1  ;;  %v1466_v45 = vpop.f32.mrf.mxu0  ;;  %v1503_v5 = vadd.f32 %v1502_v53, %v11436_v63 }
 0x277   : > { %v1486_v42 = vadd.f32 %v1485_v41, %v1322_v36  ;;  %v1467_v46 = vadd.f32 %v1466_v45, %v1321_v40  ;;  %v1547_v41 = vshrl.u32 %v11390_v43, 16 }
 0x278   : > { %v11465_v6 = vpack.c.bf16 %v1503_v5, %v1503_v5 }
 0x279   : > { %v11392_v44 = vpack.c.bf16 %v1486_v42, %v1486_v42  ;;  %v11400_v48 = vpack.c.bf16 %v1467_v46, %v1467_v46 }
 0x27a   : > { %14687 = vst [vmem:[#allocation52_spill] sm:$0xff] %v11465_v6 }
 0x27b   : > { %2011 = vrot.lane.b32.xlu1 %v11392_v44, %s10889_s8  ;;  %1528 = vrot.lane.b32.xlu0 %v11390_v43, %s10888_s13 }
 0x27c   : > { %1520 = vrot.lane.b32.xlu2 %v11390_v43, %s10889_s8 }
 0x27d   : > { %v11424_v57 = vpop.f32.mrf.mxu2 }
 0x27e   : > { %v1488_v47 = vpop.f32.mrf.mxu1  ;;  %v1469_v54 = vpop.f32.mrf.mxu0  ;;  %14685 = vst [vmem:[#allocation50_spill] sm:$0xff] %v11424_v57 }
 0x27f   : > { %v1489_v49 = vadd.f32 %v1488_v47, %v1322_v36  ;;  %v1470_v56 = vadd.f32 %v1469_v54, %v1321_v40 }
 0x281   : > { %v11408_v50 = vpack.c.bf16 %v1489_v49, %v1489_v49  ;;  %v11426_v58 = vpack.c.bf16 %v1470_v56, %v1470_v56 }
 0x283   : > { %1522 = vrot.lane.b32.xlu1 %v11400_v48, %s10889_s8  ;;  %2019 = vrot.lane.b32.xlu0 %v11392_v44, %s10888_s13 }
 0x284   : > { %1536 = vrot.lane.b32.xlu2 %v11390_v43, %s10887_s5 }
 0x285   : > { %v1507_v62 = vpop.f32.mrf.mxu2 }
 0x286   : > { %v1490_v51 = vpop.f32.mrf.mxu1  ;;  %v1471_v59 = vpop.f32.mrf.mxu0  ;;  %v1508_v0 = vadd.f32 %v1507_v62, %v11436_v63 }
 0x287   : > { %v1491_v52 = vadd.f32 %v1490_v51, %v1322_v36  ;;  %v1472_v60 = vadd.f32 %v1471_v59, %v1321_v40 }
 0x288   : > { %v11445_v1 = vpack.c.bf16 %v1508_v0, %v1508_v0 }
 0x289   : > { %v11416_v55 = vpack.c.bf16 %v1491_v52, %v1491_v52  ;;  %v11434_v61 = vpack.c.bf16 %v1472_v60, %v1472_v60 }
 0x28b   : > { %1530 = vrot.lane.b32.xlu0 %v11400_v48, %s10888_s13  ;;  %2013 = vrot.lane.b32.xlu1 %v11408_v50, %s10889_s8 }
 0x28c   : > { %2027 = vrot.lane.b32.xlu2 %v11392_v44, %s10887_s5 }
 0x28d   : > { %v1509_v2 = vpop.f32.mrf.mxu2 }
 0x28e   : > { %v1510_v3 = vadd.f32 %v1509_v2, %v11436_v63 }
 0x290   : > { %v11458_v4 = vpack.c.bf16 %v1510_v3, %v1510_v3 }
 0x293   : > { %2015 = vrot.lane.b32.xlu0 %v11416_v55, %s10889_s8  ;;  %2023 = vrot.lane.b32.xlu1 %v11416_v55, %s10888_s13 }
 0x294   : > { %1538 = vrot.lane.b32.xlu2 %v11400_v48, %s10887_s5 }
 0x29b   : > { %2029 = vrot.lane.b32.xlu0 %v11408_v50, %s10887_s5  ;;  %1524 = vrot.lane.b32.xlu1 %v11426_v58, %s10889_s8 }
 0x29c   : > { %2021 = vrot.lane.b32.xlu2 %v11408_v50, %s10888_s13 }
 0x2a3   : > { %1532 = vrot.lane.b32.xlu0 %v11426_v58, %s10888_s13  ;;  %1526 = vrot.lane.b32.xlu1 %v11434_v61, %s10889_s8 }
 0x2a4   : > { %2031 = vrot.lane.b32.xlu2 %v11416_v55, %s10887_s5 }
 0x2ab   : > { %1534 = vrot.lane.b32.xlu0 %v11434_v61, %s10888_s13  ;;  %2509 = vrot.lane.b32.xlu1 %v11445_v1, %s10888_s13 }
 0x2ac   : > { %1540 = vrot.lane.b32.xlu2 %v11426_v58, %s10887_s5 }
 0x2b3   : > { %2501 = vrot.lane.b32.xlu0 %v11445_v1, %s10889_s8 }
 0x2b4   : > { %1542 = vrot.lane.b32.xlu2 %v11434_v61, %s10887_s5 }
 0x2bb   : > { %2511 = vrot.lane.b32.xlu0 %v11458_v4, %s10888_s13 }
 0x2bc   : > { %2517 = vrot.lane.b32.xlu2 %v11445_v1, %s10887_s5 }
 0x2c3   : > { %2519 = vrot.lane.b32.xlu0 %v11458_v4, %s10887_s5 }
 0x2c4   : > { %2497 = vrot.lane.b32.xlu2 %v11465_v6, %s10889_s8 }
 0x2cc   : > { %2503 = vrot.lane.b32.xlu2 %v11458_v4, %s10889_s8 }
 0x2ce   : > { %v2010_v7 = vpop.permute.xlu2 %2009 }
 0x2cf   : > { %v2035_v13 = vpack.i.b16 %v2010_v7, %v11382_v25  ;;  %v2037_v17 = vshrl.u32 %v2010_v7, 16 }
 0x2d1   : > { %v2085_v18 = vperm.slane %v2035_v13, %v11473_v12  ;;  %v2038_v22 = vpack.i.b16 %v2037_v17, %v2036_v23  ;;  %v2048_v13 = vshrl.u32 %v11392_v44, 16 }
 0x2d3   : > { %v2093_v28 = vrot.slane %v2085_v18, 4  ;;  %v2111_v35 = vperm.slane %v2038_v22, %v11473_v12 }
 0x2d5   : > { %v2119_v42 = vrot.slane %v2111_v35, 4 }
 0x2d6   : > { %v1521_v8 = vpop.permute.xlu2 %1520 }
 0x2d7   : > { %v1546_v36 = vpack.i.b16 %v1521_v8, %v11390_v43  ;;  %v1548_v40 = vshrl.u32 %v1521_v8, 16 }
 0x2d9   : > { %v1596_v45 = vperm.slane %v1546_v36, %v11473_v12  ;;  %v1549_v52 = vpack.i.b16 %v1548_v40, %v1547_v41 }
 0x2db   : > { %v1605_v60 = vrot.slane %v1596_v45, 4  ;;  %v1623_v5 = vperm.slane %v1549_v52, %v11473_v12 }
 0x2de   : > { %v1537_v14 = vpop.permute.xlu2 %1536 }
 0x2df   : > { %v1554_v53 = vshrl.u32 %v1537_v14, 16 }
 0x2e5   : > { %v2026_v20 = vpop.permute.xlu1 %2025  ;;  %v2018_v21 = vpop.permute.xlu0 %2017 }
 0x2e6   : > { %v2043_v24 = vshrl.u32 %v2026_v20, 16  ;;  %v2041_v26 = vpack.i.b16 %v2026_v20, %v2018_v21  ;;  %v2042_v27 = vshrl.u32 %v2018_v21, 16  ;;  %v11482_v34 = vpop.permute.xlu2 %2027 }
 0x2e7   : > { %v2055_v52 = vshrl.u32 %v11482_v34, 16 }
 0x2e8   : > { %v2090_v30 = vperm.slane %v2041_v26, %v11473_v12  ;;  %v2044_v31 = vpack.i.b16 %v2043_v24, %v2042_v27  ;;  %v2060_v24 = vshrl.u32 %v11408_v50, 16  ;;  %v1571_v26 = vshrl.u32 %v11426_v58, 16 }
 0x2e9   : > { %v1631_v27 = vrot.slane %v1623_v5, 4 }
 0x2ea   : > { %v2091_v32 = vrot.slane %v2090_v30, 4  ;;  %v2094_v33 = vsel %vm1603_vm13, %v2090_v30, %v2093_v28  ;;  %v2116_v25 = vperm.slane %v2044_v31, %v11473_v12  ;;  %v2072_v30 = vshrl.u32 %v11416_v55, 16 }
 0x2eb   : > { %v2102_v37 = vperm.slane %v2094_v33, %v11478_v29  ;;  %v1583_v33 = vshrl.u32 %v11434_v61, 16 }
 0x2ec   : > { %v2092_v38 = vsel %vm1603_vm13, %v2091_v32, %v2085_v18  ;;  %v2120_v54 = vsel %vm1603_vm13, %v2116_v25, %v2119_v42  ;;  %v2117_v59 = vrot.slane %v2116_v25, 4 }
 0x2ed   : > { %v1529_v39 = vpop.permute.xlu0 %1528  ;;  %v11492_v46 = vperm.slane %v2092_v38, %v11478_v29  ;;  %v11494_v47 = vrot.slane %v2102_v37, 4  ;;  %v2012_v49 = vpop.permute.xlu1 %2011  ;;  %v2128_v2 = vperm.slane %v2120_v54, %v11478_v29 }
 0x2ee   : > { %v1552_v15 = vpack.i.b16 %v1537_v14, %v1529_v39  ;;  %v1553_v51 = vshrl.u32 %v1529_v39, 16  ;;  %v11502_v3 = vpop.permute.xlu2 %1538  ;;  %v2118_v9 = vsel %vm1603_vm13, %v2117_v59, %v2111_v35  ;;  %v1559_v14 = vshrl.u32 %v11400_v48, 16 }
 0x2ef   : > { %v2103_v43 = vrot.slane %v11492_v46, 4  ;;  %v2106_v62 = vsel %vm1603_vm13, 0, %v11494_v47  ;;  %v2047_v17 = vpack.i.b16 %v2012_v49, %v11392_v44  ;;  %v2049_v18 = vshrl.u32 %v2012_v49, 16 }
 0x2f0   : > { %v1601_v56 = vperm.slane %v1552_v15, %v11473_v12  ;;  %v1555_v0 = vpack.i.b16 %v1554_v53, %v1553_v51  ;;  %v2294_v11 = vrot.slane %v2106_v62, 4  ;;  %v11512_v21 = vrot.slane %v2128_v2, 4 }
 0x2f1   : > { %v2104_v20 = vsel %vm1603_vm13, 0, %v2103_v43  ;;  %v2124_v22 = vperm.slane %v2118_v9, %v11478_v29  ;;  %v2050_v36 = vpack.i.b16 %v2049_v18, %v2048_v13  ;;  %v2137_v37 = vperm.slane %v2047_v17, %v11473_v12 }
 0x2f2   : > { %v1602_v7 = vrot.slane %v1601_v56, 4  ;;  %v1606_v8 = vsel %vm1603_vm13, %v1601_v56, %v1605_v60  ;;  %v1628_v19 = vperm.slane %v1555_v0, %v11473_v12  ;;  %v2295_v32 = vsel %vm1603_vm13, %v2294_v11, %v2104_v20 }
 0x2f3   : > { %v1614_v23 = vperm.slane %v1606_v8, %v11478_v29  ;;  %v2132_v40 = vsel %vm1603_vm13, 0, %v11512_v21  ;;  %v2129_v42 = vrot.slane %v2124_v22, 4  ;;  %v2299_v51 = vperm.slane %v2295_v32, %v11473_v12 }
 0x2f4   : > { %v1604_v28 = vsel %vm1603_vm13, %v1602_v7, %v1596_v45  ;;  %v1632_v38 = vsel %vm1603_vm13, %v1628_v19, %v1631_v27  ;;  %v1629_v45 = vrot.slane %v1628_v19, 4  ;;  %v2313_v60 = vrot.slane %v2132_v40, 4 }
 0x2f5   : > { %v2020_v16 = vpop.permute.xlu0 %2019  ;;  %v1523_v44 = vpop.permute.xlu1 %1522  ;;  %v11530_v25 = vperm.slane %v1604_v28, %v11478_v29  ;;  %v11532_v15 = vrot.slane %v1614_v23, 4  ;;  %v1640_v53 = vperm.slane %v1632_v38, %v11478_v29  ;;  %v1566_v43 = vshrl.u32 %v11502_v3, 16 }
 0x2f6   : > { %v2053_v31 = vpack.i.b16 %v11482_v34, %v2020_v16  ;;  %v2054_v41 = vshrl.u32 %v2020_v16, 16  ;;  %v1560_v49 = vshrl.u32 %v1523_v44, 16  ;;  %v1558_v54 = vpack.i.b16 %v1523_v44, %v11400_v48  ;;  %v11538_v56 = vpop.permute.xlu2 %2021 }
 0x2f7   : > { %v2145_v62 = vrot.slane %v2137_v37, 4  ;;  %v2163_v0 = vperm.slane %v2050_v36, %v11473_v12  ;;  %v1615_v2 = vrot.slane %v11530_v25, 4  ;;  %v11546_v7 = vsel %vm1603_vm13, 0, %v11532_v15 }
 0x2f8   : > { %v2142_v59 = vperm.slane %v2053_v31, %v11473_v12  ;;  %v2056_v34 = vpack.i.b16 %v2055_v52, %v2054_v41  ;;  %v2289_v48 = vsel %vm1603_vm13, %v11494_v47, %v11492_v46  ;;  %v1630_v8 = vsel %vm1603_vm13, %v1629_v45, %v1623_v5 }
 0x2f9   : > { %v1561_v9 = vpack.i.b16 %v1560_v49, %v1559_v14  ;;  %v2130_v13 = vsel %vm1603_vm13, 0, %v2129_v42  ;;  %v2300_v17 = vrot.slane %v2299_v51, 4  ;;  %v11553_v18 = vrot.slane %v1640_v53, 4 }
 0x2fa   : > { %v1649_v19 = vperm.slane %v1558_v54, %v11473_v12  ;;  %v2143_v16 = vrot.slane %v2142_v59, 4  ;;  %v2146_v20 = vsel %vm1603_vm13, %v2142_v59, %v2145_v62  ;;  %v2171_v23 = vrot.slane %v2163_v0, 4 }
 0x2fb   : > { %v1806_v27 = vrot.slane %v11546_v7, 4  ;;  %v2066_v28 = vshrl.u32 %v11538_v56, 16  ;;  %v2293_v47 = vperm.slane %v2289_v48, %v11473_v12  ;;  %v11561_v5 = vsel %vm1603_vm13, 0, %v1615_v2 }
 0x2fc   : > { %v11564_v14 = vperm.slane %v1630_v8, %v11478_v29  ;;  %v2168_v44 = vperm.slane %v2056_v34, %v11473_v12  ;;  %v11569_v32 = vperm.slane %v1561_v9, %v11473_v12  ;;  %v2154_v36 = vperm.slane %v2146_v20, %v11478_v29 }
 0x2fd   : > { %v1531_v11 = vpop.permute.xlu0 %1530  ;;  %v2014_v46 = vpop.permute.xlu1 %2013  ;;  %v2301_v38 = vsel %vm1603_vm13, %v2300_v17, %v2293_v47  ;;  %v2314_v40 = vsel %vm1603_vm13, %v2313_v60, %v2130_v13  ;;  %v11576_v41 = vsel %vm1603_vm13, 0, %v11553_v18  ;;  %v1657_v42 = vrot.slane %v1649_v19, 4 }
 0x2fe   : > { %v1564_v31 = vpack.i.b16 %v11502_v3, %v1531_v11  ;;  %v2144_v45 = vsel %vm1603_vm13, %v2143_v16, %v2137_v37  ;;  %v1565_v49 = vshrl.u32 %v1531_v11, 16  ;;  %v2061_v51 = vshrl.u32 %v2014_v46, 16  ;;  %v2032_v60 = vpop.permute.xlu2 %2031 }
 0x2ff   : > { %v2305_v3 = vperm.slane %v2301_v38, %v11478_v29  ;;  %v2308_v52 = vsel %vm1603_vm13, %v11512_v21, %v2124_v22  ;;  %v2318_v53 = vperm.slane %v2314_v40, %v11473_v12  ;;  %v2169_v54 = vrot.slane %v2168_v44, 4 }
 0x300   : > { %v2172_v59 = vsel %vm1603_vm13, %v2168_v44, %v2171_v23  ;;  %v2059_v62 = vpack.i.b16 %v2014_v46, %v11408_v50  ;;  %v1654_v2 = vperm.slane %v1564_v31, %v11473_v12  ;;  %v1641_v34 = vrot.slane %v11564_v14, 4 }
 0x301   : > { %v1683_v37 = vrot.slane %v11569_v32, 4  ;;  %v11589_v48 = vperm.slane %v2144_v45, %v11478_v29  ;;  %v11591_v8 = vrot.slane %v2154_v36, 4  ;;  %v1567_v21 = vpack.i.b16 %v1566_v43, %v1565_v49 }
 0x302   : > { %v2312_v22 = vperm.slane %v2308_v52, %v11473_v12  ;;  %v2319_v9 = vrot.slane %v2318_v53, 4  ;;  %v2306_v11 = vrot.slane %v2305_v3, 4  ;;  %v1825_v13 = vrot.slane %v11576_v41, 4 }
 0x303   : > { %v2180_v17 = vperm.slane %v2172_v59, %v11478_v29  ;;  %v2079_v16 = vshrl.u32 %v2032_v60, 16  ;;  %v2062_v20 = vpack.i.b16 %v2061_v51, %v2060_v24  ;;  %v2170_v46 = vsel %vm1603_vm13, %v2169_v54, %v2163_v0 }
 0x304   : > { %v11600_v47 = vperm.slane %v2059_v62, %v11473_v12  ;;  %v1655_v44 = vrot.slane %v1654_v2, 4  ;;  %v2320_v43 = vsel %vm1603_vm13, %v2319_v9, %v2312_v22  ;;  %v2155_v31 = vrot.slane %v11589_v48, 4 }
 0x305   : > { %v2016_v23 = vpop.permute.xlu0 %2015  ;;  %v1658_v36 = vsel %vm1603_vm13, %v1654_v2, %v1657_v42  ;;  %v2324_v38 = vperm.slane %v2320_v43, %v11478_v29  ;;  %v2307_v40 = vsel %vm1603_vm13, 0, %v2306_v11  ;;  %v2024_v45 = vpop.permute.xlu1 %2023  ;;  %v11609_v50 = vsel %vm1603_vm13, 0, %v11591_v8 }
 0x306   : > { %v1680_v24 = vperm.slane %v1567_v21, %v11473_v12  ;;  %v2071_v0 = vpack.i.b16 %v2016_v23, %v11416_v55  ;;  %v2444_v51 = vshrl.u32 %v2305_v3, 16  ;;  %v1656_v42 = vsel %vm1603_vm13, %v1655_v44, %v1649_v19 }
 0x307   : > { %v11613_v49 = vpack.i.b16 %v2324_v38, %v2305_v3  ;;  %v2445_v52 = vshrl.u32 %v2324_v38, 16  ;;  %v2325_v53 = vrot.slane %v2324_v38, 4  ;;  %v1666_v54 = vperm.slane %v1658_v36, %v11478_v29 }
 0x308   : > { %v2450_v59 = vshrl.u32 %v2307_v40, 16  ;;  %v2077_v62 = vpack.i.b16 %v2032_v60, %v2024_v45  ;;  %v2078_v9 = vshrl.u32 %v2024_v45, 16  ;;  %v2073_v43 = vshrl.u32 %v2016_v23, 16 }
 0x309   : > { %v3046_v2 = vsel %vm3041_vm14, %v11613_v49, 0  ;;  %v11619_v22 = vpack.i.b16 %v2445_v52, %v2444_v51  ;;  %v2326_v21 = vsel %vm1603_vm13, 0, %v2325_v53  ;;  %v2241_v38 = vperm.slane %v2071_v0, %v11473_v12 }
 0x30a   : > { %3055 = vmatpush.bf16.xpose.msra.mxu3 %v3046_v2  ;;  %v11622_v11 = vpack.i.b16 %v2326_v21, %v2307_v40  ;;  %v2451_v3 = vshrl.u32 %v2326_v21, 16  ;;  %v11626_v19 = vperm.slane %v2170_v46, %v11478_v29  ;;  %v11628_v44 = vrot.slane %v2180_v17, 4 }
 0x30b   : > { %v1681_v60 = vrot.slane %v1680_v24, 4  ;;  %v3122_v36 = vsel %vm3041_vm14, %v11619_v22, 0  ;;  %v1662_v51 = vperm.slane %v1656_v42, %v11478_v29  ;;  %v1684_v45 = vsel %vm1603_vm13, %v1680_v24, %v1683_v37 }
 0x30c   : > { %3131 = vmatpush.bf16.xpose.msrb.mxu1 %v3122_v36  ;;  %v3198_v40 = vsel %vm3041_vm14, %v11622_v11, 0  ;;  %v11636_v23 = vpack.i.b16 %v2451_v3, %v2450_v59  ;;  %v2332_v0 = vrot.slane %v11609_v50, 4  ;;  %v1669_v46 = vrot.slane %v1666_v54, 4 }
 0x30d   : > { %3207 = vmatpush.bf16.xpose.msrb.mxu0 %v3198_v40  ;;  %v2080_v17 = vpack.i.b16 %v2079_v16, %v2078_v9  ;;  %v2246_v52 = vperm.slane %v2077_v62, %v11473_v12  ;;  %v2197_v53 = vrot.slane %v11600_v47, 4  ;;  %v2074_v37 = vpack.i.b16 %v2073_v43, %v2072_v30 }
 0x30e   : > { %v3274_v42 = vsel %vm3041_vm14, %v11636_v23, 0  ;;  %v2249_v24 = vrot.slane %v2241_v38, 4  ;;  %v11647_v59 = vsel %vm1603_vm13, 0, %v11628_v44  ;;  %v11650_v2 = vperm.slane %v2062_v20, %v11473_v12 }
 0x30f   : > { %v1682_v16 = vsel %vm1603_vm13, %v1681_v60, %v11569_v32  ;;  %v1692_v54 = vperm.slane %v1684_v45, %v11478_v29  ;;  %v1667_v62 = vrot.slane %v1662_v51, 4  ;;  %v1642_v55 = vsel %vm1603_vm13, 0, %v1641_v34 }
 0x310   : > { %v1801_v30 = vsel %vm1603_vm13, %v11532_v15, %v11530_v25  ;;  %v1807_v20 = vsel %vm1603_vm13, %v1806_v27, %v11561_v5  ;;  %v1670_v21 = vsel %vm1603_vm13, 0, %v1669_v46  ;;  %v2247_v32 = vrot.slane %v2246_v52, 4 }
 0x311   : > { %v2272_v9 = vperm.slane %v2080_v17, %v11473_v12  ;;  %v1811_v3 = vperm.slane %v1807_v20, %v11473_v12  ;;  %v1688_v43 = vperm.slane %v1682_v16, %v11478_v29  ;;  %v11670_v34 = vsel %vm1603_vm13, %v1669_v46, %v1662_v51 }
 0x312   : > { %v2250_v60 = vsel %vm1603_vm13, %v2246_v52, %v2249_v24  ;;  %v2267_v25 = vperm.slane %v2074_v37, %v11473_v12  ;;  %v1805_v15 = vperm.slane %v1801_v30, %v11473_v12  ;;  %v1820_v27 = vsel %vm1603_vm13, %v11553_v18, %v11564_v14 }
 0x313   : > { %v1812_v7 = vrot.slane %v1811_v3, 4  ;;  %v1826_v5 = vsel %vm1603_vm13, %v1825_v13, %v1642_v55  ;;  %v1668_v36 = vsel %vm1603_vm13, 0, %v1667_v62  ;;  %v1695_v45 = vrot.slane %v1692_v54, 4  ;;  %v11704_v3 = vpop.permute.xlu2 %1540 }
 0x314   : > { %v1844_v51 = vrot.slane %v1670_v21, 4  ;;  %v1830_v40 = vperm.slane %v1826_v5, %v11473_v12  ;;  %v2273_v46 = vrot.slane %v2272_v9, 4  ;;  %v2248_v17 = vsel %vm1603_vm13, %v2247_v32, %v2241_v38  ;;  %v1525_v38 = vpop.permute.xlu1 %1524  ;;  %v2030_v21 = vpop.permute.xlu0 %2029 }
 0x315   : > { %3283 = vmatpush.bf16.xpose.msra.mxu0 %v3274_v42  ;;  %v2258_v52 = vperm.slane %v2250_v60, %v11478_v29  ;;  %v1813_v42 = vsel %vm1603_vm13, %v1812_v7, %v1805_v15  ;;  %v2275_v37 = vrot.slane %v2267_v25, 4  ;;  %v1824_v14 = vperm.slane %v1820_v27, %v11473_v12 }
 0x316   : > { %v1817_v18 = vperm.slane %v1813_v42, %v11478_v29  ;;  %v1831_v41 = vrot.slane %v1830_v40, 4  ;;  %v2181_v13 = vrot.slane %v11626_v19, 4  ;;  %v2351_v24 = vrot.slane %v11647_v59, 4 }
 0x317   : > { %v2223_v16 = vrot.slane %v11650_v2, 4  ;;  %v1843_v54 = vperm.slane %v11670_v34, %v11473_v12  ;;  %v1693_v62 = vrot.slane %v1688_v43, 4  ;;  %v11694_v55 = vsel %vm1603_vm13, 0, %v1695_v45 }
 0x318   : > { %v2254_v30 = vperm.slane %v2248_v17, %v11478_v29  ;;  %v1832_v20 = vsel %vm1603_vm13, %v1831_v41, %v1824_v14  ;;  %v11699_v32 = vsel %vm1603_vm13, %v1844_v51, %v1668_v36  ;;  %v11702_v59 = vsel %vm1603_vm13, %v1695_v45, %v1688_v43 }
 0x319   : > { %v1836_v60 = vperm.slane %v1832_v20, %v11478_v29  ;;  %v1818_v15 = vrot.slane %v1817_v18, 4  ;;  %v2261_v7 = vrot.slane %v2258_v52, 4  ;;  %v2274_v27 = vsel %vm1603_vm13, %v2273_v46, %v2267_v25 }
 0x31a   : > { %v2276_v5 = vsel %vm1603_vm13, %v2272_v9, %v2275_v37  ;;  %v1572_v40 = vshrl.u32 %v1525_v38, 16  ;;  %v1956_v42 = vshrl.u32 %v1817_v18, 16  ;;  %v1863_v51 = vrot.slane %v11694_v55, 4 }
 0x31b   : > { %v11709_v17 = vpack.i.b16 %v1836_v60, %v1817_v18  ;;  %v1957_v14 = vshrl.u32 %v1836_v60, 16  ;;  %v1837_v36 = vrot.slane %v1836_v60, 4  ;;  %v2259_v43 = vrot.slane %v2254_v30, 4 }
 0x31c   : > { %v2065_v45 = vpack.i.b16 %v2030_v21, %v11538_v56  ;;  %v2067_v41 = vshrl.u32 %v2030_v21, 16  ;;  %v11714_v20 = vperm.slane %v2274_v27, %v11478_v29  ;;  %v11721_v9 = vsel %vm1603_vm13, 0, %v1818_v15 }
 0x31d   : > { %9344 = vmatmul.msk.bf16.vlgmr.msra.gmra.mxu3 %vm3041_vm14, %v11709_v17  ;;  %v11718_v25 = vpack.i.b16 %v1957_v14, %v1956_v42  ;;  %v11724_v46 = vsel %vm1603_vm13, 0, %v1837_v36  ;;  %v11727_v52 = vsel %vm1603_vm13, 0, %v1693_v62  ;;  %v11730_v37 = vsel %vm1603_vm13, 0, %v2261_v7 }
 0x31e   : > { %v2284_v18 = vperm.slane %v2276_v5, %v11478_v29  ;;  %v11735_v21 = vpack.i.b16 %v11724_v46, %v11721_v9  ;;  %v1578_v60 = vshrl.u32 %v11704_v3, 16  ;;  %v1570_v15 = vpack.i.b16 %v1525_v38, %v11426_v58 }
 0x31f   : > { %9348 = vmatmul.msk.bf16.vlgmr.msrb.gmra.mxu1 %vm3041_vm14, %v11718_v25  ;;  %v1573_v62 = vpack.i.b16 %v1572_v40, %v1571_v26  ;;  %v2156_v27 = vsel %vm1603_vm13, 0, %v2155_v31  ;;  %v2068_v42 = vpack.i.b16 %v2067_v41, %v2066_v28  ;;  %v2194_v14 = vperm.slane %v2065_v45, %v11473_v12  ;;  %v11770_v45 = vpop.permute.xlu2 %1542 }
 0x320   : > { %9352 = vmatmul.msk.bf16.vlgmr.msrb.gmra.mxu0 %vm3041_vm14, %v11735_v21  ;;  %v2182_v36 = vsel %vm1603_vm13, 0, %v2181_v13  ;;  %v11754_v38 = vsel %vm1603_vm13, 0, %v2259_v43  ;;  %v2285_v58 = vrot.slane %v11714_v20, 4  ;;  %v11758_v26 = vsel %vm1603_vm13, %v2261_v7, %v2254_v30  ;;  %v1533_v43 = vpop.permute.xlu0 %1532 }
 0x321   : > { %v11761_v40 = vrot.slane %v2284_v18, 4  ;;  %v2327_v56 = vsel %vm1603_vm13, %v11591_v8, %v11589_v48  ;;  %v2333_v28 = vsel %vm1603_vm13, %v2332_v0, %v2156_v27  ;;  %v2352_v13 = vsel %vm1603_vm13, %v2351_v24, %v2182_v36 }
 0x322   : > { %v11773_v30 = vperm.slane %v1570_v15, %v11473_v12  ;;  %v11776_v7 = vperm.slane %v1573_v62, %v11473_v12  ;;  %v2337_v41 = vperm.slane %v2333_v28, %v11473_v12  ;;  %v2346_v48 = vsel %vm1603_vm13, %v11628_v44, %v11626_v19 }
 0x323   : > { %v2195_v8 = vrot.slane %v2194_v14, 4  ;;  %v2198_v50 = vsel %vm1603_vm13, %v2194_v14, %v2197_v53  ;;  %v2220_v0 = vperm.slane %v2068_v42, %v11473_v12  ;;  %v2356_v24 = vperm.slane %v2352_v13, %v11473_v12 }
 0x324   : > { %v2331_v18 = vperm.slane %v2327_v56, %v11473_v12  ;;  %v2338_v15 = vrot.slane %v2337_v41, 4  ;;  %v1576_v62 = vpack.i.b16 %v11704_v3, %v1533_v43  ;;  %v1577_v27 = vshrl.u32 %v1533_v43, 16 }
 0x325   : > { %v11791_v36 = vsel %vm1603_vm13, 0, %v11761_v40  ;;  %v1590_v19 = vshrl.u32 %v11770_v45, 16  ;;  %v2350_v44 = vperm.slane %v2346_v48, %v11473_v12  ;;  %v2357_v28 = vrot.slane %v2356_v24, 4 }
 0x326   : > { %v1709_v53 = vrot.slane %v11773_v30, 4  ;;  %v2206_v42 = vperm.slane %v2198_v50, %v11478_v29  ;;  %v2339_v14 = vsel %vm1603_vm13, %v2338_v15, %v2331_v18  ;;  %v1579_v56 = vpack.i.b16 %v1578_v60, %v1577_v27 }
 0x327   : > { %v1962_v13 = vshrl.u32 %v11721_v9, 16  ;;  %v2343_v3 = vperm.slane %v2339_v14, %v11478_v29  ;;  %v2358_v43 = vsel %vm1603_vm13, %v2357_v28, %v2350_v44  ;;  %v1706_v41 = vperm.slane %v1576_v62, %v11473_v12 }
 0x328   : > { %v1735_v5 = vrot.slane %v11776_v7, 4  ;;  %v2196_v48 = vsel %vm1603_vm13, %v2195_v8, %v11600_v47  ;;  %v2221_v24 = vrot.slane %v2220_v0, 4  ;;  %v2362_v31 = vperm.slane %v2358_v43, %v11478_v29  ;;  %v1527_v8 = vpop.permute.xlu1 %1526 }
 0x329   : > { %v1963_v50 = vshrl.u32 %v11724_v46, 16  ;;  %v2344_v18 = vrot.slane %v2343_v3, 4  ;;  %v1732_v60 = vperm.slane %v1579_v56, %v11473_v12  ;;  %v1849_v9 = vperm.slane %v11699_v32, %v11473_v12 }
 0x32a   : > { %v11810_v15 = vpack.i.b16 %v2362_v31, %v2343_v3  ;;  %v2456_v27 = vshrl.u32 %v2343_v3, 16  ;;  %v2457_v62 = vshrl.u32 %v2362_v31, 16  ;;  %v2363_v44 = vrot.slane %v2362_v31, 4  ;;  %v11822_v3 = vpop.permute.xlu2 %2517 }
 0x32b   : > { %v11813_v28 = vperm.slane %v2196_v48, %v11478_v29  ;;  %v2209_v47 = vrot.slane %v2206_v42, 4  ;;  %v1707_v14 = vrot.slane %v1706_v41, 4  ;;  %v1710_v43 = vsel %vm1603_vm13, %v1706_v41, %v1709_v53 }
 0x32c   : > { %v3065_v46 = vsel %vm3041_vm14, %v11810_v15, 0  ;;  %v11818_v56 = vpack.i.b16 %v2457_v62, %v2456_v27  ;;  %v2345_v32 = vsel %vm1603_vm13, 0, %v2344_v18  ;;  %v2364_v39 = vsel %vm1603_vm13, 0, %v2363_v44 }
 0x32d   : > { %v11824_v31 = vpack.i.b16 %v1963_v50, %v1962_v13  ;;  %v2222_v42 = vsel %vm1603_vm13, %v2221_v24, %v11650_v2  ;;  %3074 = vmatpush.bf16.xpose.msrb.mxu3 %v3065_v46  ;;  %v11828_v48 = vpack.i.b16 %v2364_v39, %v2345_v32  ;;  %v1733_v53 = vrot.slane %v1732_v60, 4 }
 0x32e   : > { %v3141_v41 = vsel %vm3041_vm14, %v11818_v56, 0  ;;  %v1584_v27 = vshrl.u32 %v1527_v8, 16  ;;  %v1736_v62 = vsel %vm1603_vm13, %v1732_v60, %v1735_v5  ;;  %v1850_v18 = vrot.slane %v1849_v9, 4  ;;  %v1535_v9 = vpop.permute.xlu0 %1534 }
 0x32f   : > { %14688 = vst [vmem:[#allocation53_spill] sm:$0xff] %v11828_v48  ;;  %v11836_v44 = vsel %vm1603_vm13, 0, %v2285_v58  ;;  %3150 = vmatpush.bf16.xpose.msra.mxu1 %v3141_v41  ;;  %v3217_v24 = vsel %vm3041_vm14, %v11828_v48, 0  ;;  %v1718_v50 = vperm.slane %v1710_v43, %v11478_v29  ;;  %v11846_v5 = vsel %vm1603_vm13, 0, %v2209_v47 }
 0x330   : > { %9356 = vmatmul.msk.bf16.vlgmr.msra.gmra.mxu0 %vm3041_vm14, %v11824_v31  ;;  %v2224_v58 = vsel %vm1603_vm13, %v2220_v0, %v2223_v16  ;;  %v1708_v60 = vsel %vm1603_vm13, %v1707_v14, %v11773_v30  ;;  %v11854_v41 = vperm.slane %v2222_v42, %v11478_v29  ;;  %v1734_v43 = vsel %vm1603_vm13, %v1733_v53, %v11776_v7 }
 0x331   : > { %v1744_v13 = vperm.slane %v1736_v62, %v11478_v29  ;;  %v1864_v2 = vsel %vm1603_vm13, %v1863_v51, %v11727_v52  ;;  %v1582_v16 = vpack.i.b16 %v1527_v8, %v11434_v61  ;;  %v1585_v0 = vpack.i.b16 %v1584_v27, %v1583_v33 }
 0x332   : > { %v1851_v30 = vsel %vm1603_vm13, %v1850_v18, %v1843_v54  ;;  %v1868_v14 = vperm.slane %v1864_v2, %v11473_v12  ;;  %v2232_v7 = vperm.slane %v2224_v58, %v11478_v29  ;;  %v11874_v42 = vsel %vm1603_vm13, %v2209_v47, %v11813_v28 }
 0x333   : > { %v11877_v55 = vperm.slane %v1708_v60, %v11478_v29  ;;  %v11879_v51 = vrot.slane %v1718_v50, 4  ;;  %v11882_v61 = vperm.slane %v1734_v43, %v11478_v29  ;;  %v1862_v33 = vperm.slane %v11702_v59, %v11473_v12  ;;  %v11896_v50 = vpop.permute.xlu2 %2497 }
 0x334   : > { %v1869_v34 = vrot.slane %v1868_v14, 4  ;;  %v2463_v54 = vshrl.u32 %v2364_v39, 16  ;;  %v2233_v52 = vrot.slane %v11854_v41, 4  ;;  %v11888_v53 = vrot.slane %v1744_v13, 4  ;;  %14689 = vst [vmem:[#allocation54_spill] sm:$0xff] %v11896_v50 }
 0x335   : > { %v11891_v47 = vperm.slane %v1851_v30, %v11478_v29  ;;  %v1753_v27 = vperm.slane %v1582_v16, %v11473_v12  ;;  %v1779_v62 = vperm.slane %v1585_v0, %v11473_v12  ;;  %v11898_v59 = vrot.slane %v2232_v7, 4 }
 0x336   : > { %v1870_v18 = vsel %vm1603_vm13, %v1869_v34, %v1862_v33  ;;  %v1719_v39 = vrot.slane %v11877_v55, 4  ;;  %v1722_v13 = vsel %vm1603_vm13, 0, %v11879_v51  ;;  %v1745_v60 = vrot.slane %v11882_v61, 4 }
 0x337   : > { %3226 = vmatpush.bf16.xpose.msrb.mxu1 %v3217_v24  ;;  %v2462_v24 = vshrl.u32 %v2345_v32, 16  ;;  %v11904_v58 = vperm.slane %v1870_v18, %v11478_v29  ;;  %v1588_v2 = vpack.i.b16 %v11770_v45, %v1535_v9  ;;  %v1589_v16 = vshrl.u32 %v1535_v9, 16  ;;  %v2502_v9 = vpop.permute.xlu0 %2501 }
 0x338   : > { %v1748_v32 = vsel %vm1603_vm13, 0, %v11888_v53  ;;  %v1968_v30 = vshrl.u32 %v11891_v47, 16  ;;  %v2555_v7 = vshrl.u32 %v11822_v3, 16  ;;  %v1761_v33 = vrot.slane %v1753_v27, 4 }
 0x339   : > { %v11907_v43 = vpack.i.b16 %v2463_v54, %v2462_v24  ;;  %v11914_v0 = vpack.i.b16 %v11904_v58, %v11891_v47  ;;  %v1969_v14 = vshrl.u32 %v11904_v58, 16  ;;  %v1787_v34 = vrot.slane %v1779_v62, 4  ;;  %v2510_v54 = vpop.permute.xlu1 %2509 }
 0x33a   : > { %v1591_v18 = vpack.i.b16 %v1590_v19, %v1589_v16  ;;  %v1720_v24 = vsel %vm1603_vm13, 0, %v1719_v39  ;;  %v1882_v8 = vrot.slane %v1722_v13, 4  ;;  %v1758_v46 = vperm.slane %v1588_v2, %v11473_v12 }
 0x33b   : > { %14690 = vst [vmem:[#allocation55_spill] sm:$0xff] %v11907_v43  ;;  %9345 = vmatmul.msk.bf16.vlgmr.msrb.gmra.mxu3 %vm3041_vm14, %v11914_v0  ;;  %v11924_v35 = vpack.i.b16 %v1969_v14, %v1968_v30  ;;  %v1746_v10 = vsel %vm1603_vm13, 0, %v1745_v60  ;;  %v1901_v50 = vrot.slane %v1748_v32, 4  ;;  %v3293_v6 = vsel %vm3041_vm14, %v11907_v43, 0 }
 0x33c   : > { %v1784_v45 = vperm.slane %v1591_v18, %v11473_v12  ;;  %v2554_v19 = vshrl.u32 %v2510_v54, 16  ;;  %v1759_v39 = vrot.slane %v1758_v46, 4  ;;  %v1762_v13 = vsel %vm1603_vm13, %v1758_v46, %v1761_v33 }
 0x33d   : > { %9349 = vmatmul.msk.bf16.vlgmr.msra.gmra.mxu1 %vm3041_vm14, %v11924_v35  ;;  %v2547_v16 = vpack.i.b16 %v2502_v9, %v11445_v1  ;;  %v1770_v2 = vperm.slane %v1762_v13, %v11478_v29  ;;  %v2549_v32 = vshrl.u32 %v2502_v9, 16  ;;  %v1883_v14 = vsel %vm1603_vm13, %v1882_v8, %v1720_v24  ;;  %v2504_v13 = vpop.permute.xlu2 %2503 }
 0x33e   : > { %v1785_v30 = vrot.slane %v1784_v45, 4  ;;  %v1788_v60 = vsel %vm1603_vm13, %v1784_v45, %v1787_v34  ;;  %v2553_v18 = vpack.i.b16 %v11822_v3, %v2510_v54  ;;  %v1760_v57 = vsel %vm1603_vm13, %v1759_v39, %v1753_v27 }
 0x33f   : > { %3302 = vmatpush.bf16.xpose.msra.mxu1 %v3293_v6  ;;  %v1796_v63 = vperm.slane %v1788_v60, %v11478_v29  ;;  %v1902_v43 = vsel %vm1603_vm13, %v1901_v50, %v1746_v10  ;;  %v1766_v46 = vperm.slane %v1760_v57, %v11478_v29  ;;  %v1773_v33 = vrot.slane %v1770_v2, 4 }
 0x340   : > { %v1786_v6 = vsel %vm1603_vm13, %v1785_v30, %v1779_v62  ;;  %v2556_v48 = vpack.i.b16 %v2555_v7, %v2554_v19  ;;  %v2677_v8 = vperm.slane %v2547_v16, %v11473_v12  ;;  %v14691_v3 = vrot.slane %v11813_v28, 4 }
 0x341   : > { %v1792_v34 = vperm.slane %v1786_v6, %v11478_v29  ;;  %v1799_v9 = vrot.slane %v1796_v63, 4  ;;  %v2234_v54 = vsel %vm1603_vm13, 0, %v2233_v52  ;;  %v2236_v10 = vsel %vm1603_vm13, 0, %v11898_v59 }
 0x342   : > { %v2208_v27 = vsel %vm1603_vm13, 0, %v14691_v3  ;;  %v14692_v57 = vshrl.u32 %v11445_v1, 16  ;;  %v11957_v62 = vsel %vm1603_vm13, %v11879_v51, %v11877_v55  ;;  %v1771_v63 = vrot.slane %v1766_v46, 4 }
 0x343   : > { %v1774_v7 = vsel %vm1603_vm13, 0, %v1773_v33  ;;  %v2561_v24 = vshrl.u32 %v2504_v13, 16  ;;  %v1887_v28 = vperm.slane %v1883_v14, %v11473_v12  ;;  %v1906_v45 = vperm.slane %v1902_v43, %v11473_v12 }
 0x344   : > { %v2550_v50 = vpack.i.b16 %v2549_v32, %v14692_v57  ;;  %v1797_v52 = vrot.slane %v1792_v34, 4  ;;  %v1800_v19 = vsel %vm1603_vm13, 0, %v1799_v9  ;;  %v11966_v1 = vsel %vm1603_vm13, %v11888_v53, %v11882_v61 }
 0x345   : > { %v2682_v39 = vperm.slane %v2553_v18, %v11473_v12  ;;  %v11970_v55 = vperm.slane %v2556_v48, %v11473_v12  ;;  %v2685_v51 = vrot.slane %v2677_v8, 4  ;;  %v2389_v16 = vrot.slane %v2236_v10, 4 }
 0x346   : > { %v1920_v2 = vrot.slane %v1774_v7, 4  ;;  %v2559_v30 = vpack.i.b16 %v2504_v13, %v11458_v4  ;;  %v11974_v43 = vperm.slane %v2550_v50, %v11473_v12  ;;  %v1881_v60 = vperm.slane %v11957_v62, %v11473_v12 }
 0x347   : > { %v1772_v32 = vsel %vm1603_vm13, 0, %v1771_v63  ;;  %v1939_v61 = vrot.slane %v1800_v19, 4  ;;  %v14693_v53 = vshrl.u32 %v11458_v4, 16  ;;  %v11981_v18 = vrot.slane %v1887_v28, 4 }
 0x348   : > { %v1900_v48 = vperm.slane %v11966_v1, %v11473_v12  ;;  %v11985_v6 = vrot.slane %v1906_v45, 4  ;;  %v1798_v13 = vsel %vm1603_vm13, 0, %v1797_v52  ;;  %v2683_v3 = vrot.slane %v2682_v39, 4 }
 0x349   : > { %v2562_v14 = vpack.i.b16 %v2561_v24, %v14693_v53  ;;  %v2709_v10 = vrot.slane %v11970_v55, 4  ;;  %v2686_v57 = vsel %vm1603_vm13, %v2682_v39, %v2685_v51  ;;  %v14694_v50 = vrot.slane %v11846_v5, 4 }
 0x34a   : > { %v11994_v4 = vsel %vm1603_vm13, %v1920_v2, %v1772_v32  ;;  %v11997_v7 = vperm.slane %v2559_v30, %v11473_v12  ;;  %v2711_v24 = vrot.slane %v11974_v43, 4  ;;  %v12002_v45 = vsel %vm1603_vm13, %v1939_v61, %v1798_v13 }
 0x34b   : > { %v2371_v63 = vsel %vm1603_vm13, %v14694_v50, %v2208_v27  ;;  %v12005_v52 = vperm.slane %v2562_v14, %v11473_v12  ;;  %v2684_v5 = vsel %vm1603_vm13, %v2683_v3, %v2677_v8  ;;  %v2390_v27 = vsel %vm1603_vm13, %v2389_v16, %v2234_v54 }
 0x34c   : > { %v2375_v28 = vperm.slane %v2371_v63, %v11473_v12  ;;  %v2694_v19 = vperm.slane %v2686_v57, %v11478_v29  ;;  %v2369_v39 = vperm.slane %v11874_v42, %v11473_v12  ;;  %v2384_v2 = vsel %vm1603_vm13, %v11898_v59, %v11854_v41 }
 0x34d   : > { %v12016_v30 = vsel %vm1603_vm13, %v1773_v33, %v1766_v46  ;;  %v1925_v32 = vperm.slane %v11994_v4, %v11473_v12  ;;  %v12021_v8 = vsel %vm1603_vm13, %v1799_v9, %v1792_v34  ;;  %v2394_v54 = vperm.slane %v2390_v27, %v11473_v12 }
 0x34e   : > { %v2376_v51 = vrot.slane %v2375_v28, 4  ;;  %v12025_v16 = vperm.slane %v2684_v5, %v11478_v29  ;;  %v12029_v42 = vsel %vm1603_vm13, %v11970_v55, %v2711_v24  ;;  %v14695_v59 = vrot.slane %v11730_v37, 4  ;;  %v12056_v24 = vpop.permute.xlu0 %2511 }
 0x34f   : > { %v1944_v33 = vperm.slane %v12002_v45, %v11473_v12  ;;  %v2388_v9 = vperm.slane %v2384_v2, %v11473_v12  ;;  %v2395_v61 = vrot.slane %v2394_v54, 4  ;;  %v12040_v53 = vrot.slane %v2694_v19, 4 }
 0x350   : > { %v2377_v41 = vsel %vm1603_vm13, %v2376_v51, %v2369_v39  ;;  %v2409_v46 = vsel %vm1603_vm13, %v14695_v59, %v11754_v38  ;;  %v2422_v13 = vsel %vm1603_vm13, %v11761_v40, %v11714_v20  ;;  %v14696_v37 = vrot.slane %v11791_v36, 4 }
 0x351   : > { %v2381_v34 = vperm.slane %v2377_v41, %v11478_v29  ;;  %v2413_v14 = vperm.slane %v2409_v46, %v11473_v12  ;;  %v2720_v3 = vperm.slane %v12029_v42, %v11478_v29  ;;  %v2396_v57 = vsel %vm1603_vm13, %v2395_v61, %v2388_v9 }
 0x352   : > { %v2428_v38 = vsel %vm1603_vm13, %v14696_v37, %v11836_v44  ;;  %v2407_v50 = vperm.slane %v11758_v26, %v11473_v12  ;;  %v2400_v28 = vperm.slane %v2396_v57, %v11478_v29  ;;  %v1856_v40 = vrot.slane %v11891_v47, 4 }
 0x353   : > { %v2432_v63 = vperm.slane %v2428_v38, %v11473_v12  ;;  %v2414_v20 = vrot.slane %v2413_v14, 4  ;;  %v1875_v36 = vrot.slane %v11904_v58, 4  ;;  %v2426_v44 = vperm.slane %v2422_v13, %v11473_v12 }
 0x354   : > { %v2468_v27 = vshrl.u32 %v2381_v34, 16  ;;  %v2382_v19 = vrot.slane %v2381_v34, 4  ;;  %v2467_v39 = vpack.i.b16 %v2400_v28, %v2381_v34  ;;  %v12064_v26 = vsel %vm1603_vm13, 0, %v1856_v40 }
 0x355   : > { %v2433_v5 = vrot.slane %v2432_v63, 4  ;;  %v2415_v51 = vsel %vm1603_vm13, %v2414_v20, %v2407_v50  ;;  %v12067_v2 = vsel %vm1603_vm13, 0, %v1875_v36  ;;  %v2469_v41 = vshrl.u32 %v2400_v28, 16 }
 0x356   : > { %v12070_v54 = vperm.slane %v2415_v51, %v11478_v29  ;;  %v12075_v58 = vpack.i.b16 %v12067_v2, %v12064_v26  ;;  %v3084_v59 = vsel %vm3041_vm14, %v2467_v39, 0  ;;  %v2383_v34 = vsel %vm1603_vm13, 0, %v2382_v19 }
 0x357   : > { %v2434_v47 = vsel %vm1603_vm13, %v2433_v5, %v2426_v44  ;;  %v2401_v9 = vrot.slane %v2400_v28, 4  ;;  %3093 = vmatpush.bf16.xpose.msra.mxu3 %v3084_v59  ;;  %v2470_v61 = vpack.i.b16 %v2469_v41, %v2468_v27  ;;  %v2977_v14 = vunpack.c.l.b16 %v2467_v39  ;;  %v2520_v27 = vpop.permute.xlu0 %2519 }
 0x358   : > { %v12079_v46 = vperm.slane %v2434_v47, %v11478_v29  ;;  %9353 = vmatmul.msk.bf16.vlgmr.msrb.gmra.mxu1 %vm3041_vm14, %v12075_v58  ;;  %v1889_v13 = vsel %vm1603_vm13, %v11981_v18, %v1881_v60  ;;  %v1908_v37 = vsel %vm1603_vm13, %v11985_v6, %v1900_v48  ;;  %v2480_v6 = vshrl.u32 %v12070_v54, 16 }
 0x359   : > { %v2402_v57 = vsel %vm1603_vm13, 0, %v2401_v9  ;;  %v12098_v50 = vperm.slane %v1889_v13, %v11478_v29  ;;  %v12101_v63 = vperm.slane %v1908_v37, %v11478_v29  ;;  %v2979_v62 = vunpack.c.l.b16 %v2470_v61 }
 0x35a   : > { %v2479_v38 = vpack.i.b16 %v12079_v46, %v12070_v54  ;;  %v3160_v60 = vsel %vm3041_vm14, %v2470_v61, 0  ;;  %v2473_v18 = vpack.i.b16 %v2402_v57, %v2383_v34  ;;  %v3009_v28 = vpack.c.b16 %v2977_v14, %v2977_v14 }
 0x35b   : > { %3169 = vmatpush.bf16.xpose.msrb.mxu2 %v3160_v60  ;;  %v12107_v48 = vpack.i.b16 %v12101_v63, %v12098_v50  ;;  %v3013_v40 = vpack.c.b16 %v2979_v62, %v2979_v62  ;;  %v2481_v5 = vshrl.u32 %v12079_v46, 16  ;;  %v1980_v39 = vshrl.u32 %v12098_v50, 16 }
 0x35c   : > { %v3103_v1 = vsel %vm3041_vm14, %v2479_v38, 0  ;;  %v2978_v20 = vunpack.c.l.b16 %v2479_v38  ;;  %v3236_v36 = vsel %vm3041_vm14, %v2473_v18, 0  ;;  %v3363_v44 = vsel %vm3041_vm14, %v3009_v28, 0 }
 0x35d   : > { %3372 = vmatpush.bf16.xpose.msrb.mxu0 %v3363_v44  ;;  %v1981_v51 = vshrl.u32 %v12101_v63, 16  ;;  %v2474_v47 = vshrl.u32 %v2383_v34, 16  ;;  %v3427_v41 = vsel %vm3041_vm14, %v3013_v40, 0  ;;  %v2482_v59 = vpack.i.b16 %v2481_v5, %v2480_v6 }
 0x35e   : > { %v3010_v19 = vpack.c.b16 %v2978_v20, %v2978_v20  ;;  %v2475_v9 = vshrl.u32 %v2402_v57, 16  ;;  %v2981_v61 = vunpack.c.l.b16 %v2473_v18  ;;  %v2566_v13 = vshrl.u32 %v12056_v24, 16  ;;  %9346 = vmatmul.msk.bf16.vlgmr.msra.gmra.mxu3 %vm3041_vm14, %v12107_v48 }
 0x35f   : > { %3112 = vmatpush.bf16.xpose.msrb.mxu3 %v3103_v1  ;;  %v12120_v37 = vpack.i.b16 %v1981_v51, %v1980_v39  ;;  %v2567_v38 = vshrl.u32 %v2520_v27, 16  ;;  %v2710_v34 = vsel %vm1603_vm13, %v2709_v10, %v11974_v43  ;;  %v3179_v57 = vsel %vm3041_vm14, %v2482_v59, 0 }
 0x360   : > { %v3379_v14 = vsel %vm3041_vm14, %v3010_v19, 0  ;;  %v12127_v62 = vpack.i.b16 %v2475_v9, %v2474_v47  ;;  %v3017_v60 = vpack.c.b16 %v2981_v61, %v2981_v61  ;;  %v1945_v18 = vrot.slane %v1944_v33, 4 }
 0x361   : > { %3388 = vmatpush.bf16.xpose.msrb.mxu1 %v3379_v14  ;;  %v12135_v28 = vrot.slane %v2720_v3, 4  ;;  %v2568_v1 = vpack.i.b16 %v2567_v38, %v2566_v13  ;;  %v2980_v55 = vunpack.c.l.b16 %v2482_v59  ;;  %v2698_v43 = vsel %vm1603_vm13, 0, %v12040_v53 }
 0x362   : > { %9350 = vmatmul.msk.bf16.vlgmr.msrb.gmra.mxu2 %vm3041_vm14, %v12120_v37  ;;  %v3312_v10 = vsel %vm3041_vm14, %v12127_v62, 0  ;;  %v2565_v45 = vpack.i.b16 %v2520_v27, %v12056_v24  ;;  %v1975_v33 = vshrl.u32 %v12067_v2, 16  ;;  %v1926_v42 = vrot.slane %v1925_v32, 4 }
 0x363   : > { %3245 = vmatpush.bf16.xpose.msra.mxu2 %v3236_v36  ;;  %v1938_v3 = vperm.slane %v12021_v8, %v11473_v12  ;;  %v2716_v20 = vperm.slane %v2710_v34, %v11478_v29  ;;  %v2760_v6 = vperm.slane %v2568_v1, %v11473_v12  ;;  %v2695_v40 = vrot.slane %v12025_v16, 4 }
 0x364   : > { %9360 = vmatmul.msk.bf16.vlgmr.msrb.gmra.mxu0 %vm3041_vm14, %v11709_v17  ;;  %v3491_v24 = vsel %vm3041_vm14, %v3017_v60, 0  ;;  %v1974_v2 = vshrl.u32 %v12064_v26, 16  ;;  %v3014_v36 = vpack.c.b16 %v2980_v55, %v2980_v55  ;;  %v1919_v4 = vperm.slane %v12016_v30, %v11473_v12 }
 0x365   : > { %3436 = vmatpush.bf16.xpose.msra.mxu0 %v3427_v41  ;;  %v2763_v32 = vrot.slane %v12005_v52, 4  ;;  %v2724_v8 = vsel %vm1603_vm13, 0, %v12135_v28  ;;  %v2858_v44 = vrot.slane %v2698_v43, 4  ;;  %v2734_v5 = vperm.slane %v2565_v45, %v11473_v12 }
 0x366   : > { %v12163_v27 = vpack.i.b16 %v1975_v33, %v1974_v2  ;;  %v1946_v17 = vsel %vm1603_vm13, %v1945_v18, %v1938_v3  ;;  %v2420_v19 = vrot.slane %v12070_v54, 4  ;;  %v2737_v26 = vrot.slane %v11997_v7, 4 }
 0x367   : > { %3188 = vmatpush.bf16.xpose.msra.mxu3 %v3179_v57  ;;  %v2761_v39 = vrot.slane %v2760_v6, 4  ;;  %v1927_v30 = vsel %vm1603_vm13, %v1926_v42, %v1919_v4  ;;  %v2439_v51 = vrot.slane %v12079_v46, 4  ;;  %v2696_v47 = vsel %vm1603_vm13, 0, %v2695_v40 }
 0x368   : > { %v2721_v41 = vrot.slane %v2716_v20, 4  ;;  %v2764_v59 = vsel %vm1603_vm13, %v2760_v6, %v2763_v32  ;;  %9357 = vmatmul.msk.bf16.vlgmr.msra.gmra.mxu1 %vm3041_vm14, %v12163_v27  ;;  %v3443_v9 = vsel %vm3041_vm14, %v3014_v36, 0  ;;  %v2859_v61 = vsel %vm1603_vm13, %v2858_v44, %v2696_v47 }
 0x369   : > { %v2877_v54 = vrot.slane %v2724_v8, 4  ;;  %3452 = vmatpush.bf16.xpose.msra.mxu1 %v3443_v9  ;;  %v12177_v14 = vperm.slane %v1946_v17, %v11478_v29  ;;  %v12180_v13 = vsel %vm1603_vm13, 0, %v2439_v51  ;;  %v2735_v46 = vrot.slane %v2734_v5, 4 }
 0x36a   : > { %v2738_v38 = vsel %vm1603_vm13, %v2734_v5, %v2737_v26  ;;  %v12184_v34 = vperm.slane %v1927_v30, %v11478_v29  ;;  %v12187_v57 = vsel %vm1603_vm13, 0, %v2420_v19  ;;  %v2762_v60 = vsel %vm1603_vm13, %v2761_v39, %v12005_v52 }
 0x36b   : > { %3321 = vmatpush.bf16.xpose.msrb.mxu2 %v3312_v10  ;;  %v2772_v18 = vperm.slane %v2764_v59, %v11478_v29  ;;  %v2485_v1 = vpack.i.b16 %v12180_v13, %v12187_v57  ;;  %v1894_v55 = vrot.slane %v12098_v50, 4  ;;  %v14697_v43 = vunpack.c.l.b16 %v11613_v49 }
 0x36c   : > { %v2722_v45 = vsel %vm1603_vm13, 0, %v2721_v41  ;;  %v2853_v33 = vsel %vm1603_vm13, %v12040_v53, %v12025_v16  ;;  %v1913_v42 = vrot.slane %v12101_v63, 4  ;;  %v2863_v52 = vperm.slane %v2859_v61, %v11473_v12 }
 0x36d   : > { %3500 = vmatpush.bf16.xpose.msrb.mxu0 %v3491_v24  ;;  %v3011_v10 = vpack.c.b16 %v14697_v43, %v14697_v43  ;;  %v2746_v3 = vperm.slane %v2738_v38, %v11478_v29  ;;  %v12207_v6 = vpack.i.b16 %v12177_v14, %v12184_v34  ;;  %v2983_v49 = vunpack.c.l.b16 %v12127_v62 }
 0x36e   : > { %v2878_v50 = vsel %vm1603_vm13, %v2877_v54, %v2722_v45  ;;  %v2736_v40 = vsel %vm1603_vm13, %v2735_v46, %v11997_v7  ;;  %v2768_v24 = vperm.slane %v2762_v60, %v11478_v29  ;;  %v1914_v16 = vsel %vm1603_vm13, 0, %v1913_v42 }
 0x36f   : > { %v2775_v53 = vrot.slane %v2772_v18, 4  ;;  %9347 = vmatmul.msk.bf16.vlgmr.msrb.gmra.mxu3 %vm3041_vm14, %v12207_v6  ;;  %v3255_v63 = vsel %vm3041_vm14, %v2485_v1, 0  ;;  %v1895_v2 = vsel %vm1603_vm13, 0, %v1894_v55  ;;  %v2982_v36 = vunpack.c.l.b16 %v2485_v1 }
 0x370   : > { %3264 = vmatpush.bf16.xpose.msrb.mxu3 %v3255_v63  ;;  %v12219_v62 = vpack.i.b16 %v1914_v16, %v1895_v2  ;;  %v3021_v4 = vpack.c.b16 %v2983_v49, %v2983_v49  ;;  %v2872_v7 = vsel %vm1603_vm13, %v12135_v28, %v2716_v20  ;;  %v2742_v32 = vperm.slane %v2736_v40, %v11478_v29 }
 0x371   : > { %v2749_v8 = vrot.slane %v2746_v3, 4  ;;  %v2864_v44 = vrot.slane %v2863_v52, 4  ;;  %v2857_v5 = vperm.slane %v2853_v33, %v11473_v12  ;;  %v3395_v17 = vsel %vm3041_vm14, %v3011_v10, 0 }
 0x372   : > { %9354 = vmatmul.msk.bf16.vlgmr.msra.gmra.mxu2 %vm3041_vm14, %v12219_v62  ;;  %v2882_v19 = vperm.slane %v2878_v50, %v11473_v12  ;;  %v2773_v26 = vrot.slane %v2768_v24, 4  ;;  %v2776_v39 = vsel %vm1603_vm13, 0, %v2775_v53  ;;  %v3018_v30 = vpack.c.b16 %v2982_v36, %v2982_v36 }
 0x373   : > { %3404 = vmatpush.bf16.xpose.msra.mxu2 %v3395_v17  ;;  %v3555_v28 = vsel %vm3041_vm14, %v3021_v4, 0  ;;  %v2865_v20 = vsel %vm1603_vm13, %v2864_v44, %v2857_v5  ;;  %v2876_v51 = vperm.slane %v2872_v7, %v11473_v12  ;;  %v2747_v41 = vrot.slane %v2742_v32, 4 }
 0x374   : > { %9364 = vmatmul.msk.bf16.vlgmr.msra.gmra.mxu0 %vm3041_vm14, %v11718_v25  ;;  %v2883_v47 = vrot.slane %v2882_v19, 4  ;;  %v2750_v59 = vsel %vm1603_vm13, 0, %v2749_v8  ;;  %v2915_v9 = vrot.slane %v2776_v39, 4  ;;  %v2774_v54 = vsel %vm1603_vm13, 0, %v2773_v26 }
 0x375   : > { %3564 = vmatpush.bf16.xpose.msra.mxu0 %v3555_v28  ;;  %v2487_v46 = vshrl.u32 %v12180_v13, 16  ;;  %v12240_v25 = vperm.slane %v2865_v20, %v11478_v29  ;;  %v2896_v60 = vrot.slane %v2750_v59, 4  ;;  %v3507_v18 = vsel %vm3041_vm14, %v3018_v30, 0 }
 0x376   : > { %v2884_v61 = vsel %vm1603_vm13, %v2883_v47, %v2876_v51  ;;  %v2748_v1 = vsel %vm1603_vm13, 0, %v2747_v41  ;;  %v1993_v55 = vshrl.u32 %v12177_v14, 16  ;;  %v2486_v43 = vshrl.u32 %v12187_v57, 16 }
 0x377   : > { %v12243_v38 = vperm.slane %v2884_v61, %v11478_v29  ;;  %v2987_v10 = vunpack.c.l.b16 %v11619_v22  ;;  %v2916_v45 = vsel %vm1603_vm13, %v2915_v9, %v2774_v54  ;;  %v1992_v33 = vshrl.u32 %v12184_v34, 16 }
 0x378   : > { %9361 = vmatmul.msk.bf16.vlgmr.msrb.gmra.mxu1 %vm3041_vm14, %v11914_v0  ;;  %v2488_v0 = vpack.i.b16 %v2487_v46, %v2486_v43  ;;  %v2897_v42 = vsel %vm1603_vm13, %v2896_v60, %v2748_v1  ;;  %v1987_v52 = vshrl.u32 %v1914_v16, 16  ;;  %v2920_v57 = vperm.slane %v2916_v45, %v11473_v12  ;;  %v12316_v45 = vld [vmem:[%s974_s24] sm:$0xff]  }
 0x379   : > { %3516 = vmatpush.bf16.xpose.msrb.mxu1 %v3507_v18  ;;  %v12253_v13 = vpack.i.b16 %v12243_v38, %v12240_v25  ;;  %v12260_v49 = vpack.i.b16 %v1993_v55, %v1992_v33  ;;  %v3015_v50 = vpack.c.b16 %v2987_v10, %v2987_v10  ;;  %v1986_v40 = vshrl.u32 %v1895_v2, 16 }
 0x37a   : > { %v3331_v22 = vsel %vm3041_vm14, %v2488_v0, 0  ;;  %v2901_v63 = vperm.slane %v2897_v42, %v11473_v12  ;;  %v2910_v36 = vsel %vm1603_vm13, %v2775_v53, %v2768_v24  ;;  %v2984_v7 = vunpack.c.l.b16 %v2488_v0 }
 0x37b   : > { %v2993_v3 = vunpack.c.l.b16 %v12253_v13  ;;  %v12268_v4 = vpack.i.b16 %v1987_v52, %v1986_v40  ;;  %v2921_v44 = vrot.slane %v2920_v57, 4  ;;  %v2891_v5 = vsel %vm1603_vm13, %v2749_v8, %v2742_v32 }
 0x37c   : > { %v3459_v2 = vsel %vm3041_vm14, %v3015_v50, 0  ;;  %v2957_v17 = vshrl.u32 %v12243_v38, 16  ;;  %v2902_v19 = vrot.slane %v2901_v63, 4  ;;  %v2914_v24 = vperm.slane %v2910_v36, %v11473_v12 }
 0x37d   : > { %v3025_v16 = vpack.c.b16 %v2993_v3, %v2993_v3  ;;  %v3022_v26 = vpack.c.b16 %v2984_v7, %v2984_v7  ;;  %v2895_v32 = vperm.slane %v2891_v5, %v11473_v12  ;;  %v2956_v8 = vshrl.u32 %v12240_v25, 16 }
 0x37e   : > { %v2922_v39 = vsel %vm1603_vm13, %v2921_v44, %v2914_v24  ;;  %v1951_v30 = vrot.slane %v12177_v14, 4  ;;  %v2986_v28 = vunpack.c.l.b16 %v11810_v15  ;;  %v1932_v47 = vrot.slane %v12184_v34, 4 }
 0x37f   : > { %9351 = vmatmul.msk.bf16.vlgmr.msra.gmra.mxu3 %vm3041_vm14, %v12260_v49  ;;  %v4056_v53 = vsel %vm4054_vm15, %v3025_v16, 0  ;;  %v12284_v20 = vpack.i.b16 %v2957_v17, %v2956_v8  ;;  %v2903_v51 = vsel %vm1603_vm13, %v2902_v19, %v2895_v32  ;;  %v12292_v41 = vperm.slane %v2922_v39, %v11478_v29 }
 0x380   : > { %3340 = vmatpush.bf16.xpose.msra.mxu3 %v3331_v22  ;;  %v2989_v59 = vunpack.c.l.b16 %v11622_v11  ;;  %v1952_v14 = vsel %vm1603_vm13, 0, %v1951_v30  ;;  %v2907_v15 = vperm.slane %v2903_v51, %v11478_v29  ;;  %v3012_v9 = vpack.c.b16 %v2986_v28, %v2986_v28 }
 0x381   : > { %14698 = vst [vmem:[#allocation56_spill] sm:$0xff] %v12284_v20  ;;  %v2995_v61 = vunpack.c.l.b16 %v12284_v20  ;;  %v2870_v18 = vrot.slane %v12240_v25, 4  ;;  %v2889_v43 = vrot.slane %v12243_v38, 4  ;;  %v9838_v25 = vunpack.c.l.bf16 %v12316_v45 }
 0x382   : > { %9358 = vmatmul.msk.bf16.vlgmr.msrb.gmra.mxu2 %vm3041_vm14, %v12268_v4  ;;  %v12300_v54 = vpack.i.b16 %v12292_v41, %v2907_v15  ;;  %v3019_v46 = vpack.c.b16 %v2989_v59, %v2989_v59  ;;  %v3411_v11 = vsel %vm3041_vm14, %v3012_v9, 0  ;;  %v2988_v57 = vunpack.c.l.b16 %v11818_v56 }
 0x383   : > { %3468 = vmatpush.bf16.xpose.msrb.mxu2 %v3459_v2  ;;  %v3029_v60 = vpack.c.b16 %v2995_v61, %v2995_v61  ;;  %v2871_v55 = vsel %vm1603_vm13, 0, %v2870_v18  ;;  %v2890_v0 = vsel %vm1603_vm13, 0, %v2889_v43  ;;  %v9242_v50 = vadd.f32 -1.0, %v9838_v25  ;;  %v14700_v18 = vld [vmem:[#allocation53_spill] sm:$0xff] }
 0x384   : > { %9368 = vmatmul.msk.bf16.vlgmr.msrb.gmra.mxu0 %vm3041_vm14, %v11735_v21  ;;  %v3571_v21 = vsel %vm3041_vm14, %v3022_v26, 0  ;;  %v2994_v1 = vunpack.c.l.b16 %v12300_v54  ;;  %v3523_v10 = vsel %vm3041_vm14, %v3019_v46, 0  ;;  %v12323_v38 = vpack.i.b16 %v2890_v0, %v2871_v55 }
 0x385   : > { %4065 = vmatpush.bf16.msrb.mxu0 %v4056_v53  ;;  %v4132_v33 = vsel %vm4054_vm15, %v3029_v60, 0  ;;  %v2962_v52 = vshrl.u32 %v2871_v55, 16  ;;  %v2969_v22 = vshrl.u32 %v12292_v41, 16  ;;  %v2991_v63 = vunpack.c.l.b16 %v11636_v23 }
 0x386   : > { %v3026_v42 = vpack.c.b16 %v2994_v1, %v2994_v1  ;;  %v2968_v36 = vshrl.u32 %v2907_v15, 16  ;;  %v3016_v7 = vpack.c.b16 %v2988_v57, %v2988_v57  ;;  %v12333_v44 = vmul.f32 1e+30, %v9242_v50 }
 0x387   : > { %v3023_v17 = vpack.c.b16 %v2991_v63, %v2991_v63  ;;  %v2908_v24 = vrot.slane %v2907_v15, 4  ;;  %v2927_v8 = vrot.slane %v12292_v41, 4  ;;  %v2990_v1 = vunpack.c.l.b16 %v14700_v18 }
 0x388   : > { %9365 = vmatmul.msk.bf16.vlgmr.msra.gmra.mxu1 %vm3041_vm14, %v11924_v35  ;;  %v1933_v35 = vsel %vm1603_vm13, 0, %v1932_v47  ;;  %v4075_v40 = vsel %vm4054_vm15, %v3026_v42, 0  ;;  %v12335_v5 = vpack.i.b16 %v2969_v22, %v2968_v36  ;;  %v3475_v23 = vsel %vm3041_vm14, %v3016_v7, 0 }
 0x389   : > { %3580 = vmatpush.bf16.xpose.msra.mxu1 %v3571_v21  ;;  %v12302_v34 = vpack.i.b16 %v1952_v14, %v1933_v35  ;;  %v1998_v16 = vshrl.u32 %v1933_v35, 16  ;;  %v2909_v32 = vsel %vm1603_vm13, 0, %v2908_v24  ;;  %v3587_v51 = vsel %vm3041_vm14, %v3023_v17, 0  ;;  %v9841_v17 = vld [vmem:[%s984_s15] sm:$0xff]  }
 0x38a   : > { %14699 = vst [vmem:[#allocation57_spill] sm:$0xff] %v12335_v5  ;;  %v2996_v39 = vunpack.c.l.b16 %v12335_v5  ;;  %v2928_v59 = vsel %vm1603_vm13, 0, %v2927_v8  ;;  %v2974_v15 = vshrl.u32 %v2909_v32, 16 }
 0x38b   : > { %v2975_v9 = vshrl.u32 %v2928_v59, 16 }
 0x38c   : > { %v3030_v35 = vpack.c.b16 %v2996_v39, %v2996_v39 }
 0x38e   : > { %v4151_v55 = vsel %vm4054_vm15, %v3030_v35, 0 }
 0x38f   : > { %9355 = vmatmul.msk.bf16.vlgmr.msrb.gmra.mxu3 %vm3041_vm14, %v12302_v34 }
 0x390   : > { %3420 = vmatpush.bf16.xpose.msrb.mxu3 %v3411_v11  ;;  %v12364_v11 = vpack.i.b16 %v2975_v9, %v2974_v15 }
 0x392   : > { %9362 = vmatmul.msk.bf16.vlgmr.msra.gmra.mxu2 %vm3041_vm14, %v12107_v48  ;;  %v2963_v48 = vshrl.u32 %v2890_v0, 16  ;;  %v9839_v0 = vunpack.c.h.bf16 %v12316_v45 }
 0x393   : > { %3532 = vmatpush.bf16.xpose.msra.mxu2 %v3523_v10  ;;  %v3020_v10 = vpack.c.b16 %v2990_v1, %v2990_v1 }
 0x394   : > { %9372 = vmatmul.msk.bf16.vlgmr.msra.gmra.mxu0 %vm3041_vm14, %v11824_v31  ;;  %v12325_v3 = vpack.i.b16 %v2963_v48, %v2962_v52  ;;  %v1999_v31 = vshrl.u32 %v1952_v14, 16  ;;  %v12359_v14 = vpack.i.b16 %v2928_v59, %v2909_v32  ;;  %v14701_v52 = vld [vmem:[#allocation55_spill] sm:$0xff] }
 0x395   : > { %4141 = vmatpush.bf16.msra.mxu0 %v4132_v33  ;;  %v3539_v25 = vsel %vm3041_vm14, %v3020_v10, 0  ;;  %v2992_v48 = vunpack.c.l.b16 %v14701_v52 }
 0x396   : > { %v12337_v2 = vpack.i.b16 %v1999_v31, %v1998_v16 }
 0x397   : > { %v3024_v50 = vpack.c.b16 %v2992_v48, %v2992_v48 }
 0x398   : > { %9369 = vmatmul.msk.bf16.vlgmr.msrb.gmra.mxu1 %vm3041_vm14, %v12075_v58 }
 0x399   : > { %4084 = vmatpush.bf16.msrb.mxu1 %v4075_v40 }
 0x39c   : > { %v3133_v56 = vpop.f32.mrf.mxu1 }
 0x39d   : > { %v3350_v58 = vmul.f32 0.17677669, %v3133_v56  ;;  %v3209_v19 = vpop.f32.mrf.mxu0 }
 0x39e   : > { %v3354_v53 = vmul.f32 0.17677669, %v3209_v19 }
 0x39f   : > { %9359 = vmatmul.msk.bf16.vlgmr.msra.gmra.mxu3 %vm3041_vm14, %v12337_v2  ;;  %v12343_v26 = vadd.f32 %v3350_v58, %v12333_v44 }
 0x3a0   : > { %3484 = vmatpush.bf16.xpose.msra.mxu3 %v3475_v23  ;;  %v3057_v30 = vpop.f32.mrf.mxu3  ;;  %v12349_v28 = vadd.f32 %v3354_v53, %v12333_v44 }
 0x3a1   : > { %v3346_v21 = vmul.f32 0.17677669, %v3057_v30  ;;  %v3679_v47 = vsel %vm3666_vm0, %v12343_v26, -inf }
 0x3a2   : > { %9366 = vmatmul.msk.bf16.vlgmr.msrb.gmra.mxu2 %vm3041_vm14, %v12120_v37  ;;  %3680 = vmax.xlane.f32.xlu2 %v3679_v47  ;;  %v3691_v41 = vsel %vm3666_vm0, %v12349_v28, -inf }
 0x3a3   : > { %3596 = vmatpush.bf16.xpose.msrb.mxu2 %v3587_v51  ;;  %3692 = vmax.xlane.f32.xlu0 %v3691_v41  ;;  %v12362_v61 = vadd.f32 %v3346_v21, %v12333_v44 }
 0x3a4   : > { %v3135_v46 = vpop.f32.mrf.mxu1 }
 0x3a5   : > { %v3211_v60 = vpop.f32.mrf.mxu0  ;;  %v3667_v37 = vsel %vm3666_vm0, %v12362_v61, -inf }
 0x3a6   : > { %3668 = vmax.xlane.f32.xlu1 %v3667_v37 }
 0x3a8   : > { %9373 = vmatmul.msk.bf16.vlgmr.msra.gmra.mxu1 %vm3041_vm14, %v12163_v27  ;;  %v3059_v43 = vpop.f32.mrf.mxu3  ;;  %v9243_v27 = vadd.f32 -1.0, %v9839_v0 }
 0x3a9   : > { %4160 = vmatpush.bf16.msra.mxu1 %v4151_v55 }
 0x3aa   : > { %v12381_v57 = vmul.f32 1e+30, %v9243_v27 }
 0x3ad   : > { %v12372_v33 = vpop.f32.mrf.mxu0 }
 0x3af   : > { %9363 = vmatmul.msk.bf16.vlgmr.msrb.gmra.mxu3 %vm3041_vm14, %v12207_v6  ;;  %v3603_v6 = vsel %vm3041_vm14, %v3024_v50, 0 }
 0x3b0   : > { %3548 = vmatpush.bf16.xpose.msrb.mxu3 %v3539_v25 }
 0x3b2   : > { %9370 = vmatmul.msk.bf16.vlgmr.msra.gmra.mxu2 %vm3041_vm14, %v12219_v62 }
 0x3b5   : > { %v3287_v42 = vpop.f32.mrf.mxu0 }
 0x3ba   : > { %v3152_v40 = vpop.f32.mrf.mxu1 }
 0x3bb   : > { %v3351_v22 = vmul.f32 0.17677669, %v3152_v40 }
 0x3bd   : > { %v12384_v31 = vadd.f32 %v3351_v22, %v12381_v57 }
 0x3be   : > { %v3076_v62 = vpop.f32.mrf.mxu3 }
 0x3bf   : > { %9367 = vmatmul.msk.bf16.vlgmr.msra.gmra.mxu3 %vm3041_vm14, %v12260_v49  ;;  %v3347_v45 = vmul.f32 0.17677669, %v3076_v62  ;;  %v3682_v63 = vsel %vm3666_vm0, %v12384_v31, -inf }
 0x3c0   : > { %3612 = vmatpush.bf16.xpose.msra.mxu3 %v3603_v6  ;;  %3683 = vmax.xlane.f32.xlu0 %v3682_v63 }
 0x3c1   : > { %v12394_v36 = vadd.f32 %v3347_v45, %v12381_v57 }
 0x3c2   : > { %9374 = vmatmul.msk.bf16.vlgmr.msrb.gmra.mxu2 %vm3041_vm14, %v12268_v4  ;;  %v3154_v16 = vpop.f32.mrf.mxu1  ;;  %v9842_v4 = vunpack.c.l.bf16 %v9841_v17 }
 0x3c3   : > { %v3670_v7 = vsel %vm3666_vm0, %v12394_v36, -inf }
 0x3c4   : > { %3671 = vmax.xlane.f32.xlu2 %v3670_v7  ;;  %v9244_v53 = vadd.f32 -1.0, %v9842_v4 }
 0x3c6   : > { %v3078_v49 = vpop.f32.mrf.mxu3  ;;  %v12409_v32 = vmul.f32 1e+30, %v9244_v53 }
 0x3c7   : > { %v14702_v49 = vld [vmem:[#allocation51_spill] sm:$0xff] }
 0x3cf   : > { %9371 = vmatmul.msk.bf16.vlgmr.msrb.gmra.mxu3 %vm3041_vm14, %v12302_v34 }
 0x3d5   : > { %v3228_v56 = vpop.f32.mrf.mxu1 }
 0x3d6   : > { %v3355_v58 = vmul.f32 0.17677669, %v3228_v56  ;;  %v14703_v56 = vld [vmem:[#allocation50_spill] sm:$0xff] }
 0x3d8   : > { %v12403_v19 = vadd.f32 %v3355_v58, %v12381_v57 }
 0x3da   : > { %v3694_v24 = vsel %vm3666_vm0, %v12403_v19, -inf }
 0x3db   : > { %3695 = vmax.xlane.f32.xlu1 %v3694_v24 }
 0x3dd   : > { %v3230_v23 = vpop.f32.mrf.mxu1 }
 0x3df   : > { %9375 = vmatmul.msk.bf16.vlgmr.msra.gmra.mxu3 %vm3041_vm14, %v12337_v2  ;;  %v9843_v2 = vunpack.c.h.bf16 %v9841_v17  ;;  %v1505_v17 = vadd.f32 %v14703_v56, %v14702_v49 }
 0x3e1   : > { %v3374_v34 = vpop.f32.mrf.mxu0  ;;  %v12411_v39 = vpop.f32.mrf.mxu3  ;;  %v9245_v35 = vadd.f32 -1.0, %v9843_v2  ;;  %v12452_v53 = vpack.c.bf16 %v1505_v17, %v1505_v17 }
 0x3e2   : > { %v3618_v8 = vmul.f32 0.17677669, %v3374_v34 }
 0x3e3   : > { %v12427_v1 = vmul.f32 1e+30, %v9245_v35 }
 0x3e4   : > { %v12414_v30 = vadd.f32 %v3618_v8, %v12409_v32 }
 0x3e5   : > { %v12416_v51 = vpop.f32.mrf.mxu2  ;;  %v12418_v21 = vpop.f32.mrf.mxu1 }
 0x3e6   : > { %v3859_v47 = vsel %vm3666_vm0, %v12414_v30, -inf }
 0x3e7   : > { %3860 = vmax.xlane.f32.xlu1 %v3859_v47 }
 0x3e9   : > { %v3376_v59 = vpop.f32.mrf.mxu0  ;;  %v3097_v41 = vpop.f32.mrf.mxu3 }
 0x3ed   : > { %v3173_v15 = vpop.f32.mrf.mxu2  ;;  %v3306_v9 = vpop.f32.mrf.mxu1 }
 0x3f1   : > { %v3438_v46 = vpop.f32.mrf.mxu0 }
 0x3f2   : > { %v3622_v60 = vmul.f32 0.17677669, %v3438_v46  ;;  %v12422_v37 = vpop.f32.mrf.mxu3 }
 0x3f4   : > { %v12425_v18 = vadd.f32 %v3622_v60, %v12409_v32 }
 0x3f5   : > { %v12429_v55 = vpop.f32.mrf.mxu2  ;;  %v3390_v43 = vpop.f32.mrf.mxu1 }
 0x3f6   : > { %v3619_v10 = vmul.f32 0.17677669, %v3390_v43  ;;  %v3871_v25 = vsel %vm3666_vm0, %v12425_v18, -inf }
 0x3f7   : > { %3872 = vmax.xlane.f32.xlu2 %v3871_v25 }
 0x3f8   : > { %v12434_v0 = vadd.f32 %v3619_v10, %v12427_v1 }
 0x3f9   : > { %v3440_v42 = vpop.f32.mrf.mxu0 }
 0x3fa   : > { %v3116_v27 = vpop.f32.mrf.mxu3  ;;  %v3862_v52 = vsel %vm3666_vm0, %v12434_v0, -inf }
 0x3fb   : > { %3863 = vmax.xlane.f32.xlu0 %v3862_v52  ;;  %v14704_v52 = vld [vmem:[#allocation52_spill] sm:$0xff] }
 0x3fd   : > { %v3249_v48 = vpop.f32.mrf.mxu2  ;;  %v3392_v50 = vpop.f32.mrf.mxu1 }
 0x401   : > { %v3502_v40 = vpop.f32.mrf.mxu0 }
 0x402   : > { %v3626_v22 = vmul.f32 0.17677669, %v3502_v40  ;;  %v12438_v6 = vpop.f32.mrf.mxu3 }
 0x404   : > { %v12441_v62 = vadd.f32 %v3626_v22, %v12409_v32 }
 0x405   : > { %v12443_v45 = vpop.f32.mrf.mxu2  ;;  %v3454_v63 = vpop.f32.mrf.mxu1 }
 0x406   : > { %v3623_v16 = vmul.f32 0.17677669, %v3454_v63  ;;  %v3883_v7 = vsel %vm3666_vm0, %v12441_v62, -inf }
 0x407   : > { %3884 = vmax.xlane.f32.xlu1 %v3883_v7 }
 0x408   : > { %v12450_v24 = vadd.f32 %v3623_v16, %v12427_v1 }
 0x409   : > { %v3504_v58 = vpop.f32.mrf.mxu0 }
 0x40a   : > { %v3192_v4 = vpop.f32.mrf.mxu3  ;;  %v3874_v8 = vsel %vm3666_vm0, %v12450_v24, -inf }
 0x40d   : > { %v3325_v23 = vpop.f32.mrf.mxu2  ;;  %v3456_v34 = vpop.f32.mrf.mxu1 }
 0x40f   : > { %3875 = vmax.xlane.f32.xlu1 %v3874_v8  ;;  %2499 = vrot.lane.b32.xlu0 %v12452_v53, %s10889_s8 }
 0x411   : > { %v3566_v47 = vpop.f32.mrf.mxu0 }
 0x412   : > { %v12458_v59 = vpop.f32.mrf.mxu3  ;;  %v3630_v22 = vmul.f32 0.17677669, %v3566_v47 }
 0x414   : > { %v12476_v16 = vadd.f32 %v3630_v22, %v12409_v32 }
 0x415   : > { %v12460_v41 = vpop.f32.mrf.mxu2  ;;  %v3518_v2 = vpop.f32.mrf.mxu1 }
 0x416   : > { %v3627_v15 = vmul.f32 0.17677669, %v3518_v2  ;;  %v3895_v49 = vsel %vm3666_vm0, %v12476_v16, -inf }
 0x418   : > { %v12463_v9 = vadd.f32 %v3627_v15, %v12427_v1 }
 0x419   : > { %v3568_v35 = vpop.f32.mrf.mxu0  ;;  %v12486_v34 = vpop.xlane.xlu1 %3668 }
 0x41a   : > { %v3268_v46 = vpop.f32.mrf.mxu3  ;;  %v3886_v60 = vsel %vm3666_vm0, %v12463_v9, -inf }
 0x41b   : > { %3887 = vmax.xlane.f32.xlu2 %v3886_v60  ;;  %v3681_v60 = vpop.xlane.xlu2 %3680 }
 0x41d   : > { %v3408_v43 = vpop.f32.mrf.mxu2  ;;  %v3520_v10 = vpop.f32.mrf.mxu1 }
 0x422   : > { %v12467_v25 = vpop.f32.mrf.mxu3 }
 0x425   : > { %v12469_v42 = vpop.f32.mrf.mxu2  ;;  %v3582_v27 = vpop.f32.mrf.mxu1 }
 0x426   : > { %v3631_v23 = vmul.f32 0.17677669, %v3582_v27 }
 0x428   : > { %2505 = vrot.lane.b32.xlu1 %v14704_v52, %s10888_s13  ;;  %v12489_v2 = vadd.f32 %v3631_v23, %v12427_v1 }
 0x42a   : > { %v3344_v48 = vpop.f32.mrf.mxu3  ;;  %v3898_v15 = vsel %vm3666_vm0, %v12489_v2, -inf }
 0x42d   : > { %v3472_v50 = vpop.f32.mrf.mxu2  ;;  %v3584_v40 = vpop.f32.mrf.mxu1 }
 0x42e   : > { %v12498_v50 = vpop.xlane.xlu0 %3692 }
 0x432   : > { %v12473_v63 = vpop.f32.mrf.mxu3 }
 0x435   : > { %v12478_v7 = vpop.f32.mrf.mxu2 }
 0x437   : > { %v12500_v40 = vpop.xlane.xlu2 %3671 }
 0x439   : > { %3896 = vmax.xlane.f32.xlu0 %v3895_v49 }
 0x43a   : > { %v3424_v56 = vpop.f32.mrf.mxu3 }
 0x43b   : > { %v12506_v56 = vpop.xlane.xlu0 %3683 }
 0x43d   : > { %v3536_v17 = vpop.f32.mrf.mxu2 }
 0x442   : > { %v12482_v58 = vpop.f32.mrf.mxu3 }
 0x445   : > { %v12484_v4 = vpop.f32.mrf.mxu2 }
 0x44a   : > { %v3488_v8 = vpop.f32.mrf.mxu3 }
 0x44d   : > { %v3600_v47 = vpop.f32.mrf.mxu2 }
 0x44e   : > { %v12493_v35 = vpop.xlane.xlu1 %3695 }
 0x452   : > { %3899 = vmax.xlane.f32.xlu1 %v3898_v15  ;;  %v12495_v46 = vpop.f32.mrf.mxu3 }
 0x45a   : > { %v3861_v43 = vpop.xlane.xlu1 %3860  ;;  %v3552_v10 = vpop.f32.mrf.mxu3 }
 0x45b   : > { %v3907_v27 = vsub.f32 %v12414_v30, %v3861_v43 }
 0x45d   : > { %v3923_v48 = vmul.f32 1.442695, %v3907_v27 }
 0x45f   : > { %10130 = vpow2.f32 %v3923_v48 }
 0x462   : > { %v12502_v22 = vpop.f32.mrf.mxu3 }
 0x465   : > { %v12504_v49 = vpop.eup %10130 }
 0x466   : > { %v3955_v17 = vsel %vm3666_vm0, %v12504_v49, 0.0 }
 0x467   : > { %3956 = vadd.xlane.f32.xlu2 %v3955_v17 }
 0x46a   : > { %v3873_v23 = vpop.xlane.xlu2 %3872  ;;  %v3616_v8 = vpop.f32.mrf.mxu3 }
 0x46b   : > { %v3911_v30 = vsub.f32 %v12425_v18, %v3873_v23 }
 0x46d   : > { %v3931_v47 = vmul.f32 1.442695, %v3911_v30 }
 0x46e   : > { %v3864_v15 = vpop.xlane.xlu0 %3863 }
 0x46f   : > { %10132 = vpow2.f32 %v3931_v47  ;;  %v3908_v43 = vsub.f32 %v12434_v0, %v3864_v15 }
 0x471   : > { %v3925_v10 = vmul.f32 1.442695, %v3908_v43 }
 0x473   : > { %10134 = vpow2.f32 %v3925_v10 }
 0x475   : > { %v12512_v27 = vpop.eup %10132 }
 0x476   : > { %v3967_v48 = vsel %vm3666_vm0, %v12512_v27, 0.0 }
 0x477   : > { %3968 = vadd.xlane.f32.xlu0 %v3967_v48 }
 0x479   : > { %v12516_v20 = vpop.eup %10134 }
 0x47a   : > { %v3885_v5 = vpop.xlane.xlu1 %3884  ;;  %v3958_v18 = vsel %vm3666_vm0, %v12516_v20, 0.0 }
 0x47b   : > { %v3915_v17 = vsub.f32 %v12441_v62, %v3885_v5 }
 0x47d   : > { %v3939_v8 = vmul.f32 1.442695, %v3915_v17 }
 0x47f   : > { %10136 = vpow2.f32 %v3939_v8  ;;  %3959 = vadd.xlane.f32.xlu0 %v3958_v18 }
 0x481   : > { %v12537_v8 = vpop.permute.xlu0 %2499 }
 0x482   : > { %v3876_v0 = vpop.xlane.xlu1 %3875 }
 0x483   : > { %v3912_v23 = vsub.f32 %v12450_v24, %v3876_v0 }
 0x485   : > { %v12522_v30 = vpop.eup %10136  ;;  %v3933_v47 = vmul.f32 1.442695, %v3912_v23 }
 0x486   : > { %v3979_v15 = vsel %vm3666_vm0, %v12522_v30, 0.0 }
 0x487   : > { %10138 = vpow2.f32 %v3933_v47  ;;  %3980 = vadd.xlane.f32.xlu1 %v3979_v15  ;;  %v3719_v47 = vsub.f32 %v12343_v26, %v3681_v60  ;;  %v3359_v15 = vmul.f32 0.17677669, %v12418_v21  ;;  %v3716_v60 = vsub.f32 %v12394_v36, %v12500_v40 }
 0x488   : > { %v3620_v40 = vmul.f32 0.17677669, %v12460_v41  ;;  %v3720_v41 = vsub.f32 %v12384_v31, %v12506_v56 }
 0x48d   : > { %v12526_v43 = vpop.eup %10138 }
 0x48e   : > { %v3970_v5 = vsel %vm3666_vm0, %v12526_v43, 0.0  ;;  %v3888_v62 = vpop.xlane.xlu2 %3887 }
 0x48f   : > { %3971 = vadd.xlane.f32.xlu1 %v3970_v5  ;;  %v3916_v10 = vsub.f32 %v12463_v9, %v3888_v62  ;;  %v3739_v62 = vmul.f32 1.442695, %v3719_v47  ;;  %v3733_v47 = vmul.f32 1.442695, %v3716_v60  ;;  %v3625_v60 = vmul.f32 0.17677669, %v12482_v58 }
 0x491   : > { %v3941_v48 = vmul.f32 1.442695, %v3916_v10  ;;  %v12603_v31 = vadd.f32 %v3625_v60, %v12427_v1 }
 0x493   : > { %10140 = vpow2.f32 %v3941_v48  ;;  %2507 = vrot.lane.b32.xlu0 %v12452_v53, %s10888_s13  ;;  %v3724_v48 = vsub.f32 %v12403_v19, %v12493_v35 }
 0x495   : > { %v3749_v26 = vmul.f32 1.442695, %v3724_v48 }
 0x499   : > { %v12533_v24 = vpop.eup %10140 }
 0x49a   : > { %v3982_v17 = vsel %vm3666_vm0, %v12533_v24, 0.0  ;;  %v12550_v10 = vpop.permute.xlu1 %2505 }
 0x49b   : > { %3983 = vadd.xlane.f32.xlu2 %v3982_v17 }
 0x4a8   : > { %2515 = vrot.lane.b32.xlu1 %v12452_v53, %s10887_s5 }
 0x4ac   : > { %v3897_v18 = vpop.xlane.xlu0 %3896 }
 0x4ad   : > { %v3919_v0 = vsub.f32 %v12476_v16, %v3897_v18  ;;  %v12553_v16 = vadd.f32 %v3359_v15, %v12381_v57 }
 0x4af   : > { %v3947_v9 = vmul.f32 1.442695, %v3919_v0  ;;  %v3706_v17 = vsel %vm3666_vm0, %v12553_v16, -inf  ;;  %v3358_v0 = vmul.f32 0.17677669, %v12372_v33 }
 0x4b1   : > { %10142 = vpow2.f32 %v3947_v9  ;;  %v12568_v35 = vadd.f32 %v3358_v0, %v12333_v44 }
 0x4b2   : > { %10144 = vpow2.f32 %v3739_v62 }
 0x4b3   : > { %2513 = vrot.lane.b32.xlu2 %v14704_v52, %s10887_s5  ;;  %10146 = vpow2.f32 %v3749_v26  ;;  %v3703_v33 = vsel %vm3666_vm0, %v12568_v35, -inf  ;;  %v12586_v26 = vadd.f32 %v3620_v40, %v12409_v32  ;;  %v3632_v40 = vmul.f32 0.17677669, %v12484_v4 }
 0x4b4   : > { %10148 = vpow2.f32 %v3733_v47  ;;  %v3741_v47 = vmul.f32 1.442695, %v3720_v41 }
 0x4b5   : > { %v3865_v0 = vsel %vm3666_vm0, %v12586_v26, -inf }
 0x4b7   : > { %v12544_v23 = vpop.eup %10142 }
 0x4b8   : > { %v3991_v5 = vsel %vm3666_vm0, %v12544_v23, 0.0  ;;  %v12561_v18 = vpop.eup %10144 }
 0x4b9   : > { %v3775_v19 = vsel %vm3666_vm0, %v12561_v18, 0.0  ;;  %v12572_v36 = vpop.eup %10146 }
 0x4ba   : > { %v3790_v48 = vsel %vm3666_vm0, %v12572_v36, 0.0 }
 0x4bd   : > { %3992 = vadd.xlane.f32.xlu0 %v3991_v5  ;;  %v3723_v5 = vsub.f32 %v12349_v28, %v12498_v50 }
 0x4bf   : > { %v3747_v62 = vmul.f32 1.442695, %v3723_v5 }
 0x4c5   : > { %3707 = vmax.xlane.f32.xlu0 %v3706_v17  ;;  %v3900_v21 = vpop.xlane.xlu1 %3899  ;;  %v12581_v17 = vpop.eup %10148 }
 0x4c6   : > { %v3920_v9 = vsub.f32 %v12489_v2, %v3900_v21  ;;  %v3715_v2 = vsub.f32 %v12362_v61, %v12486_v34  ;;  %v3766_v61 = vsel %vm3666_vm0, %v12581_v17, 0.0 }
 0x4c8   : > { %v3949_v15 = vmul.f32 1.442695, %v3920_v9  ;;  %v3731_v28 = vmul.f32 1.442695, %v3715_v2 }
 0x4ca   : > { %10150 = vpow2.f32 %v3949_v15 }
 0x4cb   : > { %10152 = vpow2.f32 %v3747_v62 }
 0x4cc   : > { %10154 = vpow2.f32 %v3731_v28 }
 0x4cd   : > { %3776 = vadd.xlane.f32.xlu0 %v3775_v19  ;;  %v2997_v19 = vunpack.c.l.b16 %v12323_v38 }
 0x4d0   : > { %v12583_v50 = vpop.eup %10150 }
 0x4d1   : > { %v3994_v21 = vsel %vm3666_vm0, %v12583_v50, 0.0  ;;  %v12597_v9 = vpop.eup %10152 }
 0x4d2   : > { %3704 = vmax.xlane.f32.xlu1 %v3703_v33  ;;  %v12600_v15 = vpop.eup %10154  ;;  %v3787_v5 = vsel %vm3666_vm0, %v12597_v9, 0.0  ;;  %v3033_v33 = vpack.c.b16 %v2997_v19, %v2997_v19 }
 0x4d3   : > { %v3763_v2 = vsel %vm3666_vm0, %v12600_v15, 0.0 }
 0x4d4   : > { %v4208_v28 = vsel %vm4054_vm15, %v3033_v33, 0 }
 0x4d5   : > { %3791 = vadd.xlane.f32.xlu0 %v3790_v48  ;;  %v3880_v48 = vsel %vm3666_vm0, %v12603_v31, -inf }
 0x4da   : > { %v3957_v34 = vpop.xlane.xlu2 %3956  ;;  %3767 = vadd.xlane.f32.xlu1 %v3766_v61 }
 0x4db   : > { %10156 = vrcp.f32 %v3957_v34 }
 0x4dc   : > { %3995 = vadd.xlane.f32.xlu2 %v3994_v21  ;;  %10158 = vpow2.f32 %v3741_v47  ;;  %v2999_v21 = vunpack.c.l.b16 %v12325_v3 }
 0x4dd   : > { %3866 = vmax.xlane.f32.xlu0 %v3865_v0 }
 0x4de   : > { %v3037_v19 = vpack.c.b16 %v2999_v21, %v2999_v21  ;;  %v3000_v21 = vunpack.c.l.b16 %v12364_v11 }
 0x4e1   : > { %v10157_v56 = vpop.eup %10156 }
 0x4e2   : > { %v4019_v58 = vmul.f32 %v10157_v56, %v12504_v49  ;;  %3788 = vadd.xlane.f32.xlu1 %v3787_v5  ;;  %v12615_v61 = vpop.eup %10158  ;;  %v12618_v49 = vadd.f32 %v3632_v40, %v12409_v32  ;;  %v4284_v5 = vsel %vm4054_vm15, %v3037_v19, 0  ;;  %v14705_v19 = vld [vmem:[#allocation54_spill] sm:$0xff] }
 0x4e3   : > { %v3778_v4 = vsel %vm3666_vm0, %v12615_v61, 0.0 }
 0x4e4   : > { %v4035_v62 = vpack.c.bf16 %v4019_v58, %v4019_v58  ;;  %3764 = vadd.xlane.f32.xlu2 %v3763_v2  ;;  %v3901_v34 = vsel %vm3666_vm0, %v12618_v49, -inf  ;;  %v2998_v58 = vunpack.c.l.b16 %v12359_v14 }
 0x4e5   : > { %3881 = vmax.xlane.f32.xlu0 %v3880_v48 }
 0x4e6   : > { %9376 = vmatmul.msk.bf16.vlgmr.msrb.gmra.mxu0 %vm3666_vm0, %v4035_v62  ;;  %v3034_v62 = vpack.c.b16 %v2998_v58, %v2998_v58 }
 0x4e7   : > { %4217 = vmatpush.bf16.msrb.mxu0 %v4208_v28 }
 0x4ea   : > { %v3969_v41 = vpop.xlane.xlu0 %3968 }
 0x4eb   : > { %10160 = vrcp.f32 %v3969_v41 }
 0x4ec   : > { %3779 = vadd.xlane.f32.xlu2 %v3778_v4 }
 0x4ed   : > { %3902 = vmax.xlane.f32.xlu0 %v3901_v34 }
 0x4f1   : > { %v10161_v60 = vpop.eup %10160 }
 0x4f2   : > { %v4023_v0 = vmul.f32 %v10161_v60, %v12512_v27  ;;  %v3960_v47 = vpop.xlane.xlu0 %3959  ;;  %v4227_v27 = vsel %vm4054_vm15, %v3034_v62, 0 }
 0x4f3   : > { %10162 = vrcp.f32 %v3960_v47 }
 0x4f4   : > { %v4039_v56 = vpack.c.bf16 %v4023_v0, %v4023_v0  ;;  %v3038_v0 = vpack.c.b16 %v3000_v21, %v3000_v21 }
 0x4f6   : > { %9380 = vmatmul.msk.bf16.vlgmr.msra.gmra.mxu0 %vm3666_vm0, %v4039_v56  ;;  %v2525_v56 = vshrl.u32 %v14705_v19, 16 }
 0x4f7   : > { %4293 = vmatpush.bf16.msra.mxu0 %v4284_v5  ;;  %v4303_v5 = vsel %vm4054_vm15, %v3038_v0, 0 }
 0x4f9   : > { %v10163_v33 = vpop.eup %10162 }
 0x4fa   : > { %v4020_v2 = vmul.f32 %v10163_v33, %v12516_v20  ;;  %v3981_v40 = vpop.xlane.xlu1 %3980  ;;  %v2523_v33 = vpack.i.b16 %v14705_v19, %v14704_v52 }
 0x4fb   : > { %10164 = vrcp.f32 %v3981_v40 }
 0x4fc   : > { %v4036_v48 = vpack.c.bf16 %v4020_v2, %v4020_v2  ;;  %v2573_v62 = vperm.slane %v2523_v33, %v11473_v12 }
 0x4fe   : > { %9377 = vmatmul.msk.bf16.vlgmr.msrb.gmra.mxu1 %vm3666_vm0, %v4036_v48 }
 0x4ff   : > { %4236 = vmatpush.bf16.msrb.mxu1 %v4227_v27  ;;  %v2537_v27 = vshrl.u32 %v12537_v8, 16 }
 0x501   : > { %v10165_v28 = vpop.eup %10164 }
 0x502   : > { %v4027_v41 = vmul.f32 %v10165_v28, %v12522_v30  ;;  %v3972_v4 = vpop.xlane.xlu1 %3971  ;;  %v2524_v30 = vshrl.u32 %v14704_v52, 16  ;;  %v2536_v52 = vshrl.u32 %v12452_v53, 16 }
 0x503   : > { %10166 = vrcp.f32 %v3972_v4  ;;  %v2530_v4 = vshrl.u32 %v12550_v10, 16 }
 0x504   : > { %v4043_v34 = vpack.c.bf16 %v4027_v41, %v4027_v41  ;;  %v2526_v2 = vpack.i.b16 %v2525_v56, %v2524_v30 }
 0x505   : > { %v2508_v0 = vpop.permute.xlu0 %2507 }
 0x506   : > { %9384 = vmatmul.msk.bf16.vlgmr.msrb.gmra.mxu0 %vm3666_vm0, %v4043_v34  ;;  %v2599_v48 = vperm.slane %v2526_v2, %v11473_v12 }
 0x508   : > { %v2607_v56 = vrot.slane %v2599_v48, 4 }
 0x509   : > { %v10167_v20 = vpop.eup %10166 }
 0x50a   : > { %v4024_v60 = vmul.f32 %v10167_v20, %v12526_v43  ;;  %v2535_v43 = vpack.i.b16 %v12537_v8, %v12452_v53 }
 0x50c   : > { %v4040_v47 = vpack.c.bf16 %v4024_v60, %v4024_v60  ;;  %v2625_v28 = vperm.slane %v2535_v43, %v11473_v12  ;;  %v2581_v60 = vrot.slane %v2573_v62, 4  ;;  %v2542_v43 = vshrl.u32 %v2508_v0, 16 }
 0x50e   : > { %9381 = vmatmul.msk.bf16.vlgmr.msra.gmra.mxu1 %vm3666_vm0, %v4040_v47  ;;  %v3984_v58 = vpop.xlane.xlu2 %3983  ;;  %v2633_v8 = vrot.slane %v2625_v28, 4 }
 0x50f   : > { %4312 = vmatpush.bf16.msra.mxu1 %v4303_v5  ;;  %10168 = vrcp.f32 %v3984_v58  ;;  %v2538_v5 = vpack.i.b16 %v2537_v27, %v2536_v52 }
 0x515   : > { %v10169_v40 = vpop.eup %10168 }
 0x516   : > { %v2514_v41 = vpop.permute.xlu2 %2513  ;;  %v4028_v20 = vmul.f32 %v10169_v40, %v12533_v24 }
 0x517   : > { %v2529_v34 = vpack.i.b16 %v2514_v41, %v12550_v10  ;;  %v2531_v21 = vshrl.u32 %v2514_v41, 16 }
 0x518   : > { %v4044_v41 = vpack.c.bf16 %v4028_v20, %v4028_v20 }
 0x519   : > { %v2532_v47 = vpack.i.b16 %v2531_v21, %v2530_v4  ;;  %v2578_v19 = vperm.slane %v2529_v34, %v11473_v12  ;;  %v2651_v21 = vperm.slane %v2538_v5, %v11473_v12 }
 0x51a   : > { %v2516_v58 = vpop.permute.xlu1 %2515 }
 0x51b   : > { %v2579_v30 = vrot.slane %v2578_v19, 4  ;;  %v2582_v33 = vsel %vm1603_vm13, %v2578_v19, %v2581_v60  ;;  %v2604_v2 = vperm.slane %v2532_v47, %v11473_v12  ;;  %v2541_v10 = vpack.i.b16 %v2516_v58, %v2508_v0 }
 0x51c   : > { %v2590_v53 = vperm.slane %v2582_v33, %v11478_v29  ;;  %v2543_v24 = vshrl.u32 %v2516_v58, 16 }
 0x51d   : > { %v2580_v40 = vsel %vm1603_vm13, %v2579_v30, %v2573_v62  ;;  %v2605_v4 = vrot.slane %v2604_v2, 4  ;;  %v2608_v34 = vsel %vm1603_vm13, %v2604_v2, %v2607_v56  ;;  %v2630_v27 = vperm.slane %v2541_v10, %v11473_v12 }
 0x51e   : > { %v2586_v52 = vperm.slane %v2580_v40, %v11478_v29  ;;  %v2593_v60 = vrot.slane %v2590_v53, 4  ;;  %v2616_v47 = vperm.slane %v2608_v34, %v11478_v29  ;;  %9385 = vmatmul.msk.bf16.vlgmr.msrb.gmra.mxu1 %vm3666_vm0, %v4044_v41  ;;  %v2544_v0 = vpack.i.b16 %v2543_v24, %v2542_v43 }
 0x51f   : > { %v2606_v20 = vsel %vm1603_vm13, %v2605_v4, %v2599_v48  ;;  %v2631_v19 = vrot.slane %v2630_v27, 4  ;;  %v2634_v62 = vsel %vm1603_vm13, %v2630_v27, %v2633_v8  ;;  %v2659_v24 = vrot.slane %v2651_v21, 4 }
 0x520   : > { %v2591_v58 = vrot.slane %v2586_v52, 4  ;;  %v2594_v56 = vsel %vm1603_vm13, 0, %v2593_v60  ;;  %v2612_v30 = vperm.slane %v2606_v20, %v11478_v29  ;;  %v2619_v33 = vrot.slane %v2616_v47, 4 }
 0x521   : > { %v2782_v5 = vrot.slane %v2594_v56, 4  ;;  %v2632_v2 = vsel %vm1603_vm13, %v2631_v19, %v2625_v28  ;;  %v2642_v10 = vperm.slane %v2634_v62, %v11478_v29  ;;  %v2656_v4 = vperm.slane %v2544_v0, %v11473_v12 }
 0x522   : > { %v2592_v53 = vsel %vm1603_vm13, 0, %v2591_v58  ;;  %v2617_v41 = vrot.slane %v2612_v30, 4  ;;  %v2620_v48 = vsel %vm1603_vm13, 0, %v2619_v33  ;;  %v2638_v43 = vperm.slane %v2632_v2, %v11478_v29 }
 0x523   : > { %v2801_v8 = vrot.slane %v2620_v48, 4  ;;  %v2645_v40 = vrot.slane %v2642_v10, 4  ;;  %v2783_v47 = vsel %vm1603_vm13, %v2782_v5, %v2592_v53  ;;  %v2777_v28 = vsel %vm1603_vm13, %v2593_v60, %v2586_v52 }
 0x524   : > { %v2618_v34 = vsel %vm1603_vm13, 0, %v2617_v41  ;;  %v2643_v27 = vrot.slane %v2638_v43, 4  ;;  %v2657_v19 = vrot.slane %v2656_v4, 4  ;;  %v2660_v62 = vsel %vm1603_vm13, %v2656_v4, %v2659_v24 }
 0x525   : > { %v2646_v20 = vsel %vm1603_vm13, 0, %v2645_v40  ;;  %v2668_v56 = vperm.slane %v2660_v62, %v11478_v29  ;;  %v2796_v10 = vsel %vm1603_vm13, %v2619_v33, %v2612_v30  ;;  %v2815_v41 = vsel %vm1603_vm13, %v2645_v40, %v2638_v43 }
 0x526   : > { %v2644_v58 = vsel %vm1603_vm13, 0, %v2643_v27  ;;  %v2820_v2 = vrot.slane %v2646_v20, 4  ;;  %v2658_v0 = vsel %vm1603_vm13, %v2657_v19, %v2651_v21  ;;  %v2787_v5 = vperm.slane %v2783_v47, %v11473_v12 }
 0x527   : > { %v2802_v52 = vsel %vm1603_vm13, %v2801_v8, %v2618_v34  ;;  %v2664_v60 = vperm.slane %v2658_v0, %v11478_v29  ;;  %v2671_v53 = vrot.slane %v2668_v56, 4  ;;  %v2781_v4 = vperm.slane %v2777_v28, %v11473_v12 }
 0x528   : > { %v2821_v48 = vsel %vm1603_vm13, %v2820_v2, %v2644_v58  ;;  %v2806_v24 = vperm.slane %v2802_v52, %v11473_v12  ;;  %v2788_v27 = vrot.slane %v2787_v5, 4  ;;  %v2800_v43 = vperm.slane %v2796_v10, %v11473_v12 }
 0x529   : > { %v2825_v30 = vperm.slane %v2821_v48, %v11473_v12  ;;  %v2669_v33 = vrot.slane %v2664_v60, 4  ;;  %v2672_v21 = vsel %vm1603_vm13, 0, %v2671_v53  ;;  %v2819_v8 = vperm.slane %v2815_v41, %v11473_v12 }
 0x52a   : > { %v2807_v40 = vrot.slane %v2806_v24, 4  ;;  %v2839_v34 = vrot.slane %v2672_v21, 4  ;;  %v2789_v47 = vsel %vm1603_vm13, %v2788_v27, %v2781_v4  ;;  %v2834_v58 = vsel %vm1603_vm13, %v2671_v53, %v2664_v60 }
 0x52b   : > { %v2826_v20 = vrot.slane %v2825_v30, 4  ;;  %v2670_v19 = vsel %vm1603_vm13, 0, %v2669_v33  ;;  %v12696_v62 = vperm.slane %v2789_v47, %v11478_v29  ;;  %v2838_v60 = vperm.slane %v2834_v58, %v11473_v12 }
 0x52c   : > { %v2808_v28 = vsel %vm1603_vm13, %v2807_v40, %v2800_v43  ;;  %v2840_v10 = vsel %vm1603_vm13, %v2839_v34, %v2670_v19 }
 0x52d   : > { %v12701_v56 = vperm.slane %v2808_v28, %v11478_v29  ;;  %v2827_v2 = vsel %vm1603_vm13, %v2826_v20, %v2819_v8  ;;  %v2844_v0 = vperm.slane %v2840_v10, %v11473_v12  ;;  %v2932_v5 = vshrl.u32 %v12696_v62, 16 }
 0x52e   : > { %v12711_v24 = vperm.slane %v2827_v2, %v11478_v29 }
 0x52f   : > { %v2931_v41 = vpack.i.b16 %v12701_v56, %v12696_v62  ;;  %v2933_v52 = vshrl.u32 %v12701_v56, 16  ;;  %v2845_v53 = vrot.slane %v2844_v0, 4 }
 0x530   : > { %v3993_v48 = vpop.xlane.xlu0 %3992  ;;  %v2944_v8 = vshrl.u32 %v12711_v24, 16 }
 0x531   : > { %10170 = vrcp.f32 %v3993_v48  ;;  %v4360_v4 = vsel %vm4054_vm15, %v2931_v41, 0  ;;  %v3001_v27 = vunpack.c.l.b16 %v2931_v41  ;;  %v2934_v30 = vpack.i.b16 %v2933_v52, %v2932_v5 }
 0x532   : > { %4369 = vmatpush.bf16.msrb.mxu0 %v4360_v4  ;;  %v2846_v33 = vsel %vm1603_vm13, %v2845_v53, %v2838_v60 }
 0x533   : > { %v12717_v21 = vperm.slane %v2846_v33, %v11478_v29  ;;  %v3027_v43 = vpack.c.b16 %v3001_v27, %v3001_v27  ;;  %v3003_v40 = vunpack.c.l.b16 %v2934_v30 }
 0x535   : > { %v2943_v34 = vpack.i.b16 %v12717_v21, %v12711_v24  ;;  %v4094_v47 = vsel %vm4054_vm15, %v3027_v43, 0  ;;  %v3031_v20 = vpack.c.b16 %v3003_v40, %v3003_v40  ;;  %v2945_v19 = vshrl.u32 %v12717_v21, 16 }
 0x536   : > { %4103 = vmatpush.bf16.msra.mxu2 %v4094_v47  ;;  %v4436_v43 = vsel %vm4054_vm15, %v2934_v30, 0 }
 0x537   : > { %v10171_v28 = vpop.eup %10170  ;;  %v4379_v58 = vsel %vm4054_vm15, %v2943_v34, 0  ;;  %v3002_v2 = vunpack.c.l.b16 %v2943_v34  ;;  %v4170_v10 = vsel %vm4054_vm15, %v3031_v20, 0  ;;  %v2946_v0 = vpack.i.b16 %v2945_v19, %v2944_v8 }
 0x538   : > { %v4031_v41 = vmul.f32 %v10171_v28, %v12544_v23  ;;  %4388 = vmatpush.bf16.msrb.mxu1 %v4379_v58  ;;  %v3708_v5 = vpop.xlane.xlu0 %3707  ;;  %v3624_v8 = vmul.f32 0.17677669, %v12469_v42  ;;  %v3629_v58 = vmul.f32 0.17677669, %v12495_v46 }
 0x539   : > { %v3728_v52 = vsub.f32 %v12553_v16, %v3708_v5  ;;  %v3028_v48 = vpack.c.b16 %v3002_v2, %v3002_v2  ;;  %v3004_v60 = vunpack.c.l.b16 %v2946_v0  ;;  %v3621_v5 = vmul.f32 0.17677669, %v12473_v63 }
 0x53a   : > { %4179 = vmatpush.bf16.msrb.mxu2 %v4170_v10  ;;  %v4047_v53 = vpack.c.bf16 %v4031_v41, %v4031_v41  ;;  %v12743_v28 = vadd.f32 %v3624_v8, %v12409_v32  ;;  %v2813_v63 = vrot.slane %v12701_v56, 4 }
 0x53b   : > { %v3757_v4 = vmul.f32 1.442695, %v3728_v52  ;;  %v4113_v27 = vsel %vm4054_vm15, %v3028_v48, 0  ;;  %v3032_v33 = vpack.c.b16 %v3004_v60, %v3004_v60 }
 0x53c   : > { %4122 = vmatpush.bf16.msrb.mxu3 %v4113_v27  ;;  %9388 = vmatmul.msk.bf16.vlgmr.msra.gmra.mxu0 %vm3666_vm0, %v4047_v53  ;;  %v3877_v2 = vsel %vm3666_vm0, %v12743_v28, -inf  ;;  %v12760_v53 = vadd.f32 %v3621_v5, %v12427_v1  ;;  %v2814_v56 = vsel %vm1603_vm13, 0, %v2813_v63 }
 0x53d   : > { %10172 = vpow2.f32 %v3757_v4  ;;  %v4189_v23 = vsel %vm4054_vm15, %v3032_v33, 0  ;;  %4445 = vmatpush.bf16.msra.mxu0 %v4436_v43 }
 0x53e   : > { %v3868_v8 = vsel %vm3666_vm0, %v12760_v53, -inf }
 0x540   : > { %4198 = vmatpush.bf16.msra.mxu3 %v4189_v23  ;;  %v12732_v40 = vpop.xlane.xlu0 %3776 }
 0x543   : > { %v12734_v16 = vpop.eup %10172 }
 0x544   : > { %v3802_v34 = vsel %vm3666_vm0, %v12734_v16, 0.0 }
 0x545   : > { %3803 = vadd.xlane.f32.xlu1 %v3802_v34  ;;  %v3705_v47 = vpop.xlane.xlu1 %3704  ;;  %v2794_v34 = vrot.slane %v12696_v62, 4 }
 0x546   : > { %v3727_v20 = vsub.f32 %v12568_v35, %v3705_v47  ;;  %v12751_v35 = vadd.f32 %v3629_v58, %v12427_v1 }
 0x547   : > { %v2795_v58 = vsel %vm1603_vm13, 0, %v2794_v34 }
 0x548   : > { %v3755_v19 = vmul.f32 1.442695, %v3727_v20  ;;  %v12740_v30 = vpop.xlane.xlu0 %3791  ;;  %v3892_v60 = vsel %vm3666_vm0, %v12751_v35, -inf  ;;  %v3349_v20 = vmul.f32 0.17677669, %v12422_v37 }
 0x54a   : > { %10174 = vpow2.f32 %v3755_v19  ;;  %v12784_v37 = vadd.f32 %v3349_v20, %v12381_v57 }
 0x54d   : > { %3878 = vmax.xlane.f32.xlu1 %v3877_v2  ;;  %v3768_v43 = vpop.xlane.xlu1 %3767 }
 0x54f   : > { %v3996_v42 = vpop.xlane.xlu2 %3995 }
 0x550   : > { %v12748_v10 = vpop.eup %10174  ;;  %v3867_v41 = vpop.xlane.xlu0 %3866  ;;  %10176 = vrcp.f32 %v3996_v42  ;;  %v12781_v42 = vpack.i.b16 %v2814_v56, %v2795_v58 }
 0x551   : > { %v3909_v52 = vsub.f32 %v12586_v26, %v3867_v41  ;;  %v3799_v48 = vsel %vm3666_vm0, %v12748_v10, 0.0  ;;  %v3628_v26 = vmul.f32 0.17677669, %v12478_v7  ;;  %v3633_v41 = vmul.f32 0.17677669, %v12502_v22 }
 0x552   : > { %3800 = vadd.xlane.f32.xlu2 %v3799_v48  ;;  %v2832_v48 = vrot.slane %v12711_v24, 4  ;;  %v3676_v22 = vsel %vm3666_vm0, %v12784_v37, -inf }
 0x553   : > { %v3927_v46 = vmul.f32 1.442695, %v3909_v52  ;;  %v12777_v19 = vadd.f32 %v3628_v26, %v12409_v32  ;;  %v3348_v26 = vmul.f32 0.17677669, %v12411_v39 }
 0x555   : > { %10178 = vpow2.f32 %v3927_v46  ;;  %3893 = vmax.xlane.f32.xlu1 %v3892_v60  ;;  %v3889_v52 = vsel %vm3666_vm0, %v12777_v19, -inf  ;;  %v3352_v60 = vmul.f32 0.17677669, %v12416_v51 }
 0x556   : > { %v10177_v4 = vpop.eup %10176 }
 0x557   : > { %v4032_v27 = vmul.f32 %v10177_v4, %v12583_v50  ;;  %v3765_v33 = vpop.xlane.xlu2 %3764  ;;  %v4455_v50 = vsel %vm4054_vm15, %v2946_v0, 0  ;;  %v2851_v0 = vrot.slane %v12717_v21, 4 }
 0x558   : > { %10180 = vrcp.f32 %v3765_v33  ;;  %v3882_v24 = vpop.xlane.xlu0 %3881  ;;  %v2833_v33 = vsel %vm1603_vm13, 0, %v2832_v48 }
 0x559   : > { %v4048_v23 = vpack.c.bf16 %v4032_v27, %v4032_v27  ;;  %10182 = vrcp.f32 %v3768_v43  ;;  %v2852_v21 = vsel %vm1603_vm13, 0, %v2851_v0  ;;  %v12803_v27 = vadd.f32 %v3633_v41, %v12427_v1  ;;  %v3789_v41 = vpop.xlane.xlu1 %3788 }
 0x55a   : > { %3869 = vmax.xlane.f32.xlu2 %v3868_v8  ;;  %10184 = vrcp.f32 %v12732_v40  ;;  %v12806_v63 = vpack.i.b16 %v2852_v21, %v2833_v33  ;;  %v3914_v51 = vsub.f32 %v12603_v31, %v3882_v24  ;;  %v12810_v40 = vadd.f32 %v3352_v60, %v12333_v44 }
 0x55b   : > { %v12768_v47 = vpop.eup %10178  ;;  %9389 = vmatmul.msk.bf16.vlgmr.msra.gmra.mxu1 %vm3666_vm0, %v4048_v23  ;;  %v2950_v48 = vshrl.u32 %v2833_v33, 16 }
 0x55c   : > { %v3961_v7 = vsel %vm3666_vm0, %v12768_v47, 0.0  ;;  %4464 = vmatpush.bf16.msra.mxu1 %v4455_v50  ;;  %v4531_v34 = vsel %vm4054_vm15, %v12806_v63, 0  ;;  %v2939_v50 = vshrl.u32 %v2814_v56, 16  ;;  %v3937_v31 = vmul.f32 1.442695, %v3914_v51 }
 0x55d   : > { %3962 = vadd.xlane.f32.xlu1 %v3961_v7  ;;  %v3685_v20 = vsel %vm3666_vm0, %v12810_v40, -inf  ;;  %v12822_v7 = vadd.f32 %v3348_v26, %v12333_v44 }
 0x55e   : > { %v10181_v62 = vpop.eup %10180 }
 0x55f   : > { %v3827_v2 = vmul.f32 %v10181_v62, %v12600_v15  ;;  %v10183_v32 = vpop.eup %10182  ;;  %v4512_v15 = vsel %vm4054_vm15, %v12781_v42, 0  ;;  %v3780_v23 = vpop.xlane.xlu2 %3779  ;;  %v2938_v62 = vshrl.u32 %v2795_v58, 16  ;;  %v3673_v56 = vsel %vm3666_vm0, %v12822_v7, -inf }
 0x560   : > { %v3828_v4 = vmul.f32 %v10183_v32, %v12581_v17  ;;  %v3904_v17 = vsel %vm3666_vm0, %v12803_v27, -inf  ;;  %v10185_v8 = vpop.eup %10184  ;;  %10186 = vrcp.f32 %v3780_v23  ;;  %v2951_v32 = vshrl.u32 %v2852_v21, 16 }
 0x561   : > { %v3843_v5 = vpack.c.bf16 %v3827_v2, %v3827_v2  ;;  %v3831_v39 = vmul.f32 %v10185_v8, %v12561_v18  ;;  %v12824_v2 = vpack.i.b16 %v2939_v50, %v2938_v62  ;;  %10188 = vpow2.f32 %v3937_v31 }
 0x562   : > { %3890 = vmax.xlane.f32.xlu2 %v3889_v52  ;;  %v3844_v43 = vpack.c.bf16 %v3828_v4, %v3828_v4  ;;  %10190 = vrcp.f32 %v3789_v41  ;;  %v12836_v60 = vpack.i.b16 %v2951_v32, %v2950_v48 }
 0x563   : > { %v12791_v46 = vpop.f32.mrf.mxu0  ;;  %9392 = vmatmul.msk.bf16.vlgmr.msrb.gmra.mxu0 %vm3666_vm0, %v3843_v5  ;;  %v3847_v0 = vpack.c.bf16 %v3831_v39, %v3831_v39  ;;  %v4588_v18 = vsel %vm4054_vm15, %v12824_v2, 0  ;;  %10192 = vrcp.f32 %v12740_v30 }
 0x564   : > { %4521 = vmatpush.bf16.msrb.mxu0 %v4512_v15  ;;  %v4607_v21 = vsel %vm4054_vm15, %v12836_v60, 0 }
 0x565   : > { %3677 = vmax.xlane.f32.xlu1 %v3676_v22 }
 0x566   : > { %v10187_v5 = vpop.eup %10186 }
 0x567   : > { %v3832_v58 = vmul.f32 %v10187_v5, %v12615_v61  ;;  %v12834_v15 = vpop.eup %10188 }
 0x568   : > { %v3976_v4 = vsel %vm3666_vm0, %v12834_v15, 0.0  ;;  %v10191_v24 = vpop.eup %10190 }
 0x569   : > { %v3848_v22 = vpack.c.bf16 %v3832_v58, %v3832_v58  ;;  %v3835_v61 = vmul.f32 %v10191_v24, %v12597_v9 }
 0x56a   : > { %3905 = vmax.xlane.f32.xlu2 %v3904_v17 }
 0x56b   : > { %v4069_v1 = vpop.f32.mrf.mxu0  ;;  %9393 = vmatmul.msk.bf16.vlgmr.msrb.gmra.mxu1 %vm3666_vm0, %v3844_v43  ;;  %v3851_v33 = vpack.c.bf16 %v3835_v61, %v3835_v61  ;;  %v10193_v43 = vpop.eup %10192 }
 0x56c   : > { %4540 = vmatpush.bf16.msrb.mxu1 %v4531_v34  ;;  %v3836_v8 = vmul.f32 %v10193_v43, %v12572_v36 }
 0x56d   : > { %3686 = vmax.xlane.f32.xlu1 %v3685_v20 }
 0x56e   : > { %v3852_v1 = vpack.c.bf16 %v3836_v8, %v3836_v8  ;;  %v3005_v8 = vunpack.c.l.b16 %v12781_v42 }
 0x572   : > { %3674 = vmax.xlane.f32.xlu2 %v3673_v56 }
 0x573   : > { %v12828_v52 = vpop.f32.mrf.mxu0  ;;  %9396 = vmatmul.msk.bf16.vlgmr.msra.gmra.mxu0 %vm3666_vm0, %v3847_v0 }
 0x574   : > { %4597 = vmatpush.bf16.msra.mxu0 %v4588_v18  ;;  %v3903_v18 = vpop.xlane.xlu0 %3902 }
 0x575   : > { %v3921_v48 = vsub.f32 %v12618_v49, %v3903_v18 }
 0x57a   : > { %3977 = vadd.xlane.f32.xlu2 %v3976_v4 }
 0x57b   : > { %v12840_v51 = vpop.f32.mrf.mxu1  ;;  %v4145_v26 = vpop.f32.mrf.mxu0  ;;  %9397 = vmatmul.msk.bf16.vlgmr.msra.gmra.mxu1 %vm3666_vm0, %v3848_v22 }
 0x57c   : > { %4616 = vmatpush.bf16.msra.mxu1 %v4607_v21  ;;  %v3951_v21 = vmul.f32 1.442695, %v3921_v48 }
 0x583   : > { %v4088_v23 = vpop.f32.mrf.mxu1  ;;  %v12847_v17 = vpop.f32.mrf.mxu0  ;;  %9400 = vmatmul.msk.bf16.vlgmr.msrb.gmra.mxu0 %vm3666_vm0, %v3851_v33 }
 0x58b   : > { %v12851_v34 = vpop.f32.mrf.mxu1  ;;  %v4221_v50 = vpop.f32.mrf.mxu0  ;;  %9401 = vmatmul.msk.bf16.vlgmr.msrb.gmra.mxu1 %vm3666_vm0, %v3852_v1 }
 0x593   : > { %v4164_v31 = vpop.f32.mrf.mxu1 }
 0x59b   : > { %v12854_v30 = vpop.f32.mrf.mxu1 }
 0x5a3   : > { %v4240_v20 = vpop.f32.mrf.mxu1 }
 0x5b8   : > { %v3804_v9 = vpop.xlane.xlu1 %3803 }
 0x5b9   : > { %10194 = vrcp.f32 %v3804_v9  ;;  %v12856_v39 = vpop.f32.mrf.mxu0 }
 0x5bf   : > { %v10195_v62 = vpop.eup %10194 }
 0x5c0   : > { %v3840_v0 = vmul.f32 %v10195_v62, %v12734_v16  ;;  %v3879_v41 = vpop.xlane.xlu1 %3878 }
 0x5c1   : > { %v4297_v56 = vpop.f32.mrf.mxu0  ;;  %v3913_v33 = vsub.f32 %v12743_v28, %v3879_v41 }
 0x5c2   : > { %v3856_v36 = vpack.c.bf16 %v3840_v0, %v3840_v0  ;;  %v3035_v0 = vpack.c.b16 %v3005_v8, %v3005_v8 }
 0x5c3   : > { %v3935_v49 = vmul.f32 1.442695, %v3913_v33 }
 0x5c4   : > { %9405 = vmatmul.msk.bf16.vlgmr.msra.gmra.mxu1 %vm3666_vm0, %v3856_v36  ;;  %v4246_v36 = vsel %vm4054_vm15, %v3035_v0, 0 }
 0x5c5   : > { %v3801_v5 = vpop.xlane.xlu2 %3800 }
 0x5c6   : > { %10196 = vrcp.f32 %v3801_v5 }
 0x5c8   : > { %v3894_v32 = vpop.xlane.xlu1 %3893 }
 0x5c9   : > { %v3918_v58 = vsub.f32 %v12751_v35, %v3894_v32  ;;  %v3353_v32 = vmul.f32 0.17677669, %v12438_v6 }
 0x5cb   : > { %v3945_v22 = vmul.f32 1.442695, %v3918_v58 }
 0x5cc   : > { %v10197_v4 = vpop.eup %10196 }
 0x5cd   : > { %v3839_v24 = vmul.f32 %v10197_v4, %v12748_v10  ;;  %10198 = vpow2.f32 %v3945_v22  ;;  %v3870_v26 = vpop.xlane.xlu2 %3869 }
 0x5ce   : > { %v3910_v16 = vsub.f32 %v12760_v53, %v3870_v26 }
 0x5cf   : > { %v3855_v61 = vpack.c.bf16 %v3839_v24, %v3839_v24 }
 0x5d0   : > { %v3929_v43 = vmul.f32 1.442695, %v3910_v16  ;;  %v3963_v23 = vpop.xlane.xlu1 %3962 }
 0x5d1   : > { %10200 = vrcp.f32 %v3963_v23  ;;  %9404 = vmatmul.msk.bf16.vlgmr.msra.gmra.mxu0 %vm3666_vm0, %v3855_v61 }
 0x5d2   : > { %10202 = vpow2.f32 %v3929_v43 }
 0x5d3   : > { %v12866_v35 = vpop.eup %10198  ;;  %10204 = vpow2.f32 %v3951_v21 }
 0x5d4   : > { %v3988_v10 = vsel %vm3666_vm0, %v12866_v35, 0.0  ;;  %10206 = vpow2.f32 %v3935_v49  ;;  %v3356_v49 = vmul.f32 0.17677669, %v12429_v55 }
 0x5d5   : > { %v3891_v53 = vpop.xlane.xlu2 %3890  ;;  %3989 = vadd.xlane.f32.xlu1 %v3988_v10  ;;  %v3360_v10 = vmul.f32 0.17677669, %v12443_v45 }
 0x5d6   : > { %v3917_v1 = vsub.f32 %v12777_v19, %v3891_v53  ;;  %v3361_v19 = vmul.f32 0.17677669, %v12467_v25  ;;  %v3357_v25 = vmul.f32 0.17677669, %v12458_v59  ;;  %v12924_v45 = vadd.f32 %v3356_v49, %v12333_v44 }
 0x5d7   : > { %v10201_v28 = vpop.eup %10200  ;;  %v12921_v55 = vadd.f32 %v3360_v10, %v12333_v44 }
 0x5d8   : > { %v12872_v50 = vpop.eup %10202  ;;  %v4021_v31 = vmul.f32 %v10201_v28, %v12768_v47  ;;  %v3943_v20 = vmul.f32 1.442695, %v3917_v1  ;;  %v3678_v9 = vpop.xlane.xlu1 %3677  ;;  %v12892_v22 = vadd.f32 %v3361_v19, %v12381_v57  ;;  %v12903_v59 = vadd.f32 %v3357_v25, %v12381_v57 }
 0x5d9   : > { %v12875_v62 = vpop.f32.mrf.mxu1  ;;  %v12877_v41 = vpop.eup %10204  ;;  %v3964_v42 = vsel %vm3666_vm0, %v12872_v50, 0.0  ;;  %v3718_v33 = vsub.f32 %v12784_v37, %v3678_v9 }
 0x5da   : > { %v4037_v56 = vpack.c.bf16 %v4021_v31, %v4021_v31  ;;  %10208 = vpow2.f32 %v3943_v20  ;;  %3965 = vadd.xlane.f32.xlu0 %v3964_v42  ;;  %v3997_v47 = vsel %vm3666_vm0, %v12877_v41, 0.0  ;;  %v12886_v5 = vpop.eup %10206  ;;  %v3712_v61 = vsel %vm3666_vm0, %v12892_v22, -inf }
 0x5db   : > { %v3973_v16 = vsel %vm3666_vm0, %v12886_v5, 0.0  ;;  %v3700_v53 = vsel %vm3666_vm0, %v12903_v59, -inf  ;;  %v3737_v28 = vmul.f32 1.442695, %v3718_v33  ;;  %v3709_v42 = vsel %vm3666_vm0, %v12921_v55, -inf }
 0x5dc   : > { %9378 = vmatmul.msk.bf16.vlgmr.msra.gmra.mxu2 %vm3666_vm0, %v4037_v56  ;;  %v3697_v56 = vsel %vm3666_vm0, %v12924_v45, -inf }
 0x5dd   : > { %4255 = vmatpush.bf16.msra.mxu2 %v4246_v36  ;;  %3998 = vadd.xlane.f32.xlu1 %v3997_v47  ;;  %v3906_v21 = vpop.xlane.xlu2 %3905 }
 0x5de   : > { %v3922_v43 = vsub.f32 %v12803_v27, %v3906_v21 }
 0x5e0   : > { %v12888_v18 = vpop.eup %10208  ;;  %v3687_v58 = vpop.xlane.xlu1 %3686  ;;  %v3953_v37 = vmul.f32 1.442695, %v3922_v43 }
 0x5e1   : > { %v4316_v48 = vpop.f32.mrf.mxu1  ;;  %v3721_v4 = vsub.f32 %v12810_v40, %v3687_v58  ;;  %v4371_v24 = vpop.f32.mrf.mxu0  ;;  %v3985_v26 = vsel %vm3666_vm0, %v12888_v18, 0.0  ;;  %v12906_v40 = vadd.f32 %v3353_v32, %v12381_v57 }
 0x5e2   : > { %3986 = vadd.xlane.f32.xlu2 %v3985_v26  ;;  %3974 = vadd.xlane.f32.xlu0 %v3973_v16  ;;  %v4372_v25 = vadd.f32 %v4371_v24, %v12791_v46 }
 0x5e3   : > { %v3743_v6 = vmul.f32 1.442695, %v3721_v4  ;;  %v3688_v1 = vsel %vm3666_vm0, %v12906_v40, -inf }
 0x5e4   : > { %v4663_v21 = vrot.slane %v4372_v25, 4 }
 0x5e5   : > { %10210 = vpow2.f32 %v3743_v6  ;;  %3713 = vmax.xlane.f32.xlu1 %v3712_v61  ;;  %v3675_v31 = vpop.xlane.xlu2 %3674 }
 0x5e6   : > { %10212 = vpow2.f32 %v3737_v28  ;;  %v3717_v20 = vsub.f32 %v12822_v7, %v3675_v31 }
 0x5e7   : > { %10214 = vpow2.f32 %v3953_v37 }
 0x5e8   : > { %v3735_v19 = vmul.f32 1.442695, %v3717_v20 }
 0x5e9   : > { %v4390_v23 = vpop.f32.mrf.mxu1  ;;  %v4373_v8 = vpop.f32.mrf.mxu0 }
 0x5ea   : > { %3701 = vmax.xlane.f32.xlu2 %v3700_v53  ;;  %3689 = vmax.xlane.f32.xlu0 %v3688_v1  ;;  %10216 = vpow2.f32 %v3735_v19  ;;  %v4391_v43 = vadd.f32 %v4390_v23, %v12840_v51 }
 0x5eb   : > { %v12916_v57 = vpop.eup %10210 }
 0x5ec   : > { %v3781_v27 = vsel %vm3666_vm0, %v12916_v57, 0.0  ;;  %v12931_v36 = vpop.eup %10212  ;;  %v4719_v8 = vrot.slane %v4391_v43, 4 }
 0x5ed   : > { %3782 = vadd.xlane.f32.xlu1 %v3781_v27  ;;  %v12933_v47 = vpop.eup %10214  ;;  %v3772_v58 = vsel %vm3666_vm0, %v12931_v36, 0.0 }
 0x5ee   : > { %v4000_v7 = vsel %vm3666_vm0, %v12933_v47, 0.0 }
 0x5f0   : > { %v12939_v48 = vpop.eup %10216 }
 0x5f1   : > { %v4392_v9 = vpop.f32.mrf.mxu1  ;;  %v4447_v0 = vpop.f32.mrf.mxu0  ;;  %v3769_v16 = vsel %vm3666_vm0, %v12939_v48, 0.0 }
 0x5f2   : > { %3710 = vmax.xlane.f32.xlu2 %v3709_v42  ;;  %3698 = vmax.xlane.f32.xlu0 %v3697_v56 }
 0x5f9   : > { %v4466_v44 = vpop.f32.mrf.mxu1  ;;  %v4449_v32 = vpop.f32.mrf.mxu0 }
 0x5fa   : > { %4001 = vadd.xlane.f32.xlu0 %v4000_v7  ;;  %3773 = vadd.xlane.f32.xlu2 %v3772_v58 }
 0x601   : > { %v4468_v4 = vpop.f32.mrf.mxu1  ;;  %v4523_v26 = vpop.f32.mrf.mxu0 }
 0x602   : > { %v4524_v6 = vadd.f32 %v4523_v26, %v12847_v17  ;;  %3770 = vadd.xlane.f32.xlu0 %v3769_v16  ;;  %v4467_v17 = vadd.f32 %v4466_v44, %v12851_v34  ;;  %v4448_v16 = vadd.f32 %v4447_v0, %v12828_v52 }
 0x604   : > { %v4660_v61 = vrot.slane %v4524_v6, 4  ;;  %v4664_v33 = vsel %vm1603_vm13, %v4524_v6, %v4663_v21  ;;  %v4731_v20 = vrot.slane %v4467_v17, 4  ;;  %v3978_v6 = vpop.xlane.xlu2 %3977 }
 0x606   : > { %v4662_v49 = vsel %vm1603_vm13, %v4660_v61, %v4372_v25 }
 0x609   : > { %v4542_v10 = vpop.f32.mrf.mxu1  ;;  %v4525_v53 = vpop.f32.mrf.mxu0 }
 0x60a   : > { %v4543_v46 = vadd.f32 %v4542_v10, %v12854_v30 }
 0x60c   : > { %v4717_v24 = vrot.slane %v4543_v46, 4  ;;  %v4720_v1 = vsel %vm1603_vm13, %v4543_v46, %v4719_v8  ;;  %v4675_v8 = vrot.slane %v4448_v16, 4  ;;  %v3006_v46 = vunpack.c.l.b16 %v12806_v63 }
 0x60d   : > { %v4728_v27 = vperm.slane %v4720_v1, %v11473_v12 }
 0x60e   : > { %v4718_v28 = vsel %vm1603_vm13, %v4717_v24, %v4391_v43  ;;  %v4672_v43 = vperm.slane %v4664_v33, %v11473_v12  ;;  %v4668_v24 = vperm.slane %v4662_v49, %v11473_v12 }
 0x60f   : > { %v4724_v23 = vperm.slane %v4718_v28, %v11473_v12  ;;  %v4755_v30 = vrot.slane %v4728_v27, 4 }
 0x611   : > { %v4544_v37 = vpop.f32.mrf.mxu1  ;;  %v4743_v32 = vrot.slane %v4724_v23, 4 }
 0x612   : > { %v4699_v37 = vrot.slane %v4672_v43, 4 }
 0x641   : > { %v4618_v31 = vpop.f32.mrf.mxu1 }
 0x642   : > { %v4619_v51 = vadd.f32 %v4618_v31, %v12875_v62 }
 0x644   : > { %v4729_v9 = vrot.slane %v4619_v51, 4  ;;  %v4732_v42 = vsel %vm1603_vm13, %v4619_v51, %v4731_v20 }
 0x645   : > { %v4740_v56 = vperm.slane %v4732_v42, %v11473_v12 }
 0x646   : > { %v4730_v19 = vsel %vm1603_vm13, %v4729_v9, %v4467_v17  ;;  %v3036_v17 = vpack.c.b16 %v3006_v46, %v3006_v46 }
 0x647   : > { %v4736_v7 = vperm.slane %v4730_v19, %v11473_v12  ;;  %v4753_v34 = vrot.slane %v4740_v56, 4  ;;  %v4756_v44 = vsel %vm1603_vm13, %v4740_v56, %v4755_v30 }
 0x648   : > { %v3990_v26 = vpop.xlane.xlu1 %3989  ;;  %v4764_v42 = vperm.slane %v4756_v44, %v11478_v29  ;;  %v3008_v44 = vunpack.c.l.b16 %v12836_v60 }
 0x649   : > { %v4741_v58 = vrot.slane %v4736_v7, 4  ;;  %v4744_v25 = vsel %vm1603_vm13, %v4736_v7, %v4743_v32  ;;  %v4754_v62 = vsel %vm1603_vm13, %v4753_v34, %v4728_v27  ;;  %v4620_v4 = vpop.f32.mrf.mxu1  ;;  %v4687_v27 = vrot.slane %v4668_v24, 4 }
 0x64a   : > { %v4752_v7 = vperm.slane %v4744_v25, %v11478_v29  ;;  %v3007_v4 = vunpack.c.l.b16 %v12824_v2  ;;  %v12990_v25 = vperm.slane %v4754_v62, %v11478_v29  ;;  %v12992_v2 = vrot.slane %v4764_v42, 4 }
 0x64b   : > { %v4742_v21 = vsel %vm1603_vm13, %v4741_v58, %v4724_v23 }
 0x64c   : > { %v4767_v46 = vrot.slane %v4752_v7, 4 }
 0x64d   : > { %v3966_v61 = vpop.xlane.xlu0 %3965 }
 0x64e   : > { %10218 = vrcp.f32 %v3966_v61  ;;  %v4599_v10 = vpop.f32.mrf.mxu0 }
 0x64f   : > { %v4600_v53 = vadd.f32 %v4599_v10, %v12856_v39  ;;  %10220 = vrcp.f32 %v3978_v6 }
 0x650   : > { %v12973_v63 = vpop.xlane.xlu1 %3998 }
 0x651   : > { %v4673_v1 = vrot.slane %v4600_v53, 4  ;;  %v4676_v28 = vsel %vm1603_vm13, %v4600_v53, %v4675_v8  ;;  %v4748_v53 = vperm.slane %v4742_v21, %v11478_v29  ;;  %v13003_v21 = vsel %vm1603_vm13, 0.0, %v12992_v2 }
 0x652   : > { %v4684_v52 = vperm.slane %v4676_v28, %v11473_v12 }
 0x653   : > { %v4674_v0 = vsel %vm1603_vm13, %v4673_v1, %v4448_v16  ;;  %v4265_v16 = vsel %vm4054_vm15, %v3036_v17, 0  ;;  %v3040_v1 = vpack.c.b16 %v3008_v44, %v3008_v44 }
 0x654   : > { %v10219_v33 = vpop.eup %10218  ;;  %v4680_v31 = vperm.slane %v4674_v0, %v11473_v12  ;;  %v4697_v20 = vrot.slane %v4684_v52, 4  ;;  %v4700_v39 = vsel %vm1603_vm13, %v4684_v52, %v4699_v37 }
 0x655   : > { %v4022_v49 = vmul.f32 %v10219_v33, %v12872_v50  ;;  %v4708_v51 = vperm.slane %v4700_v39, %v11478_v29  ;;  %v3987_v23 = vpop.xlane.xlu2 %3986  ;;  %v3975_v9 = vpop.xlane.xlu0 %3974  ;;  %v4768_v39 = vsel %vm1603_vm13, 0.0, %v4767_v46 }
 0x656   : > { %v4685_v30 = vrot.slane %v4680_v31, 4  ;;  %v4688_v56 = vsel %vm1603_vm13, %v4680_v31, %v4687_v27  ;;  %v4698_v19 = vsel %vm1603_vm13, %v4697_v20, %v4672_v43  ;;  %v4601_v32 = vpop.f32.mrf.mxu0  ;;  %10222 = vrcp.f32 %v3975_v9  ;;  %v10221_v6 = vpop.eup %10220 }
 0x657   : > { %v4038_v34 = vpack.c.bf16 %v4022_v49, %v4022_v49  ;;  %v4696_v58 = vperm.slane %v4688_v56, %v11478_v29  ;;  %v4704_v43 = vperm.slane %v4698_v19, %v11478_v29  ;;  %v4715_v8 = vrot.slane %v4708_v51, 4 }
 0x658   : > { %v4686_v50 = vsel %vm1603_vm13, %v4685_v30, %v4668_v24  ;;  %v12996_v60 = vmul.f32 %v10221_v6, %v12834_v15  ;;  %10224 = vrcp.f32 %v3990_v26  ;;  %v3039_v24 = vpack.c.b16 %v3007_v4, %v3007_v4  ;;  %v3714_v15 = vpop.xlane.xlu1 %3713 }
 0x659   : > { %v4692_v61 = vperm.slane %v4686_v50, %v11478_v29  ;;  %v4711_v10 = vrot.slane %v4696_v58, 4  ;;  %9379 = vmatmul.msk.bf16.vlgmr.msrb.gmra.mxu3 %vm3666_vm0, %v4038_v34  ;;  %v4713_v52 = vrot.slane %v4704_v43, 4  ;;  %v4716_v0 = vsel %vm1603_vm13, 0.0, %v4715_v8 }
 0x65a   : > { %4274 = vmatpush.bf16.msrb.mxu3 %v4265_v16  ;;  %v4769_v27 = vrot.slane %v12990_v25, 4  ;;  %v4765_v20 = vrot.slane %v4748_v53, 4  ;;  %10226 = vrcp.f32 %v3987_v23  ;;  %v4901_v42 = vrot.slane %v4716_v0, 4 }
 0x65b   : > { %v4709_v28 = vrot.slane %v4692_v61, 4  ;;  %v4712_v37 = vsel %vm1603_vm13, 0.0, %v4711_v10  ;;  %v4714_v32 = vsel %vm1603_vm13, 0.0, %v4713_v52  ;;  %v4042_v23 = vpack.c.bf16 %v12996_v60, %v12996_v60 }
 0x65c   : > { %v10223_v33 = vpop.eup %10222  ;;  %v4890_v9 = vrot.slane %v4712_v37, 4  ;;  %v4341_v34 = vsel %vm4054_vm15, %v3040_v1, 0  ;;  %v4766_v58 = vsel %vm1603_vm13, 0.0, %v4765_v20  ;;  %v4944_v4 = vrot.slane %v4768_v39, 4 }
 0x65d   : > { %v3702_v62 = vpop.xlane.xlu2 %3701  ;;  %v3690_v17 = vpop.xlane.xlu0 %3689  ;;  %v4025_v49 = vmul.f32 %v10223_v33, %v12886_v5  ;;  %v4710_v19 = vsel %vm1603_vm13, 0.0, %v4709_v28  ;;  %v4322_v5 = vsel %vm4054_vm15, %v3039_v24, 0  ;;  %v4955_v50 = vrot.slane %v13003_v21, 4 }
 0x65e   : > { %v3726_v26 = vsub.f32 %v12903_v59, %v3702_v62  ;;  %v3722_v31 = vsub.f32 %v12906_v40, %v3690_v17  ;;  %v3730_v59 = vsub.f32 %v12892_v22, %v3714_v15  ;;  %v13014_v40 = vpop.eup %10224  ;;  %v4885_v22 = vsel %vm1603_vm13, %v4711_v10, %v4692_v61 }
 0x65f   : > { %v13009_v51 = vpop.f32.mrf.mxu2  ;;  %v4041_v7 = vpack.c.bf16 %v4025_v49, %v4025_v49  ;;  %v4891_v16 = vsel %vm1603_vm13, %v4890_v9, %v4710_v19  ;;  %v4896_v44 = vsel %vm1603_vm13, %v4715_v8, %v4704_v43  ;;  %v4902_v6 = vsel %vm1603_vm13, %v4901_v42, %v4714_v32 }
 0x660   : > { %v3753_v30 = vmul.f32 1.442695, %v3726_v26  ;;  %v3745_v56 = vmul.f32 1.442695, %v3722_v31  ;;  %v10227_v60 = vpop.eup %10226  ;;  %v4770_v24 = vsel %vm1603_vm13, 0.0, %v4769_v27  ;;  %v4889_v52 = vperm.slane %v4885_v22, %v11473_v12 }
 0x661   : > { %9382 = vmatmul.msk.bf16.vlgmr.msrb.gmra.mxu2 %vm3666_vm0, %v4041_v7  ;;  %v3761_v1 = vmul.f32 1.442695, %v3730_v59  ;;  %v4895_v0 = vperm.slane %v4891_v16, %v11473_v12  ;;  %v4906_v10 = vperm.slane %v4902_v6, %v11473_v12  ;;  %v4939_v43 = vsel %vm1603_vm13, %v4767_v46, %v4748_v53 }
 0x662   : > { %10228 = vpow2.f32 %v3753_v30  ;;  %4331 = vmatpush.bf16.msrb.mxu2 %v4322_v5  ;;  %v4900_v17 = vperm.slane %v4896_v44, %v11473_v12  ;;  %v4945_v27 = vsel %vm1603_vm13, %v4944_v4, %v4766_v58  ;;  %v4950_v21 = vsel %vm1603_vm13, %v12992_v2, %v12990_v25 }
 0x663   : > { %10230 = vpow2.f32 %v3745_v56  ;;  %v4907_v33 = vrot.slane %v4895_v0, 4  ;;  %v4919_v31 = vrot.slane %v4906_v10, 4  ;;  %v4949_v39 = vperm.slane %v4945_v27, %v11473_v12 }
 0x664   : > { %v4954_v25 = vperm.slane %v4950_v21, %v11473_v12  ;;  %v4029_v2 = vmul.f32 %v10227_v60, %v12888_v18  ;;  %v4956_v30 = vsel %vm1603_vm13, %v4955_v50, %v4770_v24  ;;  %v4909_v7 = vrot.slane %v4889_v52, 4 }
 0x665   : > { %v3711_v28 = vpop.xlane.xlu2 %3710  ;;  %v3699_v37 = vpop.xlane.xlu0 %3698  ;;  %v4908_v46 = vsel %vm1603_vm13, %v4907_v33, %v4889_v52  ;;  %v4920_v42 = vsel %vm1603_vm13, %v4919_v31, %v4900_v17  ;;  %v4961_v56 = vrot.slane %v4949_v39, 4  ;;  %v4960_v32 = vperm.slane %v4956_v30, %v11473_v12 }
 0x666   : > { %v3729_v62 = vsub.f32 %v12921_v55, %v3711_v28  ;;  %v3725_v61 = vsub.f32 %v12924_v45, %v3699_v37  ;;  %v4943_v45 = vperm.slane %v4939_v43, %v11473_v12  ;;  %v13054_v9 = vperm.slane %v4908_v46, %v11478_v29 }
 0x667   : > { %v4107_v8 = vpop.f32.mrf.mxu2  ;;  %v13059_v19 = vperm.slane %v4920_v42, %v11478_v29  ;;  %v4045_v50 = vpack.c.bf16 %v4029_v2, %v4029_v2  ;;  %v4973_v22 = vrot.slane %v4960_v32, 4  ;;  %v4910_v16 = vsel %vm1603_vm13, %v4895_v0, %v4909_v7 }
 0x668   : > { %v13039_v15 = vpop.eup %10228  ;;  %v3759_v26 = vmul.f32 1.442695, %v3729_v62  ;;  %v3751_v55 = vmul.f32 1.442695, %v3725_v61  ;;  %v4933_v18 = vrot.slane %v13054_v9, 4  ;;  %v4962_v59 = vsel %vm1603_vm13, %v4961_v56, %v4943_v45 }
 0x669   : > { %v13042_v20 = vpop.eup %10230  ;;  %9383 = vmatmul.msk.bf16.vlgmr.msra.gmra.mxu3 %vm3666_vm0, %v4042_v23  ;;  %v3796_v53 = vsel %vm3666_vm0, %v13039_v15, 0.0  ;;  %v4921_v23 = vrot.slane %v4900_v17, 4  ;;  %v4963_v5 = vrot.slane %v4943_v45, 4  ;;  %v4968_v4 = vperm.slane %v4962_v59, %v11478_v29 }
 0x66a   : > { %10232 = vpow2.f32 %v3759_v26  ;;  %4350 = vmatpush.bf16.msra.mxu3 %v4341_v34  ;;  %v3784_v49 = vsel %vm3666_vm0, %v13042_v20, 0.0  ;;  %3797 = vadd.xlane.f32.xlu1 %v3796_v53  ;;  %v4975_v34 = vrot.slane %v4954_v25, 4  ;;  %v4934_v58 = vsel %vm1603_vm13, %v13059_v19, %v4933_v18 }
 0x66b   : > { %10234 = vpow2.f32 %v3751_v55  ;;  %3785 = vadd.xlane.f32.xlu0 %v3784_v49  ;;  %v4922_v44 = vsel %vm1603_vm13, %v4906_v10, %v4921_v23  ;;  %v4987_v60 = vrot.slane %v4968_v4, 4  ;;  %v4918_v24 = vperm.slane %v4910_v16, %v11478_v29 }
 0x66c   : > { %10236 = vpow2.f32 %v3761_v1  ;;  %v4930_v28 = vperm.slane %v4922_v44, %v11478_v29  ;;  %v4964_v1 = vsel %vm1603_vm13, %v4949_v39, %v4963_v5  ;;  %v4974_v62 = vsel %vm1603_vm13, %v4973_v22, %v4954_v25 }
 0x66d   : > { %v4972_v0 = vperm.slane %v4964_v1, %v11478_v29  ;;  %v4976_v61 = vsel %vm1603_vm13, %v4960_v32, %v4975_v34  ;;  %v4980_v43 = vperm.slane %v4974_v62, %v11478_v29  ;;  %v4030_v33 = vmul.f32 %v13014_v40, %v12866_v35 }
 0x66e   : > { %v4935_v8 = vrot.slane %v4930_v28, 4  ;;  %v4984_v17 = vperm.slane %v4976_v61, %v11478_v29  ;;  %v4398_v27 = vsel %vm4054_vm15, %v12253_v13, 0  ;;  %10238 = vrcp.f32 %v12973_v63  ;;  %v4002_v13 = vpop.xlane.xlu0 %4001  ;;  %v9769_v61 = vld [vmem:[#allocation19 + $0x30] sm:$0xff] }
 0x66f   : > { %v4988_v26 = vsel %vm1603_vm13, %v4980_v43, %v4987_v60  ;;  %v4937_v53 = vrot.slane %v4918_v24, 4  ;;  %v4991_v35 = vrot.slane %v4972_v0, 4  ;;  %v4985_v40 = vrot.slane %v4980_v43, 4  ;;  %v3783_v60 = vpop.xlane.xlu1 %3782  ;;  %v9767_v43 = vld [vmem:[#allocation19 + $0x20] sm:$0xff] }
 0x670   : > { %v13069_v6 = vpop.eup %10232  ;;  %v4936_v55 = vsel %vm1603_vm13, %v4935_v8, %v4918_v24  ;;  %v4989_v31 = vrot.slane %v4984_v17, 4  ;;  %v10050_v45 = vpack.i.bf16 %v4988_v26, %v4934_v58  ;;  %v4046_v39 = vpack.c.bf16 %v4030_v33, %v4030_v33  ;;  %v9765_v8 = vld [vmem:[#allocation19 + $0x10] sm:$0xff]  ;;  %v9764_v33 = vld [vmem:[#allocation19 + $0x8] sm:$0xff] }
 0x671   : > { %v13074_v37 = vpop.eup %10234  ;;  %v3805_v52 = vsel %vm3666_vm0, %v13069_v6, 0.0  ;;  %9386 = vmatmul.msk.bf16.vlgmr.msra.gmra.mxu2 %vm3666_vm0, %v4045_v50  ;;  %v4938_v2 = vsel %vm1603_vm13, %v4930_v28, %v4937_v53  ;;  %v4992_v63 = vsel %vm1603_vm13, %v4984_v17, %v4991_v35  ;;  %v4417_v42 = vsel %vm4054_vm15, %v12300_v54, 0  ;;  %v14706_v54 = vld [vmem:[#allocation56_spill] sm:$0xff]  ;;  %v3774_v50 = vpop.xlane.xlu2 %3773 }
 0x672   : > { %v3793_v10 = vsel %vm3666_vm0, %v13074_v37, 0.0  ;;  %v13090_v21 = vpop.eup %10236  ;;  %4407 = vmatpush.bf16.msra.mxu2 %v4398_v27  ;;  %v4990_v46 = vsel %vm1603_vm13, %v4989_v31, %v4972_v0  ;;  %v10060_v49 = vpack.i.bf16 %v4992_v63, %v4938_v2  ;;  %10240 = vrcp.f32 %v4002_v13  ;;  %v9770_v0 = vld [vmem:[#allocation19 + $0x38] sm:$0xff] }
 0x673   : > { %3806 = vadd.xlane.f32.xlu0 %v3805_v52  ;;  %3794 = vadd.xlane.f32.xlu2 %v3793_v10  ;;  %v10055_v25 = vpack.i.bf16 %v4990_v46, %v4936_v55  ;;  %v13102_v56 = vsel %vm1603_vm13, %v4985_v40, %v4968_v4  ;;  %v3808_v18 = vsel %vm3666_vm0, %v13090_v21, 0.0  ;;  %v4474_v34 = vsel %vm4054_vm15, %v14706_v54, 0  ;;  %v9768_v10 = vld [vmem:[#allocation19 + $0x28] sm:$0xff] }
 0x674   : > { %v10239_v30 = vpop.eup %10238  ;;  %v4931_v58 = vrot.slane %v13059_v19, 4  ;;  %5233 = vmatpush.bf16.msrb.mxu0 %v9770_v0  ;;  %v4645_v40 = vsel %vm4054_vm15, %v12364_v11, 0 }
 0x675   : > { %v4033_v32 = vmul.f32 %v10239_v30, %v12877_v41 }
 0x676   : > { %v3771_v23 = vpop.xlane.xlu0 %3770  ;;  %v13116_v41 = vsel %vm1603_vm13, %v4931_v58, %v13054_v9  ;;  %v4550_v9 = vsel %vm4054_vm15, %v12323_v38, 0  ;;  %v4626_v38 = vsel %vm4054_vm15, %v12325_v3, 0  ;;  %v9763_v3 = vld [vmem:[#allocation19] sm:$0xff] }
 0x677   : > { %v4049_v59 = vpack.c.bf16 %v4033_v32, %v4033_v32  ;;  %10242 = vrcp.f32 %v3771_v23 }
 0x678   : > { %v10241_v7 = vpop.eup %10240  ;;  %10244 = vrcp.f32 %v3774_v50  ;;  %5234 = vmatpush.bf16.msrb.mxu0 %v9769_v61 }
 0x679   : > { %9387 = vmatmul.msk.bf16.vlgmr.msrb.gmra.mxu3 %vm3666_vm0, %v4046_v39  ;;  %v4034_v5 = vmul.f32 %v10241_v7, %v12933_v47  ;;  %v14707_v47 = vld [vmem:[#allocation57_spill] sm:$0xff]  ;;  %10246 = vrcp.f32 %v3783_v60 }
 0x67a   : > { %4426 = vmatpush.bf16.msrb.mxu3 %v4417_v42  ;;  %v4493_v22 = vsel %vm4054_vm15, %v14707_v47, 0 }
 0x67b   : > { %3809 = vadd.xlane.f32.xlu2 %v3808_v18  ;;  %v4050_v4 = vpack.c.bf16 %v4034_v5, %v4034_v5 }
 0x67c   : > { %5235 = vmatpush.bf16.msrb.mxu0 %v9768_v10 }
 0x67d   : > { %v10243_v16 = vpop.eup %10242 }
 0x67e   : > { %v3829_v19 = vmul.f32 %v10243_v16, %v12939_v48  ;;  %v10245_v44 = vpop.eup %10244  ;;  %v4569_v48 = vsel %vm4054_vm15, %v12359_v14, 0  ;;  %v9766_v14 = vld [vmem:[#allocation19 + $0x18] sm:$0xff] }
 0x67f   : > { %v3830_v28 = vmul.f32 %v10245_v44, %v12931_v36  ;;  %v10247_v52 = vpop.eup %10246 }
 0x680   : > { %v3845_v24 = vpack.c.bf16 %v3829_v19, %v3829_v19  ;;  %v3833_v62 = vmul.f32 %v10247_v52, %v12916_v57  ;;  %5236 = vmatpush.bf16.msrb.mxu0 %v9767_v43 }
 0x681   : > { %9390 = vmatmul.msk.bf16.vlgmr.msrb.gmra.mxu2 %vm3666_vm0, %v4049_v59  ;;  %v3846_v1 = vpack.c.bf16 %v3830_v28, %v3830_v28 }
 0x682   : > { %4483 = vmatpush.bf16.msrb.mxu2 %v4474_v34  ;;  %v3849_v36 = vpack.c.bf16 %v3833_v62, %v3833_v62 }
 0x683   : > { %10051 = vrot.lane.b32.xlu1 %v10050_v45, %s10887_s5 }
 0x684   : > { %5237 = vmatpush.bf16.msrb.mxu0 %v9766_v14 }
 0x687   : > { %10056 = vrot.lane.b32.xlu0 %v10055_v25, %s10888_s13 }
 0x688   : > { %5238 = vmatpush.bf16.msrb.mxu0 %v9765_v8 }
 0x689   : > { %9391 = vmatmul.msk.bf16.vlgmr.msra.gmra.mxu3 %vm3666_vm0, %v4050_v4 }
 0x68a   : > { %4502 = vmatpush.bf16.msra.mxu3 %v4493_v22 }
 0x68c   : > { %5239 = vmatpush.bf16.msrb.mxu0 %v9764_v33 }
 0x690   : > { %5240 = vmatpush.bf16.msrb.mxu0 %v9763_v3 }
 0x691   : > { %9394 = vmatmul.msk.bf16.vlgmr.msra.gmra.mxu2 %vm3666_vm0, %v3845_v24 }
 0x692   : > { %4559 = vmatpush.bf16.msra.mxu2 %v4550_v9 }
 0x693   : > { %10061 = vrot.lane.b32.xlu2 %v10060_v49, %s10889_s8 }
 0x699   : > { %9395 = vmatmul.msk.bf16.vlgmr.msrb.gmra.mxu3 %vm3666_vm0, %v3846_v1 }
 0x69a   : > { %4578 = vmatpush.bf16.msrb.mxu3 %v4569_v48 }
 0x6a1   : > { %9398 = vmatmul.msk.bf16.vlgmr.msrb.gmra.mxu2 %vm3666_vm0, %v3849_v36 }
 0x6a2   : > { %4635 = vmatpush.bf16.msrb.mxu2 %v4626_v38 }
 0x6dc   : > { %v13134_v17 = vpop.f32.mrf.mxu3 }
 0x6dd   : > { %v3798_v35 = vpop.xlane.xlu1 %3797 }
 0x6de   : > { %v3786_v57 = vpop.xlane.xlu0 %3785 }
 0x6df   : > { %10248 = vrcp.f32 %v3786_v57 }
 0x6e4   : > { %v4126_v27 = vpop.f32.mrf.mxu3  ;;  %v13137_v31 = vpop.f32.mrf.mxu2 }
 0x6e5   : > { %v10249_v26 = vpop.eup %10248  ;;  %v13167_v27 = vld [vmem:[%s14593_s14] ss:$0 sm:$0xff] }
 0x6e6   : > { %v3834_v55 = vmul.f32 %v10249_v26, %v13042_v20  ;;  %v3795_v45 = vpop.xlane.xlu2 %3794  ;;  %v3807_v63 = vpop.xlane.xlu0 %3806 }
 0x6e7   : > { %10250 = vrcp.f32 %v3795_v45 }
 0x6e8   : > { %v3850_v53 = vpack.c.bf16 %v3834_v55, %v3834_v55  ;;  %10252 = vrcp.f32 %v3798_v35 }
 0x6e9   : > { %10254 = vrcp.f32 %v3807_v63 }
 0x6ea   : > { %9399 = vmatmul.msk.bf16.vlgmr.msra.gmra.mxu3 %vm3666_vm0, %v3850_v53 }
 0x6eb   : > { %4654 = vmatpush.bf16.msra.mxu3 %v4645_v40 }
 0x6ec   : > { %v13142_v46 = vpop.f32.mrf.mxu3  ;;  %v4183_v13 = vpop.f32.mrf.mxu2 }
 0x6ed   : > { %v10251_v39 = vpop.eup %10250 }
 0x6ee   : > { %v3837_v20 = vmul.f32 %v10251_v39, %v13074_v37  ;;  %v3810_v25 = vpop.xlane.xlu2 %3809  ;;  %v10253_v2 = vpop.eup %10252  ;;  %v10338_v39 = vld [vmem:[%s11297_s4] sm:$0xff] }
 0x6ef   : > { %v3838_v42 = vmul.f32 %v10253_v2, %v13039_v15  ;;  %v10255_v54 = vpop.eup %10254  ;;  %10256 = vrcp.f32 %v3810_v25 }
 0x6f0   : > { %v3853_v49 = vpack.c.bf16 %v3837_v20, %v3837_v20  ;;  %v3841_v19 = vmul.f32 %v10255_v54, %v13069_v6 }
 0x6f1   : > { %v3854_v59 = vpack.c.bf16 %v3838_v42, %v3838_v42 }
 0x6f2   : > { %9402 = vmatmul.msk.bf16.vlgmr.msra.gmra.mxu2 %vm3666_vm0, %v3853_v49  ;;  %v3857_v1 = vpack.c.bf16 %v3841_v19, %v3841_v19 }
 0x6f4   : > { %v4202_v30 = vpop.f32.mrf.mxu3  ;;  %v4257_v11 = vpop.f32.mrf.mxu2 }
 0x6f5   : > { %v10052_v18 = vpop.permute.xlu1 %10051  ;;  %v10257_v9 = vpop.eup %10256 }
 0x6f6   : > { %v10054_v32 = vunpack.i.h.bf16 %v10052_v18  ;;  %v10053_v7 = vunpack.i.l.bf16 %v10052_v18  ;;  %v10062_v23 = vpop.permute.xlu2 %10061 }
 0x6f7   : > { %v10064_v58 = vunpack.i.h.bf16 %v10062_v23  ;;  %v10063_v4 = vunpack.i.l.bf16 %v10062_v23 }
 0x6f8   : > { %v5150_v15 = vsel %vm3041_vm14, %v13102_v56, %v10054_v32  ;;  %v5149_v50 = vsel %vm3041_vm14, %v13116_v41, %v10053_v7  ;;  %v3842_v56 = vmul.f32 %v10257_v9, %v13090_v21 }
 0x6f9   : > { %v10057_v5 = vpop.permute.xlu0 %10056 }
 0x6fa   : > { %v10059_v37 = vunpack.i.h.bf16 %v10057_v5  ;;  %v10058_v34 = vunpack.i.l.bf16 %v10057_v5  ;;  %9403 = vmatmul.msk.bf16.vlgmr.msrb.gmra.mxu3 %vm3666_vm0, %v3854_v59  ;;  %v3858_v52 = vpack.c.bf16 %v3842_v56, %v3842_v56  ;;  %v10339_v5 = vld [vmem:[%s11297_s4 + $0x8] sm:$0xff] }
 0x6fc   : > { %v5154_v47 = vsel %vm5153_vm1, %v5149_v50, %v10058_v34  ;;  %v5155_v22 = vsel %vm5153_vm1, %v5150_v15, %v10059_v37  ;;  %v4276_v16 = vpop.f32.mrf.mxu3  ;;  %v4259_v28 = vpop.f32.mrf.mxu2 }
 0x6fd   : > { %v5159_v44 = vsel %vm5158_vm2, %v5154_v47, %v10063_v4  ;;  %v5160_v60 = vsel %vm5158_vm2, %v5155_v22, %v10064_v58 }
 0x6fe   : > { %v5179_v24 = vpack.c.bf16 %v5160_v60, %v5159_v44 }
 0x700   : > { %5241 = vmatmul.bf16.vlgmr.msrb.gmra.mxu0 %v5179_v24 }
 0x702   : > { %9406 = vmatmul.msk.bf16.vlgmr.msrb.gmra.mxu2 %vm3666_vm0, %v3857_v1 }
 0x704   : > { %v4278_v41 = vpop.f32.mrf.mxu3  ;;  %v4333_v48 = vpop.f32.mrf.mxu2 }
 0x70a   : > { %9407 = vmatmul.msk.bf16.vlgmr.msra.gmra.mxu3 %vm3666_vm0, %v3858_v52 }
 0x70c   : > { %v13160_v62 = vpop.f32.mrf.mxu3  ;;  %v4335_v6 = vpop.f32.mrf.mxu2 }
 0x714   : > { %v4354_v36 = vpop.f32.mrf.mxu3  ;;  %v4409_v38 = vpop.f32.mrf.mxu2 }
 0x715   : > { %v4410_v55 = vadd.f32 %v4409_v38, %v13009_v51 }
 0x717   : > { %v4775_v13 = vrot.slane %v4410_v55, 4 }
 0x71c   : > { %v4428_v0 = vpop.f32.mrf.mxu3  ;;  %v4411_v10 = vpop.f32.mrf.mxu2 }
 0x71d   : > { %v4429_v61 = vadd.f32 %v4428_v0, %v13134_v17 }
 0x71f   : > { %v4831_v42 = vrot.slane %v4429_v61, 4 }
 0x724   : > { %v4430_v43 = vpop.f32.mrf.mxu3  ;;  %v4485_v14 = vpop.f32.mrf.mxu2 }
 0x725   : > { %v4486_v8 = vadd.f32 %v4485_v14, %v13137_v31 }
 0x727   : > { %v4787_v32 = vrot.slane %v4486_v8, 4 }
 0x72c   : > { %v4487_v21 = vpop.f32.mrf.mxu2 }
 0x76d   : > { %v4504_v57 = vpop.f32.mrf.mxu3 }
 0x76e   : > { %v4505_v37 = vadd.f32 %v4504_v57, %v13142_v46 }
 0x770   : > { %v4843_v24 = vrot.slane %v4505_v37, 4 }
 0x775   : > { %v4506_v33 = vpop.f32.mrf.mxu3  ;;  %v4561_v3 = vpop.f32.mrf.mxu2 }
 0x776   : > { %v4562_v26 = vadd.f32 %v4561_v3, %v4257_v11 }
 0x778   : > { %v4773_v40 = vrot.slane %v4562_v26, 4  ;;  %v4776_v25 = vsel %vm1603_vm13, %v4562_v26, %v4775_v13 }
 0x779   : > { %v4784_v30 = vperm.slane %v4776_v25, %v11473_v12 }
 0x77a   : > { %v4774_v2 = vsel %vm1603_vm13, %v4773_v40, %v4410_v55 }
 0x77b   : > { %v4780_v7 = vperm.slane %v4774_v2, %v11473_v12  ;;  %v4811_v15 = vrot.slane %v4784_v30, 4 }
 0x77d   : > { %v4580_v45 = vpop.f32.mrf.mxu3  ;;  %v5242_v17 = vpop.f32.mrf.mxu0  ;;  %v4799_v47 = vrot.slane %v4780_v7, 4 }
 0x77e   : > { %v4563_v53 = vpop.f32.mrf.mxu2  ;;  %v5243_v35 = vadd.f32 %v13167_v27, %v5242_v17  ;;  %v4581_v20 = vadd.f32 %v4580_v45, %v4276_v16 }
 0x780   : > { %v13172_v31 = vadd.f32 %v10338_v39, %v5243_v35  ;;  %v4829_v63 = vrot.slane %v4581_v20, 4  ;;  %v4832_v23 = vsel %vm1603_vm13, %v4581_v20, %v4831_v42 }
 0x781   : > { %v4840_v22 = vperm.slane %v4832_v23, %v11473_v12 }
 0x782   : > { %5258 = vadd.xlane.f32.xlu0 %v13172_v31  ;;  %v4830_v34 = vsel %vm1603_vm13, %v4829_v63, %v4429_v61 }
 0x783   : > { %v4836_v19 = vperm.slane %v4830_v34, %v11473_v12  ;;  %v4867_v6 = vrot.slane %v4840_v22, 4 }
 0x785   : > { %v4582_v51 = vpop.f32.mrf.mxu3  ;;  %v5244_v49 = vpop.f32.mrf.mxu0  ;;  %v4855_v61 = vrot.slane %v4836_v19, 4 }
 0x786   : > { %v4637_v18 = vpop.f32.mrf.mxu2  ;;  %v5245_v11 = vadd.f32 %v13167_v27, %v5244_v49 }
 0x787   : > { %v4638_v59 = vadd.f32 %v4637_v18, %v4333_v48 }
 0x788   : > { %v13182_v54 = vadd.f32 %v10339_v5, %v5245_v11 }
 0x789   : > { %v4785_v58 = vrot.slane %v4638_v59, 4  ;;  %v4788_v4 = vsel %vm1603_vm13, %v4638_v59, %v4787_v32 }
 0x78a   : > { %v4796_v50 = vperm.slane %v4788_v4, %v11473_v12  ;;  %5260 = vadd.xlane.f32.xlu1 %v13182_v54 }
 0x78b   : > { %v4786_v16 = vsel %vm1603_vm13, %v4785_v58, %v4486_v8 }
 0x78c   : > { %v4792_v44 = vperm.slane %v4786_v16, %v11473_v12  ;;  %v4809_v46 = vrot.slane %v4796_v50, 4  ;;  %v4812_v60 = vsel %vm1603_vm13, %v4796_v50, %v4811_v15 }
 0x78d   : > { %v4820_v28 = vperm.slane %v4812_v60, %v11478_v29  ;;  %v4656_v9 = vpop.f32.mrf.mxu3 }
 0x78e   : > { %v4797_v1 = vrot.slane %v4792_v44, 4  ;;  %v4800_v56 = vsel %vm1603_vm13, %v4792_v44, %v4799_v47  ;;  %v4810_v41 = vsel %vm1603_vm13, %v4809_v46, %v4784_v30  ;;  %v4639_v48 = vpop.f32.mrf.mxu2  ;;  %v4657_v52 = vadd.f32 %v4656_v9, %v13160_v62 }
 0x78f   : > { %v4808_v36 = vperm.slane %v4800_v56, %v11478_v29  ;;  %v4816_v38 = vperm.slane %v4810_v41, %v11478_v29  ;;  %v4827_v0 = vrot.slane %v4820_v28, 4 }
 0x790   : > { %v4798_v10 = vsel %vm1603_vm13, %v4797_v1, %v4780_v7  ;;  %v4841_v43 = vrot.slane %v4657_v52, 4  ;;  %v4844_v14 = vsel %vm1603_vm13, %v4657_v52, %v4843_v24 }
 0x791   : > { %v4804_v8 = vperm.slane %v4798_v10, %v11478_v29  ;;  %v4823_v21 = vrot.slane %v4808_v36, 4  ;;  %v4825_v57 = vrot.slane %v4816_v38, 4  ;;  %v4828_v33 = vsel %vm1603_vm13, 0.0, %v4827_v0 }
 0x792   : > { %v5009_v3 = vrot.slane %v4828_v33, 4  ;;  %v4842_v62 = vsel %vm1603_vm13, %v4841_v43, %v4505_v37  ;;  %v4852_v26 = vperm.slane %v4844_v14, %v11473_v12  ;;  %v5004_v55 = vsel %vm1603_vm13, %v4827_v0, %v4816_v38 }
 0x793   : > { %v4821_v45 = vrot.slane %v4804_v8, 4  ;;  %v4824_v17 = vsel %vm1603_vm13, 0.0, %v4823_v21  ;;  %v4826_v53 = vsel %vm1603_vm13, 0.0, %v4825_v57  ;;  %v4848_v35 = vperm.slane %v4842_v62, %v11473_v12 }
 0x794   : > { %v4998_v40 = vrot.slane %v4824_v17, 4  ;;  %v4865_v39 = vrot.slane %v4852_v26, 4  ;;  %v4868_v13 = vsel %vm1603_vm13, %v4852_v26, %v4867_v6  ;;  %v4993_v20 = vsel %vm1603_vm13, %v4823_v21, %v4804_v8  ;;  %v9530_v17 = vld [vmem:[#allocation22 + $0x70] sm:$0xf] }
 0x795   : > { %v4822_v25 = vsel %vm1603_vm13, 0.0, %v4821_v45  ;;  %v4853_v2 = vrot.slane %v4848_v35, 4  ;;  %v4856_v63 = vsel %vm1603_vm13, %v4848_v35, %v4855_v61  ;;  %v4876_v51 = vperm.slane %v4868_v13, %v11478_v29  ;;  %v4658_v49 = vpop.f32.mrf.mxu3 }
 0x796   : > { %v4864_v42 = vperm.slane %v4856_v63, %v11478_v29  ;;  %v4866_v30 = vsel %vm1603_vm13, %v4865_v39, %v4840_v22  ;;  %v4997_v18 = vperm.slane %v4993_v20, %v11473_v12  ;;  %v4999_v11 = vsel %vm1603_vm13, %v4998_v40, %v4822_v25  ;;  %v9522_v63 = vld [vmem:[#allocation22 + $0x60] sm:$0xf] }
 0x797   : > { %v4854_v32 = vsel %vm1603_vm13, %v4853_v2, %v4836_v19  ;;  %v4872_v7 = vperm.slane %v4866_v30, %v11478_v29  ;;  %v4883_v59 = vrot.slane %v4876_v51, 4  ;;  %v5003_v23 = vperm.slane %v4999_v11, %v11473_v12  ;;  %v9792_v51 = vld [vmem:[#allocation22 + $0x64] sm:$0xf0] }
 0x798   : > { %v4860_v5 = vperm.slane %v4854_v32, %v11478_v29  ;;  %v4879_v37 = vrot.slane %v4864_v42, 4  ;;  %v5008_v34 = vperm.slane %v5004_v55, %v11473_v12  ;;  %v5010_v58 = vsel %vm1603_vm13, %v5009_v3, %v4826_v53  ;;  %v9794_v53 = vld [vmem:[#allocation22 + $0x74] sm:$0xf0] }
 0x799   : > { %v4881_v4 = vrot.slane %v4872_v7, 4  ;;  %v4884_v15 = vsel %vm1603_vm13, 0.0, %v4883_v59  ;;  %v5014_v50 = vperm.slane %v5010_v58, %v11473_v12  ;;  %v5015_v47 = vrot.slane %v5003_v23, 4 }
 0x79a   : > { %v4877_v22 = vrot.slane %v4860_v5, 4  ;;  %v4880_v16 = vsel %vm1603_vm13, 0.0, %v4879_v37  ;;  %v5063_v19 = vrot.slane %v4884_v15, 4  ;;  %v5047_v44 = vsel %vm1603_vm13, %v4879_v37, %v4860_v5  ;;  %v9790_v15 = vld [vmem:[#allocation22 + $0x54] sm:$0xf0] }
 0x79b   : > { %v4882_v46 = vsel %vm1603_vm13, 0.0, %v4881_v4  ;;  %v5052_v60 = vrot.slane %v4880_v16, 4  ;;  %v5016_v24 = vsel %vm1603_vm13, %v5015_v47, %v4997_v18  ;;  %v5027_v28 = vrot.slane %v5014_v50, 4  ;;  %v9514_v4 = vld [vmem:[#allocation22 + $0x50] sm:$0xf] }
 0x79c   : > { %v4878_v9 = vsel %vm1603_vm13, 0.0, %v4877_v22  ;;  %v13233_v1 = vperm.slane %v5016_v24, %v11478_v29  ;;  %v5051_v56 = vperm.slane %v5047_v44, %v11473_v12  ;;  %v5058_v41 = vsel %vm1603_vm13, %v4883_v59, %v4872_v7  ;;  %v9788_v44 = vld [vmem:[#allocation22 + $0x44] sm:$0xf0]  ;;  %v9786_v24 = vld [vmem:[#allocation22 + $0x34] sm:$0xf0] }
 0x79d   : > { %v5028_v48 = vsel %vm1603_vm13, %v5027_v28, %v5008_v34  ;;  %v5053_v52 = vsel %vm1603_vm13, %v5052_v60, %v4878_v9  ;;  %v5062_v6 = vperm.slane %v5058_v41, %v11473_v12  ;;  %v5064_v36 = vsel %vm1603_vm13, %v5063_v19, %v4882_v46  ;;  %v9506_v19 = vld [vmem:[#allocation22 + $0x40] sm:$0xf]  ;;  %v9498_v60 = vld [vmem:[#allocation22 + $0x30] sm:$0xf] }
 0x79e   : > { %v13242_v38 = vperm.slane %v5028_v48, %v11478_v29  ;;  %v5041_v0 = vrot.slane %v13233_v1, 4  ;;  %v5057_v61 = vperm.slane %v5053_v52, %v11473_v12  ;;  %v5068_v10 = vperm.slane %v5064_v36, %v11473_v12  ;;  %v9490_v9 = vld [vmem:[#allocation22 + $0x20] sm:$0xf]  ;;  %v9482_v48 = vld [vmem:[#allocation22 + $0x10] sm:$0xf] }
 0x79f   : > { %v5017_v43 = vrot.slane %v4997_v18, 4  ;;  %v5029_v14 = vrot.slane %v5008_v34, 4  ;;  %v5071_v8 = vrot.slane %v5051_v56, 4  ;;  %v5083_v21 = vrot.slane %v5062_v6, 4  ;;  %v9782_v52 = vld [vmem:[#allocation22 + $0x14] sm:$0xf0] }
 0x7a0   : > { %v5042_v57 = vsel %vm1603_vm13, %v13242_v38, %v5041_v0  ;;  %v5069_v33 = vrot.slane %v5057_v61, 4  ;;  %v5081_v3 = vrot.slane %v5068_v10, 4  ;;  %v9531_v30 = vor.u32 %v9794_v53, %v9530_v17  ;;  %v9474_v0 = vld [vmem:[#allocation22] sm:$0xf] }
 0x7a1   : > { %v5018_v62 = vsel %vm1603_vm13, %v5003_v23, %v5017_v43  ;;  %v5030_v26 = vsel %vm1603_vm13, %v5014_v50, %v5029_v14  ;;  %v5072_v55 = vsel %vm1603_vm13, %v5057_v61, %v5071_v8  ;;  %v5084_v45 = vsel %vm1603_vm13, %v5068_v10, %v5083_v21  ;;  %v9780_v61 = vld [vmem:[#allocation22 + $0x4] sm:$0xf0] }
 0x7a2   : > { %v5070_v35 = vsel %vm1603_vm13, %v5069_v33, %v5051_v56  ;;  %v5082_v40 = vsel %vm1603_vm13, %v5081_v3, %v5062_v6  ;;  %v5026_v39 = vperm.slane %v5018_v62, %v11478_v29  ;;  %v5038_v13 = vperm.slane %v5030_v26, %v11478_v29  ;;  %6037 = vmatpush.bf16.msra.mxu2 %v9531_v30  ;;  %v9784_v56 = vld [vmem:[#allocation22 + $0x24] sm:$0xf0]  ;;  %v5931_v33 = vld [vmem:[%s11314_s29 + $0x10] sm:$0xff]  ;;  %v5932_v3 = vld [vmem:[%s11314_s29 + $0x18] sm:$0xff] }
 0x7a3   : > { %v5076_v20 = vperm.slane %v5070_v35, %v11478_v29  ;;  %v5080_v25 = vperm.slane %v5072_v55, %v11478_v29  ;;  %v5092_v2 = vperm.slane %v5084_v45, %v11478_v29  ;;  %v5088_v18 = vperm.slane %v5082_v40, %v11478_v29  ;;  %v5929_v21 = vld [vmem:[%s11314_s29] sm:$0xff] }
 0x7a4   : > { %v5043_v49 = vrot.slane %v5038_v13, 4  ;;  %v5045_v42 = vrot.slane %v5026_v39, 4  ;;  %v9523_v5 = vor.u32 %v9792_v51, %v9522_v63  ;;  %v9515_v16 = vor.u32 %v9790_v15, %v9514_v4  ;;  %v9777_v15 = vld [vmem:[#allocation20 + $0x30] sm:$0xff] }
 0x7a5   : > { %v5095_v11 = vrot.slane %v5076_v20, 4  ;;  %v5097_v32 = vrot.slane %v5092_v2, 4  ;;  %v5099_v7 = vrot.slane %v5080_v25, 4  ;;  %v9507_v46 = vor.u32 %v9788_v44, %v9506_v19  ;;  %v9775_v19 = vld [vmem:[#allocation20 + $0x20] sm:$0xff] }
 0x7a6   : > { %v5044_v59 = vsel %vm1603_vm13, %v5043_v49, %v5026_v39  ;;  %v5046_v23 = vsel %vm1603_vm13, %v5038_v13, %v5045_v42  ;;  %6038 = vmatpush.bf16.msra.mxu2 %v9523_v5  ;;  %v9499_v28 = vor.u32 %v9786_v24, %v9498_v60  ;;  %v9491_v41 = vor.u32 %v9784_v56, %v9490_v9  ;;  %v9774_v9 = vld [vmem:[#allocation20 + $0x18] sm:$0xff] }
 0x7a7   : > { %v5096_v37 = vsel %vm1603_vm13, %v5088_v18, %v5095_v11  ;;  %v5098_v34 = vsel %vm1603_vm13, %v5097_v32, %v5080_v25  ;;  %v5100_v58 = vsel %vm1603_vm13, %v5092_v2, %v5099_v7  ;;  %v5039_v6 = vrot.slane %v13242_v38, 4 }
 0x7a8   : > { %v10065_v50 = vpack.i.bf16 %v5096_v37, %v5042_v57  ;;  %v10070_v47 = vpack.i.bf16 %v5098_v34, %v5044_v59  ;;  %v10075_v22 = vpack.i.bf16 %v5100_v58, %v5046_v23  ;;  %v9483_v36 = vor.u32 %v9782_v52, %v9482_v48  ;;  %v5930_v57 = vld [vmem:[%s11314_s29 + $0x8] sm:$0xff]  ;;  %v9778_v37 = vld [vmem:[#allocation20 + $0x38] sm:$0xff] }
 0x7a9   : > { %v5040_v10 = vsel %vm1603_vm13, %v5039_v6, %v13233_v1  ;;  %v9475_v43 = vor.u32 %v9780_v61, %v9474_v0  ;;  %v5093_v14 = vrot.slane %v5088_v18, 4  ;;  %v13275_v38 = vpack.c.bf16 %v5930_v57, %v5929_v21  ;;  %v14708_v1 = vld [vmem:[#allocation49_spill] sm:$0xff]  ;;  %5422 = vmatpush.bf16.msrb.mxu1 %v9778_v37  ;;  %v9773_v52 = vld [vmem:[#allocation20 + $0x10] sm:$0xff] }
 0x7aa   : > { %10066 = vrot.lane.b32.xlu2 %v10065_v50, %s10887_s5  ;;  %6039 = vmatpush.bf16.msra.mxu2 %v9515_v16  ;;  %v13280_v62 = vpack.c.bf16 %v5932_v3, %v5931_v33  ;;  %v9771_v3 = vld [vmem:[#allocation20] sm:$0xff] }
 0x7ab   : > { %v5094_v8 = vsel %vm1603_vm13, %v5093_v14, %v5076_v20  ;;  %v9772_v14 = vld [vmem:[#allocation20 + $0x8] sm:$0xff] }
 0x7ad   : > { %5423 = vmatpush.bf16.msrb.mxu1 %v9777_v15 }
 0x7ae   : > { %6040 = vmatpush.bf16.msra.mxu2 %v9507_v46 }
 0x7b2   : > { %10071 = vrot.lane.b32.xlu2 %v10070_v47, %s10888_s13  ;;  %6041 = vmatpush.bf16.msra.mxu2 %v9499_v28  ;;  %v9776_v47 = vld [vmem:[#allocation20 + $0x28] sm:$0xff] }
 0x7b3   : > { %5424 = vmatpush.bf16.msrb.mxu1 %v9776_v47  ;;  %v13308_v28 = vld [vmem:[%s14597_s18] sm:$0x3]  ;;  %v9524_v47 = vld [vmem:[#allocation22 + $0x68] sm:$0xf0] }
 0x7b4   : > { %v5953_v48 = vperm.slane %v13308_v28, 0 }
 0x7b6   : > { %6042 = vmatpush.bf16.msra.mxu2 %v9491_v41 }
 0x7b7   : > { %5425 = vmatpush.bf16.msrb.mxu1 %v9775_v19  ;;  %v9516_v19 = vld [vmem:[#allocation22 + $0x58] sm:$0xf0] }
 0x7ba   : > { %10076 = vrot.lane.b32.xlu2 %v10075_v22, %s10889_s8  ;;  %6043 = vmatpush.bf16.msra.mxu2 %v9483_v36 }
 0x7bb   : > { %5426 = vmatpush.bf16.msrb.mxu1 %v9774_v9  ;;  %v9785_v9 = vld [vmem:[#allocation22 + $0x34] sm:$0xf] }
 0x7be   : > { %6044 = vmatpush.bf16.msra.mxu2 %v9475_v43 }
 0x7bf   : > { %5427 = vmatpush.bf16.msrb.mxu1 %v9773_v52  ;;  %v9492_v52 = vld [vmem:[#allocation22 + $0x28] sm:$0xf0] }
 0x7c1   : > { %6045 = vmatmul.bf16.vlgmr.msra.gmra.mxu2 %v13275_v38 }
 0x7c3   : > { %5428 = vmatpush.bf16.msrb.mxu1 %v9772_v14 }
 0x7c7   : > { %5429 = vmatpush.bf16.msrb.mxu1 %v9771_v3 }
 0x7d1   : > { %6050 = vmatmul.bf16.gmra.mxu2 %v13280_v62 }
 0x7f5   : > { %v5259_v26 = vpop.xlane.xlu0 %5258 }
 0x7f6   : > { %v5266_v55 = vmul.f32 %v5259_v26, %v14708_v1 }
 0x7f8   : > { %v13285_v45 = vsub.f32 %v13172_v31, %v5266_v55 }
 0x7fa   : > { %v5274_v17 = vmul.f32 %v13285_v45, %v13285_v45 }
 0x7fc   : > { %5278 = vadd.xlane.f32.xlu2 %v5274_v17  ;;  %v10113_v17 = vld [vmem:[#allocation14] ss:$0 sm:$0xff] }
 0x7fd   : > { %v5261_v53 = vpop.xlane.xlu1 %5260 }
 0x7fe   : > { %v5267_v35 = vmul.f32 %v5261_v53, %v14708_v1 }
 0x800   : > { %v13291_v40 = vsub.f32 %v13182_v54, %v5267_v35 }
 0x802   : > { %v5275_v39 = vmul.f32 %v13291_v40, %v13291_v40 }
 0x804   : > { %v10067_v13 = vpop.permute.xlu2 %10066  ;;  %5280 = vadd.xlane.f32.xlu0 %v5275_v39 }
 0x805   : > { %v10069_v25 = vunpack.i.h.bf16 %v10067_v13  ;;  %v10068_v2 = vunpack.i.l.bf16 %v10067_v13 }
 0x807   : > { %v5151_v42 = vsel %vm3041_vm14, %v5040_v10, %v10068_v2  ;;  %v5152_v30 = vsel %vm3041_vm14, %v5094_v8, %v10069_v25 }
 0x80c   : > { %v10072_v20 = vpop.permute.xlu2 %10071 }
 0x80d   : > { %v10074_v63 = vunpack.i.h.bf16 %v10072_v20  ;;  %v10073_v51 = vunpack.i.l.bf16 %v10072_v20  ;;  %v10114_v20 = vld [vmem:[#allocation16] ss:$0 sm:$0xff] }
 0x80f   : > { %v5156_v32 = vsel %vm5153_vm1, %v5151_v42, %v10073_v51  ;;  %v5157_v7 = vsel %vm5153_vm1, %v5152_v30, %v10074_v63 }
 0x814   : > { %v10077_v49 = vpop.permute.xlu2 %10076 }
 0x815   : > { %v10079_v18 = vunpack.i.h.bf16 %v10077_v49  ;;  %v10078_v11 = vunpack.i.l.bf16 %v10077_v49 }
 0x817   : > { %v5161_v59 = vsel %vm5158_vm2, %v5156_v32, %v10078_v11  ;;  %v5162_v23 = vsel %vm5158_vm2, %v5157_v7, %v10079_v18  ;;  %v10340_v32 = vld [vmem:[%s11297_s4 + $0x10] sm:$0xff] }
 0x818   : > { %v5180_v5 = vpack.c.bf16 %v5162_v23, %v5161_v59 }
 0x81a   : > { %5246 = vmatmul.bf16.gmra.mxu0 %v5180_v5  ;;  %v10341_v5 = vld [vmem:[%s11297_s4 + $0x18] sm:$0xff]  ;;  %s1146_s4 = scalar_lea.vmem [#allocation28], %s11293_s25  ;;  %s8890_s25 = scalar_lea.sflag [#allocation4], %s11290_s10 }
 0x844   : > { %v6046_v50 = vpop.f32.mrf.mxu2 }
 0x845   : > { %v6047_v55 = vadd.f32 %v6046_v50, %v5953_v48  ;;  %v9791_v50 = vld [vmem:[#allocation22 + $0x64] sm:$0xf] }
 0x847   : > { %v13316_v13 = vpack.c.bf16 %v6047_v55, %v6047_v55 }
 0x84c   : > { %v13303_v60 = vpop.f32.mrf.mxu2 }
 0x84d   : > { %v6049_v15 = vadd.f32 %v13303_v60, %v5953_v48 }
 0x854   : > { %v6051_v0 = vpop.f32.mrf.mxu2 }
 0x855   : > { %v6052_v43 = vadd.f32 %v6051_v0, %v5953_v48  ;;  %v9484_v0 = vld [vmem:[#allocation22 + $0x18] sm:$0xf0] }
 0x857   : > { %v13311_v21 = vpack.c.bf16 %v6052_v43, %v6052_v43  ;;  %v9476_v43 = vld [vmem:[#allocation22 + $0x8] sm:$0xf0] }
 0x859   : > { %6087 = vrot.lane.b32.xlu2 %v13311_v21, %s10889_s8 }
 0x85c   : > { %v6053_v18 = vpop.f32.mrf.mxu2 }
 0x85d   : > { %v6054_v11 = vadd.f32 %v6053_v18, %v5953_v48  ;;  %v9783_v48 = vld [vmem:[#allocation22 + $0x24] sm:$0xf] }
 0x85f   : > { %v13325_v59 = vpack.c.bf16 %v6054_v11, %v6054_v11 }
 0x861   : > { %6099 = vrot.lane.b32.xlu2 %v13316_v13, %s10887_s5 }
 0x869   : > { %6105 = vrot.lane.b32.xlu2 %v13325_v59, %s10887_s5 }
 0x86f   : > { %v5279_v34 = vpop.xlane.xlu2 %5278 }
 0x870   : > { %v5286_v58 = vmul.f32 %v5279_v34, %v14708_v1  ;;  %v9793_v34 = vld [vmem:[#allocation22 + $0x74] sm:$0xf] }
 0x872   : > { %v5290_v4 = vadd.f32 1e-12, %v5286_v58  ;;  %v9532_v58 = vld [vmem:[#allocation22 + $0x78] sm:$0xf0] }
 0x874   : > { %10258 = vrsqrt.f32 %v5290_v4  ;;  %vm5300_vm4 = vweird.f32 %v5290_v4 }
 0x877   : > { %v5281_v22 = vpop.xlane.xlu0 %5280 }
 0x878   : > { %v5287_v16 = vmul.f32 %v5281_v22, %v14708_v1  ;;  %v9527_v22 = vor.u32 %v9791_v50, %v9524_v47 }
 0x87a   : > { %v10259_v44 = vpop.eup %10258  ;;  %v5291_v46 = vadd.f32 1e-12, %v5287_v16  ;;  %v9789_v16 = vld [vmem:[#allocation22 + $0x54] sm:$0xf] }
 0x87b   : > { %v5295_v24 = vmul.f32 %v10259_v44, %v5290_v4  ;;  %vm5301_vm3 = vweird.f32 %v10259_v44  ;;  %v9535_v4 = vor.u32 %v9793_v34, %v9532_v58 }
 0x87c   : > { %10260 = vrsqrt.f32 %v5291_v46  ;;  %vm5302_vm5 = vmor %vm5300_vm4, %vm5301_vm3  ;;  %vm5310_vm7 = vweird.f32 %v5291_v46  ;;  %vm7243_vm3 = vcmask 130048  }
 0x87d   : > { %v5296_v56 = vmul.f32 %v10259_v44, %v5295_v24  ;;  %6056 = vmatpush.bf16.msrb.mxu3 %v9535_v4  ;;  %v9508_v24 = vld [vmem:[#allocation22 + $0x48] sm:$0xf0]  ;;  %v6134_v4 = vshrl.u32 %v13311_v21, 16 }
 0x87f   : > { %v5297_v41 = vmul.f32 0.5, %v5296_v56  ;;  %v9500_v56 = vld [vmem:[#allocation22 + $0x38] sm:$0xf0] }
 0x881   : > { %v5298_v6 = vsub.f32 1.5, %v5297_v41  ;;  %6057 = vmatpush.bf16.msrb.mxu3 %v9527_v22  ;;  %v9503_v41 = vor.u32 %v9785_v9, %v9500_v56 }
 0x882   : > { %v10261_v36 = vpop.eup %10260 }
 0x883   : > { %v5299_v61 = vmul.f32 %v10259_v44, %v5298_v6  ;;  %v5305_v10 = vmul.f32 %v10261_v36, %v5291_v46  ;;  %vm5311_vm6 = vweird.f32 %v10261_v36  ;;  %v9787_v46 = vld [vmem:[#allocation22 + $0x44] sm:$0xf]  ;;  %v9495_v6 = vor.u32 %v9783_v48, %v9492_v52 }
 0x884   : > { %vm5312_vm8 = vmor %vm5310_vm7, %vm5311_vm6  ;;  %v9511_v60 = vor.u32 %v9787_v46, %v9508_v24 }
 0x885   : > { %v5306_v8 = vmul.f32 %v10261_v36, %v5305_v10  ;;  %v5303_v57 = vsel %vm5302_vm5, %v10259_v44, %v5299_v61  ;;  %v13336_v44 = vpack.c.bf16 %v6049_v15, %v6049_v15  ;;  %v9779_v10 = vld [vmem:[#allocation22 + $0x4] sm:$0xf] }
 0x886   : > { %v5334_v53 = vmul.f32 %v5303_v57, %v13285_v45  ;;  %v9479_v14 = vor.u32 %v9779_v10, %v9476_v43 }
 0x887   : > { %v5307_v33 = vmul.f32 0.5, %v5306_v8 }
 0x888   : > { %v5341_v25 = vmul.f32 %v10113_v17, %v5334_v53 }
 0x889   : > { %v5308_v26 = vsub.f32 1.5, %v5307_v33  ;;  %v10115_v33 = vld [vmem:[%s14709_s21] ss:$0 sm:$0xff] }
 0x88a   : > { %v5348_v51 = vadd.f32 %v10114_v20, %v5341_v25 }
 0x88b   : > { %v5309_v35 = vmul.f32 %v10261_v36, %v5308_v26 }
 0x88d   : > { %v5313_v39 = vsel %vm5312_vm8, %v10261_v36, %v5309_v35  ;;  %v9781_v36 = vld [vmem:[#allocation22 + $0x14] sm:$0xf] }
 0x88e   : > { %v5335_v2 = vmul.f32 %v5313_v39, %v13291_v40  ;;  %v9487_v61 = vor.u32 %v9781_v36, %v9484_v0 }
 0x890   : > { %v5342_v63 = vmul.f32 %v10113_v17, %v5335_v2 }
 0x892   : > { %v5349_v49 = vadd.f32 %v10114_v20, %v5342_v63 }
 0x894   : > { %v5368_v45 = vpack.c.bf16 %v5349_v49, %v5348_v51 }
 0x896   : > { %5430 = vmatmul.bf16.vlgmr.msrb.gmra.mxu1 %v5368_v45  ;;  %v6110_v45 = vshrl.u32 %v13316_v13, 16 }
 0x897   : > { %v5247_v42 = vpop.f32.mrf.mxu0 }
 0x898   : > { %v5248_v30 = vadd.f32 %v13167_v27, %v5247_v42 }
 0x89a   : > { %v13323_v7 = vadd.f32 %v10340_v32, %v5248_v30 }
 0x89c   : > { %5262 = vadd.xlane.f32.xlu1 %v13323_v7 }
 0x89f   : > { %v5249_v40 = vpop.f32.mrf.mxu0 }
 0x8a0   : > { %v5250_v23 = vadd.f32 %v13167_v27, %v5249_v40  ;;  %v9519_v27 = vor.u32 %v9789_v16, %v9516_v19 }
 0x8a2   : > { %v13332_v37 = vadd.f32 %v10341_v5, %v5250_v23  ;;  %6058 = vmatpush.bf16.msrb.mxu3 %v9519_v27 }
 0x8a4   : > { %5264 = vadd.xlane.f32.xlu0 %v13332_v37 }
 0x8a6   : > { %6059 = vmatpush.bf16.msrb.mxu3 %v9511_v60 }
 0x8aa   : > { %6060 = vmatpush.bf16.msrb.mxu3 %v9503_v41  ;;  %v6122_v41 = vshrl.u32 %v13336_v44, 16 }
 0x8ae   : > { %6061 = vmatpush.bf16.msrb.mxu3 %v9495_v6 }
 0x8b2   : > { %6062 = vmatpush.bf16.msrb.mxu3 %v9487_v61 }
 0x8b3   : > { %v6088_v2 = vpop.permute.xlu2 %6087 }
 0x8b4   : > { %v6135_v15 = vshrl.u32 %v6088_v2, 16 }
 0x8b5   : > { %6083 = vrot.lane.b32.xlu1 %v13316_v13, %s10889_s8 }
 0x8b6   : > { %6063 = vmatpush.bf16.msrb.mxu3 %v9479_v14  ;;  %v6136_v9 = vpack.i.b16 %v6135_v15, %v6134_v4 }
 0x8b8   : > { %6085 = vrot.lane.b32.xlu0 %v13336_v44, %s10889_s8 }
 0x8b9   : > { %6064 = vmatmul.bf16.vlgmr.msrb.gmra.mxu3 %v13275_v38 }
 0x8bb   : > { %v6100_v11 = vpop.permute.xlu2 %6099 }
 0x8bc   : > { %v6117_v58 = vshrl.u32 %v6100_v11, 16 }
 0x8bd   : > { %6091 = vrot.lane.b32.xlu1 %v13316_v13, %s10888_s13 }
 0x8c0   : > { %6089 = vrot.lane.b32.xlu0 %v13325_v59, %s10889_s8 }
 0x8c5   : > { %6095 = vrot.lane.b32.xlu1 %v13311_v21, %s10888_s13 }
 0x8c8   : > { %6093 = vrot.lane.b32.xlu0 %v13336_v44, %s10888_s13 }
 0x8c9   : > { %6069 = vmatmul.bf16.gmra.mxu3 %v13280_v62 }
 0x8cd   : > { %6101 = vrot.lane.b32.xlu1 %v13336_v44, %s10887_s5 }
 0x8d0   : > { %6097 = vrot.lane.b32.xlu0 %v13325_v59, %s10888_s13 }
 0x8d8   : > { %6103 = vrot.lane.b32.xlu0 %v13311_v21, %s10887_s5 }
 0x90f   : > { %v5263_v8 = vpop.xlane.xlu1 %5262 }
 0x910   : > { %v5268_v57 = vmul.f32 %v5263_v8, %v14708_v1 }
 0x912   : > { %v13363_v3 = vsub.f32 %v13323_v7, %v5268_v57 }
 0x913   : > { %v5431_v26 = vpop.f32.mrf.mxu1 }
 0x914   : > { %v5432_v38 = vadd.f32 %v10115_v33, %v5431_v26  ;;  %v5276_v55 = vmul.f32 %v13363_v3, %v13363_v3 }
 0x916   : > { %v13367_v17 = vpack.c.bf16 %v5432_v38, %v5432_v38  ;;  %5282 = vadd.xlane.f32.xlu1 %v5276_v55 }
 0x917   : > { %v5265_v53 = vpop.xlane.xlu0 %5264 }
 0x918   : > { %v5269_v62 = vmul.f32 %v5265_v53, %v14708_v1  ;;  %5449 = vrot.lane.b32.xlu2 %v13367_v17, %s10889_s8 }
 0x91a   : > { %v13373_v35 = vsub.f32 %v13332_v37, %v5269_v62  ;;  %v13416_v62 = vperm.slane %v6136_v9, %v11473_v12 }
 0x91b   : > { %v5433_v20 = vpop.f32.mrf.mxu1 }
 0x91c   : > { %v5277_v39 = vmul.f32 %v13373_v35, %v13373_v35  ;;  %v5434_v25 = vadd.f32 %v10115_v33, %v5433_v20  ;;  %v6146_v33 = vshrl.u32 %v13325_v59, 16 }
 0x91e   : > { %5284 = vadd.xlane.f32.xlu0 %v5277_v39  ;;  %v13379_v63 = vpack.c.bf16 %v5434_v25, %v5434_v25 }
 0x920   : > { %5457 = vrot.lane.b32.xlu2 %v13367_v17, %s10888_s13 }
 0x927   : > { %v6084_v51 = vpop.permute.xlu1 %6083 }
 0x928   : > { %v6111_v49 = vshrl.u32 %v6084_v51, 16  ;;  %5451 = vrot.lane.b32.xlu2 %v13379_v63, %s10889_s8  ;;  %v6109_v42 = vpack.i.b16 %v6084_v51, %v13316_v13  ;;  %v6133_v13 = vpack.i.b16 %v6088_v2, %v13311_v21 }
 0x92a   : > { %v6086_v30 = vpop.permute.xlu0 %6085  ;;  %v6112_v18 = vpack.i.b16 %v6111_v49, %v6110_v45  ;;  %v6159_v32 = vperm.slane %v6109_v42, %v11473_v12  ;;  %v13397_v56 = vperm.slane %v6133_v13, %v11473_v12 }
 0x92b   : > { %v6123_v19 = vshrl.u32 %v6086_v30, 16  ;;  %v6121_v48 = vpack.i.b16 %v6086_v30, %v13336_v44 }
 0x92c   : > { %v6185_v23 = vperm.slane %v6112_v18, %v11473_v12  ;;  %v6167_v50 = vrot.slane %v6159_v32, 4  ;;  %v6271_v45 = vrot.slane %v13397_v56, 4 }
 0x92d   : > { %v6124_v8 = vpack.i.b16 %v6123_v19, %v6122_v41  ;;  %v6211_v39 = vperm.slane %v6121_v48, %v11473_v12 }
 0x92e   : > { %v6193_v27 = vrot.slane %v6185_v23, 4 }
 0x92f   : > { %v6092_v40 = vpop.permute.xlu1 %6091  ;;  %5467 = vrot.lane.b32.xlu1 %v13379_v63, %s10887_s5 }
 0x930   : > { %v6116_v5 = vshrl.u32 %v6092_v40, 16  ;;  %v6115_v34 = vpack.i.b16 %v6100_v11, %v6092_v40  ;;  %5459 = vrot.lane.b32.xlu2 %v13379_v63, %s10888_s13  ;;  %v6106_v11 = vpop.permute.xlu2 %6105 }
 0x932   : > { %v6118_v47 = vpack.i.b16 %v6117_v58, %v6116_v5  ;;  %v6164_v22 = vperm.slane %v6115_v34, %v11473_v12  ;;  %v6090_v16 = vpop.permute.xlu0 %6089  ;;  %v6297_v34 = vrot.slane %v13416_v62, 4  ;;  %v6219_v58 = vrot.slane %v6211_v39, 4 }
 0x933   : > { %v6147_v43 = vshrl.u32 %v6090_v16, 16  ;;  %v6145_v44 = vpack.i.b16 %v6090_v16, %v13325_v59  ;;  %v6153_v16 = vshrl.u32 %v6106_v11, 16 }
 0x934   : > { %v6165_v46 = vrot.slane %v6164_v22, 4  ;;  %v6168_v24 = vsel %vm1603_vm13, %v6164_v22, %v6167_v50  ;;  %v6190_v60 = vperm.slane %v6118_v47, %v11473_v12 }
 0x935   : > { %v6176_v21 = vperm.slane %v6168_v24, %v11478_v29  ;;  %v6148_v49 = vpack.i.b16 %v6147_v43, %v6146_v33  ;;  %v6315_v5 = vperm.slane %v6145_v44, %v11473_v12 }
 0x936   : > { %v6166_v52 = vsel %vm1603_vm13, %v6165_v46, %v6159_v32  ;;  %v6191_v6 = vrot.slane %v6190_v60, 4  ;;  %v6194_v36 = vsel %vm1603_vm13, %v6190_v60, %v6193_v27  ;;  %v6237_v32 = vperm.slane %v6124_v8, %v11473_v12 }
 0x937   : > { %v6172_v0 = vperm.slane %v6166_v52, %v11478_v29  ;;  %v6179_v61 = vrot.slane %v6176_v21, 4  ;;  %v6202_v10 = vperm.slane %v6194_v36, %v11478_v29  ;;  %v13406_v14 = vpop.permute.xlu1 %6095  ;;  %v13433_v50 = vperm.slane %v6148_v49, %v11473_v12 }
 0x938   : > { %v6192_v57 = vsel %vm1603_vm13, %v6191_v6, %v6185_v23  ;;  %5465 = vrot.lane.b32.xlu2 %v13367_v17, %s10887_s5  ;;  %v6245_v60 = vrot.slane %v6237_v32, 4  ;;  %v6323_v41 = vrot.slane %v6315_v5, 4  ;;  %v6140_v21 = vshrl.u32 %v13406_v14, 16 }
 0x939   : > { %v6177_v26 = vrot.slane %v6172_v0, 4  ;;  %v6180_v38 = vsel %vm1603_vm13, 0, %v6179_v61  ;;  %v6198_v55 = vperm.slane %v6192_v57, %v11478_v29  ;;  %v6205_v53 = vrot.slane %v6202_v10, 4 }
 0x93a   : > { %v6368_v20 = vrot.slane %v6180_v38, 4  ;;  %v6094_v25 = vpop.permute.xlu0 %6093  ;;  %v6363_v42 = vsel %vm1603_vm13, %v6179_v61, %v6172_v0  ;;  %v6349_v61 = vrot.slane %v13433_v50, 4 }
 0x93b   : > { %v6178_v2 = vsel %vm1603_vm13, 0, %v6177_v26  ;;  %v6203_v51 = vrot.slane %v6198_v55, 4  ;;  %v6206_v59 = vsel %vm1603_vm13, 0, %v6205_v53  ;;  %v6382_v4 = vsel %vm1603_vm13, %v6205_v53, %v6198_v55 }
 0x93c   : > { %v6369_v30 = vsel %vm1603_vm13, %v6368_v20, %v6178_v2  ;;  %v6387_v18 = vrot.slane %v6206_v59, 4  ;;  %v6367_v15 = vperm.slane %v6363_v42, %v11473_v12  ;;  %v6128_v47 = vshrl.u32 %v6094_v25, 16 }
 0x93d   : > { %v6204_v40 = vsel %vm1603_vm13, 0, %v6203_v51  ;;  %v6373_v23 = vperm.slane %v6369_v30, %v11473_v12  ;;  %v6386_v9 = vperm.slane %v6382_v4, %v11473_v12 }
 0x93e   : > { %v6388_v13 = vsel %vm1603_vm13, %v6387_v18, %v6204_v40 }
 0x93f   : > { %v6102_v22 = vpop.permute.xlu1 %6101  ;;  %v6374_v46 = vrot.slane %v6373_v23, 4  ;;  %v6392_v24 = vperm.slane %v6388_v13, %v11473_v12 }
 0x940   : > { %v6127_v19 = vpack.i.b16 %v6102_v22, %v6094_v25  ;;  %v6129_v27 = vshrl.u32 %v6102_v22, 16 }
 0x941   : > { %v6375_v36 = vsel %vm1603_vm13, %v6374_v46, %v6367_v15  ;;  %v6393_v0 = vrot.slane %v6392_v24, 4 }
 0x942   : > { %v6130_v48 = vpack.i.b16 %v6129_v27, %v6128_v47  ;;  %v6216_v52 = vperm.slane %v6127_v19, %v11473_v12  ;;  %v6098_v6 = vpop.permute.xlu0 %6097  ;;  %v13442_v8 = vperm.slane %v6375_v36, %v11478_v29 }
 0x943   : > { %v6151_v10 = vpack.i.b16 %v6106_v11, %v6098_v6  ;;  %v6152_v43 = vshrl.u32 %v6098_v6, 16  ;;  %v6394_v26 = vsel %vm1603_vm13, %v6393_v0, %v6386_v9 }
 0x944   : > { %v6217_v57 = vrot.slane %v6216_v52, 4  ;;  %v6220_v33 = vsel %vm1603_vm13, %v6216_v52, %v6219_v58  ;;  %v6242_v44 = vperm.slane %v6130_v48, %v11473_v12  ;;  %v13450_v20 = vperm.slane %v6394_v26, %v11478_v29 }
 0x945   : > { %v6228_v38 = vperm.slane %v6220_v33, %v11478_v29  ;;  %v6154_v55 = vpack.i.b16 %v6153_v16, %v6152_v43  ;;  %v6320_v53 = vperm.slane %v6151_v10, %v11473_v12  ;;  %v6518_v59 = vshrl.u32 %v13442_v8, 16 }
 0x946   : > { %v6218_v25 = vsel %vm1603_vm13, %v6217_v57, %v6211_v39  ;;  %v6243_v2 = vrot.slane %v6242_v44, 4  ;;  %v6246_v51 = vsel %vm1603_vm13, %v6242_v44, %v6245_v60  ;;  %v6517_v39 = vpack.i.b16 %v13450_v20, %v13442_v8 }
 0x947   : > { %v6224_v49 = vperm.slane %v6218_v25, %v11478_v29  ;;  %v6231_v42 = vrot.slane %v6228_v38, 4  ;;  %v6254_v30 = vperm.slane %v6246_v51, %v11478_v29  ;;  %v6321_v18 = vrot.slane %v6320_v53, 4 }
 0x948   : > { %v6244_v11 = vsel %vm1603_vm13, %v6243_v2, %v6237_v32  ;;  %v6324_v40 = vsel %vm1603_vm13, %v6320_v53, %v6323_v41  ;;  %v6346_v23 = vperm.slane %v6154_v55, %v11473_v12 }
 0x949   : > { %v6229_v58 = vrot.slane %v6224_v49, 4  ;;  %v6232_v4 = vsel %vm1603_vm13, 0, %v6231_v42  ;;  %v6250_v13 = vperm.slane %v6244_v11, %v11478_v29  ;;  %v6257_v15 = vrot.slane %v6254_v30, 4 }
 0x94a   : > { %v6401_v47 = vsel %vm1603_vm13, %v6231_v42, %v6224_v49  ;;  %v6406_v22 = vrot.slane %v6232_v4, 4  ;;  %v6322_v16 = vsel %vm1603_vm13, %v6321_v18, %v6315_v5  ;;  %v6332_v32 = vperm.slane %v6324_v40, %v11478_v29  ;;  %v6104_v52 = vpop.permute.xlu0 %6103 }
 0x94b   : > { %v6230_v19 = vsel %vm1603_vm13, 0, %v6229_v58  ;;  %v6255_v27 = vrot.slane %v6250_v13, 4  ;;  %v6258_v46 = vsel %vm1603_vm13, 0, %v6257_v15  ;;  %v6405_v24 = vperm.slane %v6401_v47, %v11473_v12 }
 0x94c   : > { %v6407_v60 = vsel %vm1603_vm13, %v6406_v22, %v6230_v19  ;;  %v6420_v9 = vsel %vm1603_vm13, %v6257_v15, %v6250_v13  ;;  %v6425_v41 = vrot.slane %v6258_v46, 4  ;;  %v6328_v48 = vperm.slane %v6322_v16, %v11478_v29 }
 0x94d   : > { %v6256_v6 = vsel %vm1603_vm13, 0, %v6255_v27  ;;  %v6411_v5 = vperm.slane %v6407_v60, %v11473_v12  ;;  %v6424_v36 = vperm.slane %v6420_v9, %v11473_v12  ;;  %v6335_v0 = vrot.slane %v6332_v32, 4 }
 0x94e   : > { %v6426_v10 = vsel %vm1603_vm13, %v6425_v41, %v6256_v6  ;;  %v6333_v43 = vrot.slane %v6328_v48, 4  ;;  %v6347_v57 = vrot.slane %v6346_v23, 4  ;;  %v6350_v33 = vsel %vm1603_vm13, %v6346_v23, %v6349_v61 }
 0x94f   : > { %v6336_v44 = vsel %vm1603_vm13, 0, %v6335_v0  ;;  %v6358_v26 = vperm.slane %v6350_v33, %v11478_v29  ;;  %v13481_v38 = vsel %vm1603_vm13, %v6335_v0, %v6328_v48  ;;  %v6139_v55 = vpack.i.b16 %v6104_v52, %v13406_v14 }
 0x950   : > { %v6334_v53 = vsel %vm1603_vm13, 0, %v6333_v43  ;;  %v6348_v25 = vsel %vm1603_vm13, %v6347_v57, %v13433_v50  ;;  %v6481_v2 = vperm.slane %v13481_v38, %v11473_v12  ;;  %v6482_v51 = vrot.slane %v6336_v44, 4 }
 0x951   : > { %v6354_v61 = vperm.slane %v6348_v25, %v11478_v29  ;;  %v6361_v49 = vrot.slane %v6358_v26, 4  ;;  %v6141_v42 = vshrl.u32 %v6104_v52, 16  ;;  %v6268_v30 = vperm.slane %v6139_v55, %v11473_v12 }
 0x952   : > { %v13492_v18 = vsel %vm1603_vm13, %v6482_v51, %v6334_v53  ;;  %v6412_v11 = vrot.slane %v6411_v5, 4  ;;  %v6430_v40 = vperm.slane %v6426_v10, %v11473_v12  ;;  %v7051_v23 = vunpack.c.l.b16 %v6517_v39 }
 0x953   : > { %v6359_v58 = vrot.slane %v6354_v61, 4  ;;  %v6362_v50 = vsel %vm1603_vm13, 0, %v6361_v49  ;;  %v6487_v4 = vperm.slane %v13492_v18, %v11473_v12  ;;  %v13499_v13 = vsel %vm1603_vm13, %v6361_v49, %v6354_v61  ;;  %v13535_v49 = vpop.f32.mrf.mxu3 }
 0x954   : > { %v6500_v15 = vperm.slane %v13499_v13, %v11473_v12  ;;  %v6501_v47 = vrot.slane %v6362_v50, 4  ;;  %v6142_v22 = vpack.i.b16 %v6141_v42, %v6140_v21  ;;  %v6269_v16 = vrot.slane %v6268_v30, 4 }
 0x955   : > { %v6360_v32 = vsel %vm1603_vm13, 0, %v6359_v58  ;;  %v6272_v39 = vsel %vm1603_vm13, %v6268_v30, %v6271_v45  ;;  %v6413_v19 = vsel %vm1603_vm13, %v6412_v11, %v6405_v24  ;;  %v6431_v27 = vrot.slane %v6430_v40, 4 }
 0x956   : > { %v13511_v46 = vsel %vm1603_vm13, %v6501_v47, %v6360_v32  ;;  %v6270_v60 = vsel %vm1603_vm13, %v6269_v16, %v13397_v56  ;;  %v6280_v9 = vperm.slane %v6272_v39, %v11478_v29  ;;  %v6294_v14 = vperm.slane %v6142_v22, %v11473_v12 }
 0x957   : > { %v6276_v21 = vperm.slane %v6270_v60, %v11478_v29  ;;  %v6417_v41 = vperm.slane %v6413_v19, %v11478_v29  ;;  %v6432_v48 = vsel %vm1603_vm13, %v6431_v27, %v6424_v36  ;;  %v6519_v45 = vshrl.u32 %v13450_v20, 16 }
 0x958   : > { %v6283_v24 = vrot.slane %v6280_v9, 4  ;;  %v6295_v52 = vrot.slane %v6294_v14, 4  ;;  %v6298_v6 = vsel %vm1603_vm13, %v6294_v14, %v6297_v34  ;;  %v6436_v56 = vperm.slane %v6432_v48, %v11478_v29 }
 0x959   : > { %v6281_v5 = vrot.slane %v6276_v21, 4  ;;  %v6306_v0 = vperm.slane %v6298_v6, %v11478_v29  ;;  %v6520_v10 = vpack.i.b16 %v6519_v45, %v6518_v59  ;;  %v6530_v43 = vshrl.u32 %v6417_v41, 16 }
 0x95a   : > { %v6284_v57 = vsel %vm1603_vm13, 0, %v6283_v24  ;;  %v6296_v36 = vsel %vm1603_vm13, %v6295_v52, %v13416_v62  ;;  %v6439_v33 = vsel %vm1603_vm13, %v6283_v24, %v6276_v21  ;;  %v6529_v44 = vpack.i.b16 %v6436_v56, %v6417_v41 }
 0x95b   : > { %v6282_v26 = vsel %vm1603_vm13, 0, %v6281_v5  ;;  %v6302_v34 = vperm.slane %v6296_v36, %v11478_v29  ;;  %v6309_v55 = vrot.slane %v6306_v0, 4  ;;  %v6443_v53 = vperm.slane %v6439_v33, %v11473_v12 }
 0x95c   : > { %v6444_v25 = vrot.slane %v6284_v57, 4  ;;  %v7052_v51 = vunpack.c.l.b16 %v6529_v44  ;;  %v6531_v61 = vshrl.u32 %v6436_v56, 16  ;;  %v7095_v59 = vunpack.c.l.b16 %v6520_v10 }
 0x95d   : > { %v6307_v42 = vrot.slane %v6302_v34, 4  ;;  %v6310_v30 = vsel %vm1603_vm13, 0, %v6309_v55  ;;  %v6458_v62 = vsel %vm1603_vm13, %v6309_v55, %v6302_v34  ;;  %v6380_v11 = vrot.slane %v13442_v8, 4  ;;  %v6067_v55 = vpop.f32.mrf.mxu3 }
 0x95e   : > { %v6445_v40 = vsel %vm1603_vm13, %v6444_v25, %v6282_v26  ;;  %v6462_v58 = vperm.slane %v6458_v62, %v11473_v12  ;;  %v6463_v50 = vrot.slane %v6310_v30, 4  ;;  %v7053_v47 = vpack.c.b16 %v7052_v51, %v7051_v23 }
 0x95f   : > { %v6308_v22 = vsel %vm1603_vm13, 0, %v6307_v42  ;;  %v6449_v16 = vperm.slane %v6445_v40, %v11473_v12  ;;  %v6532_v32 = vpack.i.b16 %v6531_v61, %v6530_v43  ;;  %v6381_v39 = vsel %vm1603_vm13, 0, %v6380_v11 }
 0x960   : > { %v6464_v19 = vsel %vm1603_vm13, %v6463_v50, %v6308_v22  ;;  %v13547_v27 = vsel %vm3041_vm14, %v7053_v47, 0  ;;  %v6399_v8 = vrot.slane %v13450_v20, 4  ;;  %v6418_v60 = vrot.slane %v6417_v41, 4 }
 0x961   : > { %7067 = vmatpush.bf16.xpose.msra.mxu0 %v13547_v27  ;;  %v7096_v9 = vunpack.c.l.b16 %v6532_v32  ;;  %v6437_v14 = vrot.slane %v6436_v56, 4  ;;  %v6524_v23 = vshrl.u32 %v6381_v39, 16  ;;  %v6450_v21 = vrot.slane %v6449_v16, 4 }
 0x962   : > { %v6400_v48 = vsel %vm1603_vm13, 0, %v6399_v8  ;;  %v6419_v45 = vsel %vm1603_vm13, 0, %v6418_v60  ;;  %v6468_v24 = vperm.slane %v6464_v19, %v11473_v12  ;;  %v6488_v52 = vrot.slane %v6487_v4, 4 }
 0x963   : > { %v7097_v6 = vpack.c.b16 %v7096_v9, %v7095_v59  ;;  %v6438_v20 = vsel %vm1603_vm13, 0, %v6437_v14  ;;  %v6523_v41 = vpack.i.b16 %v6400_v48, %v6381_v39  ;;  %v6525_v5 = vshrl.u32 %v6400_v48, 16 }
 0x964   : > { %v6535_v0 = vpack.i.b16 %v6438_v20, %v6419_v45  ;;  %v6536_v10 = vshrl.u32 %v6419_v45, 16  ;;  %v6537_v56 = vshrl.u32 %v6438_v20, 16  ;;  %v6451_v43 = vsel %vm1603_vm13, %v6450_v21, %v6443_v53 }
 0x965   : > { %v13560_v57 = vsel %vm3041_vm14, %v7097_v6, 0  ;;  %v7139_v36 = vunpack.c.l.b16 %v6523_v41  ;;  %v6526_v33 = vpack.i.b16 %v6525_v5, %v6524_v23  ;;  %v6455_v44 = vperm.slane %v6451_v43, %v11478_v29 }
 0x966   : > { %7111 = vmatpush.bf16.xpose.msrb.mxu2 %v13560_v57  ;;  %v7140_v18 = vunpack.c.l.b16 %v6535_v0  ;;  %v6538_v4 = vpack.i.b16 %v6537_v56, %v6536_v10  ;;  %v6469_v26 = vrot.slane %v6468_v24, 4  ;;  %v6489_v34 = vsel %vm1603_vm13, %v6488_v52, %v6481_v2  ;;  %v6070_v56 = vpop.f32.mrf.mxu3 }
 0x967   : > { %v7183_v25 = vunpack.c.l.b16 %v6526_v33  ;;  %v6493_v53 = vperm.slane %v6489_v34, %v11478_v29  ;;  %v6506_v51 = vperm.slane %v13511_v46, %v11473_v12  ;;  %v6542_v61 = vshrl.u32 %v6455_v44, 16 }
 0x968   : > { %v7141_v59 = vpack.c.b16 %v7140_v18, %v7139_v36  ;;  %v7184_v42 = vunpack.c.l.b16 %v6538_v4  ;;  %v6470_v30 = vsel %vm1603_vm13, %v6469_v26, %v6462_v58  ;;  %v6456_v62 = vrot.slane %v6455_v44, 4 }
 0x969   : > { %v6474_v11 = vperm.slane %v6470_v30, %v11478_v29  ;;  %v6507_v40 = vrot.slane %v6506_v51, 4  ;;  %v6554_v50 = vshrl.u32 %v6493_v53, 16  ;;  %v6494_v38 = vrot.slane %v6493_v53, 4 }
 0x96a   : > { %v13574_v2 = vsel %vm3041_vm14, %v7141_v59, 0  ;;  %v7185_v47 = vpack.c.b16 %v7184_v42, %v7183_v25  ;;  %v6457_v22 = vsel %vm1603_vm13, 0, %v6456_v62  ;;  %v5954_v16 = vperm.slane %v13308_v28, 1 }
 0x96b   : > { %7155 = vmatpush.bf16.xpose.msrb.mxu0 %v13574_v2  ;;  %v6508_v46 = vsel %vm1603_vm13, %v6507_v40, %v6500_v15  ;;  %v6541_v58 = vpack.i.b16 %v6474_v11, %v6455_v44  ;;  %v6543_v32 = vshrl.u32 %v6474_v11, 16  ;;  %v6475_v39 = vrot.slane %v6474_v11, 4 }
 0x96c   : > { %v13584_v19 = vsel %vm3041_vm14, %v7185_v47, 0  ;;  %v6512_v8 = vperm.slane %v6508_v46, %v11478_v29  ;;  %v6495_v60 = vsel %vm1603_vm13, 0, %v6494_v38  ;;  %v6548_v9 = vshrl.u32 %v6457_v22, 16 }
 0x96d   : > { %v7073_v28 = vunpack.c.l.b16 %v6541_v58  ;;  %v6544_v14 = vpack.i.b16 %v6543_v32, %v6542_v61  ;;  %v6476_v23 = vsel %vm1603_vm13, 0, %v6475_v39  ;;  %v6560_v13 = vshrl.u32 %v6495_v60, 16 }
 0x96e   : > { %7199 = vmatpush.bf16.xpose.msra.mxu2 %v13584_v19  ;;  %v6553_v21 = vpack.i.b16 %v6512_v8, %v6493_v53  ;;  %v6555_v15 = vshrl.u32 %v6512_v8, 16  ;;  %v6513_v48 = vrot.slane %v6512_v8, 4  ;;  %v6547_v45 = vpack.i.b16 %v6476_v23, %v6457_v22  ;;  %v6072_v47 = vpop.f32.mrf.mxu3 }
 0x96f   : > { %v7117_v24 = vunpack.c.l.b16 %v6544_v14  ;;  %v6549_v52 = vshrl.u32 %v6476_v23, 16  ;;  %v6066_v6 = vadd.f32 %v13535_v49, %v5954_v16  ;;  %v6068_v20 = vadd.f32 %v6067_v55, %v5954_v16 }
 0x970   : > { %v7074_v41 = vunpack.c.l.b16 %v6553_v21  ;;  %v6556_v5 = vpack.i.b16 %v6555_v15, %v6554_v50  ;;  %v6514_v0 = vsel %vm1603_vm13, 0, %v6513_v48  ;;  %v7161_v10 = vunpack.c.l.b16 %v6547_v45 }
 0x971   : > { %v6559_v43 = vpack.i.b16 %v6514_v0, %v6495_v60  ;;  %v6550_v36 = vpack.i.b16 %v6549_v52, %v6548_v9  ;;  %v6561_v33 = vshrl.u32 %v6514_v0, 16  ;;  %v13592_v44 = vpack.c.bf16 %v6066_v6, %v6066_v6 }
 0x972   : > { %v7075_v18 = vpack.c.b16 %v7074_v41, %v7073_v28  ;;  %v7118_v4 = vunpack.c.l.b16 %v6556_v5  ;;  %v5450_v26 = vpop.permute.xlu2 %5449  ;;  %v13594_v34 = vpack.c.bf16 %v6068_v20, %v6068_v20  ;;  %v6071_v55 = vadd.f32 %v6070_v56, %v5954_v16 }
 0x973   : > { %v7162_v25 = vunpack.c.l.b16 %v6559_v43  ;;  %v6562_v53 = vpack.i.b16 %v6561_v33, %v6560_v13  ;;  %v7205_v49 = vunpack.c.l.b16 %v6550_v36  ;;  %6571 = vrot.lane.b32.xlu0 %v13592_v44, %s10889_s8  ;;  %v6073_v22 = vadd.f32 %v6072_v47, %v5954_v16 }
 0x974   : > { %v13599_v51 = vsel %vm3041_vm14, %v7075_v18, 0  ;;  %v7119_v61 = vpack.c.b16 %v7118_v4, %v7117_v24  ;;  %6573 = vrot.lane.b32.xlu2 %v13594_v34, %s10889_s8  ;;  %v13611_v40 = vpack.c.bf16 %v6071_v55, %v6071_v55  ;;  %v5477_v39 = vshrl.u32 %v5450_v26, 16 }
 0x975   : > { %7089 = vmatpush.bf16.xpose.msra.mxu1 %v13599_v51  ;;  %v7163_v59 = vpack.c.b16 %v7162_v25, %v7161_v10  ;;  %v7206_v42 = vunpack.c.l.b16 %v6562_v53  ;;  %v13624_v58 = vpack.c.bf16 %v6073_v22, %v6073_v22  ;;  %v5476_v16 = vshrl.u32 %v13367_v17, 16 }
 0x976   : > { %v13605_v30 = vsel %vm3041_vm14, %v7119_v61, 0  ;;  %v5475_v28 = vpack.i.b16 %v5450_v26, %v13367_v17  ;;  %v5488_v20 = vshrl.u32 %v13379_v63, 16 }
 0x977   : > { %7133 = vmatpush.bf16.xpose.msra.mxu3 %v13605_v30  ;;  %v13609_v62 = vsel %vm3041_vm14, %v7163_v59, 0  ;;  %v7207_v11 = vpack.c.b16 %v7206_v42, %v7205_v49  ;;  %6577 = vrot.lane.b32.xlu1 %v13624_v58, %s10889_s8  ;;  %v5478_v14 = vpack.i.b16 %v5477_v39, %v5476_v16 }
 0x978   : > { %v5525_v23 = vperm.slane %v5475_v28, %v11473_v12 }
 0x979   : > { %v13615_v50 = vsel %vm3041_vm14, %v7207_v11, 0  ;;  %v5551_v21 = vperm.slane %v5478_v14, %v11473_v12 }
 0x97a   : > { %v5458_v38 = vpop.permute.xlu2 %5457  ;;  %v5533_v5 = vrot.slane %v5525_v23, 4 }
 0x97b   : > { %6575 = vrot.lane.b32.xlu0 %v13611_v40, %s10889_s8  ;;  %v5482_v24 = vshrl.u32 %v5458_v38, 16  ;;  %v5559_v43 = vrot.slane %v5551_v21, 4 }
 0x97c   : > { %6581 = vrot.lane.b32.xlu2 %v13594_v34, %s10888_s13 }
 0x97d   : > { %7177 = vmatpush.bf16.xpose.msrb.mxu1 %v13609_v62 }
 0x97f   : > { %7221 = vmatpush.bf16.xpose.msrb.mxu3 %v13615_v50  ;;  %6589 = vrot.lane.b32.xlu1 %v13594_v34, %s10887_s5 }
 0x982   : > { %v5452_v46 = vpop.permute.xlu2 %5451 }
 0x983   : > { %6579 = vrot.lane.b32.xlu0 %v13592_v44, %s10888_s13  ;;  %v5489_v15 = vshrl.u32 %v5452_v46, 16  ;;  %v5487_v36 = vpack.i.b16 %v5452_v46, %v13379_v63 }
 0x984   : > { %6585 = vrot.lane.b32.xlu2 %v13624_v58, %s10888_s13 }
 0x985   : > { %v5490_v33 = vpack.i.b16 %v5489_v15, %v5488_v20  ;;  %v5577_v63 = vperm.slane %v5487_v36, %v11473_v12 }
 0x987   : > { %v13665_v47 = vperm.slane %v5490_v33, %v11473_v12 }
 0x989   : > { %v5283_v32 = vpop.xlane.xlu1 %5282 }
 0x98a   : > { %v5288_v8 = vmul.f32 %v5283_v32, %v14708_v1  ;;  %v13631_v60 = vpop.permute.xlu2 %5459 }
 0x98b   : > { %6583 = vrot.lane.b32.xlu0 %v13611_v40, %s10888_s13  ;;  %v5494_v20 = vshrl.u32 %v13631_v60, 16 }
 0x98c   : > { %v5292_v9 = vadd.f32 1e-12, %v5288_v8  ;;  %6591 = vrot.lane.b32.xlu2 %v13611_v40, %s10887_s5 }
 0x98e   : > { %10262 = vrsqrt.f32 %v5292_v9  ;;  %vm5320_vm10 = vweird.f32 %v5292_v9 }
 0x991   : > { %v5285_v13 = vpop.xlane.xlu0 %5284 }
 0x992   : > { %v5289_v48 = vmul.f32 %v5285_v13, %v14708_v1  ;;  %v5466_v45 = vpop.permute.xlu2 %5465  ;;  %v5585_v13 = vrot.slane %v5577_v63, 4 }
 0x993   : > { %v5481_v52 = vpack.i.b16 %v5466_v45, %v5458_v38  ;;  %v5483_v17 = vshrl.u32 %v5466_v45, 16  ;;  %6587 = vrot.lane.b32.xlu0 %v13592_v44, %s10887_s5  ;;  %v5611_v45 = vrot.slane %v13665_v47, 4 }
 0x994   : > { %v13646_v6 = vpop.eup %10262  ;;  %v13649_v41 = vadd.f32 1e-12, %v5289_v48 }
 0x995   : > { %v5315_v0 = vmul.f32 %v13646_v6, %v5292_v9  ;;  %v5484_v10 = vpack.i.b16 %v5483_v17, %v5482_v24  ;;  %v5530_v56 = vperm.slane %v5481_v52, %v11473_v12  ;;  %vm5321_vm9 = vweird.f32 %v13646_v6  ;;  %v10342_v17 = vld [vmem:[#allocation14] ss:$0 sm:$0xff] }
 0x996   : > { %10264 = vrsqrt.f32 %v13649_v41  ;;  %vm13678_vm11 = vmor %vm5320_vm10, %vm5321_vm9  ;;  %vm5330_vm12 = vweird.f32 %v13649_v41 }
 0x997   : > { %v5316_v18 = vmul.f32 %v13646_v6, %v5315_v0  ;;  %v5531_v4 = vrot.slane %v5530_v56, 4  ;;  %v5534_v26 = vsel %vm1603_vm13, %v5530_v56, %v5533_v5  ;;  %v5556_v25 = vperm.slane %v5484_v10, %v11473_v12 }
 0x998   : > { %v5542_v53 = vperm.slane %v5534_v26, %v11478_v29 }
 0x999   : > { %v5317_v49 = vmul.f32 0.5, %v5316_v18  ;;  %v5532_v55 = vsel %vm1603_vm13, %v5531_v4, %v5525_v23  ;;  %v5557_v61 = vrot.slane %v5556_v25, 4  ;;  %v5560_v59 = vsel %vm1603_vm13, %v5556_v25, %v5559_v43 }
 0x99a   : > { %v5538_v42 = vperm.slane %v5532_v55, %v11478_v29  ;;  %v5545_v11 = vrot.slane %v5542_v53, 4  ;;  %v5568_v38 = vperm.slane %v5560_v59, %v11478_v29 }
 0x99b   : > { %v5318_v22 = vsub.f32 1.5, %v5317_v49  ;;  %v5558_v46 = vsel %vm1603_vm13, %v5557_v61, %v5551_v21  ;;  %6593 = vrot.lane.b32.xlu0 %v13624_v58, %s10887_s5 }
 0x99c   : > { %v10265_v32 = vpop.eup %10264  ;;  %v5543_v39 = vrot.slane %v5538_v42, 4  ;;  %v5546_v8 = vsel %vm1603_vm13, 0, %v5545_v11  ;;  %v5564_v16 = vperm.slane %v5558_v46, %v11478_v29  ;;  %v5571_v28 = vrot.slane %v5568_v38, 4 }
 0x99d   : > { %v5319_v14 = vmul.f32 %v13646_v6, %v5318_v22  ;;  %v5325_v23 = vmul.f32 %v10265_v32, %v13649_v41  ;;  %v5734_v52 = vrot.slane %v5546_v8, 4  ;;  %v5729_v0 = vsel %vm1603_vm13, %v5545_v11, %v5538_v42 }
 0x99e   : > { %v5544_v15 = vsel %vm1603_vm13, 0, %v5543_v39  ;;  %v5569_v21 = vrot.slane %v5564_v16, 4  ;;  %v5572_v48 = vsel %vm1603_vm13, 0, %v5571_v28  ;;  %v5748_v36 = vsel %vm1603_vm13, %v5571_v28, %v5564_v16 }
 0x99f   : > { %v5326_v24 = vmul.f32 %v10265_v32, %v5325_v23  ;;  %v5753_v10 = vrot.slane %v5572_v48, 4  ;;  %v5323_v56 = vsel %vm13678_vm11, %v13646_v6, %v5319_v14  ;;  %v5735_v9 = vsel %vm1603_vm13, %v5734_v52, %v5544_v15 }
 0x9a0   : > { %v5570_v5 = vsel %vm1603_vm13, 0, %v5569_v21  ;;  %v5739_v18 = vperm.slane %v5735_v9, %v11473_v12  ;;  %vm5331_vm15 = vweird.f32 %v10265_v32  ;;  %v5733_v6 = vperm.slane %v5729_v0, %v11473_v12 }
 0x9a1   : > { %v5327_v43 = vmul.f32 0.5, %v5326_v24  ;;  %v5468_v33 = vpop.permute.xlu1 %5467  ;;  %v5754_v4 = vsel %vm1603_vm13, %v5753_v10, %v5570_v5  ;;  %v5336_v42 = vmul.f32 %v5323_v56, %v13363_v3  ;;  %v5752_v38 = vperm.slane %v5748_v36, %v11473_v12  ;;  %vm5332_vm0 = vmor %vm5330_vm12, %vm5331_vm15 }
 0x9a2   : > { %v5493_v26 = vpack.i.b16 %v5468_v33, %v13631_v60  ;;  %v5495_v25 = vshrl.u32 %v5468_v33, 16  ;;  %v5758_v49 = vperm.slane %v5754_v4, %v11473_v12  ;;  %v5740_v55 = vrot.slane %v5739_v18, 4 }
 0x9a3   : > { %v5328_v53 = vsub.f32 1.5, %v5327_v43 }
 0x9a4   : > { %v5496_v61 = vpack.i.b16 %v5495_v25, %v5494_v20  ;;  %v5582_v59 = vperm.slane %v5493_v26, %v11473_v12  ;;  %v5759_v22 = vrot.slane %v5758_v49, 4  ;;  %v5741_v60 = vsel %vm1603_vm13, %v5740_v55, %v5733_v6  ;;  %v10343_v6 = vld [vmem:[#allocation16] ss:$0 sm:$0xff] }
 0x9a5   : > { %v5329_v11 = vmul.f32 %v10265_v32, %v5328_v53  ;;  %v5745_v16 = vperm.slane %v5741_v60, %v11478_v29  ;;  %v5343_v20 = vmul.f32 %v10342_v17, %v5336_v42 }
 0x9a6   : > { %v5583_v46 = vrot.slane %v5582_v59, 4  ;;  %v5586_v41 = vsel %vm1603_vm13, %v5582_v59, %v5585_v13  ;;  %v5608_v39 = vperm.slane %v5496_v61, %v11473_v12  ;;  %v5760_v28 = vsel %vm1603_vm13, %v5759_v22, %v5752_v38 }
 0x9a7   : > { %v5333_v8 = vsel %vm5332_vm0, %v10265_v32, %v5329_v11  ;;  %v5594_v14 = vperm.slane %v5586_v41, %v11478_v29  ;;  %v5764_v32 = vperm.slane %v5760_v28, %v11478_v29  ;;  %v5884_v43 = vshrl.u32 %v5745_v16, 16 }
 0x9a8   : > { %v5337_v3 = vmul.f32 %v5333_v8, %v13373_v35  ;;  %v5584_v23 = vsel %vm1603_vm13, %v5583_v46, %v5577_v63  ;;  %v5609_v15 = vrot.slane %v5608_v39, 4  ;;  %v5612_v21 = vsel %vm1603_vm13, %v5608_v39, %v5611_v45 }
 0x9a9   : > { %v5590_v48 = vperm.slane %v5584_v23, %v11478_v29  ;;  %v5597_v24 = vrot.slane %v5594_v14, 4  ;;  %v5620_v13 = vperm.slane %v5612_v21, %v11478_v29  ;;  %v5883_v56 = vpack.i.b16 %v5764_v32, %v5745_v16 }
 0x9aa   : > { %v5610_v52 = vsel %vm1603_vm13, %v5609_v15, %v13665_v47  ;;  %v5344_v5 = vmul.f32 %v10342_v17, %v5337_v3  ;;  %v5885_v9 = vshrl.u32 %v5764_v32, 16  ;;  %v5350_v55 = vadd.f32 %v10343_v6, %v5343_v20 }
 0x9ab   : > { %v5595_v0 = vrot.slane %v5590_v48, 4  ;;  %v5598_v35 = vsel %vm1603_vm13, 0, %v5597_v24  ;;  %v5616_v63 = vperm.slane %v5610_v52, %v11478_v29  ;;  %v5623_v10 = vrot.slane %v5620_v13, 4  ;;  %9536 = vmatmul.msk.bf16.vlgmr.msra.gmra.mxu0 %vm3041_vm14, %v5883_v56 }
 0x9ac   : > { %v5772_v45 = vrot.slane %v5598_v35, 4  ;;  %v5767_v47 = vsel %vm1603_vm13, %v5597_v24, %v5590_v48  ;;  %v5886_v25 = vpack.i.b16 %v5885_v9, %v5884_v43  ;;  %v5351_v61 = vadd.f32 %v10343_v6, %v5344_v5 }
 0x9ad   : > { %v5596_v36 = vsel %vm1603_vm13, 0, %v5595_v0  ;;  %v5621_v33 = vrot.slane %v5616_v63, 4  ;;  %v5624_v18 = vsel %vm1603_vm13, 0, %v5623_v10  ;;  %v5786_v59 = vsel %vm1603_vm13, %v5623_v10, %v5616_v63 }
 0x9ae   : > { %v5773_v4 = vsel %vm1603_vm13, %v5772_v45, %v5596_v36  ;;  %v5791_v26 = vrot.slane %v5624_v18, 4  ;;  %9538 = vmatmul.msk.bf16.vlgmr.msrb.gmra.mxu2 %vm3041_vm14, %v5886_v25  ;;  %v5771_v11 = vperm.slane %v5767_v47, %v11473_v12  ;;  %v5369_v60 = vpack.c.bf16 %v5351_v61, %v5350_v55 }
 0x9af   : > { %v5622_v53 = vsel %vm1603_vm13, 0, %v5621_v33  ;;  %v5777_v49 = vperm.slane %v5773_v4, %v11473_v12  ;;  %v5790_v41 = vperm.slane %v5786_v59, %v11473_v12  ;;  %v5765_v8 = vrot.slane %v5764_v32, 4 }
 0x9b0   : > { %v5792_v42 = vsel %vm1603_vm13, %v5791_v26, %v5622_v53  ;;  %5435 = vmatmul.bf16.gmra.mxu1 %v5369_v60  ;;  %v5746_v3 = vrot.slane %v5745_v16, 4  ;;  %v6610_v4 = vshrl.u32 %v13594_v34, 16  ;;  %v6598_v25 = vshrl.u32 %v13592_v44, 16 }
 0x9b1   : > { %v5778_v38 = vrot.slane %v5777_v49, 4  ;;  %v5796_v22 = vperm.slane %v5792_v42, %v11473_v12  ;;  %v5766_v15 = vsel %vm1603_vm13, 0, %v5765_v8  ;;  %v6622_v49 = vshrl.u32 %v13611_v40, 16 }
 0x9b2   : > { %v5747_v24 = vsel %vm1603_vm13, 0, %v5746_v3  ;;  %v5891_v52 = vshrl.u32 %v5766_v15, 16 }
 0x9b3   : > { %v5779_v46 = vsel %vm1603_vm13, %v5778_v38, %v5771_v11  ;;  %v5797_v39 = vrot.slane %v5796_v22, 4  ;;  %v5889_v17 = vpack.i.b16 %v5766_v15, %v5747_v24  ;;  %v5890_v20 = vshrl.u32 %v5747_v24, 16 }
 0x9b4   : > { %v5783_v28 = vperm.slane %v5779_v46, %v11478_v29 }
 0x9b5   : > { %v5798_v14 = vsel %vm1603_vm13, %v5797_v39, %v5790_v41  ;;  %v5892_v32 = vpack.i.b16 %v5891_v52, %v5890_v20  ;;  %v6634_v41 = vshrl.u32 %v13624_v58, 16 }
 0x9b6   : > { %v5802_v23 = vperm.slane %v5798_v14, %v11478_v29  ;;  %v5896_v21 = vshrl.u32 %v5783_v28, 16  ;;  %v5784_v0 = vrot.slane %v5783_v28, 4 }
 0x9b8   : > { %v5897_v48 = vshrl.u32 %v5802_v23, 16  ;;  %v5803_v5 = vrot.slane %v5802_v23, 4  ;;  %v5895_v16 = vpack.i.b16 %v5802_v23, %v5783_v28  ;;  %v5785_v63 = vsel %vm1603_vm13, 0, %v5784_v0 }
 0x9b9   : > { %v5902_v45 = vshrl.u32 %v5785_v63, 16 }
 0x9ba   : > { %v5898_v13 = vpack.i.b16 %v5897_v48, %v5896_v21  ;;  %v5804_v35 = vsel %vm1603_vm13, 0, %v5803_v5 }
 0x9bb   : > { %9540 = vmatmul.msk.bf16.vlgmr.msrb.gmra.mxu0 %vm3041_vm14, %v5889_v17  ;;  %v5903_v10 = vshrl.u32 %v5804_v35, 16  ;;  %v5901_v43 = vpack.i.b16 %v5804_v35, %v5785_v63 }
 0x9bc   : > { %9539 = vmatmul.msk.bf16.vlgmr.msra.gmra.mxu3 %vm3041_vm14, %v5898_v13 }
 0x9bd   : > { %v5904_v56 = vpack.i.b16 %v5903_v10, %v5902_v45 }
 0x9be   : > { %9542 = vmatmul.msk.bf16.vlgmr.msra.gmra.mxu2 %vm3041_vm14, %v5892_v32 }
 0x9c0   : > { %9537 = vmatmul.msk.bf16.vlgmr.msra.gmra.mxu1 %vm3041_vm14, %v5895_v16 }
 0x9cc   : > { %9543 = vmatmul.msk.bf16.vlgmr.msrb.gmra.mxu3 %vm3041_vm14, %v5904_v56 }
 0x9ce   : > { %v6574_v36 = vpop.permute.xlu2 %6573 }
 0x9cf   : > { %v6611_v26 = vshrl.u32 %v6574_v36, 16  ;;  %v6609_v61 = vpack.i.b16 %v6574_v36, %v13594_v34 }
 0x9d0   : > { %9541 = vmatmul.msk.bf16.vlgmr.msrb.gmra.mxu1 %vm3041_vm14, %v5901_v43 }
 0x9d1   : > { %v6612_v59 = vpack.i.b16 %v6611_v26, %v6610_v4  ;;  %v6699_v46 = vperm.slane %v6609_v61, %v11473_v12 }
 0x9d3   : > { %v6725_v8 = vperm.slane %v6612_v59, %v11473_v12  ;;  %v6707_v21 = vrot.slane %v6699_v46, 4 }
 0x9d5   : > { %v6733_v52 = vrot.slane %v6725_v8, 4 }
 0x9d6   : > { %v6582_v18 = vpop.permute.xlu2 %6581 }
 0x9d7   : > { %v6616_v14 = vshrl.u32 %v6582_v18, 16 }
 0x9de   : > { %v13748_v42 = vpop.permute.xlu2 %6585 }
 0x9e5   : > { %v6572_v9 = vpop.permute.xlu0 %6571 }
 0x9e6   : > { %v6599_v53 = vshrl.u32 %v6572_v9, 16  ;;  %v6597_v11 = vpack.i.b16 %v6572_v9, %v13592_v44  ;;  %v6592_v17 = vpop.permute.xlu2 %6591 }
 0x9e8   : > { %v6600_v38 = vpack.i.b16 %v6599_v53, %v6598_v25  ;;  %v6647_v34 = vperm.slane %v6597_v11, %v11473_v12 }
 0x9e9   : > { %v6578_v55 = vpop.permute.xlu1 %6577 }
 0x9ea   : > { %v6635_v39 = vshrl.u32 %v6578_v55, 16  ;;  %v13759_v3 = vperm.slane %v6600_v38, %v11473_v12  ;;  %v6633_v15 = vpack.i.b16 %v6578_v55, %v13624_v58  ;;  %v6655_v20 = vrot.slane %v6647_v34, 4 }
 0x9ec   : > { %v6636_v13 = vpack.i.b16 %v6635_v39, %v6634_v41  ;;  %v6681_v0 = vrot.slane %v13759_v3, 4  ;;  %v13775_v10 = vperm.slane %v6633_v15, %v11473_v12 }
 0x9ed   : > { %v6576_v33 = vpop.permute.xlu0 %6575 }
 0x9ee   : > { %v6623_v6 = vshrl.u32 %v6576_v33, 16  ;;  %v6621_v22 = vpack.i.b16 %v6576_v33, %v13611_v40  ;;  %v13780_v9 = vperm.slane %v6636_v13, %v11473_v12 }
 0x9f0   : > { %v6624_v60 = vpack.i.b16 %v6623_v6, %v6622_v49  ;;  %v13762_v44 = vperm.slane %v6621_v22, %v11473_v12  ;;  %v6837_v13 = vrot.slane %v13780_v9, 4 }
 0x9f1   : > { %v6590_v23 = vpop.permute.xlu1 %6589 }
 0x9f2   : > { %v13765_v40 = vperm.slane %v6624_v60, %v11473_v12  ;;  %v6617_v48 = vshrl.u32 %v6590_v23, 16  ;;  %v6615_v24 = vpack.i.b16 %v6590_v23, %v6582_v18  ;;  %v6759_v35 = vrot.slane %v13762_v44, 4 }
 0x9f3   : > { %v6640_v18 = vshrl.u32 %v13748_v42, 16  ;;  %v6629_v60 = vshrl.u32 %v6592_v17, 16 }
 0x9f4   : > { %v6618_v32 = vpack.i.b16 %v6617_v48, %v6616_v14  ;;  %v6704_v5 = vperm.slane %v6615_v24, %v11473_v12  ;;  %v6785_v63 = vrot.slane %v13765_v40, 4  ;;  %v6811_v48 = vrot.slane %v13775_v10, 4 }
 0x9f5   : > { %v13742_v47 = vpop.permute.xlu0 %6579 }
 0x9f6   : > { %v6604_v58 = vshrl.u32 %v13742_v47, 16  ;;  %v6705_v45 = vrot.slane %v6704_v5, 4  ;;  %v6708_v56 = vsel %vm1603_vm13, %v6704_v5, %v6707_v21  ;;  %v6730_v43 = vperm.slane %v6618_v32, %v11473_v12 }
 0x9f7   : > { %v6716_v36 = vperm.slane %v6708_v56, %v11478_v29 }
 0x9f8   : > { %v6706_v26 = vsel %vm1603_vm13, %v6705_v45, %v6699_v46  ;;  %v6731_v25 = vrot.slane %v6730_v43, 4  ;;  %v6734_v53 = vsel %vm1603_vm13, %v6730_v43, %v6733_v52 }
 0x9f9   : > { %v6712_v6 = vperm.slane %v6706_v26, %v11478_v29  ;;  %v6719_v55 = vrot.slane %v6716_v36, 4  ;;  %v6742_v61 = vperm.slane %v6734_v53, %v11478_v29 }
 0x9fa   : > { %v6732_v38 = vsel %vm1603_vm13, %v6731_v25, %v6725_v8 }
 0x9fb   : > { %v6717_v41 = vrot.slane %v6712_v6, 4  ;;  %v6720_v46 = vsel %vm1603_vm13, 0, %v6719_v55  ;;  %v6738_v39 = vperm.slane %v6732_v38, %v11478_v29  ;;  %v6745_v14 = vrot.slane %v6742_v61, 4 }
 0x9fc   : > { %v6894_v23 = vrot.slane %v6720_v46, 4 }
 0x9fd   : > { %v13755_v28 = vpop.permute.xlu0 %6583  ;;  %v6743_v8 = vrot.slane %v6738_v39, 4  ;;  %v6746_v52 = vsel %vm1603_vm13, 0, %v6745_v14  ;;  %v13809_v56 = vsel %vm1603_vm13, %v6745_v14, %v6738_v39 }
 0x9fe   : > { %v6627_v16 = vpack.i.b16 %v6592_v17, %v13755_v28  ;;  %v6628_v11 = vshrl.u32 %v13755_v28, 16  ;;  %v6718_v28 = vsel %vm1603_vm13, 0, %v6717_v41 }
 0xa00   : > { %v6756_v4 = vperm.slane %v6627_v16, %v11473_v12  ;;  %v6895_v16 = vsel %vm1603_vm13, %v6894_v23, %v6718_v28  ;;  %v6630_v45 = vpack.i.b16 %v6629_v60, %v6628_v11  ;;  %v6912_v60 = vperm.slane %v13809_v56, %v11473_v12 }
 0xa02   : > { %v6757_v24 = vrot.slane %v6756_v4, 4  ;;  %v6760_v32 = vsel %vm1603_vm13, %v6756_v4, %v6759_v35  ;;  %v6913_v35 = vrot.slane %v6746_v52, 4 }
 0xa03   : > { %v6768_v26 = vperm.slane %v6760_v32, %v11478_v29 }
 0xa04   : > { %v6758_v4 = vsel %vm1603_vm13, %v6757_v24, %v13762_v44 }
 0xa05   : > { %v6588_v33 = vpop.permute.xlu0 %6587  ;;  %v6764_v61 = vperm.slane %v6758_v4, %v11478_v29 }
 0xa06   : > { %v6603_v49 = vpack.i.b16 %v6588_v33, %v13742_v47  ;;  %v6605_v59 = vshrl.u32 %v6588_v33, 16  ;;  %v13796_v47 = vsel %vm1603_vm13, %v6719_v55, %v6712_v6  ;;  %v6899_v6 = vperm.slane %v6895_v16, %v11473_v12 }
 0xa07   : > { %v6893_v5 = vperm.slane %v13796_v47, %v11473_v12  ;;  %v6769_v14 = vrot.slane %v6764_v61, 4 }
 0xa08   : > { %v6652_v22 = vperm.slane %v6603_v49, %v11473_v12  ;;  %v6606_v15 = vpack.i.b16 %v6605_v59, %v6604_v58  ;;  %v6782_v59 = vperm.slane %v6630_v45, %v11473_v12  ;;  %v6900_v24 = vrot.slane %v6899_v6, 4 }
 0xa0a   : > { %v6653_v21 = vrot.slane %v6652_v22, 4  ;;  %v6656_v58 = vsel %vm1603_vm13, %v6652_v22, %v6655_v20  ;;  %v6678_v33 = vperm.slane %v6606_v15, %v11473_v12  ;;  %v6771_v22 = vrot.slane %v6768_v26, 4 }
 0xa0b   : > { %v6664_v36 = vperm.slane %v6656_v58, %v11478_v29  ;;  %v6783_v23 = vrot.slane %v6782_v59, 4  ;;  %v6786_v15 = vsel %vm1603_vm13, %v6782_v59, %v6785_v63 }
 0xa0c   : > { %v6654_v17 = vsel %vm1603_vm13, %v6653_v21, %v6647_v34  ;;  %v6744_v34 = vsel %vm1603_vm13, 0, %v6743_v8  ;;  %v6679_v53 = vrot.slane %v6678_v33, 4  ;;  %v6682_v49 = vsel %vm1603_vm13, %v6678_v33, %v6681_v0 }
 0xa0d   : > { %v6660_v43 = vperm.slane %v6654_v17, %v11478_v29  ;;  %v6667_v20 = vrot.slane %v6664_v36, 4  ;;  %v6690_v55 = vperm.slane %v6682_v49, %v11478_v29  ;;  %v6914_v39 = vsel %vm1603_vm13, %v6913_v35, %v6744_v34  ;;  %v6594_v36 = vpop.permute.xlu0 %6593 }
 0xa0e   : > { %v6680_v44 = vsel %vm1603_vm13, %v6679_v53, %v13759_v3  ;;  %v6772_v32 = vsel %vm1603_vm13, 0, %v6771_v22  ;;  %v6918_v16 = vperm.slane %v6914_v39, %v11473_v12  ;;  %v6784_v63 = vsel %vm1603_vm13, %v6783_v23, %v13765_v40 }
 0xa0f   : > { %v6665_v25 = vrot.slane %v6660_v43, 4  ;;  %v6668_v38 = vsel %vm1603_vm13, 0, %v6667_v20  ;;  %v6686_v0 = vperm.slane %v6680_v44, %v11478_v29  ;;  %v6693_v41 = vrot.slane %v6690_v55, 4 }
 0xa10   : > { %v6856_v46 = vrot.slane %v6668_v38, 4  ;;  %v6851_v3 = vsel %vm1603_vm13, %v6667_v20, %v6660_v43  ;;  %v6794_v45 = vperm.slane %v6786_v15, %v11478_v29  ;;  %v6770_v34 = vsel %vm1603_vm13, 0, %v6769_v14 }
 0xa11   : > { %v6666_v11 = vsel %vm1603_vm13, 0, %v6665_v25  ;;  %v6691_v21 = vrot.slane %v6686_v0, 4  ;;  %v6694_v28 = vsel %vm1603_vm13, 0, %v6693_v41  ;;  %v6855_v43 = vperm.slane %v6851_v3, %v11473_v12 }
 0xa12   : > { %v6857_v8 = vsel %vm1603_vm13, %v6856_v46, %v6666_v11  ;;  %v6875_v17 = vrot.slane %v6694_v28, 4  ;;  %v6870_v33 = vsel %vm1603_vm13, %v6693_v41, %v6686_v0  ;;  %v6790_v35 = vperm.slane %v6784_v63, %v11478_v29 }
 0xa13   : > { %v6861_v52 = vperm.slane %v6857_v8, %v11473_v12  ;;  %v6692_v58 = vsel %vm1603_vm13, 0, %v6691_v21  ;;  %v6797_v26 = vrot.slane %v6794_v45, 4  ;;  %v6932_v25 = vrot.slane %v6772_v32, 4 }
 0xa14   : > { %v6876_v4 = vsel %vm1603_vm13, %v6875_v17, %v6692_v58  ;;  %v6639_v20 = vpack.i.b16 %v6594_v36, %v13748_v42  ;;  %v6795_v49 = vrot.slane %v6790_v35, 4  ;;  %v13851_v40 = vsel %vm1603_vm13, %v6771_v22, %v6764_v61 }
 0xa15   : > { %v6862_v53 = vrot.slane %v6861_v52, 4  ;;  %v6641_v6 = vshrl.u32 %v6594_v36, 16  ;;  %v6798_v55 = vsel %vm1603_vm13, 0, %v6797_v26  ;;  %v6933_v59 = vsel %vm1603_vm13, %v6932_v25, %v6770_v34 }
 0xa16   : > { %v13856_v11 = vsel %vm1603_vm13, %v6797_v26, %v6790_v35  ;;  %v6808_v38 = vperm.slane %v6639_v20, %v11473_v12  ;;  %v6880_v44 = vperm.slane %v6876_v4, %v11473_v12  ;;  %v6796_v0 = vsel %vm1603_vm13, 0, %v6795_v49 }
 0xa17   : > { %v6937_v41 = vperm.slane %v6933_v59, %v11473_v12  ;;  %v6951_v46 = vrot.slane %v6798_v55, 4  ;;  %v6874_v61 = vperm.slane %v6870_v33, %v11473_v12  ;;  %v6642_v22 = vpack.i.b16 %v6641_v6, %v6640_v18 }
 0xa18   : > { %v6809_v39 = vrot.slane %v6808_v38, 4  ;;  %v6812_v14 = vsel %vm1603_vm13, %v6808_v38, %v6811_v48  ;;  %v6931_v23 = vperm.slane %v13851_v40, %v11473_v12  ;;  %v6950_v15 = vperm.slane %v13856_v11, %v11473_v12 }
 0xa19   : > { %v6820_v21 = vperm.slane %v6812_v14, %v11478_v29  ;;  %v6863_v28 = vsel %vm1603_vm13, %v6862_v53, %v6855_v43  ;;  %v13874_v3 = vrot.slane %v6937_v41, 4  ;;  %v13877_v42 = vsel %vm1603_vm13, %v6951_v46, %v6796_v0 }
 0xa1a   : > { %v6810_v18 = vsel %vm1603_vm13, %v6809_v39, %v13775_v10  ;;  %v6834_v48 = vperm.slane %v6642_v22, %v11473_v12  ;;  %v6881_v17 = vrot.slane %v6880_v44, 4  ;;  %v6901_v32 = vsel %vm1603_vm13, %v6900_v24, %v6893_v5 }
 0xa1b   : > { %v6816_v8 = vperm.slane %v6810_v18, %v11478_v29  ;;  %v6823_v52 = vrot.slane %v6820_v21, 4  ;;  %v6867_v45 = vperm.slane %v6863_v28, %v11478_v29  ;;  %v6919_v36 = vrot.slane %v6918_v16, 4 }
 0xa1c   : > { %v6835_v58 = vrot.slane %v6834_v48, 4  ;;  %v6838_v63 = vsel %vm1603_vm13, %v6834_v48, %v6837_v13  ;;  %v6882_v24 = vsel %vm1603_vm13, %v6881_v17, %v6874_v61  ;;  %v6905_v35 = vperm.slane %v6901_v32, %v11478_v29 }
 0xa1d   : > { %v6821_v10 = vrot.slane %v6816_v8, 4  ;;  %v6824_v43 = vsel %vm1603_vm13, 0, %v6823_v52  ;;  %v6846_v33 = vperm.slane %v6838_v63, %v11478_v29  ;;  %v13894_v34 = vsel %vm1603_vm13, %v6823_v52, %v6816_v8 }
 0xa1e   : > { %v6836_v47 = vsel %vm1603_vm13, %v6835_v58, %v13780_v9  ;;  %v6970_v5 = vrot.slane %v6824_v43, 4  ;;  %v6886_v26 = vperm.slane %v6882_v24, %v11478_v29  ;;  %v6956_v25 = vperm.slane %v13877_v42, %v11473_v12 }
 0xa1f   : > { %v6822_v13 = vsel %vm1603_vm13, 0, %v6821_v10  ;;  %v6842_v16 = vperm.slane %v6836_v47, %v11478_v29  ;;  %v6849_v4 = vrot.slane %v6846_v33, 4  ;;  %v6969_v20 = vperm.slane %v13894_v34, %v11473_v12 }
 0xa20   : > { %v6971_v9 = vsel %vm1603_vm13, %v6970_v5, %v6822_v13  ;;  %v6920_v53 = vsel %vm1603_vm13, %v6919_v36, %v6912_v60  ;;  %v7006_v59 = vshrl.u32 %v6867_v45, 16  ;;  %v7005_v0 = vpack.i.b16 %v6886_v26, %v6867_v45 }
 0xa21   : > { %v6847_v49 = vrot.slane %v6842_v16, 4  ;;  %v6850_v6 = vsel %vm1603_vm13, 0, %v6849_v4  ;;  %v13914_v55 = vsel %vm1603_vm13, %v6849_v4, %v6842_v16  ;;  %v6924_v44 = vperm.slane %v6920_v53, %v11478_v29 }
 0xa22   : > { %v6989_v38 = vrot.slane %v6850_v6, 4  ;;  %v7018_v41 = vshrl.u32 %v6905_v35, 16  ;;  %v6975_v61 = vperm.slane %v6971_v9, %v11473_v12  ;;  %v7007_v22 = vshrl.u32 %v6886_v26, 16 }
 0xa23   : > { %v6848_v46 = vsel %vm1603_vm13, 0, %v6847_v49  ;;  %v6868_v56 = vrot.slane %v6867_v45, 4  ;;  %v6988_v60 = vperm.slane %v13914_v55, %v11473_v12  ;;  %v7017_v39 = vpack.i.b16 %v6924_v44, %v6905_v35 }
 0xa24   : > { %v7340_v14 = vunpack.c.l.b16 %v7005_v0  ;;  %v7019_v21 = vshrl.u32 %v6924_v44, 16  ;;  %v6990_v28 = vsel %vm1603_vm13, %v6989_v38, %v6848_v46  ;;  %v7008_v42 = vpack.i.b16 %v7007_v22, %v7006_v59  ;;  %v10344_v38 = vld [vmem:[%s14709_s21] ss:$0 sm:$0xff] }
 0xa25   : > { %v6869_v18 = vsel %vm1603_vm13, 0, %v6868_v56  ;;  %v6887_v48 = vrot.slane %v6886_v26, 4  ;;  %v7341_v52 = vunpack.c.l.b16 %v7017_v39  ;;  %v6906_v32 = vrot.slane %v6905_v35, 4 }
 0xa26   : > { %v7020_v17 = vpack.i.b16 %v7019_v21, %v7018_v41  ;;  %v6925_v58 = vrot.slane %v6924_v44, 4  ;;  %v6976_v63 = vrot.slane %v6975_v61, 4  ;;  %v7380_v45 = vunpack.c.l.b16 %v7008_v42 }
 0xa27   : > { %v6888_v36 = vsel %vm1603_vm13, 0, %v6887_v48  ;;  %v7012_v10 = vshrl.u32 %v6869_v18, 16  ;;  %v13926_v43 = vpack.c.b16 %v7341_v52, %v7340_v14  ;;  %v6907_v34 = vsel %vm1603_vm13, 0, %v6906_v32 }
 0xa28   : > { %v13923_v8 = vpop.f32.mrf.mxu0  ;;  %v7381_v33 = vunpack.c.l.b16 %v7020_v17  ;;  %v6926_v47 = vsel %vm1603_vm13, 0, %v6925_v58  ;;  %v6994_v5 = vperm.slane %v6990_v28, %v11473_v12  ;;  %v7011_v24 = vpack.i.b16 %v6888_v36, %v6869_v18 }
 0xa29   : > { %v7023_v13 = vpack.i.b16 %v6926_v47, %v6907_v34  ;;  %v7013_v16 = vshrl.u32 %v6888_v36, 16  ;;  %7354 = vmatpush.bf16.msra.mxu0 %v13926_v43  ;;  %v7024_v4 = vshrl.u32 %v6907_v34, 16  ;;  %v7025_v26 = vshrl.u32 %v6926_v47, 16 }
 0xa2a   : > { %v13932_v35 = vpack.c.b16 %v7381_v33, %v7380_v45  ;;  %v6939_v9 = vsel %vm1603_vm13, %v13874_v3, %v6931_v23  ;;  %v7420_v49 = vunpack.c.l.b16 %v7011_v24  ;;  %v6957_v41 = vrot.slane %v6956_v25, 4  ;;  %v9845_v33 = vld [vmem:[%s1004_s23] sm:$0xff]  }
 0xa2b   : > { %v7421_v6 = vunpack.c.l.b16 %v7023_v13  ;;  %v7014_v55 = vpack.i.b16 %v7013_v16, %v7012_v10  ;;  %v6943_v59 = vperm.slane %v6939_v9, %v11478_v29  ;;  %v7026_v0 = vpack.i.b16 %v7025_v26, %v7024_v4 }
 0xa2c   : > { %7394 = vmatpush.bf16.msrb.mxu2 %v13932_v35  ;;  %v6977_v40 = vsel %vm1603_vm13, %v6976_v63, %v6969_v20  ;;  %v6995_v61 = vrot.slane %v6994_v5, 4  ;;  %v6958_v21 = vsel %vm1603_vm13, %v6957_v41, %v6950_v15 }
 0xa2d   : > { %v5436_v53 = vpop.f32.mrf.mxu1  ;;  %v13945_v46 = vpack.c.b16 %v7421_v6, %v7420_v49  ;;  %v7460_v23 = vunpack.c.l.b16 %v7014_v55  ;;  %v6981_v3 = vperm.slane %v6977_v40, %v11478_v29  ;;  %v7461_v14 = vunpack.c.l.b16 %v7026_v0 }
 0xa2e   : > { %v5437_v44 = vadd.f32 %v10344_v38, %v5436_v53  ;;  %v6962_v25 = vperm.slane %v6958_v21, %v11478_v29  ;;  %v6996_v20 = vsel %vm1603_vm13, %v6995_v61, %v6988_v60  ;;  %v7030_v28 = vshrl.u32 %v6943_v59, 16 }
 0xa2f   : > { %7434 = vmatpush.bf16.msrb.mxu0 %v13945_v46  ;;  %v13959_v42 = vpack.c.b16 %v7461_v14, %v7460_v23  ;;  %v7000_v18 = vperm.slane %v6996_v20, %v11478_v29  ;;  %v7042_v48 = vshrl.u32 %v6981_v3, 16  ;;  %v6944_v17 = vrot.slane %v6943_v59, 4 }
 0xa30   : > { %v13948_v22 = vpack.c.bf16 %v5437_v44, %v5437_v44  ;;  %v7071_v56 = vpop.f32.mrf.mxu0  ;;  %v7029_v52 = vpack.i.b16 %v6962_v25, %v6943_v59  ;;  %v7031_v11 = vshrl.u32 %v6962_v25, 16  ;;  %v6963_v58 = vrot.slane %v6962_v25, 4 }
 0xa31   : > { %v13950_v39 = vpop.f32.mrf.mxu2  ;;  %7474 = vmatpush.bf16.msra.mxu2 %v13959_v42  ;;  %v7041_v15 = vpack.i.b16 %v7000_v18, %v6981_v3  ;;  %v7043_v32 = vshrl.u32 %v7000_v18, 16  ;;  %v6945_v36 = vsel %vm1603_vm13, 0, %v6944_v17  ;;  %v6982_v10 = vrot.slane %v6981_v3, 4 }
 0xa32   : > { %5453 = vrot.lane.b32.xlu2 %v13948_v22, %s10889_s8  ;;  %v7360_v60 = vunpack.c.l.b16 %v7029_v52  ;;  %v7032_v45 = vpack.i.b16 %v7031_v11, %v7030_v28  ;;  %v6964_v24 = vsel %vm1603_vm13, 0, %v6963_v58  ;;  %v7001_v4 = vrot.slane %v7000_v18, 4 }
 0xa33   : > { %v7361_v47 = vunpack.c.l.b16 %v7041_v15  ;;  %v7044_v5 = vpack.i.b16 %v7043_v32, %v7042_v48  ;;  %v6983_v16 = vsel %vm1603_vm13, 0, %v6982_v10  ;;  %v7035_v26 = vpack.i.b16 %v6964_v24, %v6945_v36 }
 0xa34   : > { %v7400_v13 = vunpack.c.l.b16 %v7032_v45  ;;  %v7036_v59 = vshrl.u32 %v6945_v36, 16  ;;  %v9846_v44 = vunpack.c.l.bf16 %v9845_v33  ;;  %v7037_v41 = vshrl.u32 %v6964_v24, 16 }
 0xa35   : > { %v5438_v63 = vpop.f32.mrf.mxu1  ;;  %v13974_v6 = vpack.c.b16 %v7361_v47, %v7360_v60  ;;  %v7401_v55 = vunpack.c.l.b16 %v7044_v5  ;;  %v7440_v0 = vunpack.c.l.b16 %v7035_v26  ;;  %v7048_v3 = vshrl.u32 %v6983_v16, 16 }
 0xa36   : > { %v5439_v34 = vadd.f32 %v10344_v38, %v5438_v63  ;;  %v7002_v38 = vsel %vm1603_vm13, 0, %v7001_v4  ;;  %v7038_v56 = vpack.i.b16 %v7037_v41, %v7036_v59  ;;  %v9246_v20 = vadd.f32 -1.0, %v9846_v44 }
 0xa37   : > { %7374 = vmatpush.bf16.msra.mxu1 %v13974_v6  ;;  %v13980_v40 = vpack.c.b16 %v7401_v55, %v7400_v13  ;;  %v7047_v23 = vpack.i.b16 %v7002_v38, %v6983_v16  ;;  %v7049_v61 = vshrl.u32 %v7002_v38, 16  ;;  %v7229_v5 = vmul.f32 0.17677669, %v13950_v39 }
 0xa38   : > { %v13970_v9 = vpack.c.bf16 %v5439_v34, %v5439_v34  ;;  %v13972_v49 = vpop.f32.mrf.mxu0  ;;  %v7480_v18 = vunpack.c.l.b16 %v7038_v56  ;;  %v13988_v32 = vmul.f32 1e+30, %v9246_v20  ;;  %v9847_v24 = vunpack.c.h.bf16 %v9845_v33 }
 0xa39   : > { %v7115_v53 = vpop.f32.mrf.mxu2  ;;  %7414 = vmatpush.bf16.msra.mxu3 %v13980_v40  ;;  %v7441_v21 = vunpack.c.l.b16 %v7047_v23  ;;  %v7050_v25 = vpack.i.b16 %v7049_v61, %v7048_v3  ;;  %v7227_v59 = vmul.f32 0.17677669, %v13923_v8  ;;  %v7231_v56 = vmul.f32 0.17677669, %v13972_v49 }
 0xa3a   : > { %5455 = vrot.lane.b32.xlu0 %v13970_v9, %s10889_s8  ;;  %v7237_v4 = vadd.f32 %v7229_v5, %v13988_v32  ;;  %v9247_v26 = vadd.f32 -1.0, %v9847_v24 }
 0xa3b   : > { %v13983_v48 = vpack.c.b16 %v7441_v21, %v7440_v0  ;;  %v7481_v52 = vunpack.c.l.b16 %v7050_v25  ;;  %v7235_v0 = vadd.f32 %v7227_v59, %v13988_v32  ;;  %v7239_v25 = vadd.f32 %v7231_v56, %v13988_v32 }
 0xa3c   : > { %v7250_v55 = vsel %vm7243_vm3, %v7237_v4, -inf  ;;  %v14000_v44 = vmul.f32 1e+30, %v9247_v26 }
 0xa3d   : > { %v7091_v28 = vpop.f32.mrf.mxu1  ;;  %7454 = vmatpush.bf16.msrb.mxu1 %v13983_v48  ;;  %v13986_v15 = vpack.c.b16 %v7481_v52, %v7480_v18  ;;  %v7244_v41 = vsel %vm7243_vm3, %v7235_v0, -inf }
 0xa3e   : > { %v7228_v33 = vmul.f32 0.17677669, %v7091_v28  ;;  %v7256_v28 = vsel %vm7243_vm3, %v7239_v25, -inf }
 0xa3f   : > { %v7135_v14 = vpop.f32.mrf.mxu3  ;;  %7494 = vmatpush.bf16.msrb.mxu3 %v13986_v15 }
 0xa40   : > { %v7159_v11 = vpop.f32.mrf.mxu0  ;;  %v7236_v23 = vadd.f32 %v7228_v33, %v14000_v44  ;;  %v7230_v3 = vmul.f32 0.17677669, %v7135_v14 }
 0xa41   : > { %v7201_v17 = vpop.f32.mrf.mxu2 }
 0xa42   : > { %v7233_v58 = vmul.f32 0.17677669, %v7201_v17  ;;  %v7247_v8 = vsel %vm7243_vm3, %v7236_v23, -inf  ;;  %v7238_v61 = vadd.f32 %v7230_v3, %v14000_v44 }
 0xa44   : > { %v13992_v63 = vadd.f32 %v7233_v58, %v13988_v32  ;;  %v7253_v21 = vsel %vm7243_vm3, %v7238_v61, -inf }
 0xa45   : > { %v7093_v45 = vpop.f32.mrf.mxu1 }
 0xa46   : > { %v7262_v36 = vsel %vm7243_vm3, %v13992_v63, -inf }
 0xa47   : > { %v7137_v60 = vpop.f32.mrf.mxu3  ;;  %7263 = vmax.xlane.f32.xlu1 %v7262_v36 }
 0xa49   : > { %v7203_v10 = vpop.f32.mrf.mxu2 }
 0xa4d   : > { %v7179_v47 = vpop.f32.mrf.mxu1 }
 0xa4e   : > { %v7232_v53 = vmul.f32 0.17677669, %v7179_v47 }
 0xa4f   : > { %v7223_v34 = vpop.f32.mrf.mxu3 }
 0xa50   : > { %v14003_v38 = vadd.f32 %v7232_v53, %v14000_v44  ;;  %v7234_v20 = vmul.f32 0.17677669, %v7223_v34 }
 0xa52   : > { %v7259_v39 = vsel %vm7243_vm3, %v14003_v38, -inf  ;;  %v7242_v18 = vadd.f32 %v7234_v20, %v14000_v44 }
 0xa54   : > { %v7265_v14 = vsel %vm7243_vm3, %v7242_v18, -inf }
 0xa55   : > { %v7181_v16 = vpop.f32.mrf.mxu1 }
 0xa57   : > { %v7225_v13 = vpop.f32.mrf.mxu3 }
 0xa5b   : > { %7251 = vmax.xlane.f32.xlu2 %v7250_v55 }
 0xa63   : > { %7260 = vmax.xlane.f32.xlu2 %v7259_v39 }
 0xa64   : > { %7245 = vmax.xlane.f32.xlu0 %v7244_v41 }
 0xa6c   : > { %7248 = vmax.xlane.f32.xlu0 %v7247_v8 }
 0xa74   : > { %7254 = vmax.xlane.f32.xlu0 %v7253_v21 }
 0xa7c   : > { %7257 = vmax.xlane.f32.xlu0 %v7256_v28 }
 0xa84   : > { %7266 = vmax.xlane.f32.xlu0 %v7265_v14 }
 0xa8c   : > { %v14018_v52 = vpop.permute.xlu2 %5453 }
 0xaac   : > { %v14020_v17 = vpop.permute.xlu0 %5455 }
 0xaba   : > { %v7264_v47 = vpop.xlane.xlu1 %7263 }
 0xabb   : > { %v7274_v16 = vsub.f32 %v13992_v63, %v7264_v47 }
 0xace   : > { %v7252_v11 = vpop.xlane.xlu2 %7251 }
 0xacf   : > { %v7270_v49 = vsub.f32 %v7237_v4, %v7252_v11  ;;  %v7288_v4 = vmul.f32 1.442695, %v7274_v16 }
 0xad1   : > { %v7280_v58 = vmul.f32 1.442695, %v7270_v49 }
 0xad3   : > { %10266 = vpow2.f32 %v7280_v58 }
 0xad6   : > { %v7261_v58 = vpop.xlane.xlu2 %7260 }
 0xad7   : > { %v7246_v60 = vpop.xlane.xlu0 %7245 }
 0xad8   : > { %v7268_v45 = vsub.f32 %v7235_v0, %v7246_v60  ;;  %v7273_v60 = vsub.f32 %v14003_v38, %v7261_v58 }
 0xad9   : > { %v10267_v36 = vpop.eup %10266 }
 0xada   : > { %v7276_v10 = vmul.f32 1.442695, %v7268_v45  ;;  %v7298_v34 = vsel %vm7243_vm3, %v10267_v36, 0.0  ;;  %v7286_v45 = vmul.f32 1.442695, %v7273_v60 }
 0xadb   : > { %7299 = vadd.xlane.f32.xlu1 %v7298_v34 }
 0xadc   : > { %10268 = vpow2.f32 %v7276_v10 }
 0xadf   : > { %v7249_v5 = vpop.xlane.xlu0 %7248 }
 0xae0   : > { %v7269_v24 = vsub.f32 %v7236_v23, %v7249_v5 }
 0xae2   : > { %v10269_v13 = vpop.eup %10268  ;;  %v7278_v26 = vmul.f32 1.442695, %v7269_v24 }
 0xae3   : > { %v7292_v53 = vsel %vm7243_vm3, %v10269_v13, 0.0 }
 0xae4   : > { %10270 = vpow2.f32 %v7278_v26  ;;  %7293 = vadd.xlane.f32.xlu0 %v7292_v53 }
 0xae5   : > { %10272 = vpow2.f32 %v7288_v4 }
 0xae7   : > { %v7255_v55 = vpop.xlane.xlu0 %7254 }
 0xae8   : > { %v7271_v59 = vsub.f32 %v7238_v61, %v7255_v55 }
 0xaea   : > { %v10271_v0 = vpop.eup %10270  ;;  %v7282_v39 = vmul.f32 1.442695, %v7271_v59 }
 0xaeb   : > { %v7295_v33 = vsel %vm7243_vm3, %v10271_v0, 0.0  ;;  %v10273_v23 = vpop.eup %10272 }
 0xaec   : > { %10274 = vpow2.f32 %v7282_v39  ;;  %7296 = vadd.xlane.f32.xlu1 %v7295_v33  ;;  %v7310_v63 = vsel %vm7243_vm3, %v10273_v23, 0.0 }
 0xaef   : > { %v7258_v41 = vpop.xlane.xlu0 %7257 }
 0xaf0   : > { %v7272_v14 = vsub.f32 %v7239_v25, %v7258_v41  ;;  %v5513_v41 = vshrl.u32 %v14020_v17, 16 }
 0xaf2   : > { %v10275_v3 = vpop.eup %10274  ;;  %v7284_v11 = vmul.f32 1.442695, %v7272_v14 }
 0xaf3   : > { %v7301_v8 = vsel %vm7243_vm3, %v10275_v3, 0.0 }
 0xaf4   : > { %7311 = vadd.xlane.f32.xlu1 %v7310_v63  ;;  %7302 = vadd.xlane.f32.xlu2 %v7301_v8 }
 0xaf7   : > { %v7267_v56 = vpop.xlane.xlu0 %7266 }
 0xaf8   : > { %v7275_v21 = vsub.f32 %v7242_v18, %v7267_v56  ;;  %5469 = vrot.lane.b32.xlu0 %v13948_v22, %s10887_s5 }
 0xafa   : > { %v7290_v61 = vmul.f32 1.442695, %v7275_v21 }
 0xafc   : > { %10276 = vpow2.f32 %v7290_v61 }
 0xafd   : > { %10278 = vpow2.f32 %v7284_v11 }
 0xafe   : > { %10280 = vpow2.f32 %v7286_v45 }
 0xb02   : > { %v14030_v20 = vpop.eup %10276 }
 0xb03   : > { %v7313_v28 = vsel %vm7243_vm3, %v14030_v20, 0.0  ;;  %v14040_v18 = vpop.eup %10278 }
 0xb04   : > { %7314 = vadd.xlane.f32.xlu1 %v7313_v28  ;;  %v7304_v49 = vsel %vm7243_vm3, %v14040_v18, 0.0  ;;  %v14045_v25 = vpop.eup %10280 }
 0xb05   : > { %v7307_v10 = vsel %vm7243_vm3, %v14045_v25, 0.0 }
 0xb0c   : > { %5463 = vrot.lane.b32.xlu2 %v13970_v9, %s10888_s13 }
 0xb14   : > { %5471 = vrot.lane.b32.xlu2 %v13970_v9, %s10887_s5 }
 0xb1d   : > { %5461 = vrot.lane.b32.xlu1 %v13948_v22, %s10888_s13 }
 0xb22   : > { %7305 = vadd.xlane.f32.xlu0 %v7304_v49 }
 0xb3d   : > { %7308 = vadd.xlane.f32.xlu2 %v7307_v10 }
 0xb4e   : > { %v7300_v34 = vpop.xlane.xlu1 %7299 }
 0xb4f   : > { %10282 = vrcp.f32 %v7300_v34 }
 0xb55   : > { %v10283_v47 = vpop.eup %10282 }
 0xb56   : > { %v7326_v5 = vmul.f32 %v10283_v47, %v10267_v36 }
 0xb57   : > { %v7294_v24 = vpop.xlane.xlu0 %7293 }
 0xb58   : > { %v7334_v16 = vpack.c.bf16 %v7326_v5, %v7326_v5  ;;  %10284 = vrcp.f32 %v7294_v24 }
 0xb5a   : > { %9546 = vmatmul.msk.bf16.vlgmr.msrb.gmra.mxu2 %vm7243_vm3, %v7334_v16 }
 0xb5b   : > { %7542 = vmatpush.bf16.xpose.msrb.mxu2 %v13560_v57 }
 0xb5e   : > { %v10285_v38 = vpop.eup %10284 }
 0xb5f   : > { %v7324_v26 = vmul.f32 %v10285_v38, %v10269_v13  ;;  %v7297_v53 = vpop.xlane.xlu1 %7296 }
 0xb60   : > { %10286 = vrcp.f32 %v7297_v53 }
 0xb61   : > { %v7332_v4 = vpack.c.bf16 %v7324_v26, %v7324_v26 }
 0xb63   : > { %9544 = vmatmul.msk.bf16.vlgmr.msra.gmra.mxu0 %vm7243_vm3, %v7332_v4 }
 0xb64   : > { %7510 = vmatpush.bf16.xpose.msra.mxu0 %v13547_v27  ;;  %v5512_v27 = vshrl.u32 %v13970_v9, 16 }
 0xb66   : > { %v10287_v55 = vpop.eup %10286  ;;  %v5514_v28 = vpack.i.b16 %v5513_v41, %v5512_v27 }
 0xb67   : > { %v7325_v59 = vmul.f32 %v10287_v55, %v10271_v0  ;;  %v7312_v39 = vpop.xlane.xlu1 %7311  ;;  %v7303_v36 = vpop.xlane.xlu2 %7302  ;;  %v5511_v0 = vpack.i.b16 %v14020_v17, %v13970_v9 }
 0xb68   : > { %10288 = vrcp.f32 %v7312_v39 }
 0xb69   : > { %v7333_v33 = vpack.c.bf16 %v7325_v59, %v7325_v59  ;;  %10290 = vrcp.f32 %v7303_v36 }
 0xb6b   : > { %9545 = vmatmul.msk.bf16.vlgmr.msra.gmra.mxu1 %vm7243_vm3, %v7333_v33 }
 0xb6c   : > { %7526 = vmatpush.bf16.xpose.msra.mxu1 %v13599_v51  ;;  %v5681_v51 = vperm.slane %v5511_v0, %v11473_v12 }
 0xb6e   : > { %v10289_v57 = vpop.eup %10288  ;;  %v5689_v9 = vrot.slane %v5681_v51, 4 }
 0xb6f   : > { %v10291_v13 = vpop.eup %10290  ;;  %v7330_v63 = vmul.f32 %v10289_v57, %v10273_v23  ;;  %v5464_v8 = vpop.permute.xlu2 %5463  ;;  %v5707_v23 = vperm.slane %v5514_v28, %v11473_v12 }
 0xb70   : > { %v7327_v56 = vmul.f32 %v10291_v13, %v10275_v3  ;;  %v5518_v11 = vshrl.u32 %v5464_v8, 16 }
 0xb71   : > { %v7338_v21 = vpack.c.bf16 %v7330_v63, %v7330_v63  ;;  %v5715_v45 = vrot.slane %v5707_v23, 4 }
 0xb72   : > { %v7335_v61 = vpack.c.bf16 %v7327_v56, %v7327_v56 }
 0xb73   : > { %9550 = vmatmul.msk.bf16.vlgmr.msra.gmra.mxu2 %vm7243_vm3, %v7338_v21 }
 0xb74   : > { %9547 = vmatmul.msk.bf16.vlgmr.msra.gmra.mxu3 %vm7243_vm3, %v7335_v61  ;;  %7606 = vmatpush.bf16.xpose.msra.mxu2 %v13584_v19 }
 0xb75   : > { %7558 = vmatpush.bf16.xpose.msra.mxu3 %v13605_v30 }
 0xb77   : > { %v5472_v3 = vpop.permute.xlu2 %5471  ;;  %v7315_v14 = vpop.xlane.xlu1 %7314 }
 0xb78   : > { %v5517_v49 = vpack.i.b16 %v5472_v3, %v5464_v8  ;;  %v5519_v58 = vshrl.u32 %v5472_v3, 16  ;;  %10292 = vrcp.f32 %v7315_v14 }
 0xb7a   : > { %v5520_v17 = vpack.i.b16 %v5519_v58, %v5518_v11  ;;  %v5686_v60 = vperm.slane %v5517_v49, %v11473_v12  ;;  %v5500_v11 = vshrl.u32 %v13948_v22, 16 }
 0xb7c   : > { %v5687_v10 = vrot.slane %v5686_v60, 4  ;;  %v5690_v19 = vsel %vm1603_vm13, %v5686_v60, %v5689_v9  ;;  %v5712_v30 = vperm.slane %v5520_v17, %v11473_v12 }
 0xb7d   : > { %v5698_v34 = vperm.slane %v5690_v19, %v11478_v29  ;;  %v5470_v19 = vpop.permute.xlu0 %5469 }
 0xb7e   : > { %v10293_v47 = vpop.eup %10292  ;;  %v5688_v5 = vsel %vm1603_vm13, %v5687_v10, %v5681_v51  ;;  %v5713_v24 = vrot.slane %v5712_v30, 4  ;;  %v5716_v16 = vsel %vm1603_vm13, %v5712_v30, %v5715_v45  ;;  %v5501_v51 = vshrl.u32 %v14018_v52, 16 }
 0xb7f   : > { %v5694_v38 = vperm.slane %v5688_v5, %v11478_v29  ;;  %v5701_v26 = vrot.slane %v5698_v34, 4  ;;  %v5724_v53 = vperm.slane %v5716_v16, %v11478_v29  ;;  %v7331_v4 = vmul.f32 %v10293_v47, %v14030_v20 }
 0xb80   : > { %v5714_v55 = vsel %vm1603_vm13, %v5713_v24, %v5707_v23  ;;  %v5502_v60 = vpack.i.b16 %v5501_v51, %v5500_v11 }
 0xb81   : > { %v5699_v59 = vrot.slane %v5694_v38, 4  ;;  %v5702_v39 = vsel %vm1603_vm13, 0, %v5701_v26  ;;  %v5720_v36 = vperm.slane %v5714_v55, %v11478_v29  ;;  %v5727_v33 = vrot.slane %v5724_v53, 4 }
 0xb82   : > { %v5848_v57 = vrot.slane %v5702_v39, 4  ;;  %v7339_v13 = vpack.c.bf16 %v7331_v4, %v7331_v4  ;;  %v5843_v56 = vsel %vm1603_vm13, %v5701_v26, %v5694_v38  ;;  %v5655_v5 = vperm.slane %v5502_v60, %v11473_v12 }
 0xb83   : > { %v5700_v41 = vsel %vm1603_vm13, 0, %v5699_v59  ;;  %v5725_v63 = vrot.slane %v5720_v36, 4  ;;  %v5728_v8 = vsel %vm1603_vm13, 0, %v5727_v33  ;;  %v5862_v61 = vsel %vm1603_vm13, %v5727_v33, %v5720_v36 }
 0xb84   : > { %v5849_v27 = vsel %vm1603_vm13, %v5848_v57, %v5700_v41  ;;  %v5867_v20 = vrot.slane %v5728_v8, 4  ;;  %9551 = vmatmul.msk.bf16.vlgmr.msrb.gmra.mxu3 %vm7243_vm3, %v7339_v13  ;;  %v5847_v23 = vperm.slane %v5843_v56, %v11473_v12  ;;  %v5866_v58 = vperm.slane %v5862_v61, %v11473_v12 }
 0xb85   : > { %v5726_v21 = vsel %vm1603_vm13, 0, %v5725_v63  ;;  %v5853_v0 = vperm.slane %v5849_v27, %v11473_v12  ;;  %7622 = vmatpush.bf16.xpose.msrb.mxu3 %v13615_v50  ;;  %v5499_v50 = vpack.i.b16 %v14018_v52, %v13948_v22  ;;  %v5507_v22 = vshrl.u32 %v5470_v19, 16 }
 0xb86   : > { %v5868_v28 = vsel %vm1603_vm13, %v5867_v20, %v5726_v21  ;;  %v5663_v55 = vrot.slane %v5655_v5, 4 }
 0xb87   : > { %v5854_v3 = vrot.slane %v5853_v0, 4  ;;  %v5872_v14 = vperm.slane %v5868_v28, %v11473_v12  ;;  %v5629_v30 = vperm.slane %v5499_v50, %v11473_v12 }
 0xb89   : > { %v5855_v49 = vsel %vm1603_vm13, %v5854_v3, %v5847_v23  ;;  %v5873_v9 = vrot.slane %v5872_v14, 4  ;;  %v5637_v26 = vrot.slane %v5629_v30, 4 }
 0xb8a   : > { %v14096_v17 = vperm.slane %v5855_v49, %v11478_v29 }
 0xb8b   : > { %v5874_v45 = vsel %vm1603_vm13, %v5873_v9, %v5866_v58 }
 0xb8c   : > { %v14100_v10 = vperm.slane %v5874_v45, %v11478_v29  ;;  %v5920_v34 = vshrl.u32 %v14096_v17, 16  ;;  %v5860_v0 = vrot.slane %v14096_v17, 4 }
 0xb8e   : > { %v5921_v47 = vshrl.u32 %v14100_v10, 16  ;;  %v5879_v20 = vrot.slane %v14100_v10, 4 }
 0xb8f   : > { %v5462_v24 = vpop.permute.xlu1 %5461 }
 0xb90   : > { %v5505_v52 = vpack.i.b16 %v5470_v19, %v5462_v24  ;;  %v5506_v16 = vshrl.u32 %v5462_v24, 16  ;;  %v5922_v38 = vpack.i.b16 %v5921_v47, %v5920_v34  ;;  %v5880_v49 = vsel %vm1603_vm13, 0, %v5879_v20 }
 0xb91   : > { %v5861_v34 = vsel %vm1603_vm13, 0, %v5860_v0  ;;  %v5927_v24 = vshrl.u32 %v5880_v49, 16 }
 0xb92   : > { %v5508_v53 = vpack.i.b16 %v5507_v22, %v5506_v16  ;;  %v5634_v4 = vperm.slane %v5505_v52, %v11473_v12 }
 0xb94   : > { %v5635_v59 = vrot.slane %v5634_v4, 4  ;;  %v5638_v39 = vsel %vm1603_vm13, %v5634_v4, %v5637_v26  ;;  %v5660_v36 = vperm.slane %v5508_v53, %v11473_v12  ;;  %9555 = vmatmul.msk.bf16.vlgmr.msra.gmra.mxu3 %vm3041_vm14, %v5922_v38  ;;  %v5926_v26 = vshrl.u32 %v5861_v34, 16 }
 0xb95   : > { %v5646_v33 = vperm.slane %v5638_v39, %v11478_v29  ;;  %7798 = vmatpush.bf16.msra.mxu3 %v13980_v40  ;;  %v7306_v57 = vpop.xlane.xlu0 %7305 }
 0xb96   : > { %v5636_v13 = vsel %vm1603_vm13, %v5635_v59, %v5629_v30  ;;  %v5661_v41 = vrot.slane %v5660_v36, 4  ;;  %v5664_v63 = vsel %vm1603_vm13, %v5660_v36, %v5663_v55  ;;  %10294 = vrcp.f32 %v7306_v57 }
 0xb97   : > { %v5642_v8 = vperm.slane %v5636_v13, %v11478_v29  ;;  %v5649_v56 = vrot.slane %v5646_v33, 4  ;;  %v5672_v27 = vperm.slane %v5664_v63, %v11478_v29  ;;  %v5928_v59 = vpack.i.b16 %v5927_v24, %v5926_v26 }
 0xb98   : > { %v5662_v21 = vsel %vm1603_vm13, %v5661_v41, %v5655_v5 }
 0xb99   : > { %v5647_v61 = vrot.slane %v5642_v8, 4  ;;  %v5650_v40 = vsel %vm1603_vm13, 0, %v5649_v56  ;;  %v5668_v28 = vperm.slane %v5662_v21, %v11478_v29  ;;  %v5675_v51 = vrot.slane %v5672_v27, 4 }
 0xb9a   : > { %v5810_v23 = vrot.slane %v5650_v40, 4  ;;  %v5805_v9 = vsel %vm1603_vm13, %v5649_v56, %v5642_v8 }
 0xb9b   : > { %v5648_v3 = vsel %vm1603_vm13, 0, %v5647_v61  ;;  %v5673_v14 = vrot.slane %v5668_v28, 4  ;;  %v5676_v11 = vsel %vm1603_vm13, 0, %v5675_v51  ;;  %v5824_v47 = vsel %vm1603_vm13, %v5675_v51, %v5668_v28 }
 0xb9c   : > { %v10295_v58 = vpop.eup %10294  ;;  %v5811_v50 = vsel %vm1603_vm13, %v5810_v23, %v5648_v3  ;;  %v5829_v60 = vrot.slane %v5676_v11, 4  ;;  %v5809_v22 = vperm.slane %v5805_v9, %v11473_v12  ;;  %v5828_v4 = vperm.slane %v5824_v47, %v11473_v12 }
 0xb9d   : > { %v5674_v45 = vsel %vm1603_vm13, 0, %v5673_v14  ;;  %v5815_v19 = vperm.slane %v5811_v50, %v11473_v12  ;;  %v7328_v30 = vmul.f32 %v10295_v58, %v14040_v18 }
 0xb9e   : > { %v5830_v5 = vsel %vm1603_vm13, %v5829_v60, %v5674_v45 }
 0xb9f   : > { %v5816_v52 = vrot.slane %v5815_v19, 4  ;;  %v5834_v16 = vperm.slane %v5830_v5, %v11473_v12  ;;  %v7336_v38 = vpack.c.bf16 %v7328_v30, %v7328_v30 }
 0xba1   : > { %v5817_v53 = vsel %vm1603_vm13, %v5816_v52, %v5809_v22  ;;  %v5835_v55 = vrot.slane %v5834_v16, 4  ;;  %9548 = vmatmul.msk.bf16.vlgmr.msrb.gmra.mxu0 %vm7243_vm3, %v7336_v38 }
 0xba2   : > { %v5821_v18 = vperm.slane %v5817_v53, %v11478_v29  ;;  %7574 = vmatpush.bf16.xpose.msrb.mxu0 %v13574_v2 }
 0xba3   : > { %v5836_v39 = vsel %vm1603_vm13, %v5835_v55, %v5828_v4 }
 0xba4   : > { %v5840_v36 = vperm.slane %v5836_v39, %v11478_v29  ;;  %9559 = vmatmul.msk.bf16.vlgmr.msrb.gmra.mxu3 %vm3041_vm14, %v5928_v59  ;;  %v5908_v33 = vshrl.u32 %v5821_v18, 16  ;;  %v5822_v8 = vrot.slane %v5821_v18, 4 }
 0xba5   : > { %7862 = vmatpush.bf16.msrb.mxu3 %v13986_v15 }
 0xba6   : > { %v5909_v57 = vshrl.u32 %v5840_v36, 16  ;;  %v5841_v41 = vrot.slane %v5840_v36, 4  ;;  %v5907_v63 = vpack.i.b16 %v5840_v36, %v5821_v18  ;;  %v5823_v15 = vsel %vm1603_vm13, 0, %v5822_v8 }
 0xba7   : > { %v5914_v20 = vshrl.u32 %v5823_v15, 16 }
 0xba8   : > { %v5910_v13 = vpack.i.b16 %v5909_v57, %v5908_v33  ;;  %v5842_v56 = vsel %vm1603_vm13, 0, %v5841_v41 }
 0xba9   : > { %v5915_v27 = vshrl.u32 %v5842_v56, 16  ;;  %v5913_v40 = vpack.i.b16 %v5842_v56, %v5823_v15 }
 0xbaa   : > { %9554 = vmatmul.msk.bf16.vlgmr.msrb.gmra.mxu2 %vm3041_vm14, %v5910_v13 }
 0xbab   : > { %7782 = vmatpush.bf16.msrb.mxu2 %v13932_v35  ;;  %v5916_v61 = vpack.i.b16 %v5915_v27, %v5914_v20 }
 0xbb0   : > { %v7309_v2 = vpop.xlane.xlu2 %7308 }
 0xbb1   : > { %10296 = vrcp.f32 %v7309_v2  ;;  %9552 = vmatmul.msk.bf16.vlgmr.msra.gmra.mxu0 %vm3041_vm14, %v5907_v63 }
 0xbb2   : > { %7750 = vmatpush.bf16.msra.mxu0 %v13926_v43  ;;  %v5919_v43 = vpack.i.b16 %v14100_v10, %v14096_v17 }
 0xbb7   : > { %v10297_v21 = vpop.eup %10296 }
 0xbb8   : > { %v7329_v0 = vmul.f32 %v10297_v21, %v14045_v25  ;;  %v5925_v25 = vpack.i.b16 %v5880_v49, %v5861_v34 }
 0xbba   : > { %v7337_v35 = vpack.c.bf16 %v7329_v0, %v7329_v0  ;;  %9558 = vmatmul.msk.bf16.vlgmr.msra.gmra.mxu2 %vm3041_vm14, %v5916_v61 }
 0xbbb   : > { %7846 = vmatpush.bf16.msra.mxu2 %v13959_v42 }
 0xbbc   : > { %9549 = vmatmul.msk.bf16.vlgmr.msrb.gmra.mxu1 %vm7243_vm3, %v7337_v35 }
 0xbbd   : > { %7590 = vmatpush.bf16.xpose.msrb.mxu1 %v13609_v62 }
 0xbc1   : > { %9556 = vmatmul.msk.bf16.vlgmr.msrb.gmra.mxu0 %vm3041_vm14, %v5913_v40 }
 0xbc2   : > { %7814 = vmatpush.bf16.msrb.mxu0 %v13945_v46 }
 0xbcc   : > { %9553 = vmatmul.msk.bf16.vlgmr.msra.gmra.mxu1 %vm3041_vm14, %v5919_v43 }
 0xbcd   : > { %7766 = vmatpush.bf16.msra.mxu1 %v13974_v6 }
 0xbdc   : > { %9557 = vmatmul.msk.bf16.vlgmr.msrb.gmra.mxu1 %vm3041_vm14, %v5925_v25 }
 0xbdd   : > { %7830 = vmatpush.bf16.msrb.mxu1 %v13983_v48  ;;  %v7396_v42 = vpop.f32.mrf.mxu2 }
 0xbde   : > { %v7882_v46 = vrot.slane %v7396_v42, 4 }
 0xbe0   : > { %v7356_v28 = vpop.f32.mrf.mxu0 }
 0xbe1   : > { %v7870_v22 = vrot.slane %v7356_v28, 4 }
 0xbe5   : > { %v7398_v62 = vpop.f32.mrf.mxu2 }
 0xbe8   : > { %v7358_v51 = vpop.f32.mrf.mxu0  ;;  %v14162_v23 = vpop.f32.mrf.mxu1 }
 0xbf0   : > { %v7378_v3 = vpop.f32.mrf.mxu1 }
 0xbf6   : > { %v7476_v14 = vpop.f32.mrf.mxu2 }
 0xbf7   : > { %v7416_v11 = vpop.f32.mrf.mxu3  ;;  %v7880_v17 = vrot.slane %v7476_v14, 4  ;;  %v7883_v10 = vsel %vm1603_vm13, %v7476_v14, %v7882_v46 }
 0xbf8   : > { %v7938_v9 = vrot.slane %v7416_v11, 4  ;;  %v7891_v5 = vperm.slane %v7883_v10, %v11473_v12 }
 0xbf9   : > { %v7881_v6 = vsel %vm1603_vm13, %v7880_v17, %v7396_v42 }
 0xbfa   : > { %v7887_v52 = vperm.slane %v7881_v6, %v11473_v12  ;;  %v7904_v4 = vrot.slane %v7891_v5, 4 }
 0xbfc   : > { %v7892_v59 = vrot.slane %v7887_v52, 4 }
 0xbfe   : > { %v7478_v49 = vpop.f32.mrf.mxu2 }
 0xbff   : > { %v7418_v58 = vpop.f32.mrf.mxu3 }
 0xc07   : > { %v7496_v50 = vpop.f32.mrf.mxu3 }
 0xc08   : > { %v7936_v48 = vrot.slane %v7496_v50, 4  ;;  %v7939_v60 = vsel %vm1603_vm13, %v7496_v50, %v7938_v9 }
 0xc0a   : > { %v7937_v45 = vsel %vm1603_vm13, %v7936_v48, %v7416_v11 }
 0xc0f   : > { %v7498_v19 = vpop.f32.mrf.mxu3 }
 0xc17   : > { %v7560_v30 = vpop.f32.mrf.mxu3 }
 0xc18   : > { %v7631_v34 = vmul.f32 0.17677669, %v7560_v30 }
 0xc1a   : > { %v14169_v47 = vadd.f32 %v7631_v34, %v14000_v44 }
 0xc1c   : > { %v7653_v24 = vsel %vm7243_vm3, %v14169_v47, -inf }
 0xc1d   : > { %7654 = vmax.xlane.f32.xlu0 %v7653_v24  ;;  %v7947_v24 = vperm.slane %v7939_v60, %v11473_v12 }
 0xc1e   : > { %v7436_v16 = vpop.f32.mrf.mxu0 }
 0xc1f   : > { %v7868_v38 = vrot.slane %v7436_v16, 4  ;;  %v7871_v26 = vsel %vm1603_vm13, %v7436_v16, %v7870_v22  ;;  %v7562_v53 = vpop.f32.mrf.mxu3  ;;  %v7926_v22 = vrot.slane %v14162_v23, 4 }
 0xc20   : > { %v7879_v55 = vperm.slane %v7871_v26, %v11473_v12 }
 0xc21   : > { %v7869_v18 = vsel %vm1603_vm13, %v7868_v38, %v7356_v28 }
 0xc22   : > { %v7875_v39 = vperm.slane %v7869_v18, %v11473_v12  ;;  %v7905_v36 = vsel %vm1603_vm13, %v7904_v4, %v7879_v55  ;;  %v7906_v33 = vrot.slane %v7879_v55, 4  ;;  %v7960_v4 = vrot.slane %v7947_v24, 4 }
 0xc23   : > { %v7911_v57 = vperm.slane %v7905_v36, %v11478_v29 }
 0xc24   : > { %v7893_v13 = vsel %vm1603_vm13, %v7892_v59, %v7875_v39  ;;  %v7894_v41 = vrot.slane %v7875_v39, 4  ;;  %v7907_v63 = vsel %vm1603_vm13, %v7891_v5, %v7906_v33 }
 0xc25   : > { %v7899_v8 = vperm.slane %v7893_v13, %v11478_v29  ;;  %v7915_v2 = vperm.slane %v7907_v63, %v11478_v29  ;;  %v7920_v20 = vrot.slane %v7911_v57, 4 }
 0xc26   : > { %v7895_v56 = vsel %vm1603_vm13, %v7887_v52, %v7894_v41  ;;  %v7438_v15 = vpop.f32.mrf.mxu0  ;;  %v7943_v52 = vperm.slane %v7937_v45, %v11473_v12 }
 0xc27   : > { %v7903_v27 = vperm.slane %v7895_v56, %v11478_v29  ;;  %v7922_v21 = vrot.slane %v7915_v2, 4  ;;  %v7624_v0 = vpop.f32.mrf.mxu3  ;;  %v7916_v61 = vrot.slane %v7899_v8, 4  ;;  %v7921_v28 = vsel %vm1603_vm13, 0.0, %v7920_v20 }
 0xc28   : > { %v7635_v50 = vmul.f32 0.17677669, %v7624_v0  ;;  %v7948_v59 = vrot.slane %v7943_v52, 4 }
 0xc29   : > { %v7918_v35 = vrot.slane %v7903_v27, 4  ;;  %v7923_v40 = vsel %vm1603_vm13, 0.0, %v7922_v21  ;;  %v8103_v43 = vsel %vm1603_vm13, %v7922_v21, %v7911_v57  ;;  %v7917_v46 = vsel %vm1603_vm13, 0.0, %v7916_v61 }
 0xc2a   : > { %v8108_v25 = vrot.slane %v7923_v40, 4  ;;  %v14210_v34 = vadd.f32 %v7635_v50, %v14000_v44  ;;  %v8107_v61 = vperm.slane %v8103_v43, %v11473_v12 }
 0xc2b   : > { %v7919_v42 = vsel %vm1603_vm13, 0.0, %v7918_v35  ;;  %v14192_v62 = vsel %vm1603_vm13, %v7918_v35, %v7899_v8 }
 0xc2c   : > { %v8097_v51 = vrot.slane %v7919_v42, 4  ;;  %v8109_v3 = vsel %vm1603_vm13, %v8108_v25, %v7921_v28  ;;  %v7665_v53 = vsel %vm7243_vm3, %v14210_v34, -inf }
 0xc2d   : > { %v7544_v14 = vpop.f32.mrf.mxu2 }
 0xc2e   : > { %v14197_v11 = vsel %vm1603_vm13, %v8097_v51, %v7917_v46  ;;  %v7630_v17 = vmul.f32 0.17677669, %v7544_v14  ;;  %v7512_v10 = vpop.f32.mrf.mxu0  ;;  %v8113_v14 = vperm.slane %v8109_v3, %v11473_v12 }
 0xc2f   : > { %v7628_v6 = vmul.f32 0.17677669, %v7512_v10  ;;  %v7626_v49 = vpop.f32.mrf.mxu3  ;;  %v8102_v3 = vperm.slane %v14197_v11, %v11473_v12 }
 0xc30   : > { %v14200_v58 = vadd.f32 %v7630_v17, %v13988_v32  ;;  %v8096_v49 = vperm.slane %v14192_v62, %v11473_v12 }
 0xc31   : > { %v14203_v9 = vadd.f32 %v7628_v6, %v13988_v32 }
 0xc32   : > { %v7650_v48 = vsel %vm7243_vm3, %v14200_v58, -inf }
 0xc33   : > { %7651 = vmax.xlane.f32.xlu1 %v7650_v48  ;;  %v7644_v19 = vsel %vm7243_vm3, %v14203_v9, -inf }
 0xc34   : > { %7645 = vmax.xlane.f32.xlu2 %v7644_v19  ;;  %v8128_v19 = vrot.slane %v8107_v61, 4 }
 0xc35   : > { %v7546_v30 = vpop.f32.mrf.mxu2 }
 0xc36   : > { %v7514_v5 = vpop.f32.mrf.mxu0  ;;  %v8129_v62 = vsel %vm1603_vm13, %v8113_v14, %v8128_v19 }
 0xc39   : > { %v7456_v16 = vpop.f32.mrf.mxu1 }
 0xc3a   : > { %v7924_v38 = vrot.slane %v7456_v16, 4  ;;  %v7927_v26 = vsel %vm1603_vm13, %v7456_v16, %v7926_v22  ;;  %v8126_v22 = vrot.slane %v8113_v14, 4  ;;  %v8116_v16 = vrot.slane %v8096_v49, 4 }
 0xc3b   : > { %v7935_v55 = vperm.slane %v7927_v26, %v11473_v12  ;;  %7666 = vmax.xlane.f32.xlu1 %v7665_v53  ;;  %v8137_v53 = vperm.slane %v8129_v62, %v11478_v29 }
 0xc3c   : > { %v7925_v18 = vsel %vm1603_vm13, %v7924_v38, %v14162_v23 }
 0xc3d   : > { %v7931_v60 = vperm.slane %v7925_v18, %v11473_v12  ;;  %v7961_v39 = vsel %vm1603_vm13, %v7960_v4, %v7935_v55  ;;  %v7962_v45 = vrot.slane %v7935_v55, 4  ;;  %v7608_v36 = vpop.f32.mrf.mxu2  ;;  %v8114_v55 = vrot.slane %v8102_v3, 4 }
 0xc3e   : > { %v7967_v33 = vperm.slane %v7961_v39, %v11478_v29  ;;  %v7634_v57 = vmul.f32 0.17677669, %v7608_v36  ;;  %v7576_v13 = vpop.f32.mrf.mxu0  ;;  %v8127_v18 = vsel %vm1603_vm13, %v8126_v22, %v8107_v61  ;;  %v8142_v39 = vrot.slane %v8137_v53, 4 }
 0xc3f   : > { %v7949_v41 = vsel %vm1603_vm13, %v7948_v59, %v7931_v60  ;;  %v7950_v63 = vrot.slane %v7931_v60, 4  ;;  %v7963_v8 = vsel %vm1603_vm13, %v7947_v24, %v7962_v45  ;;  %v7632_v26 = vmul.f32 0.17677669, %v7576_v13 }
 0xc40   : > { %v7955_v2 = vperm.slane %v7949_v41, %v11478_v29  ;;  %v7971_v23 = vperm.slane %v7963_v8, %v11478_v29  ;;  %v14229_v56 = vadd.f32 %v7634_v57, %v13988_v32  ;;  %v7976_v21 = vrot.slane %v7967_v33, 4 }
 0xc41   : > { %v7951_v15 = vsel %vm1603_vm13, %v7943_v52, %v7950_v63  ;;  %v7458_v27 = vpop.f32.mrf.mxu1  ;;  %v8117_v59 = vsel %vm1603_vm13, %v8102_v3, %v8116_v16  ;;  %v8133_v11 = vperm.slane %v8127_v18, %v11478_v29  ;;  %v8115_v45 = vsel %vm1603_vm13, %v8114_v55, %v8096_v49 }
 0xc42   : > { %v7959_v20 = vperm.slane %v7951_v15, %v11478_v29  ;;  %v7978_v0 = vrot.slane %v7971_v23, 4  ;;  %v7662_v35 = vsel %vm7243_vm3, %v14229_v56, -inf  ;;  %v7972_v40 = vrot.slane %v7955_v2, 4 }
 0xc43   : > { %7663 = vmax.xlane.f32.xlu2 %v7662_v35  ;;  %v7977_v10 = vsel %vm1603_vm13, 0.0, %v7976_v21  ;;  %v8125_v60 = vperm.slane %v8117_v59, %v11478_v29  ;;  %v8138_v41 = vrot.slane %v8133_v11, 4  ;;  %v14266_v63 = vadd.f32 %v7632_v26, %v13988_v32 }
 0xc44   : > { %v7974_v25 = vrot.slane %v7959_v20, 4  ;;  %v7979_v42 = vsel %vm1603_vm13, 0.0, %v7978_v0  ;;  %v8157_v28 = vsel %vm1603_vm13, %v7978_v0, %v7967_v33  ;;  %v7973_v30 = vsel %vm1603_vm13, 0.0, %v7972_v40 }
 0xc45   : > { %v8162_v51 = vrot.slane %v7979_v42, 4  ;;  %v7610_v46 = vpop.f32.mrf.mxu2  ;;  %v8121_v33 = vperm.slane %v8115_v45, %v11478_v29  ;;  %v14263_v57 = vsel %vm1603_vm13, %v8142_v39, %v8125_v60  ;;  %v8144_v13 = vrot.slane %v8125_v60, 4 }
 0xc46   : > { %v7975_v17 = vsel %vm1603_vm13, 0.0, %v7974_v25  ;;  %v8146_v43 = vsel %vm1603_vm13, %v7974_v25, %v7955_v2  ;;  %v7578_v6 = vpop.f32.mrf.mxu0  ;;  %v7656_v27 = vsel %vm7243_vm3, %v14266_v63, -inf  ;;  %v8161_v61 = vperm.slane %v8157_v28, %v11473_v12 }
 0xc47   : > { %v8151_v50 = vrot.slane %v7975_v17, 4  ;;  %v8163_v48 = vsel %vm1603_vm13, %v8162_v51, %v7977_v10  ;;  %v8140_v8 = vrot.slane %v8121_v33, 4  ;;  %v14269_v2 = vsel %vm1603_vm13, %v8137_v53, %v8144_v13 }
 0xc48   : > { %v14272_v23 = vsel %vm1603_vm13, %v8138_v41, %v8121_v33  ;;  %v8167_v35 = vperm.slane %v8163_v48, %v11473_v12  ;;  %v8150_v25 = vperm.slane %v8146_v43, %v11473_v12  ;;  %v8182_v42 = vrot.slane %v8161_v61, 4 }
 0xc49   : > { %v8152_v5 = vsel %vm1603_vm13, %v8151_v50, %v7973_v30  ;;  %v7528_v24 = vpop.f32.mrf.mxu1  ;;  %v14275_v15 = vsel %vm1603_vm13, %v8133_v11, %v8140_v8 }
 0xc4a   : > { %v7629_v52 = vmul.f32 0.17677669, %v7528_v24  ;;  %v8156_v51 = vperm.slane %v8152_v5, %v11473_v12  ;;  %v8180_v46 = vrot.slane %v8167_v35, 4  ;;  %v8170_v14 = vrot.slane %v8150_v25, 4 }
 0xc4b   : > { %v8183_v17 = vsel %vm1603_vm13, %v8167_v35, %v8182_v42 }
 0xc4c   : > { %v14250_v38 = vadd.f32 %v7629_v52, %v14000_v44  ;;  %v8168_v10 = vrot.slane %v8156_v51, 4  ;;  %v8181_v6 = vsel %vm1603_vm13, %v8180_v46, %v8161_v61  ;;  %v8171_v28 = vsel %vm1603_vm13, %v8156_v51, %v8170_v14 }
 0xc4d   : > { %v8187_v49 = vperm.slane %v8181_v6, %v11478_v29  ;;  %v8179_v50 = vperm.slane %v8171_v28, %v11478_v29 }
 0xc4e   : > { %v7647_v4 = vsel %vm7243_vm3, %v14250_v38, -inf  ;;  %v8169_v43 = vsel %vm1603_vm13, %v8168_v10, %v8150_v25 }
 0xc4f   : > { %7648 = vmax.xlane.f32.xlu0 %v7647_v4  ;;  %v8175_v19 = vperm.slane %v8169_v43, %v11478_v29  ;;  %v8198_v5 = vrot.slane %v8179_v50, 4  ;;  %v8192_v24 = vrot.slane %v8187_v49, 4 }
 0xc51   : > { %v7530_v36 = vpop.f32.mrf.mxu1  ;;  %v8194_v22 = vrot.slane %v8175_v19, 4  ;;  %v14305_v16 = vsel %vm1603_vm13, %v8192_v24, %v8175_v19 }
 0xc53   : > { %v8195_v26 = vsel %vm1603_vm13, %v8187_v49, %v8194_v22 }
 0xc54   : > { %v10080_v53 = vpack.i.bf16 %v8195_v26, %v14275_v15 }
 0xc57   : > { %7657 = vmax.xlane.f32.xlu0 %v7656_v27 }
 0xc59   : > { %v7592_v20 = vpop.f32.mrf.mxu1 }
 0xc5a   : > { %v7633_v21 = vmul.f32 0.17677669, %v7592_v20 }
 0xc5c   : > { %v14280_v0 = vadd.f32 %v7633_v21, %v14000_v44  ;;  %v8191_v44 = vperm.slane %v8183_v17, %v11478_v29 }
 0xc5e   : > { %v7659_v32 = vsel %vm7243_vm3, %v14280_v0, -inf  ;;  %v8196_v48 = vrot.slane %v8191_v44, 4  ;;  %v14302_v52 = vsel %vm1603_vm13, %v8191_v44, %v8198_v5 }
 0xc5f   : > { %7660 = vmax.xlane.f32.xlu2 %v7659_v32  ;;  %v10090_v62 = vpack.i.bf16 %v14302_v52, %v14269_v2 }
 0xc60   : > { %v14297_v30 = vsel %vm1603_vm13, %v8196_v48, %v8179_v50 }
 0xc61   : > { %v7594_v40 = vpop.f32.mrf.mxu1  ;;  %v10085_v3 = vpack.i.bf16 %v14297_v30, %v14263_v57 }
 0xc90   : > { %v7655_v4 = vpop.xlane.xlu0 %7654 }
 0xc91   : > { %v7671_v55 = vsub.f32 %v14169_v47, %v7655_v4  ;;  %v9801_v4 = vld [vmem:[#allocation23 + $0x30] sm:$0xff] }
 0xc93   : > { %v7682_v18 = vmul.f32 1.442695, %v7671_v55 }
 0xc95   : > { %10298 = vpow2.f32 %v7682_v18 }
 0xc9b   : > { %v10299_v59 = vpop.eup %10298 }
 0xc9c   : > { %v7701_v11 = vsel %vm7243_vm3, %v10299_v59, 0.0 }
 0xc9d   : > { %7702 = vadd.xlane.f32.xlu0 %v7701_v11  ;;  %v9800_v11 = vld [vmem:[#allocation23 + $0x28] sm:$0xff] }
 0xca6   : > { %v7652_v60 = vpop.xlane.xlu1 %7651 }
 0xca7   : > { %v7670_v39 = vsub.f32 %v14200_v58, %v7652_v60  ;;  %v7646_v45 = vpop.xlane.xlu2 %7645 }
 0xca8   : > { %v7668_v36 = vsub.f32 %v14203_v9, %v7646_v45 }
 0xca9   : > { %v7680_v33 = vmul.f32 1.442695, %v7670_v39  ;;  %v9799_v39 = vld [vmem:[#allocation23 + $0x20] sm:$0xff] }
 0xcaa   : > { %v7676_v13 = vmul.f32 1.442695, %v7668_v36 }
 0xcab   : > { %10300 = vpow2.f32 %v7680_v33 }
 0xcac   : > { %10302 = vpow2.f32 %v7676_v13  ;;  %v9798_v13 = vld [vmem:[#allocation23 + $0x18] sm:$0xff] }
 0xcae   : > { %v7667_v41 = vpop.xlane.xlu1 %7666 }
 0xcaf   : > { %v7675_v8 = vsub.f32 %v14210_v34, %v7667_v41  ;;  %v9797_v41 = vld [vmem:[#allocation23 + $0x10] sm:$0xff] }
 0xcb1   : > { %v10301_v47 = vpop.eup %10300  ;;  %v7690_v2 = vmul.f32 1.442695, %v7675_v8 }
 0xcb2   : > { %v10303_v15 = vpop.eup %10302  ;;  %v7698_v27 = vsel %vm7243_vm3, %v10301_v47, 0.0 }
 0xcb3   : > { %10304 = vpow2.f32 %v7690_v2  ;;  %7699 = vadd.xlane.f32.xlu1 %v7698_v27  ;;  %v7692_v20 = vsel %vm7243_vm3, %v10303_v15, 0.0 }
 0xcb4   : > { %7693 = vadd.xlane.f32.xlu2 %v7692_v20  ;;  %v9795_v20 = vld [vmem:[#allocation23] sm:$0xff] }
 0xcb6   : > { %v7664_v58 = vpop.xlane.xlu2 %7663 }
 0xcb7   : > { %v7674_v9 = vsub.f32 %v14229_v56, %v7664_v58 }
 0xcb9   : > { %v10305_v21 = vpop.eup %10304  ;;  %v7688_v32 = vmul.f32 1.442695, %v7674_v9 }
 0xcba   : > { %v7713_v61 = vsel %vm7243_vm3, %v10305_v21, 0.0 }
 0xcbb   : > { %10306 = vpow2.f32 %v7688_v32 }
 0xcbc   : > { %7714 = vadd.xlane.f32.xlu2 %v7713_v61 }
 0xcc1   : > { %v10307_v34 = vpop.eup %10306 }
 0xcc2   : > { %v7649_v35 = vpop.xlane.xlu0 %7648  ;;  %v7710_v25 = vsel %vm7243_vm3, %v10307_v34, 0.0 }
 0xcc3   : > { %v7669_v40 = vsub.f32 %v14250_v38, %v7649_v35  ;;  %7711 = vadd.xlane.f32.xlu0 %v7710_v25 }
 0xcc5   : > { %v7678_v42 = vmul.f32 1.442695, %v7669_v40 }
 0xcc7   : > { %10308 = vpow2.f32 %v7678_v42 }
 0xcca   : > { %v7658_v51 = vpop.xlane.xlu0 %7657 }
 0xccb   : > { %v7672_v46 = vsub.f32 %v14266_v63, %v7658_v51 }
 0xccd   : > { %v10309_v14 = vpop.eup %10308  ;;  %v7684_v56 = vmul.f32 1.442695, %v7672_v46 }
 0xcce   : > { %v7695_v17 = vsel %vm7243_vm3, %v10309_v14, 0.0 }
 0xccf   : > { %10310 = vpow2.f32 %v7684_v56  ;;  %7696 = vadd.xlane.f32.xlu1 %v7695_v17 }
 0xcd2   : > { %v7661_v44 = vpop.xlane.xlu2 %7660 }
 0xcd3   : > { %v7673_v10 = vsub.f32 %v14280_v0, %v7661_v44 }
 0xcd4   : > { %10081 = vrot.lane.b32.xlu2 %v10080_v53, %s10887_s5 }
 0xcd5   : > { %v14326_v38 = vpop.eup %10310  ;;  %v7686_v6 = vmul.f32 1.442695, %v7673_v10 }
 0xcd6   : > { %v7704_v28 = vsel %vm7243_vm3, %v14326_v38, 0.0 }
 0xcd7   : > { %10312 = vpow2.f32 %v7686_v6  ;;  %7705 = vadd.xlane.f32.xlu1 %v7704_v28 }
 0xcdd   : > { %v14330_v63 = vpop.eup %10312 }
 0xcde   : > { %v7707_v49 = vsel %vm7243_vm3, %v14330_v63, 0.0 }
 0xcdf   : > { %7708 = vadd.xlane.f32.xlu0 %v7707_v49 }
 0xcf0   : > { %10086 = vrot.lane.b32.xlu1 %v10085_v3, %s10888_s13  ;;  %v9802_v3 = vld [vmem:[#allocation23 + $0x38] sm:$0xff] }
 0xcf3   : > { %10091 = vrot.lane.b32.xlu0 %v10090_v62, %s10889_s8 }
 0xd10   : > { %v7703_v0 = vpop.xlane.xlu0 %7702 }
 0xd11   : > { %10314 = vrcp.f32 %v7703_v0 }
 0xd17   : > { %v10315_v50 = vpop.eup %10314 }
 0xd18   : > { %v7727_v48 = vmul.f32 %v10315_v50, %v10299_v59 }
 0xd1a   : > { %v7735_v43 = vpack.c.bf16 %v7727_v48, %v7727_v48 }
 0xd1c   : > { %9563 = vmatmul.msk.bf16.vlgmr.msra.gmra.mxu3 %vm7243_vm3, %v7735_v43 }
 0xd26   : > { %v7700_v19 = vpop.xlane.xlu1 %7699 }
 0xd27   : > { %10316 = vrcp.f32 %v7700_v19  ;;  %v7694_v5 = vpop.xlane.xlu2 %7693 }
 0xd28   : > { %10318 = vrcp.f32 %v7694_v5 }
 0xd2d   : > { %v10317_v24 = vpop.eup %10316 }
 0xd2e   : > { %v10319_v22 = vpop.eup %10318  ;;  %v7726_v52 = vmul.f32 %v10317_v24, %v10301_v47 }
 0xd2f   : > { %v7724_v26 = vmul.f32 %v10319_v22, %v10303_v15  ;;  %v7715_v53 = vpop.xlane.xlu2 %7714  ;;  %v9796_v15 = vld [vmem:[#allocation23 + $0x8] sm:$0xff] }
 0xd30   : > { %v7734_v57 = vpack.c.bf16 %v7726_v52, %v7726_v52  ;;  %10320 = vrcp.f32 %v7715_v53 }
 0xd31   : > { %v7732_v30 = vpack.c.bf16 %v7724_v26, %v7724_v26 }
 0xd32   : > { %9562 = vmatmul.msk.bf16.vlgmr.msrb.gmra.mxu2 %vm7243_vm3, %v7734_v57 }
 0xd33   : > { %9560 = vmatmul.msk.bf16.vlgmr.msra.gmra.mxu0 %vm7243_vm3, %v7732_v30 }
 0xd34   : > { %8438 = vmatpush.bf16.msra.mxu0 %v9802_v3 }
 0xd36   : > { %v10321_v62 = vpop.eup %10320  ;;  %v7712_v18 = vpop.xlane.xlu0 %7711 }
 0xd37   : > { %v7731_v55 = vmul.f32 %v10321_v62, %v10305_v21  ;;  %10322 = vrcp.f32 %v7712_v18  ;;  %v10082_v40 = vpop.permute.xlu2 %10081 }
 0xd38   : > { %8439 = vmatpush.bf16.msra.mxu0 %v9801_v4  ;;  %v10084_v25 = vunpack.i.h.bf16 %v10082_v40  ;;  %v10083_v42 = vunpack.i.l.bf16 %v10082_v40 }
 0xd39   : > { %v7739_v59 = vpack.c.bf16 %v7731_v55, %v7731_v55 }
 0xd3a   : > { %v8357_v17 = vsel %vm3041_vm14, %v14305_v16, %v10084_v25  ;;  %v8356_v44 = vsel %vm3041_vm14, %v14272_v23, %v10083_v42 }
 0xd3b   : > { %9567 = vmatmul.msk.bf16.vlgmr.msrb.gmra.mxu3 %vm7243_vm3, %v7739_v59 }
 0xd3c   : > { %8440 = vmatpush.bf16.msra.mxu0 %v9800_v11 }
 0xd3d   : > { %v10323_v60 = vpop.eup %10322 }
 0xd3e   : > { %v7730_v45 = vmul.f32 %v10323_v60, %v10307_v34 }
 0xd40   : > { %v7738_v36 = vpack.c.bf16 %v7730_v45, %v7730_v45  ;;  %8441 = vmatpush.bf16.msra.mxu0 %v9799_v39 }
 0xd42   : > { %v7697_v33 = vpop.xlane.xlu1 %7696  ;;  %9566 = vmatmul.msk.bf16.vlgmr.msra.gmra.mxu2 %vm7243_vm3, %v7738_v36 }
 0xd43   : > { %10324 = vrcp.f32 %v7697_v33 }
 0xd44   : > { %8442 = vmatpush.bf16.msra.mxu0 %v9798_v13 }
 0xd48   : > { %8443 = vmatpush.bf16.msra.mxu0 %v9797_v41 }
 0xd49   : > { %v10325_v8 = vpop.eup %10324 }
 0xd4a   : > { %v7725_v47 = vmul.f32 %v10325_v8, %v10309_v14  ;;  %v7706_v2 = vpop.xlane.xlu1 %7705 }
 0xd4b   : > { %10326 = vrcp.f32 %v7706_v2 }
 0xd4c   : > { %v7733_v27 = vpack.c.bf16 %v7725_v47, %v7725_v47  ;;  %8444 = vmatpush.bf16.msra.mxu0 %v9796_v15 }
 0xd4e   : > { %9561 = vmatmul.msk.bf16.vlgmr.msra.gmra.mxu1 %vm7243_vm3, %v7733_v27 }
 0xd50   : > { %8445 = vmatpush.bf16.msra.mxu0 %v9795_v20 }
 0xd51   : > { %v10327_v58 = vpop.eup %10326 }
 0xd52   : > { %v7728_v9 = vmul.f32 %v10327_v58, %v14326_v38  ;;  %v7709_v21 = vpop.xlane.xlu0 %7708 }
 0xd53   : > { %10328 = vrcp.f32 %v7709_v21 }
 0xd54   : > { %v7736_v32 = vpack.c.bf16 %v7728_v9, %v7728_v9 }
 0xd56   : > { %9564 = vmatmul.msk.bf16.vlgmr.msrb.gmra.mxu0 %vm7243_vm3, %v7736_v32 }
 0xd59   : > { %v10329_v61 = vpop.eup %10328 }
 0xd5a   : > { %v7729_v34 = vmul.f32 %v10329_v61, %v14330_v63 }
 0xd5c   : > { %v7737_v35 = vpack.c.bf16 %v7729_v34, %v7729_v34 }
 0xd5e   : > { %9565 = vmatmul.msk.bf16.vlgmr.msrb.gmra.mxu1 %vm7243_vm3, %v7737_v35 }
 0xd62   : > { %v10087_v51 = vpop.permute.xlu1 %10086 }
 0xd63   : > { %v10089_v46 = vunpack.i.h.bf16 %v10087_v51  ;;  %v10088_v14 = vunpack.i.l.bf16 %v10087_v51 }
 0xd65   : > { %v10092_v56 = vpop.permute.xlu0 %10091  ;;  %v8361_v6 = vsel %vm5153_vm1, %v8357_v17, %v10089_v46  ;;  %v8360_v28 = vsel %vm5153_vm1, %v8356_v44, %v10088_v14 }
 0xd66   : > { %v10094_v10 = vunpack.i.h.bf16 %v10092_v56  ;;  %v10093_v38 = vunpack.i.l.bf16 %v10092_v56 }
 0xd68   : > { %v8365_v63 = vsel %vm5158_vm2, %v8361_v6, %v10094_v10  ;;  %v8364_v49 = vsel %vm5158_vm2, %v8360_v28, %v10093_v38 }
 0xd69   : > { %v8384_v0 = vpack.c.bf16 %v8365_v63, %v8364_v49 }
 0xd6b   : > { %8446 = vmatmul.bf16.vlgmr.msra.gmra.mxu0 %v8384_v0 }
 0xd9f   : > { %v7800_v50 = vpop.f32.mrf.mxu3 }
 0xda0   : > { %v8050_v11 = vrot.slane %v7800_v50, 4 }
 0xda7   : > { %v7802_v48 = vpop.f32.mrf.mxu3 }
 0xdb0   : > { %v7752_v43 = vpop.f32.mrf.mxu0 }
 0xdb1   : > { %v7982_v4 = vrot.slane %v7752_v43, 4 }
 0xdb5   : > { %v7784_v19 = vpop.f32.mrf.mxu2 }
 0xdb6   : > { %v7994_v26 = vrot.slane %v7784_v19, 4 }
 0xdb8   : > { %v7754_v16 = vpop.f32.mrf.mxu0 }
 0xdbd   : > { %v7786_v5 = vpop.f32.mrf.mxu2 }
 0xdbe   : > { %v7864_v24 = vpop.f32.mrf.mxu3 }
 0xdbf   : > { %v8048_v60 = vrot.slane %v7864_v24, 4  ;;  %v8051_v13 = vsel %vm1603_vm13, %v7864_v24, %v8050_v11 }
 0xdc0   : > { %v8059_v32 = vperm.slane %v8051_v13, %v11473_v12 }
 0xdc1   : > { %v8049_v27 = vsel %vm1603_vm13, %v8048_v60, %v7800_v50 }
 0xdc2   : > { %v8055_v51 = vperm.slane %v8049_v27, %v11473_v12  ;;  %v8072_v38 = vrot.slane %v8059_v32, 4 }
 0xdc5   : > { %v7848_v23 = vpop.f32.mrf.mxu2 }
 0xdc6   : > { %v7866_v22 = vpop.f32.mrf.mxu3  ;;  %v7992_v53 = vrot.slane %v7848_v23, 4  ;;  %v7995_v57 = vsel %vm1603_vm13, %v7848_v23, %v7994_v26 }
 0xdc7   : > { %v8003_v62 = vperm.slane %v7995_v57, %v11473_v12 }
 0xdc8   : > { %v7993_v3 = vsel %vm1603_vm13, %v7992_v53, %v7784_v19 }
 0xdc9   : > { %v7999_v55 = vperm.slane %v7993_v3, %v11473_v12  ;;  %v8016_v36 = vrot.slane %v8003_v62, 4 }
 0xdcb   : > { %v7768_v52 = vpop.f32.mrf.mxu1  ;;  %v8004_v8 = vrot.slane %v7999_v55, 4 }
 0xdcc   : > { %v8038_v35 = vrot.slane %v7768_v52, 4 }
 0xdcd   : > { %v7850_v30 = vpop.f32.mrf.mxu2 }
 0xdd3   : > { %v7770_v18 = vpop.f32.mrf.mxu1  ;;  %v7816_v59 = vpop.f32.mrf.mxu0 }
 0xdd4   : > { %v7980_v39 = vrot.slane %v7816_v59, 4  ;;  %v7983_v45 = vsel %vm1603_vm13, %v7816_v59, %v7982_v4 }
 0xdd5   : > { %v7991_v33 = vperm.slane %v7983_v45, %v11473_v12 }
 0xdd6   : > { %v7981_v41 = vsel %vm1603_vm13, %v7980_v39, %v7752_v43  ;;  %v8060_v43 = vrot.slane %v8055_v51, 4 }
 0xdd7   : > { %v7987_v47 = vperm.slane %v7981_v41, %v11473_v12  ;;  %v8017_v2 = vsel %vm1603_vm13, %v8016_v36, %v7991_v33  ;;  %v8018_v15 = vrot.slane %v7991_v33, 4 }
 0xdd8   : > { %v8023_v21 = vperm.slane %v8017_v2, %v11478_v29 }
 0xdd9   : > { %v8005_v20 = vsel %vm1603_vm13, %v8004_v8, %v7987_v47  ;;  %v8006_v58 = vrot.slane %v7987_v47, 4  ;;  %v8019_v9 = vsel %vm1603_vm13, %v8003_v62, %v8018_v15 }
 0xdda   : > { %v8011_v61 = vperm.slane %v8005_v20, %v11478_v29  ;;  %v8027_v34 = vperm.slane %v8019_v9, %v11478_v29  ;;  %v8032_v17 = vrot.slane %v8023_v21, 4 }
 0xddb   : > { %v8007_v40 = vsel %vm1603_vm13, %v7999_v55, %v8006_v58  ;;  %v7818_v25 = vpop.f32.mrf.mxu0  ;;  %v7832_v42 = vpop.f32.mrf.mxu1 }
 0xddc   : > { %v8015_v46 = vperm.slane %v8007_v40, %v11478_v29  ;;  %v8034_v14 = vrot.slane %v8027_v34, 4  ;;  %v8028_v56 = vrot.slane %v8011_v61, 4  ;;  %v8036_v44 = vrot.slane %v7832_v42, 4 }
 0xddd   : > { %v8039_v10 = vsel %vm1603_vm13, %v7832_v42, %v8038_v35  ;;  %v8033_v23 = vsel %vm1603_vm13, 0.0, %v8032_v17 }
 0xdde   : > { %v8030_v6 = vrot.slane %v8015_v46, 4  ;;  %v8035_v28 = vsel %vm1603_vm13, 0.0, %v8034_v14  ;;  %v8211_v63 = vsel %vm1603_vm13, %v8034_v14, %v8023_v21  ;;  %v8037_v50 = vsel %vm1603_vm13, %v8036_v44, %v7768_v52 }
 0xddf   : > { %v14381_v49 = vperm.slane %v8211_v63, %v11473_v12  ;;  %v8216_v0 = vrot.slane %v8035_v28, 4  ;;  %v8047_v48 = vperm.slane %v8039_v10, %v11473_v12  ;;  %v8043_v5 = vperm.slane %v8037_v50, %v11473_v12 }
 0xde0   : > { %v8031_v19 = vsel %vm1603_vm13, 0.0, %v8030_v6  ;;  %v8200_v16 = vsel %vm1603_vm13, %v8030_v6, %v8011_v61  ;;  %v8029_v24 = vsel %vm1603_vm13, 0.0, %v8028_v56 }
 0xde1   : > { %v8204_v22 = vperm.slane %v8200_v16, %v11473_v12  ;;  %v8205_v26 = vrot.slane %v8031_v19, 4  ;;  %v8217_v53 = vsel %vm1603_vm13, %v8216_v0, %v8033_v23  ;;  %v8061_v52 = vsel %vm1603_vm13, %v8060_v43, %v8043_v5 }
 0xde2   : > { %v8062_v57 = vrot.slane %v8043_v5, 4  ;;  %v8073_v30 = vsel %vm1603_vm13, %v8072_v38, %v8047_v48  ;;  %v8236_v62 = vrot.slane %v14381_v49, 4  ;;  %v8067_v4 = vperm.slane %v8061_v52, %v11478_v29 }
 0xde3   : > { %v8206_v3 = vsel %vm1603_vm13, %v8205_v26, %v8029_v24  ;;  %v8074_v55 = vrot.slane %v8047_v48, 4  ;;  %v7834_v18 = vpop.f32.mrf.mxu1  ;;  %v8079_v11 = vperm.slane %v8073_v30, %v11478_v29  ;;  %v8224_v39 = vrot.slane %v8204_v22, 4 }
 0xde4   : > { %v8063_v59 = vsel %vm1603_vm13, %v8055_v51, %v8062_v57  ;;  %v8210_v60 = vperm.slane %v8206_v3, %v11473_v12  ;;  %v8221_v45 = vperm.slane %v8217_v53, %v11473_v12  ;;  %v8084_v13 = vrot.slane %v8067_v4, 4 }
 0xde5   : > { %v8071_v36 = vperm.slane %v8063_v59, %v11478_v29  ;;  %v8075_v33 = vsel %vm1603_vm13, %v8059_v32, %v8074_v55  ;;  %v8088_v2 = vrot.slane %v8079_v11, 4 }
 0xde6   : > { %v8083_v41 = vperm.slane %v8075_v33, %v11478_v29  ;;  %v8222_v47 = vrot.slane %v8210_v60, 4  ;;  %v8225_v27 = vsel %vm1603_vm13, %v8210_v60, %v8224_v39  ;;  %v8085_v20 = vsel %vm1603_vm13, 0.0, %v8084_v13 }
 0xde7   : > { %v8086_v8 = vrot.slane %v8071_v36, 4  ;;  %v8237_v21 = vsel %vm1603_vm13, %v8221_v45, %v8236_v62  ;;  %v8233_v42 = vperm.slane %v8225_v27, %v11478_v29  ;;  %v8234_v46 = vrot.slane %v8221_v45, 4 }
 0xde8   : > { %v8090_v15 = vrot.slane %v8083_v41, 4  ;;  %v8223_v51 = vsel %vm1603_vm13, %v8222_v47, %v8204_v22  ;;  %v8089_v14 = vsel %vm1603_vm13, 0.0, %v8088_v2  ;;  %v8245_v38 = vperm.slane %v8237_v21, %v11478_v29  ;;  %v8447_v33 = vpop.f32.mrf.mxu0  ;;  %v10116_v47 = vld [vmem:[%s14712_s26] ss:$0 sm:$0xff] }
 0xde9   : > { %v8087_v58 = vsel %vm1603_vm13, 0.0, %v8086_v8  ;;  %v8254_v9 = vsel %vm1603_vm13, %v8086_v8, %v8067_v4  ;;  %v8229_v63 = vperm.slane %v8223_v51, %v11478_v29  ;;  %v8252_v50 = vrot.slane %v8233_v42, 4 }
 0xdea   : > { %v8091_v61 = vsel %vm1603_vm13, 0.0, %v8090_v15  ;;  %v8258_v32 = vperm.slane %v8254_v9, %v11473_v12  ;;  %v8259_v34 = vrot.slane %v8087_v58, 4  ;;  %v8265_v35 = vsel %vm1603_vm13, %v8090_v15, %v8079_v11 }
 0xdeb   : > { %v8269_v40 = vperm.slane %v8265_v35, %v11473_v12  ;;  %v8270_v25 = vrot.slane %v8091_v61, 4  ;;  %v8250_v5 = vrot.slane %v8245_v38, 4  ;;  %v8235_v23 = vsel %vm1603_vm13, %v8234_v46, %v14381_v49 }
 0xdec   : > { %v8260_v56 = vsel %vm1603_vm13, %v8259_v34, %v8085_v20  ;;  %v8278_v17 = vrot.slane %v8258_v32, 4  ;;  %v8248_v26 = vrot.slane %v8229_v63, 4  ;;  %v8253_v30 = vsel %vm1603_vm13, %v8245_v38, %v8252_v50 }
 0xded   : > { %v8271_v44 = vsel %vm1603_vm13, %v8270_v25, %v8089_v14  ;;  %v8290_v10 = vrot.slane %v8269_v40, 4  ;;  %v8264_v6 = vperm.slane %v8260_v56, %v11473_v12  ;;  %v8241_v62 = vperm.slane %v8235_v23, %v11478_v29  ;;  %v9818_v23 = vld [vmem:[#allocation25 + $0x74] sm:$0xf0] }
 0xdee   : > { %v8275_v28 = vperm.slane %v8271_v44, %v11473_v12  ;;  %v8251_v49 = vsel %vm1603_vm13, %v8250_v5, %v8233_v42  ;;  %v8448_v15 = vadd.f32 %v10116_v47, %v8447_v33  ;;  %v9644_v33 = vld [vmem:[#allocation25 + $0x58] sm:$0xf0] }
 0xdef   : > { %v8279_v0 = vsel %vm1603_vm13, %v8264_v6, %v8278_v17  ;;  %v8276_v48 = vrot.slane %v8264_v6, 4  ;;  %v8249_v60 = vsel %vm1603_vm13, %v8241_v62, %v8248_v26  ;;  %v8246_v36 = vrot.slane %v8241_v62, 4 }
 0xdf0   : > { %v8288_v43 = vrot.slane %v8275_v28, 4  ;;  %v8287_v19 = vperm.slane %v8279_v0, %v11478_v29  ;;  %v8291_v16 = vsel %vm1603_vm13, %v8275_v28, %v8290_v10  ;;  %v8449_v8 = vpop.f32.mrf.mxu0  ;;  %v14451_v20 = vadd.f32 %v8448_v15, %v13172_v31 }
 0xdf1   : > { %v8299_v24 = vperm.slane %v8291_v16, %v11478_v29  ;;  %v8277_v22 = vsel %vm1603_vm13, %v8276_v48, %v8258_v32  ;;  %v8450_v2 = vadd.f32 %v10116_v47, %v8449_v8  ;;  %v9634_v8 = vld [vmem:[#allocation25 + $0x40] sm:$0xf] }
 0xdf2   : > { %v8306_v12 = vrot.slane %v8287_v19, 4  ;;  %v8283_v53 = vperm.slane %v8277_v22, %v11478_v29  ;;  %v8289_v52 = vsel %vm1603_vm13, %v8288_v43, %v8269_v40 }
 0xdf3   : > { %v8304_v57 = vrot.slane %v8299_v24, 4  ;;  %v8295_v4 = vperm.slane %v8289_v52, %v11478_v29  ;;  %v8247_v29 = vsel %vm1603_vm13, %v8246_v36, %v8229_v63  ;;  %v14448_v27 = vadd.f32 %v8450_v2, %v13182_v54 }
 0xdf4   : > { %v8307_v3 = vsel %vm1603_vm13, %v8299_v24, %v8306_v12  ;;  %v8302_v55 = vrot.slane %v8283_v53, 4  ;;  %v9658_v24 = vld [vmem:[#allocation25 + $0x70] sm:$0xf]  ;;  %v9660_v12 = vld [vmem:[#allocation25 + $0x78] sm:$0xf0] }
 0xdf5   : > { %v8305_v18 = vsel %vm1603_vm13, %v8304_v57, %v8287_v19  ;;  %v10105_v59 = vpack.i.bf16 %v8307_v3, %v8253_v30  ;;  %v8300_v13 = vrot.slane %v8295_v4, 4  ;;  %v9659_v22 = vor.u32 %v9818_v23, %v9658_v24  ;;  %v9806_v24 = vld [vmem:[#allocation25 + $0x14] sm:$0xf0] }
 0xdf6   : > { %v10100_v11 = vpack.i.bf16 %v8305_v18, %v8251_v49  ;;  %v8303_v39 = vsel %vm1603_vm13, %v8295_v4, %v8302_v55  ;;  %v9650_v4 = vld [vmem:[#allocation25 + $0x60] sm:$0xf]  ;;  %v9816_v55 = vld [vmem:[#allocation25 + $0x64] sm:$0xf0]  ;;  %v9815_v49 = vld [vmem:[#allocation25 + $0x64] sm:$0xf] }
 0xdf7   : > { %10106 = vrot.lane.b32.xlu1 %v10105_v59, %s10889_s8  ;;  %v10095_v45 = vpack.i.bf16 %v8303_v39, %v8249_v60  ;;  %v8301_v41 = vsel %vm1603_vm13, %v8300_v13, %v8283_v53  ;;  %8661 = vmatpush.bf16.msra.mxu1 %v9659_v22  ;;  %v9651_v59 = vor.u32 %v9816_v55, %v9650_v4  ;;  %v9642_v60 = vld [vmem:[#allocation25 + $0x50] sm:$0xf]  ;;  %v9814_v39 = vld [vmem:[#allocation25 + $0x54] sm:$0xf0]  ;;  %v9805_v22 = vld [vmem:[#allocation25 + $0x14] sm:$0xf] }
 0xdf8   : > { %10101 = vrot.lane.b32.xlu2 %v10100_v11, %s10888_s13  ;;  %v9652_v11 = vld [vmem:[#allocation25 + $0x68] sm:$0xf0]  ;;  %v9643_v13 = vor.u32 %v9814_v39, %v9642_v60  ;;  %s14714_s13 = sld [smem:[#allocation68_spill]] }
 0xdf9   : > { %10096 = vrot.lane.b32.xlu0 %v10095_v45, %s10887_s5  ;;  %v9655_v36 = vor.u32 %v9815_v49, %v9652_v11  ;;  %v9803_v49 = vld [vmem:[#allocation25 + $0x4] sm:$0xf] }
 0xdfb   : > { %8662 = vmatpush.bf16.msra.mxu1 %v9651_v59 }
 0xdff   : > { %8663 = vmatpush.bf16.msra.mxu1 %v9643_v13 }
 0xe21   : > { %8465 = vadd.xlane.f32.xlu2 %v14448_v27 }
 0xe23   : > { %8463 = vadd.xlane.f32.xlu0 %v14451_v20 }
 0xe52   : > { %v10102_v58 = vpop.permute.xlu2 %10101 }
 0xe53   : > { %v10104_v34 = vunpack.i.h.bf16 %v10102_v58  ;;  %v10103_v35 = vunpack.i.l.bf16 %v10102_v58 }
 0xe69   : > { %v10107_v9 = vpop.permute.xlu1 %10106 }
 0xe6a   : > { %v10109_v40 = vunpack.i.h.bf16 %v10107_v9  ;;  %v10108_v25 = vunpack.i.l.bf16 %v10107_v9  ;;  %v9811_v9 = vld [vmem:[#allocation25 + $0x44] sm:$0xf] }
 0xe6b   : > { %v10097_v21 = vpop.permute.xlu0 %10096 }
 0xe6c   : > { %v10099_v61 = vunpack.i.h.bf16 %v10097_v21  ;;  %v10098_v32 = vunpack.i.l.bf16 %v10097_v21  ;;  %v9636_v21 = vld [vmem:[#allocation25 + $0x48] sm:$0xf0] }
 0xe6e   : > { %v8359_v42 = vsel %vm3041_vm14, %v8301_v41, %v10099_v61  ;;  %v8358_v54 = vsel %vm3041_vm14, %v8247_v29, %v10098_v32  ;;  %v9813_v29 = vld [vmem:[#allocation25 + $0x54] sm:$0xf] }
 0xe6f   : > { %v8362_v31 = vsel %vm5153_vm1, %v8358_v54, %v10103_v35  ;;  %v8363_v51 = vsel %vm5153_vm1, %v8359_v42, %v10104_v34  ;;  %v9647_v41 = vor.u32 %v9813_v29, %v9644_v33  ;;  %v9626_v42 = vld [vmem:[#allocation25 + $0x30] sm:$0xf]  ;;  %v9810_v54 = vld [vmem:[#allocation25 + $0x34] sm:$0xf0] }
 0xe70   : > { %v8366_v46 = vsel %vm5158_vm2, %v8362_v31, %v10108_v25  ;;  %v8367_v14 = vsel %vm5158_vm2, %v8363_v51, %v10109_v40  ;;  %v9639_v25 = vor.u32 %v9811_v9, %v9636_v21  ;;  %v9809_v51 = vld [vmem:[#allocation25 + $0x34] sm:$0xf] }
 0xe71   : > { %v8385_v56 = vpack.c.bf16 %v8367_v14, %v8366_v46  ;;  %v9628_v46 = vld [vmem:[#allocation25 + $0x38] sm:$0xf0]  ;;  %v9825_v9 = vld [vmem:[#allocation26 + $0x30] sm:$0xff] }
 0xe72   : > { %v9833_v21 = vld [vmem:[#allocation26 + $0x70] sm:$0xff] }
 0xe73   : > { %8451 = vmatmul.bf16.gmra.mxu0 %v8385_v56  ;;  %v9627_v56 = vor.u32 %v9810_v54, %v9626_v42 }
 0xe94   : > { %v8466_v6 = vpop.xlane.xlu2 %8465 }
 0xe95   : > { %v8472_v0 = vmul.f32 %v8466_v6, %v14708_v1 }
 0xe96   : > { %v8464_v17 = vpop.xlane.xlu0 %8463 }
 0xe97   : > { %v8471_v44 = vmul.f32 %v8464_v17, %v14708_v1  ;;  %v14473_v48 = vsub.f32 %v14448_v27, %v8472_v0  ;;  %v9631_v17 = vor.u32 %v9809_v51, %v9628_v46  ;;  %v9822_v51 = vld [vmem:[#allocation26 + $0x18] sm:$0xff]  ;;  %v9831_v46 = vld [vmem:[#allocation26 + $0x60] sm:$0xff] }
 0xe99   : > { %v14463_v10 = vsub.f32 %v14451_v20, %v8471_v44  ;;  %v8480_v5 = vmul.f32 %v14473_v48, %v14473_v48  ;;  %v9618_v44 = vld [vmem:[#allocation25 + $0x20] sm:$0xf] }
 0xe9b   : > { %v8479_v38 = vmul.f32 %v14463_v10, %v14463_v10 }
 0xe9d   : > { %8483 = vadd.xlane.f32.xlu2 %v8479_v38  ;;  %v9808_v38 = vld [vmem:[#allocation25 + $0x24] sm:$0xf0] }
 0xe9e   : > { %v9619_v0 = vor.u32 %v9808_v38, %v9618_v44 }
 0xef0   : > { %v8452_v28 = vpop.f32.mrf.mxu0 }
 0xef1   : > { %v8453_v63 = vadd.f32 %v10116_v47, %v8452_v28  ;;  %v9807_v28 = vld [vmem:[#allocation25 + $0x24] sm:$0xf] }
 0xef3   : > { %v14469_v50 = vadd.f32 %v8453_v63, %v13323_v7  ;;  %v9817_v7 = vld [vmem:[#allocation25 + $0x74] sm:$0xf]  ;;  %v9620_v63 = vld [vmem:[#allocation25 + $0x28] sm:$0xf0] }
 0xef4   : > { %v9663_v26 = vor.u32 %v9817_v7, %v9660_v12  ;;  %v9612_v12 = vld [vmem:[#allocation25 + $0x18] sm:$0xf0] }
 0xef5   : > { %8467 = vadd.xlane.f32.xlu1 %v14469_v50 }
 0xef6   : > { %8680 = vmatpush.bf16.msrb.mxu2 %v9663_v26 }
 0xef8   : > { %v8454_v43 = vpop.f32.mrf.mxu0 }
 0xef9   : > { %v8455_v19 = vadd.f32 %v10116_v47, %v8454_v43  ;;  %v9812_v47 = vld [vmem:[#allocation25 + $0x44] sm:$0xf0] }
 0xefa   : > { %8681 = vmatpush.bf16.msrb.mxu2 %v9655_v36  ;;  %v9635_v34 = vor.u32 %v9812_v47, %v9634_v8  ;;  %v14516_v36 = vld [vmem:[%s14714_s13] ss:$0 sm:$0xff]  ;;  %v9826_v47 = vld [vmem:[#allocation26 + $0x38] sm:$0xff] }
 0xefb   : > { %v14476_v16 = vadd.f32 %v8455_v19, %v13332_v37  ;;  %v9623_v19 = vor.u32 %v9807_v28, %v9620_v63  ;;  %8843 = vmatpush.bf16.msra.mxu3 %v9826_v47 }
 0xefc   : > { %8664 = vmatpush.bf16.msra.mxu1 %v9635_v34 }
 0xefd   : > { %8485 = vadd.xlane.f32.xlu1 %v8480_v5  ;;  %8469 = vadd.xlane.f32.xlu0 %v14476_v16  ;;  %v9610_v5 = vld [vmem:[#allocation25 + $0x10] sm:$0xf] }
 0xefe   : > { %8682 = vmatpush.bf16.msrb.mxu2 %v9647_v41 }
 0xeff   : > { %8844 = vmatpush.bf16.msra.mxu3 %v9825_v9 }
 0xf00   : > { %8665 = vmatpush.bf16.msra.mxu1 %v9627_v56 }
 0xf02   : > { %8683 = vmatpush.bf16.msrb.mxu2 %v9639_v25  ;;  %v9823_v25 = vld [vmem:[#allocation26 + $0x20] sm:$0xff] }
 0xf04   : > { %8666 = vmatpush.bf16.msra.mxu1 %v9619_v0  ;;  %v9820_v0 = vld [vmem:[#allocation26 + $0x8] sm:$0xff] }
 0xf06   : > { %8684 = vmatpush.bf16.msrb.mxu2 %v9631_v17  ;;  %v9821_v17 = vld [vmem:[#allocation26 + $0x10] sm:$0xff] }
 0xf0a   : > { %8685 = vmatpush.bf16.msrb.mxu2 %v9623_v19 }
 0xf10   : > { %v8484_v53 = vpop.xlane.xlu2 %8483 }
 0xf11   : > { %v8491_v52 = vmul.f32 %v8484_v53, %v14708_v1  ;;  %v9611_v53 = vor.u32 %v9806_v24, %v9610_v5  ;;  %v9819_v24 = vld [vmem:[#allocation26] sm:$0xff] }
 0xf13   : > { %v14482_v57 = vadd.f32 1e-12, %v8491_v52  ;;  %v9615_v52 = vor.u32 %v9805_v22, %v9612_v12  ;;  %8667 = vmatpush.bf16.msra.mxu1 %v9611_v53  ;;  %v9828_v12 = vld [vmem:[#allocation26 + $0x48] sm:$0xff] }
 0xf15   : > { %10330 = vrsqrt.f32 %v14482_v57  ;;  %vm8505_vm14 = vweird.f32 %v14482_v57  ;;  %8686 = vmatpush.bf16.msrb.mxu2 %v9615_v52 }
 0xf1b   : > { %v14485_v30 = vpop.eup %10330 }
 0xf1c   : > { %v8500_v18 = vmul.f32 %v14485_v30, %v14482_v57  ;;  %vm8506_vm13 = vweird.f32 %v14485_v30  ;;  %v14510_v57 = vld [vmem:[%s14713_s28] ss:$0 sm:$0xff] }
 0xf1d   : > { %vm8507_vm1 = vmor %vm8505_vm14, %vm8506_vm13 }
 0xf1e   : > { %v8501_v2 = vmul.f32 %v14485_v30, %v8500_v18  ;;  %v9604_v18 = vld [vmem:[#allocation25 + $0x8] sm:$0xf0] }
 0xf1f   : > { %v9607_v39 = vor.u32 %v9803_v49, %v9604_v18  ;;  %v8575_v49 = vld [vmem:[%s14715_s9] sm:$0x3] }
 0xf20   : > { %v8502_v31 = vmul.f32 0.5, %v8501_v2  ;;  %v9834_v2 = vld [vmem:[#allocation26 + $0x78] sm:$0xff] }
 0xf21   : > { %8687 = vmatpush.bf16.msrb.mxu2 %v9607_v39  ;;  %8862 = vmatpush.bf16.msrb.mxu0 %v9834_v2  ;;  %v8578_v39 = vperm.slane %v8575_v49, 1 }
 0xf22   : > { %v8503_v6 = vsub.f32 1.5, %v8502_v31 }
 0xf24   : > { %v8504_v23 = vmul.f32 %v14485_v30, %v8503_v6  ;;  %v9830_v6 = vld [vmem:[#allocation26 + $0x58] sm:$0xff] }
 0xf25   : > { %8863 = vmatpush.bf16.msrb.mxu0 %v9833_v21 }
 0xf26   : > { %v8508_v4 = vsel %vm8507_vm1, %v14485_v30, %v8504_v23 }
 0xf27   : > { %v8539_v60 = vmul.f32 %v8508_v4, %v14463_v10 }
 0xf29   : > { %v8546_v29 = vmul.f32 %v14510_v57, %v8539_v60 }
 0xf2b   : > { %v8553_v10 = vadd.f32 %v14516_v36, %v8546_v29 }
 0xf68   : > { %v8468_v37 = vpop.xlane.xlu1 %8467 }
 0xf69   : > { %v8473_v3 = vmul.f32 %v8468_v37, %v14708_v1  ;;  %v9602_v37 = vld [vmem:[#allocation25] sm:$0xf] }
 0xf6b   : > { %v14489_v62 = vsub.f32 %v14469_v50, %v8473_v3  ;;  %v9804_v3 = vld [vmem:[#allocation25 + $0x4] sm:$0xf0] }
 0xf6c   : > { %v9603_v11 = vor.u32 %v9804_v3, %v9602_v37  ;;  %v9827_v37 = vld [vmem:[#allocation26 + $0x40] sm:$0xff] }
 0xf6d   : > { %v8481_v45 = vmul.f32 %v14489_v62, %v14489_v62 }
 0xf6e   : > { %8668 = vmatpush.bf16.msra.mxu1 %v9603_v11 }
 0xf6f   : > { %8487 = vadd.xlane.f32.xlu0 %v8481_v45 }
 0xf70   : > { %v8486_v15 = vpop.xlane.xlu1 %8485  ;;  %v8470_v58 = vpop.xlane.xlu0 %8469 }
 0xf71   : > { %v8492_v61 = vmul.f32 %v8486_v15, %v14708_v1  ;;  %v8474_v32 = vmul.f32 %v8470_v58, %v14708_v1 }
 0xf73   : > { %v8496_v35 = vadd.f32 1e-12, %v8492_v61  ;;  %v14499_v40 = vsub.f32 %v14476_v16, %v8474_v32  ;;  %v9824_v61 = vld [vmem:[#allocation26 + $0x28] sm:$0xff] }
 0xf74   : > { %v9832_v32 = vld [vmem:[#allocation26 + $0x68] sm:$0xff]  ;;  %8845 = vmatpush.bf16.msra.mxu3 %v9824_v61 }
 0xf75   : > { %10332 = vrsqrt.f32 %v8496_v35  ;;  %v8482_v14 = vmul.f32 %v14499_v40, %v14499_v40  ;;  %vm8515_vm4 = vweird.f32 %v8496_v35  ;;  %8864 = vmatpush.bf16.msrb.mxu0 %v9832_v32 }
 0xf77   : > { %8489 = vadd.xlane.f32.xlu2 %v8482_v14 }
 0xf78   : > { %8846 = vmatpush.bf16.msra.mxu3 %v9823_v25 }
 0xf79   : > { %8865 = vmatpush.bf16.msrb.mxu0 %v9831_v46 }
 0xf7b   : > { %v10333_v43 = vpop.eup %10332 }
 0xf7c   : > { %v8510_v7 = vmul.f32 %v10333_v43, %v8496_v35  ;;  %vm8516_vm2 = vweird.f32 %v10333_v43  ;;  %8847 = vmatpush.bf16.msra.mxu3 %v9822_v51 }
 0xf7d   : > { %vm8517_vm5 = vmor %vm8515_vm4, %vm8516_vm2  ;;  %8866 = vmatpush.bf16.msrb.mxu0 %v9830_v6 }
 0xf7e   : > { %v8511_v26 = vmul.f32 %v10333_v43, %v8510_v7 }
 0xf80   : > { %v8512_v55 = vmul.f32 0.5, %v8511_v26  ;;  %8848 = vmatpush.bf16.msra.mxu3 %v9821_v17 }
 0xf82   : > { %v8513_v59 = vsub.f32 1.5, %v8512_v55 }
 0xf84   : > { %v8514_v45 = vmul.f32 %v10333_v43, %v8513_v59  ;;  %8849 = vmatpush.bf16.msra.mxu3 %v9820_v0 }
 0xf86   : > { %v8518_v30 = vsel %vm8517_vm5, %v10333_v43, %v8514_v45  ;;  %v9829_v43 = vld [vmem:[#allocation26 + $0x50] sm:$0xff] }
 0xf87   : > { %v8540_v33 = vmul.f32 %v8518_v30, %v14473_v48  ;;  %8867 = vmatpush.bf16.msrb.mxu0 %v9829_v43 }
 0xf88   : > { %8850 = vmatpush.bf16.msra.mxu3 %v9819_v24 }
 0xf89   : > { %v8547_v13 = vmul.f32 %v14510_v57, %v8540_v33 }
 0xf8b   : > { %v8554_v41 = vadd.f32 %v14516_v36, %v8547_v13  ;;  %8868 = vmatpush.bf16.msrb.mxu0 %v9828_v12 }
 0xf8d   : > { %v8573_v8 = vpack.c.bf16 %v8554_v41, %v8553_v10 }
 0xf8f   : > { %8669 = vmatmul.bf16.vlgmr.msra.gmra.mxu1 %v8573_v8  ;;  %8688 = vmatmul.bf16.vlgmr.msrb.gmra.mxu2 %v8573_v8 }
 0xf90   : > { %8869 = vmatpush.bf16.msrb.mxu0 %v9827_v37 }
 0xfe2   : > { %v8488_v15 = vpop.xlane.xlu0 %8487 }
 0xfe3   : > { %v8493_v58 = vmul.f32 %v8488_v15, %v14708_v1 }
 0xfe5   : > { %v8497_v48 = vadd.f32 1e-12, %v8493_v58 }
 0xfe7   : > { %10334 = vrsqrt.f32 %v8497_v48  ;;  %vm8525_vm7 = vweird.f32 %v8497_v48 }
 0xfea   : > { %v8490_v34 = vpop.xlane.xlu2 %8489 }
 0xfeb   : > { %v8494_v35 = vmul.f32 %v8490_v34, %v14708_v1 }
 0xfed   : > { %v10335_v42 = vpop.eup %10334  ;;  %v8498_v54 = vadd.f32 1e-12, %v8494_v35 }
 0xfee   : > { %v8520_v31 = vmul.f32 %v10335_v42, %v8497_v48  ;;  %vm8526_vm6 = vweird.f32 %v10335_v42 }
 0xfef   : > { %10336 = vrsqrt.f32 %v8498_v54  ;;  %vm8527_vm8 = vmor %vm8525_vm7, %vm8526_vm6  ;;  %vm8535_vm10 = vweird.f32 %v8498_v54 }
 0xff0   : > { %v8521_v14 = vmul.f32 %v10335_v42, %v8520_v31  ;;  %v10119_v31 = vld [vmem:[%s14716_s19] ss:$0 sm:$0xff] }
 0xff2   : > { %v8522_v56 = vmul.f32 0.5, %v8521_v14 }
 0xff4   : > { %v8523_v44 = vsub.f32 1.5, %v8522_v56 }
 0xff5   : > { %v10337_v38 = vpop.eup %10336 }
 0xff6   : > { %v8524_v28 = vmul.f32 %v10335_v42, %v8523_v44  ;;  %v8530_v1 = vmul.f32 %v10337_v38, %v8498_v54  ;;  %vm8536_vm9 = vweird.f32 %v10337_v38 }
 0xff7   : > { %vm8537_vm11 = vmor %vm8535_vm10, %vm8536_vm9 }
 0xff8   : > { %v8531_v63 = vmul.f32 %v10337_v38, %v8530_v1  ;;  %v8528_v19 = vsel %vm8527_vm8, %v10335_v42, %v8524_v28 }
 0xff9   : > { %v8541_v7 = vmul.f32 %v8528_v19, %v14489_v62 }
 0xffa   : > { %v8532_v5 = vmul.f32 0.5, %v8531_v63 }
 0xffb   : > { %v8548_v52 = vmul.f32 %v14510_v57, %v8541_v7 }
 0xffc   : > { %v8533_v23 = vsub.f32 1.5, %v8532_v5 }
 0xffd   : > { %v8555_v4 = vadd.f32 %v14516_v36, %v8548_v52 }
 0xffe   : > { %v8534_v22 = vmul.f32 %v10337_v38, %v8533_v23 }
0x1000   : > { %v8538_v26 = vsel %vm8537_vm11, %v10337_v38, %v8534_v22 }
0x1001   : > { %v8542_v53 = vmul.f32 %v8538_v26, %v14499_v40  ;;  %v8577_v40 = vperm.slane %v8575_v49, 0 }
0x1003   : > { %v8549_v3 = vmul.f32 %v14510_v57, %v8542_v53 }
0x1005   : > { %v8556_v55 = vadd.f32 %v14516_v36, %v8549_v3 }
0x1007   : > { %v8574_v62 = vpack.c.bf16 %v8556_v55, %v8555_v4 }
0x1009   : > { %8674 = vmatmul.bf16.gmra.mxu1 %v8574_v62  ;;  %8693 = vmatmul.bf16.gmra.mxu2 %v8574_v62 }
0x100c   : > { %v8670_v18 = vpop.f32.mrf.mxu1 }
0x100d   : > { %v8671_v11 = vadd.f32 %v8670_v18, %v8577_v40 }
0x100f   : > { %v8699_v57 = vmax.f32 %v8671_v11, 0.0 }
0x1012   : > { %v8689_v59 = vpop.f32.mrf.mxu2 }
0x1013   : > { %v8690_v29 = vadd.f32 %v8689_v59, %v8578_v39 }
0x1014   : > { %v8672_v60 = vpop.f32.mrf.mxu1 }
0x1015   : > { %v8673_v45 = vadd.f32 %v8672_v60, %v8577_v40  ;;  %v8700_v10 = vmax.f32 %v8690_v29, 0.0 }
0x1017   : > { %v8701_v30 = vmax.f32 %v8673_v45, 0.0 }
0x1019   : > { %v8707_v33 = vpack.c.bf16 %v8701_v30, %v8699_v57 }
0x101a   : > { %v8691_v36 = vpop.f32.mrf.mxu2 }
0x101b   : > { %v8692_v13 = vadd.f32 %v8691_v36, %v8578_v39  ;;  %8851 = vmatmul.bf16.vlgmr.msra.gmra.mxu3 %v8707_v33 }
0x101d   : > { %v8702_v41 = vmax.f32 %v8692_v13, 0.0 }
0x101f   : > { %v8708_v8 = vpack.c.bf16 %v8702_v41, %v8700_v10 }
0x1021   : > { %8870 = vmatmul.bf16.vlgmr.msrb.gmra.mxu0 %v8708_v8 }
0x1086   : > { %v8675_v47 = vpop.f32.mrf.mxu1 }
0x1087   : > { %v8676_v15 = vadd.f32 %v8675_v47, %v8577_v40 }
0x1089   : > { %v8703_v21 = vmax.f32 %v8676_v15, 0.0 }
0x108c   : > { %v8694_v2 = vpop.f32.mrf.mxu2 }
0x108d   : > { %v8695_v61 = vadd.f32 %v8694_v2, %v8578_v39 }
0x108e   : > { %v8677_v58 = vpop.f32.mrf.mxu1 }
0x108f   : > { %v8678_v9 = vadd.f32 %v8677_v58, %v8577_v40  ;;  %v8704_v25 = vmax.f32 %v8695_v61, 0.0 }
0x1091   : > { %v8705_v48 = vmax.f32 %v8678_v9, 0.0 }
0x1093   : > { %v8709_v32 = vpack.c.bf16 %v8705_v48, %v8703_v21 }
0x1094   : > { %v8696_v34 = vpop.f32.mrf.mxu2 }
0x1095   : > { %v8697_v35 = vadd.f32 %v8696_v34, %v8578_v39  ;;  %8856 = vmatmul.bf16.gmra.mxu3 %v8709_v32 }
0x1097   : > { %v8706_v42 = vmax.f32 %v8697_v35, 0.0 }
0x1099   : > { %v8710_v54 = vpack.c.bf16 %v8706_v42, %v8704_v25 }
0x109b   : > { %8875 = vmatmul.bf16.gmra.mxu0 %v8710_v54 }
0x109e   : > { %v8852_v51 = vpop.f32.mrf.mxu3  ;;  %v8871_v46 = vpop.f32.mrf.mxu0 }
0x109f   : > { %v8853_v14 = vadd.f32 %v10119_v31, %v8852_v51 }
0x10a1   : > { %v8872_v56 = vadd.f32 %v8871_v46, %v8853_v14 }
0x10a3   : > { %v8881_v17 = vadd.f32 %v8872_v56, %v14451_v20 }
0x10a5   : > { %8885 = vst [vmem:[%s1146_s4] sm:$0xff] %v8881_v17 }
0x10a6   : > { %v8854_v44 = vpop.f32.mrf.mxu3  ;;  %v8873_v6 = vpop.f32.mrf.mxu0 }
0x10a7   : > { %v8855_v38 = vadd.f32 %v10119_v31, %v8854_v44 }
0x10a9   : > { %v8874_v28 = vadd.f32 %v8873_v6, %v8855_v38 }
0x10ab   : > { %v8882_v1 = vadd.f32 %v8874_v28, %v14448_v27 }
0x10ad   : > { %8886 = vst [vmem:[%s1146_s4 + $0x8] sm:$0xff] %v8882_v1 }
0x1118   : > { %v8857_v63 = vpop.f32.mrf.mxu3  ;;  %v8876_v0 = vpop.f32.mrf.mxu0 }
0x1119   : > { %v8858_v43 = vadd.f32 %v10119_v31, %v8857_v63 }
0x111b   : > { %v8877_v19 = vadd.f32 %v8876_v0, %v8858_v43 }
0x111d   : > { %v8883_v5 = vadd.f32 %v8877_v19, %v14469_v50 }
0x111f   : > { %8887 = vst [vmem:[%s1146_s4 + $0x10] sm:$0xff] %v8883_v5 }
0x1120   : > { %v8859_v24 = vpop.f32.mrf.mxu3  ;;  %v8878_v20 = vpop.f32.mrf.mxu0 }
0x1121   : > { %v8860_v23 = vadd.f32 %v10119_v31, %v8859_v24 }
0x1123   : > { %v8879_v7 = vadd.f32 %v8878_v20, %v8860_v23 }
0x1125   : > { %v8884_v22 = vadd.f32 %v8879_v7, %v14476_v16 }
0x1127   : > { %8888 = vst [vmem:[%s1146_s4 + $0x18] sm:$0xff] %v8884_v22 }
0x1128   : > { %s9835_s24 = sshll.u32 %s11050_s7, 4  ;;  %s8912_s0 = sshll.u32 %s1146_s4, 4  ;;  %s8913_s0 = int_to_ptr.vmem [resolvable:$true] %s8912_s0 }
0x1129   : > { %s14718_s29 = sld [smem:[#allocation80_spill]]  ;;  %s10892_s20 = smov 256  }
0x112a   : > { %9909 = sst [smem:[#allocation32]] (%p11081_p11), %s10892_s20  ;;  %s10893_s10 = smov 512  }
0x112b   : > { %9910 = sst [smem:[#allocation32 + $0x1]] (%p11081_p11), %s10893_s10  ;;  %s10894_s5 = smov 2  }
0x112c   : > { %9911 = sst [smem:[#allocation32 + $0x2]] (%p11081_p11), %s10894_s5  ;;  %s10895_s7 = smov 128  }
0x112d   : > { %9912 = sst [smem:[#allocation32 + $0x3]] (%p11081_p11), %s10895_s7  ;;  %s10896_s13 = smov 8  }
0x112e   : > { %9913 = sst [smem:[#allocation32 + $0x4]] (%p11081_p11), %s10895_s7  ;;  %s10897_s8 = smov [#allocation31]  }
0x112f   : > { %s8901_s23 = scalar_lea.hbm %s14718_s29, %s9835_s24  ;;  %9914 = sst [smem:[#allocation32 + $0x5]] (%p11081_p11), %s10896_s13 }
0x1130   : > { %s8914_s28 = sshll.u32 %s8901_s23, 4  ;;  %s10898_s17 = smov 0   ;;  %s8915_s28 = int_to_ptr.hbm [resolvable:$true] %s8914_s28 }
0x1131   : > { %9915 = dma.general (%p11081_p11), %s8913_s0, 512, %s8915_s28, %s8890_s25, %s10897_s8, [#allocation32], %s10898_s17, 0  }
0x1132 PF: > { %s14719_s9 = sld [smem:[#allocation44_spill]]  ;;  %p9952_p4 = pnand %p9205_p2, %p11085_p12 }
0x1134   : > { %p9953_p5 = pneg %p9952_p4 }
0x1138   : > { %s8942_s22 = sand.u32 1, %s14719_s9  }
0x1139   : > { %s8943_s19 = scalar_lea.sflag [#allocation4], %s8942_s22 }
0x113a   : > { %10840 = dma.done.wait (%p9953_p5), %s8943_s19, 512  }
0x113b   : > { %10842 = vsyncadd (%p9953_p5), %s8943_s19, 4294966784  ;;  %s14721_s30 = sld [smem:[#allocation45_spill]]  ;;  %s14723_s29 = smov %s10849_s2 }
0x113c   : > { %s14722_s4 = sld [smem:[#allocation46_spill]]  ;;  %s14724_s2 = smov %s10853_s6 }
0x1141   : > { %p50_p6 = scmp.ge.s32.totalorder %s14721_s30, 4  }
0x1142   : > { %s14725_s6 = smov %s14722_s4 }
0x1143   :  { %52 = sbr.rel (!%p50_p6) target bundleno = 39 (0x27), region = 267 }
0x1148   :  { %8949 = vsyncpa [#allocation3], 1 }
0x1149   :  { %8951 = vsyncpa [#allocation3 + $0x1], 1 }
0x114a   :  { %8952 = vsyncpa [#allocation6], 1 }
0x114b   :  { %8954 = vsyncpa [#allocation6 + $0x1], 1 }
0x114c   :  { %8955 = vsyncpa [#allocation9], 1 }
0x114d   :  { %8957 = vsyncpa [#allocation9 + $0x1], 1 }
0x114e   :  { %8958 = vsyncpa [#allocation12], 1 }
0x114f   :  { %8959 = vsyncpa [#allocation15], 1 }
0x1150   :  { %8960 = vsyncpa [#allocation18], 1 }
0x1151   :  { %8961 = vsyncpa [#allocation21], 1 }
0x1152   :  { %8962 = vsyncpa [#allocation24], 1 }
0x1153   :  { %8963 = vsyncpa [#allocation27], 1 }
0x1154   :  { %8964 = vsyncpa [#allocation4], 1 }
0x1155   :  { %8966 = vsyncpa [#allocation4 + $0x1], 1 }

</bundles_post_ra>
